<compile_context>
chip_gen: v5e
topology: v5e:2x2
jax: 0.10.0
libtpu: 0.0.40
codegen_flags: <defaults>
</compile_context>

<pallas_src>
import functools
from collections import defaultdict

import numpy as np
import jax
import jax.numpy as jnp
from jax.experimental import pallas as pl
from jax.experimental.pallas import tpu as pltpu

INPUT_SIZE = 512          # scaled down from 4800 for a small runnable example
HIDDEN_SIZE = 64
CLASS_NUM = 5
MAX_CHILDREN = 8          # static bound on per-node fan-in
TILE_B = 32               # nodes per grid step (levels padded to this)
CLS_PAD = 128             # lane-dense classifier output width


# ---------------- kernel 1: hoisted input projection (parallel) ----------------
def _proj_kernel(x_ref, w_ref, b_ref, o_ref):
    o_ref[...] = (jnp.dot(x_ref[...], w_ref[...],
                          preferred_element_type=jnp.float32) + b_ref[...])


# ---------------- kernel 2: sequential recurrent tree kernel ----------------
def _tree_kernel(idx_ref,                 # SMEM: (num_tiles*MAX_CHILDREN*TILE_B,) child rows
                 xw_ref,                  # (TILE_B, 4H)  pre-projected, columns [i|o|u|f]
                 u3_ref,                  # (H, 3H) recurrent weights for i,o,u
                 uf_ref,                  # (H, H)  recurrent forget weight
                 hc_out_ref,              # (TILE_B, 2H)
                 hc_state,                # VMEM (num_padded+TILE_B, 2H): resident tree state
                 ch_buf):                 # VMEM (MAX_CHILDREN*TILE_B, 2H): gather scratch
    H = HIDDEN_SIZE
    t = pl.program_id(0)

    @pl.when(t == 0)
    def _():
        hc_state[...] = jnp.zeros_like(hc_state)   # includes the zero sentinel rows

    # ---- gather children: static destination rows, dynamic source rows ----
    off = t * (TILE_B * MAX_CHILDREN)
    for k in range(MAX_CHILDREN):
        for bb in range(TILE_B):
            j = k * TILE_B + bb
            src = idx_ref[off + j]
            ch_buf[pl.ds(j, 1), :] = hc_state[pl.ds(src, 1), :]

    ch = ch_buf[...]                                             # (MC*TB, 2H)
    ch_h = ch[:, :H]                                             # (MC*TB, H)
    ch_c3 = ch[:, H:].reshape(MAX_CHILDREN, TILE_B, H)
    sum_h = ch_h.reshape(MAX_CHILDREN, TILE_B, H).sum(axis=0)    # (TB, H)

    xw = xw_ref[...]                                             # columns [i|o|u|f]
    pre = xw[:, :3 * H] + jnp.dot(sum_h, u3_ref[...],
                                  preferred_element_type=jnp.float32)
    io = jax.nn.sigmoid(pre[:, :2 * H])                          # one 128-lane sigmoid slab
    i_g = io[:, :H]
    o_g = io[:, H:]
    u_g = jnp.tanh(pre[:, 2 * H:3 * H])

    # forget gates: one batched matmul over all children, then reduce over k.
    wf_x = xw[:, 3 * H:4 * H]                                    # W_f x + b_f
    fpre = jnp.dot(ch_h, uf_ref[...], preferred_element_type=jnp.float32)
    f3 = jax.nn.sigmoid(fpre.reshape(MAX_CHILDREN, TILE_B, H) + wf_x[None, :, :])
    sum_f = jnp.sum(f3 * ch_c3, axis=0)                          # padded children have c=0

    c = sum_f + i_g * u_g
    h = o_g * jnp.tanh(c)

    hc_new = jnp.concatenate([h, c], axis=1)                     # (TB, 128) lane-dense
    base = pl.multiple_of(t * TILE_B, TILE_B)
    hc_state[pl.ds(base, TILE_B), :] = hc_new
    hc_out_ref[...] = hc_new
    # TODO(synk): Dropout(p=0.3) treated as eval-mode identity (no RNG mask).


# ---------------- kernel 3: hoisted classifier (parallel) ----------------
def _cls_kernel(hc_ref, wc_ref, bc_ref, o_ref):
    h = hc_ref[:, :HIDDEN_SIZE]
    o_ref[...] = (jnp.dot(h, wc_ref[...],
                          preferred_element_type=jnp.float32) + bc_ref[...])


def make_tree_forward(fused_params, num_padded):
    w_in, b_in, u3, uf, wc_pad, bc_pad = fused_params
    H, I = HIDDEN_SIZE, INPUT_SIZE
    num_tiles = num_padded // TILE_B
    n_state = num_padded + TILE_B            # extra rows contain the zero sentinel

    proj_call = pl.pallas_call(
        _proj_kernel,
        grid_spec=pltpu.PrefetchScalarGridSpec(
            num_scalar_prefetch=0,
            grid=(num_tiles,),
            in_specs=[
                pl.BlockSpec((TILE_B, I), lambda t: (t, 0)),
                pl.BlockSpec(w_in.shape, lambda t: (0, 0)),
                pl.BlockSpec(b_in.shape, lambda t: (0, 0)),
            ],
            out_specs=pl.BlockSpec((TILE_B, 4 * H), lambda t: (t, 0)),
        ),
        out_shape=jax.ShapeDtypeStruct((num_padded, 4 * H), jnp.float32),
        compiler_params=pltpu.CompilerParams(dimension_semantics=("parallel",)),
    )

    tree_call = pl.pallas_call(
        _tree_kernel,
        grid_spec=pltpu.PrefetchScalarGridSpec(
            num_scalar_prefetch=1,
            grid=(num_tiles,),
            in_specs=[
                pl.BlockSpec((TILE_B, 4 * H), lambda t, idx: (t, 0)),
                pl.BlockSpec(u3.shape, lambda t, idx: (0, 0)),
                pl.BlockSpec(uf.shape, lambda t, idx: (0, 0)),
            ],
            out_specs=pl.BlockSpec((TILE_B, 2 * H), lambda t, idx: (t, 0)),
            scratch_shapes=[
                pltpu.VMEM((n_state, 2 * H), jnp.float32),
                pltpu.VMEM((MAX_CHILDREN * TILE_B, 2 * H), jnp.float32),
            ],
        ),
        out_shape=jax.ShapeDtypeStruct((num_padded, 2 * H), jnp.float32),
        compiler_params=pltpu.CompilerParams(
            # later tiles read earlier tiles' results via the resident state
            dimension_semantics=("arbitrary",)),
    )

    cls_call = pl.pallas_call(
        _cls_kernel,
        grid_spec=pltpu.PrefetchScalarGridSpec(
            num_scalar_prefetch=0,
            grid=(num_tiles,),
            in_specs=[
                pl.BlockSpec((TILE_B, 2 * H), lambda t: (t, 0)),
                pl.BlockSpec(wc_pad.shape, lambda t: (0, 0)),
                pl.BlockSpec(bc_pad.shape, lambda t: (0, 0)),
            ],
            out_specs=pl.BlockSpec((TILE_B, CLS_PAD), lambda t: (t, 0)),
        ),
        out_shape=jax.ShapeDtypeStruct((num_padded, CLS_PAD), jnp.float32),
        compiler_params=pltpu.CompilerParams(dimension_semantics=("parallel",)),
    )

    @jax.jit
    def forward(child_idx_flat, x_all):
        xw = proj_call(x_all, w_in, b_in)                # big data-independent matmul
        hc = tree_call(child_idx_flat, xw, u3, uf)       # sequential recurrence only
        cls = cls_call(hc, wc_pad, bc_pad)               # classifier on all nodes
        return hc, cls

    return forward


def build_schedule(tree, root_id):
    """Level-order (deepest first) schedule + per-tile, child-major index table."""
    meta = {}          # node_id -> (depth, [child ids])
    post = []          # post-order DFS: matches the reference hidden_buffer order

    def walk(sub, nid, depth):
        cids = list(sub.keys())
        for cid in cids:
            walk(sub[cid], cid, depth + 1)
        meta[nid] = (depth, cids)
        post.append(nid)

    walk(tree, root_id, 0)

    levels = defaultdict(list)
    for nid, (d, _) in meta.items():
        levels[d].append(nid)

    pos, flat = {}, []
    for d in sorted(levels.keys(), reverse=True):      # deepest level first
        for nid in levels[d]:
            pos[nid] = len(flat)
            flat.append(nid)
        while len(flat) % TILE_B:
            flat.append(None)                          # padding node within the level
    num_padded = len(flat)
    sentinel = num_padded                              # always-zero state row

    child_idx = np.full((num_padded, MAX_CHILDREN), sentinel, dtype=np.int32)
    for nid, (_, cids) in meta.items():
        assert len(cids) <= MAX_CHILDREN, "increase MAX_CHILDREN"
        for k, cid in enumerate(cids):
            child_idx[pos[nid], k] = pos[cid]

    num_tiles = num_padded // TILE_B
    # per-tile child-major layout: flat[t*MC*TB + k*TB + bb] = child k of node t*TB+bb
    child_idx_flat = (child_idx.reshape(num_tiles, TILE_B, MAX_CHILDREN)
                      .transpose(0, 2, 1).reshape(-1).astype(np.int32))
    return pos, post, child_idx_flat, num_padded


def tree_lstm_forward(fused_params, inputs, tree, root_id):
    pos, post, child_idx_flat, num_padded = build_schedule(tree, root_id)

    x_all = np.zeros((num_padded, INPUT_SIZE), np.float32)
    for nid, p in pos.items():
        x_all[p] = np.asarray(inputs[int(nid)])

    forward = make_tree_forward(fused_params, num_padded)
    hc, cls = forward(jnp.asarray(child_idx_flat), jnp.asarray(x_all))

    root_p = pos[root_id]
    h_root = hc[root_p:root_p + 1, :HIDDEN_SIZE]
    c_root = hc[root_p:root_p + 1, HIDDEN_SIZE:]
    order = jnp.asarray(np.array([pos[n] for n in post], np.int32))
    hidden_buffer = cls[order, :CLASS_NUM]             # post-order, like the reference
    return h_root, c_root, hidden_buffer


def init_params(key):
    """Deterministic init matching PyTorch Linear shapes (weights pre-transposed)."""
    def linear(k, fan_in, fan_out, bias=True):
        kw, kb = jax.random.split(k)
        bound = 1.0 / np.sqrt(fan_in)
        w = jax.random.uniform(kw, (fan_in, fan_out), jnp.float32, -bound, bound)
        if not bias:
            return (w,)
        b = jax.random.uniform(kb, (1, fan_out), jnp.float32, -bound, bound)
        return (w, b)

    keys = jax.random.split(key, 9)
    wi, bi = linear(keys[0], INPUT_SIZE, HIDDEN_SIZE)
    (ui,) = linear(keys[1], HIDDEN_SIZE, HIDDEN_SIZE, bias=False)
    wf, bf = linear(keys[2], INPUT_SIZE, HIDDEN_SIZE)
    (uf,) = linear(keys[3], HIDDEN_SIZE, HIDDEN_SIZE, bias=False)
    wo, bo = linear(keys[4], INPUT_SIZE, HIDDEN_SIZE)
    (uo,) = linear(keys[5], HIDDEN_SIZE, HIDDEN_SIZE, bias=False)
    wu, bu = linear(keys[6], INPUT_SIZE, HIDDEN_SIZE)
    (uu,) = linear(keys[7], HIDDEN_SIZE, HIDDEN_SIZE, bias=False)
    wc, bc = linear(keys[8], HIDDEN_SIZE, CLASS_NUM)
    # TODO(synk): Conv2d(1, hidden, (2, hidden)) branch is dead code (self.sum=True); not ported.
    return (wi, bi, ui, wf, bf, uf, wo, bo, uo, wu, bu, uu, wc, bc)


def fuse_params(params):
    wi, bi, ui, wf, bf, uf, wo, bo, uo, wu, bu, uu, wc, bc = params
    # gate column order [i | o | u | f]: i,o share one aligned 128-lane sigmoid slab
    w_in = jnp.concatenate([wi, wo, wu, wf], axis=1)          # (I, 4H)
    b_in = jnp.concatenate([bi, bo, bu, bf], axis=1)          # (1, 4H)
    u3 = jnp.concatenate([ui, uo, uu], axis=1)                # (H, 3H): no dead f column
    wc_pad = jnp.pad(wc, ((0, 0), (0, CLS_PAD - CLASS_NUM)))  # (H, 128) lane-dense
    bc_pad = jnp.pad(bc, ((0, 0), (0, CLS_PAD - CLASS_NUM)))  # (1, 128)
    return (w_in, b_in, u3, uf, wc_pad, bc_pad)


# ---------------- pure-JAX reference (mirrors the PyTorch recursion) ----------------
def _ref_node(params, x, children):
    wi, bi, ui, wf, bf, uf, wo, bo, uo, wu, bu, uu, wc, bc = params
    dot = functools.partial(jnp.dot, precision=jax.lax.Precision.HIGHEST)
    sum_h = jnp.zeros((1, HIDDEN_SIZE), jnp.float32)
    for h, _ in children:
        sum_h = sum_h + h
    i = jax.nn.sigmoid(dot(x, wi) + bi + dot(sum_h, ui))
    o = jax.nn.sigmoid(dot(x, wo) + bo + dot(sum_h, uo))
    u = jnp.tanh(dot(x, wu) + bu + dot(sum_h, uu))
    wf_x = dot(x, wf) + bf
    sum_f = jnp.zeros((1, HIDDEN_SIZE), jnp.float32)
    for h, c in children:
        f = jax.nn.sigmoid(wf_x + dot(h, uf))
        sum_f = sum_f + f * c
    c = sum_f + i * u
    h = o * jnp.tanh(c)
    cls = dot(h, wc) + bc
    return h, c, cls


def _ref_tree(params, inputs, tree, nid, buf):
    children = [_ref_tree(params, inputs, tree[cid], cid, buf) for cid in tree]
    if not children:
        z = jnp.zeros((1, HIDDEN_SIZE), jnp.float32)
        children = [(z, z)]
    h, c, cls = _ref_node(params, inputs[int(nid)][None, :], children)
    buf.append(cls.reshape(-1))
    return h, c


if __name__ == "__main__":
    key = jax.random.PRNGKey(0)
    k_params, k_inputs = jax.random.split(key)

    params = init_params(k_params)
    fused = fuse_params(params)

    # 5 tree nodes, each with an INPUT_SIZE feature vector.
    inputs = jax.random.normal(k_inputs, (5, INPUT_SIZE), jnp.float32)
    # root node "0" has children "1" and "2"; "1" has leaf children "3", "4".
    tree = {"1": {"3": {}, "4": {}}, "2": {}}

    h_root, c_root, hidden_buffer = tree_lstm_forward(fused, inputs, tree, "0")
    jax.block_until_ready((h_root, c_root, hidden_buffer))

    # correctness check vs. a pure-JAX mirror of the PyTorch recursion
    ref_buf = []
    h_ref, c_ref = _ref_tree(params, inputs, tree, "0", ref_buf)
    ref_stack = jnp.stack(ref_buf)

    assert h_root.shape == (1, HIDDEN_SIZE)
    assert c_root.shape == (1, HIDDEN_SIZE)
    assert hidden_buffer.shape == (5, CLASS_NUM)
    np.testing.assert_allclose(np.asarray(h_root), np.asarray(h_ref), atol=1e-4, rtol=1e-3)
    np.testing.assert_allclose(np.asarray(c_root), np.asarray(c_ref), atol=1e-4, rtol=1e-3)
    np.testing.assert_allclose(np.asarray(hidden_buffer), np.asarray(ref_stack),
                               atol=1e-4, rtol=1e-3)
    print("KERNEL_OK")
</pallas_src>

<mosaic_0001>
module attributes {stable_mosaic.version = 11 : i64} {
  func.func @_cls_kernel(%arg0: i32, %arg1: memref<32x128xf32, #tpu.memory_space<vmem>>, %arg2: memref<64x128xf32, #tpu.memory_space<vmem>>, %arg3: memref<1x128xf32, #tpu.memory_space<vmem>>, %arg4: memref<32x128xf32, #tpu.memory_space<vmem>>) attributes {dimension_semantics = [#tpu.dimension_semantics<parallel>], iteration_bounds = array<i64: 3>, scalar_prefetch = 0 : i64, scratch_operands = 0 : i64, tpu.core_type = #tpu.core_type<tc>, window_params = [{transform_indices = @transform_0, window_bounds = array<i64: 32, 128>}, {pipeline_mode = #tpu.pipeline_mode<synchronous>, transform_indices = @transform_1, window_bounds = array<i64: 64, 128>}, {pipeline_mode = #tpu.pipeline_mode<synchronous>, transform_indices = @transform_2, window_bounds = array<i64: 1, 128>}, {transform_indices = @transform_3, window_bounds = array<i64: 32, 128>}]} {
    %c0 = arith.constant 0 : index
    %c0_0 = arith.constant 0 : index
    %0 = vector.load %arg1[%c0, %c0_0] : memref<32x128xf32, #tpu.memory_space<vmem>>, vector<32x64xf32>
    %c0_1 = arith.constant 0 : index
    %c0_2 = arith.constant 0 : index
    %1 = vector.load %arg2[%c0_1, %c0_2] : memref<64x128xf32, #tpu.memory_space<vmem>>, vector<64x128xf32>
    %cst = arith.constant dense<0.000000e+00> : vector<32x128xf32>
    %2 = tpu.matmul %0, %1, %cst {dimension_numbers = #tpu.dot_dimension_numbers<[1], [0], [0], [1], [0, 0, 1, 1], [], []>} : vector<32x64xf32>, vector<64x128xf32>, vector<32x128xf32> -> vector<32x128xf32>
    %c0_3 = arith.constant 0 : index
    %c0_4 = arith.constant 0 : index
    %3 = vector.load %arg3[%c0_3, %c0_4] : memref<1x128xf32, #tpu.memory_space<vmem>>, vector<1x128xf32>
    %4 = vector.broadcast %3 : vector<1x128xf32> to vector<32x128xf32>
    %5 = arith.addf %2, %4 : vector<32x128xf32>
    %c0_5 = arith.constant 0 : index
    %c0_6 = arith.constant 0 : index
    %6 = vector.load %arg4[%c0_5, %c0_6] : memref<32x128xf32, #tpu.memory_space<vmem>>, vector<32x128xf32>
    tpu.vector_store %arg4[%c0_5, %c0_6], %5 {strides = array<i32>} : memref<32x128xf32, #tpu.memory_space<vmem>>, vector<32x128xf32>,
    return
  }
  func.func @transform_0(%arg0: i32) -> (i32, i32) {
    %c0_i32 = arith.constant 0 : i32
    %c0_i32_0 = arith.constant 0 : i32
    return %arg0, %c0_i32 : i32, i32
  }
  func.func @transform_1(%arg0: i32) -> (i32, i32) {
    %c0_i32 = arith.constant 0 : i32
    %c0_i32_0 = arith.constant 0 : i32
    %c0_i32_1 = arith.constant 0 : i32
    return %c0_i32, %c0_i32_0 : i32, i32
  }
  func.func @transform_2(%arg0: i32) -> (i32, i32) {
    %c0_i32 = arith.constant 0 : i32
    %c0_i32_0 = arith.constant 0 : i32
    %c0_i32_1 = arith.constant 0 : i32
    return %c0_i32, %c0_i32_0 : i32, i32
  }
  func.func @transform_3(%arg0: i32) -> (i32, i32) {
    %c0_i32 = arith.constant 0 : i32
    %c0_i32_0 = arith.constant 0 : i32
    return %arg0, %c0_i32 : i32, i32
  }
}

module attributes {stable_mosaic.version = 11 : i64} {
  func.func @_proj_kernel(%arg0: i32, %arg1: memref<32x512xf32, #tpu.memory_space<vmem>>, %arg2: memref<512x256xf32, #tpu.memory_space<vmem>>, %arg3: memref<1x256xf32, #tpu.memory_space<vmem>>, %arg4: memref<32x256xf32, #tpu.memory_space<vmem>>) attributes {dimension_semantics = [#tpu.dimension_semantics<parallel>], iteration_bounds = array<i64: 3>, scalar_prefetch = 0 : i64, scratch_operands = 0 : i64, tpu.core_type = #tpu.core_type<tc>, window_params = [{transform_indices = @transform_0, window_bounds = array<i64: 32, 512>}, {pipeline_mode = #tpu.pipeline_mode<synchronous>, transform_indices = @transform_1, window_bounds = array<i64: 512, 256>}, {pipeline_mode = #tpu.pipeline_mode<synchronous>, transform_indices = @transform_2, window_bounds = array<i64: 1, 256>}, {transform_indices = @transform_3, window_bounds = array<i64: 32, 256>}]} {
    %c0 = arith.constant 0 : index
    %c0_0 = arith.constant 0 : index
    %0 = vector.load %arg1[%c0, %c0_0] : memref<32x512xf32, #tpu.memory_space<vmem>>, vector<32x512xf32>
    %c0_1 = arith.constant 0 : index
    %c0_2 = arith.constant 0 : index
    %1 = vector.load %arg2[%c0_1, %c0_2] : memref<512x256xf32, #tpu.memory_space<vmem>>, vector<512x256xf32>
    %cst = arith.constant dense<0.000000e+00> : vector<32x256xf32>
    %2 = tpu.matmul %0, %1, %cst {dimension_numbers = #tpu.dot_dimension_numbers<[1], [0], [0], [1], [0, 0, 1, 1], [], []>} : vector<32x512xf32>, vector<512x256xf32>, vector<32x256xf32> -> vector<32x256xf32>
    %c0_3 = arith.constant 0 : index
    %c0_4 = arith.constant 0 : index
    %3 = vector.load %arg3[%c0_3, %c0_4] : memref<1x256xf32, #tpu.memory_space<vmem>>, vector<1x256xf32>
    %4 = vector.broadcast %3 : vector<1x256xf32> to vector<32x256xf32>
    %5 = arith.addf %2, %4 : vector<32x256xf32>
    %c0_5 = arith.constant 0 : index
    %c0_6 = arith.constant 0 : index
    %6 = vector.load %arg4[%c0_5, %c0_6] : memref<32x256xf32, #tpu.memory_space<vmem>>, vector<32x256xf32>
    tpu.vector_store %arg4[%c0_5, %c0_6], %5 {strides = array<i32>} : memref<32x256xf32, #tpu.memory_space<vmem>>, vector<32x256xf32>,
    return
  }
  func.func @transform_0(%arg0: i32) -> (i32, i32) {
    %c0_i32 = arith.constant 0 : i32
    %c0_i32_0 = arith.constant 0 : i32
    return %arg0, %c0_i32 : i32, i32
  }
  func.func @transform_1(%arg0: i32) -> (i32, i32) {
    %c0_i32 = arith.constant 0 : i32
    %c0_i32_0 = arith.constant 0 : i32
    %c0_i32_1 = arith.constant 0 : i32
    return %c0_i32, %c0_i32_0 : i32, i32
  }
  func.func @transform_2(%arg0: i32) -> (i32, i32) {
    %c0_i32 = arith.constant 0 : i32
    %c0_i32_0 = arith.constant 0 : i32
    %c0_i32_1 = arith.constant 0 : i32
    return %c0_i32, %c0_i32_0 : i32, i32
  }
  func.func @transform_3(%arg0: i32) -> (i32, i32) {
    %c0_i32 = arith.constant 0 : i32
    %c0_i32_0 = arith.constant 0 : i32
    return %arg0, %c0_i32 : i32, i32
  }
}

module attributes {stable_mosaic.version = 11 : i64} {
  func.func @_tree_kernel(%arg0: i32, %arg1: memref<768xi32, #tpu.memory_space<smem>>, %arg2: memref<32x256xf32, #tpu.memory_space<vmem>>, %arg3: memref<64x192xf32, #tpu.memory_space<vmem>>, %arg4: memref<64x64xf32, #tpu.memory_space<vmem>>, %arg5: memref<32x128xf32, #tpu.memory_space<vmem>>, %arg6: memref<128x128xf32, #tpu.memory_space<vmem>>, %arg7: memref<256x128xf32, #tpu.memory_space<vmem>>) attributes {dimension_semantics = [#tpu.dimension_semantics<arbitrary>], iteration_bounds = array<i64: 3>, scalar_prefetch = 1 : i64, scratch_operands = 2 : i64, tpu.core_type = #tpu.core_type<tc>, window_params = [{transform_indices = @transform_0, window_bounds = array<i64: 32, 256>}, {pipeline_mode = #tpu.pipeline_mode<synchronous>, transform_indices = @transform_1, window_bounds = array<i64: 64, 192>}, {pipeline_mode = #tpu.pipeline_mode<synchronous>, transform_indices = @transform_2, window_bounds = array<i64: 64, 64>}, {transform_indices = @transform_3, window_bounds = array<i64: 32, 128>}]} {
    %c0_i32 = arith.constant 0 : i32
    %0 = arith.cmpi eq, %arg0, %c0_i32 : i32
    %1 = arith.extui %0 : i1 to i32
    %c0_i32_0 = arith.constant 0 : i32
    %2 = arith.cmpi ne, %1, %c0_i32_0 : i32
    scf.if %2 {
      %cst_531 = arith.constant 0.000000e+00 : f32
      %1585 = vector.broadcast %cst_531 : f32 to vector<128x128xf32>
      %c0_532 = arith.constant 0 : index
      %c0_533 = arith.constant 0 : index
      %1586 = vector.load %arg6[%c0_532, %c0_533] : memref<128x128xf32, #tpu.memory_space<vmem>>, vector<128x128xf32>
      tpu.vector_store %arg6[%c0_532, %c0_533], %1585 {strides = array<i32>} : memref<128x128xf32, #tpu.memory_space<vmem>>, vector<128x128xf32>,
    } else {
    }
    %c256_i32 = arith.constant 256 : i32
    %3 = arith.muli %arg0, %c256_i32 : i32
    %c0_i32_1 = arith.constant 0 : i32
    %4 = arith.addi %3, %c0_i32_1 : i32
    %5 = arith.index_cast %4 : i32 to index
    %6 = memref.load %arg1[%5] : memref<768xi32, #tpu.memory_space<smem>>
    %7 = arith.index_cast %6 : i32 to index
    %c0 = arith.constant 0 : index
    %8 = vector.load %arg6[%7, %c0] : memref<128x128xf32, #tpu.memory_space<vmem>>, vector<1x128xf32>
    %c0_2 = arith.constant 0 : index
    %c0_3 = arith.constant 0 : index
    %9 = vector.load %arg7[%c0_2, %c0_3] : memref<256x128xf32, #tpu.memory_space<vmem>>, vector<1x128xf32>
    tpu.vector_store %arg7[%c0_2, %c0_3], %8 {strides = array<i32>} : memref<256x128xf32, #tpu.memory_space<vmem>>, vector<1x128xf32>,
    %c1_i32 = arith.constant 1 : i32
    %10 = arith.addi %3, %c1_i32 : i32
    %11 = arith.index_cast %10 : i32 to index
    %12 = memref.load %arg1[%11] : memref<768xi32, #tpu.memory_space<smem>>
    %13 = arith.index_cast %12 : i32 to index
    %c0_4 = arith.constant 0 : index
    %14 = vector.load %arg6[%13, %c0_4] : memref<128x128xf32, #tpu.memory_space<vmem>>, vector<1x128xf32>
    %c1 = arith.constant 1 : index
    %c0_5 = arith.constant 0 : index
    %15 = vector.load %arg7[%c1, %c0_5] : memref<256x128xf32, #tpu.memory_space<vmem>>, vector<1x128xf32>
    tpu.vector_store %arg7[%c1, %c0_5], %14 {strides = array<i32>} : memref<256x128xf32, #tpu.memory_space<vmem>>, vector<1x128xf32>,
    %c2_i32 = arith.constant 2 : i32
    %16 = arith.addi %3, %c2_i32 : i32
    %17 = arith.index_cast %16 : i32 to index
    %18 = memref.load %arg1[%17] : memref<768xi32, #tpu.memory_space<smem>>
    %19 = arith.index_cast %18 : i32 to index
    %c0_6 = arith.constant 0 : index
    %20 = vector.load %arg6[%19, %c0_6] : memref<128x128xf32, #tpu.memory_space<vmem>>, vector<1x128xf32>
    %c2 = arith.constant 2 : index
    %c0_7 = arith.constant 0 : index
    %21 = vector.load %arg7[%c2, %c0_7] : memref<256x128xf32, #tpu.memory_space<vmem>>, vector<1x128xf32>
    tpu.vector_store %arg7[%c2, %c0_7], %20 {strides = array<i32>} : memref<256x128xf32, #tpu.memory_space<vmem>>, vector<1x128xf32>,
    %c3_i32 = arith.constant 3 : i32
    %22 = arith.addi %3, %c3_i32 : i32
    %23 = arith.index_cast %22 : i32 to index
    %24 = memref.load %arg1[%23] : memref<768xi32, #tpu.memory_space<smem>>
    %25 = arith.index_cast %24 : i32 to index
    %c0_8 = arith.constant 0 : index
    %26 = vector.load %arg6[%25, %c0_8] : memref<128x128xf32, #tpu.memory_space<vmem>>, vector<1x128xf32>
    %c3 = arith.constant 3 : index
    %c0_9 = arith.constant 0 : index
    %27 = vector.load %arg7[%c3, %c0_9] : memref<256x128xf32, #tpu.memory_space<vmem>>, vector<1x128xf32>
    tpu.vector_store %arg7[%c3, %c0_9], %26 {strides = array<i32>} : memref<256x128xf32, #tpu.memory_space<vmem>>, vector<1x128xf32>,
    %c4_i32 = arith.constant 4 : i32
    %28 = arith.addi %3, %c4_i32 : i32
    %29 = arith.index_cast %28 : i32 to index
    %30 = memref.load %arg1[%29] : memref<768xi32, #tpu.memory_space<smem>>
    %31 = arith.index_cast %30 : i32 to index
    %c0_10 = arith.constant 0 : index
    %32 = vector.load %arg6[%31, %c0_10] : memref<128x128xf32, #tpu.memory_space<vmem>>, vector<1x128xf32>
    %c4 = arith.constant 4 : index
    %c0_11 = arith.constant 0 : index
    %33 = vector.load %arg7[%c4, %c0_11] : memref<256x128xf32, #tpu.memory_space<vmem>>, vector<1x128xf32>
    tpu.vector_store %arg7[%c4, %c0_11], %32 {strides = array<i32>} : memref<256x128xf32, #tpu.memory_space<vmem>>, vector<1x128xf32>,
    %c5_i32 = arith.constant 5 : i32
    %34 = arith.addi %3, %c5_i32 : i32
    %35 = arith.index_cast %34 : i32 to index
    %36 = memref.load %arg1[%35] : memref<768xi32, #tpu.memory_space<smem>>
    %37 = arith.index_cast %36 : i32 to index
    %c0_12 = arith.constant 0 : index
    %38 = vector.load %arg6[%37, %c0_12] : memref<128x128xf32, #tpu.memory_space<vmem>>, vector<1x128xf32>
    %c5 = arith.constant 5 : index
    %c0_13 = arith.constant 0 : index
    %39 = vector.load %arg7[%c5, %c0_13] : memref<256x128xf32, #tpu.memory_space<vmem>>, vector<1x128xf32>
    tpu.vector_store %arg7[%c5, %c0_13], %38 {strides = array<i32>} : memref<256x128xf32, #tpu.memory_space<vmem>>, vector<1x128xf32>,
    %c6_i32 = arith.constant 6 : i32
    %40 = arith.addi %3, %c6_i32 : i32
    %41 = arith.index_cast %40 : i32 to index
    %42 = memref.load %arg1[%41] : memref<768xi32, #tpu.memory_space<smem>>
    %43 = arith.index_cast %42 : i32 to index
    %c0_14 = arith.constant 0 : index
    %44 = vector.load %arg6[%43, %c0_14] : memref<128x128xf32, #tpu.memory_space<vmem>>, vector<1x128xf32>
    %c6 = arith.constant 6 : index
    %c0_15 = arith.constant 0 : index
    %45 = vector.load %arg7[%c6, %c0_15] : memref<256x128xf32, #tpu.memory_space<vmem>>, vector<1x128xf32>
    tpu.vector_store %arg7[%c6, %c0_15], %44 {strides = array<i32>} : memref<256x128xf32, #tpu.memory_space<vmem>>, vector<1x128xf32>,
    %c7_i32 = arith.constant 7 : i32
    %46 = arith.addi %3, %c7_i32 : i32
    %47 = arith.index_cast %46 : i32 to index
    %48 = memref.load %arg1[%47] : memref<768xi32, #tpu.memory_space<smem>>
    %49 = arith.index_cast %48 : i32 to index
    %c0_16 = arith.constant 0 : index
    %50 = vector.load %arg6[%49, %c0_16] : memref<128x128xf32, #tpu.memory_space<vmem>>, vector<1x128xf32>
    %c7 = arith.constant 7 : index
    %c0_17 = arith.constant 0 : index
    %51 = vector.load %arg7[%c7, %c0_17] : memref<256x128xf32, #tpu.memory_space<vmem>>, vector<1x128xf32>
    tpu.vector_store %arg7[%c7, %c0_17], %50 {strides = array<i32>} : memref<256x128xf32, #tpu.memory_space<vmem>>, vector<1x128xf32>,
    %c8_i32 = arith.constant 8 : i32
    %52 = arith.addi %3, %c8_i32 : i32
    %53 = arith.index_cast %52 : i32 to index
    %54 = memref.load %arg1[%53] : memref<768xi32, #tpu.memory_space<smem>>
    %55 = arith.index_cast %54 : i32 to index
    %c0_18 = arith.constant 0 : index
    %56 = vector.load %arg6[%55, %c0_18] : memref<128x128xf32, #tpu.memory_space<vmem>>, vector<1x128xf32>
    %c8 = arith.constant 8 : index
    %c0_19 = arith.constant 0 : index
    %57 = vector.load %arg7[%c8, %c0_19] : memref<256x128xf32, #tpu.memory_space<vmem>>, vector<1x128xf32>
    tpu.vector_store %arg7[%c8, %c0_19], %56 {strides = array<i32>} : memref<256x128xf32, #tpu.memory_space<vmem>>, vector<1x128xf32>,
    %c9_i32 = arith.constant 9 : i32
    %58 = arith.addi %3, %c9_i32 : i32
    %59 = arith.index_cast %58 : i32 to index
    %60 = memref.load %arg1[%59] : memref<768xi32, #tpu.memory_space<smem>>
    %61 = arith.index_cast %60 : i32 to index
    %c0_20 = arith.constant 0 : index
    %62 = vector.load %arg6[%61, %c0_20] : memref<128x128xf32, #tpu.memory_space<vmem>>, vector<1x128xf32>
    %c9 = arith.constant 9 : index
    %c0_21 = arith.constant 0 : index
    %63 = vector.load %arg7[%c9, %c0_21] : memref<256x128xf32, #tpu.memory_space<vmem>>, vector<1x128xf32>
    tpu.vector_store %arg7[%c9, %c0_21], %62 {strides = array<i32>} : memref<256x128xf32, #tpu.memory_space<vmem>>, vector<1x128xf32>,
    %c10_i32 = arith.constant 10 : i32
    %64 = arith.addi %3, %c10_i32 : i32
    %65 = arith.index_cast %64 : i32 to index
    %66 = memref.load %arg1[%65] : memref<768xi32, #tpu.memory_space<smem>>
    %67 = arith.index_cast %66 : i32 to index
    %c0_22 = arith.constant 0 : index
    %68 = vector.load %arg6[%67, %c0_22] : memref<128x128xf32, #tpu.memory_space<vmem>>, vector<1x128xf32>
    %c10 = arith.constant 10 : index
    %c0_23 = arith.constant 0 : index
    %69 = vector.load %arg7[%c10, %c0_23] : memref<256x128xf32, #tpu.memory_space<vmem>>, vector<1x128xf32>
    tpu.vector_store %arg7[%c10, %c0_23], %68 {strides = array<i32>} : memref<256x128xf32, #tpu.memory_space<vmem>>, vector<1x128xf32>,
    %c11_i32 = arith.constant 11 : i32
    %70 = arith.addi %3, %c11_i32 : i32
    %71 = arith.index_cast %70 : i32 to index
    %72 = memref.load %arg1[%71] : memref<768xi32, #tpu.memory_space<smem>>
    %73 = arith.index_cast %72 : i32 to index
    %c0_24 = arith.constant 0 : index
    %74 = vector.load %arg6[%73, %c0_24] : memref<128x128xf32, #tpu.memory_space<vmem>>, vector<1x128xf32>
    %c11 = arith.constant 11 : index
    %c0_25 = arith.constant 0 : index
    %75 = vector.load %arg7[%c11, %c0_25] : memref<256x128xf32, #tpu.memory_space<vmem>>, vector<1x128xf32>
    tpu.vector_store %arg7[%c11, %c0_25], %74 {strides = array<i32>} : memref<256x128xf32, #tpu.memory_space<vmem>>, vector<1x128xf32>,
    %c12_i32 = arith.constant 12 : i32
    %76 = arith.addi %3, %c12_i32 : i32
    %77 = arith.index_cast %76 : i32 to index
    %78 = memref.load %arg1[%77] : memref<768xi32, #tpu.memory_space<smem>>
    %79 = arith.index_cast %78 : i32 to index
    %c0_26 = arith.constant 0 : index
    %80 = vector.load %arg6[%79, %c0_26] : memref<128x128xf32, #tpu.memory_space<vmem>>, vector<1x128xf32>
    %c12 = arith.constant 12 : index
    %c0_27 = arith.constant 0 : index
    %81 = vector.load %arg7[%c12, %c0_27] : memref<256x128xf32, #tpu.memory_space<vmem>>, vector<1x128xf32>
    tpu.vector_store %arg7[%c12, %c0_27], %80 {strides = array<i32>} : memref<256x128xf32, #tpu.memory_space<vmem>>, vector<1x128xf32>,
    %c13_i32 = arith.constant 13 : i32
    %82 = arith.addi %3, %c13_i32 : i32
    %83 = arith.index_cast %82 : i32 to index
    %84 = memref.load %arg1[%83] : memref<768xi32, #tpu.memory_space<smem>>
    %85 = arith.index_cast %84 : i32 to index
    %c0_28 = arith.constant 0 : index
    %86 = vector.load %arg6[%85, %c0_28] : memref<128x128xf32, #tpu.memory_space<vmem>>, vector<1x128xf32>
    %c13 = arith.constant 13 : index
    %c0_29 = arith.constant 0 : index
    %87 = vector.load %arg7[%c13, %c0_29] : memref<256x128xf32, #tpu.memory_space<vmem>>, vector<1x128xf32>
    tpu.vector_store %arg7[%c13, %c0_29], %86 {strides = array<i32>} : memref<256x128xf32, #tpu.memory_space<vmem>>, vector<1x128xf32>,
    %c14_i32 = arith.constant 14 : i32
    %88 = arith.addi %3, %c14_i32 : i32
    %89 = arith.index_cast %88 : i32 to index
    %90 = memref.load %arg1[%89] : memref<768xi32, #tpu.memory_space<smem>>
    %91 = arith.index_cast %90 : i32 to index
    %c0_30 = arith.constant 0 : index
    %92 = vector.load %arg6[%91, %c0_30] : memref<128x128xf32, #tpu.memory_space<vmem>>, vector<1x128xf32>
    %c14 = arith.constant 14 : index
    %c0_31 = arith.constant 0 : index
    %93 = vector.load %arg7[%c14, %c0_31] : memref<256x128xf32, #tpu.memory_space<vmem>>, vector<1x128xf32>
    tpu.vector_store %arg7[%c14, %c0_31], %92 {strides = array<i32>} : memref<256x128xf32, #tpu.memory_space<vmem>>, vector<1x128xf32>,
    %c15_i32 = arith.constant 15 : i32
    %94 = arith.addi %3, %c15_i32 : i32
    %95 = arith.index_cast %94 : i32 to index
    %96 = memref.load %arg1[%95] : memref<768xi32, #tpu.memory_space<smem>>
    %97 = arith.index_cast %96 : i32 to index
    %c0_32 = arith.constant 0 : index
    %98 = vector.load %arg6[%97, %c0_32] : memref<128x128xf32, #tpu.memory_space<vmem>>, vector<1x128xf32>
    %c15 = arith.constant 15 : index
    %c0_33 = arith.constant 0 : index
    %99 = vector.load %arg7[%c15, %c0_33] : memref<256x128xf32, #tpu.memory_space<vmem>>, vector<1x128xf32>
    tpu.vector_store %arg7[%c15, %c0_33], %98 {strides = array<i32>} : memref<256x128xf32, #tpu.memory_space<vmem>>, vector<1x128xf32>,
    %c16_i32 = arith.constant 16 : i32
    %100 = arith.addi %3, %c16_i32 : i32
    %101 = arith.index_cast %100 : i32 to index
    %102 = memref.load %arg1[%101] : memref<768xi32, #tpu.memory_space<smem>>
    %103 = arith.index_cast %102 : i32 to index
    %c0_34 = arith.constant 0 : index
    %104 = vector.load %arg6[%103, %c0_34] : memref<128x128xf32, #tpu.memory_space<vmem>>, vector<1x128xf32>
    %c16 = arith.constant 16 : index
    %c0_35 = arith.constant 0 : index
    %105 = vector.load %arg7[%c16, %c0_35] : memref<256x128xf32, #tpu.memory_space<vmem>>, vector<1x128xf32>
    tpu.vector_store %arg7[%c16, %c0_35], %104 {strides = array<i32>} : memref<256x128xf32, #tpu.memory_space<vmem>>, vector<1x128xf32>,
    %c17_i32 = arith.constant 17 : i32
    %106 = arith.addi %3, %c17_i32 : i32
    %107 = arith.index_cast %106 : i32 to index
    %108 = memref.load %arg1[%107] : memref<768xi32, #tpu.memory_space<smem>>
    %109 = arith.index_cast %108 : i32 to index
    %c0_36 = arith.constant 0 : index
    %110 = vector.load %arg6[%109, %c0_36] : memref<128x128xf32, #tpu.memory_space<vmem>>, vector<1x128xf32>
    %c17 = arith.constant 17 : index
    %c0_37 = arith.constant 0 : index
    %111 = vector.load %arg7[%c17, %c0_37] : memref<256x128xf32, #tpu.memory_space<vmem>>, vector<1x128xf32>
    tpu.vector_store %arg7[%c17, %c0_37], %110 {strides = array<i32>} : memref<256x128xf32, #tpu.memory_space<vmem>>, vector<1x128xf32>,
    %c18_i32 = arith.constant 18 : i32
    %112 = arith.addi %3, %c18_i32 : i32
    %113 = arith.index_cast %112 : i32 to index
    %114 = memref.load %arg1[%113] : memref<768xi32, #tpu.memory_space<smem>>
    %115 = arith.index_cast %114 : i32 to index
    %c0_38 = arith.constant 0 : index
    %116 = vector.load %arg6[%115, %c0_38] : memref<128x128xf32, #tpu.memory_space<vmem>>, vector<1x128xf32>
    %c18 = arith.constant 18 : index
    %c0_39 = arith.constant 0 : index
    %117 = vector.load %arg7[%c18, %c0_39] : memref<256x128xf32, #tpu.memory_space<vmem>>, vector<1x128xf32>
    tpu.vector_store %arg7[%c18, %c0_39], %116 {strides = array<i32>} : memref<256x128xf32, #tpu.memory_space<vmem>>, vector<1x128xf32>,
    %c19_i32 = arith.constant 19 : i32
    %118 = arith.addi %3, %c19_i32 : i32
    %119 = arith.index_cast %118 : i32 to index
    %120 = memref.load %arg1[%119] : memref<768xi32, #tpu.memory_space<smem>>
    %121 = arith.index_cast %120 : i32 to index
    %c0_40 = arith.constant 0 : index
    %122 = vector.load %arg6[%121, %c0_40] : memref<128x128xf32, #tpu.memory_space<vmem>>, vector<1x128xf32>
    %c19 = arith.constant 19 : index
    %c0_41 = arith.constant 0 : index
    %123 = vector.load %arg7[%c19, %c0_41] : memref<256x128xf32, #tpu.memory_space<vmem>>, vector<1x128xf32>
    tpu.vector_store %arg7[%c19, %c0_41], %122 {strides = array<i32>} : memref<256x128xf32, #tpu.memory_space<vmem>>, vector<1x128xf32>,
    %c20_i32 = arith.constant 20 : i32
    %124 = arith.addi %3, %c20_i32 : i32
    %125 = arith.index_cast %124 : i32 to index
    %126 = memref.load %arg1[%125] : memref<768xi32, #tpu.memory_space<smem>>
    %127 = arith.index_cast %126 : i32 to index
    %c0_42 = arith.constant 0 : index
    %128 = vector.load %arg6[%127, %c0_42] : memref<128x128xf32, #tpu.memory_space<vmem>>, vector<1x128xf32>
    %c20 = arith.constant 20 : index
    %c0_43 = arith.constant 0 : index
    %129 = vector.load %arg7[%c20, %c0_43] : memref<256x128xf32, #tpu.memory_space<vmem>>, vector<1x128xf32>
    tpu.vector_store %arg7[%c20, %c0_43], %128 {strides = array<i32>} : memref<256x128xf32, #tpu.memory_space<vmem>>, vector<1x128xf32>,
    %c21_i32 = arith.constant 21 : i32
    %130 = arith.addi %3, %c21_i32 : i32
    %131 = arith.index_cast %130 : i32 to index
    %132 = memref.load %arg1[%131] : memref<768xi32, #tpu.memory_space<smem>>
    %133 = arith.index_cast %132 : i32 to index
    %c0_44 = arith.constant 0 : index
    %134 = vector.load %arg6[%133, %c0_44] : memref<128x128xf32, #tpu.memory_space<vmem>>, vector<1x128xf32>
    %c21 = arith.constant 21 : index
    %c0_45 = arith.constant 0 : index
    %135 = vector.load %arg7[%c21, %c0_45] : memref<256x128xf32, #tpu.memory_space<vmem>>, vector<1x128xf32>
    tpu.vector_store %arg7[%c21, %c0_45], %134 {strides = array<i32>} : memref<256x128xf32, #tpu.memory_space<vmem>>, vector<1x128xf32>,
    %c22_i32 = arith.constant 22 : i32
    %136 = arith.addi %3, %c22_i32 : i32
    %137 = arith.index_cast %136 : i32 to index
    %138 = memref.load %arg1[%137] : memref<768xi32, #tpu.memory_space<smem>>
    %139 = arith.index_cast %138 : i32 to index
    %c0_46 = arith.constant 0 : index
    %140 = vector.load %arg6[%139, %c0_46] : memref<128x128xf32, #tpu.memory_space<vmem>>, vector<1x128xf32>
    %c22 = arith.constant 22 : index
    %c0_47 = arith.constant 0 : index
    %141 = vector.load %arg7[%c22, %c0_47] : memref<256x128xf32, #tpu.memory_space<vmem>>, vector<1x128xf32>
    tpu.vector_store %arg7[%c22, %c0_47], %140 {strides = array<i32>} : memref<256x128xf32, #tpu.memory_space<vmem>>, vector<1x128xf32>,
    %c23_i32 = arith.constant 23 : i32
    %142 = arith.addi %3, %c23_i32 : i32
    %143 = arith.index_cast %142 : i32 to index
    %144 = memref.load %arg1[%143] : memref<768xi32, #tpu.memory_space<smem>>
    %145 = arith.index_cast %144 : i32 to index
    %c0_48 = arith.constant 0 : index
    %146 = vector.load %arg6[%145, %c0_48] : memref<128x128xf32, #tpu.memory_space<vmem>>, vector<1x128xf32>
    %c23 = arith.constant 23 : index
    %c0_49 = arith.constant 0 : index
    %147 = vector.load %arg7[%c23, %c0_49] : memref<256x128xf32, #tpu.memory_space<vmem>>, vector<1x128xf32>
    tpu.vector_store %arg7[%c23, %c0_49], %146 {strides = array<i32>} : memref<256x128xf32, #tpu.memory_space<vmem>>, vector<1x128xf32>,
    %c24_i32 = arith.constant 24 : i32
    %148 = arith.addi %3, %c24_i32 : i32
    %149 = arith.index_cast %148 : i32 to index
    %150 = memref.load %arg1[%149] : memref<768xi32, #tpu.memory_space<smem>>
    %151 = arith.index_cast %150 : i32 to index
    %c0_50 = arith.constant 0 : index
    %152 = vector.load %arg6[%151, %c0_50] : memref<128x128xf32, #tpu.memory_space<vmem>>, vector<1x128xf32>
    %c24 = arith.constant 24 : index
    %c0_51 = arith.constant 0 : index
    %153 = vector.load %arg7[%c24, %c0_51] : memref<256x128xf32, #tpu.memory_space<vmem>>, vector<1x128xf32>
    tpu.vector_store %arg7[%c24, %c0_51], %152 {strides = array<i32>} : memref<256x128xf32, #tpu.memory_space<vmem>>, vector<1x128xf32>,
    %c25_i32 = arith.constant 25 : i32
    %154 = arith.addi %3, %c25_i32 : i32
    %155 = arith.index_cast %154 : i32 to index
    %156 = memref.load %arg1[%155] : memref<768xi32, #tpu.memory_space<smem>>
    %157 = arith.index_cast %156 : i32 to index
    %c0_52 = arith.constant 0 : index
    %158 = vector.load %arg6[%157, %c0_52] : memref<128x128xf32, #tpu.memory_space<vmem>>, vector<1x128xf32>
    %c25 = arith.constant 25 : index
    %c0_53 = arith.constant 0 : index
    %159 = vector.load %arg7[%c25, %c0_53] : memref<256x128xf32, #tpu.memory_space<vmem>>, vector<1x128xf32>
    tpu.vector_store %arg7[%c25, %c0_53], %158 {strides = array<i32>} : memref<256x128xf32, #tpu.memory_space<vmem>>, vector<1x128xf32>,
    %c26_i32 = arith.constant 26 : i32
    %160 = arith.addi %3, %c26_i32 : i32
    %161 = arith.index_cast %160 : i32 to index
    %162 = memref.load %arg1[%161] : memref<768xi32, #tpu.memory_space<smem>>
    %163 = arith.index_cast %162 : i32 to index
    %c0_54 = arith.constant 0 : index
    %164 = vector.load %arg6[%163, %c0_54] : memref<128x128xf32, #tpu.memory_space<vmem>>, vector<1x128xf32>
    %c26 = arith.constant 26 : index
    %c0_55 = arith.constant 0 : index
    %165 = vector.load %arg7[%c26, %c0_55] : memref<256x128xf32, #tpu.memory_space<vmem>>, vector<1x128xf32>
    tpu.vector_store %arg7[%c26, %c0_55], %164 {strides = array<i32>} : memref<256x128xf32, #tpu.memory_space<vmem>>, vector<1x128xf32>,
    %c27_i32 = arith.constant 27 : i32
    %166 = arith.addi %3, %c27_i32 : i32
    %167 = arith.index_cast %166 : i32 to index
    %168 = memref.load %arg1[%167] : memref<768xi32, #tpu.memory_space<smem>>
    %169 = arith.index_cast %168 : i32 to index
    %c0_56 = arith.constant 0 : index
    %170 = vector.load %arg6[%169, %c0_56] : memref<128x128xf32, #tpu.memory_space<vmem>>, vector<1x128xf32>
    %c27 = arith.constant 27 : index
    %c0_57 = arith.constant 0 : index
    %171 = vector.load %arg7[%c27, %c0_57] : memref<256x128xf32, #tpu.memory_space<vmem>>, vector<1x128xf32>
    tpu.vector_store %arg7[%c27, %c0_57], %170 {strides = array<i32>} : memref<256x128xf32, #tpu.memory_space<vmem>>, vector<1x128xf32>,
    %c28_i32 = arith.constant 28 : i32
    %172 = arith.addi %3, %c28_i32 : i32
    %173 = arith.index_cast %172 : i32 to index
    %174 = memref.load %arg1[%173] : memref<768xi32, #tpu.memory_space<smem>>
    %175 = arith.index_cast %174 : i32 to index
    %c0_58 = arith.constant 0 : index
    %176 = vector.load %arg6[%175, %c0_58] : memref<128x128xf32, #tpu.memory_space<vmem>>, vector<1x128xf32>
    %c28 = arith.constant 28 : index
    %c0_59 = arith.constant 0 : index
    %177 = vector.load %arg7[%c28, %c0_59] : memref<256x128xf32, #tpu.memory_space<vmem>>, vector<1x128xf32>
    tpu.vector_store %arg7[%c28, %c0_59], %176 {strides = array<i32>} : memref<256x128xf32, #tpu.memory_space<vmem>>, vector<1x128xf32>,
    %c29_i32 = arith.constant 29 : i32
    %178 = arith.addi %3, %c29_i32 : i32
    %179 = arith.index_cast %178 : i32 to index
    %180 = memref.load %arg1[%179] : memref<768xi32, #tpu.memory_space<smem>>
    %181 = arith.index_cast %180 : i32 to index
    %c0_60 = arith.constant 0 : index
    %182 = vector.load %arg6[%181, %c0_60] : memref<128x128xf32, #tpu.memory_space<vmem>>, vector<1x128xf32>
    %c29 = arith.constant 29 : index
    %c0_61 = arith.constant 0 : index
    %183 = vector.load %arg7[%c29, %c0_61] : memref<256x128xf32, #tpu.memory_space<vmem>>, vector<1x128xf32>
    tpu.vector_store %arg7[%c29, %c0_61], %182 {strides = array<i32>} : memref<256x128xf32, #tpu.memory_space<vmem>>, vector<1x128xf32>,
    %c30_i32 = arith.constant 30 : i32
    %184 = arith.addi %3, %c30_i32 : i32
    %185 = arith.index_cast %184 : i32 to index
    %186 = memref.load %arg1[%185] : memref<768xi32, #tpu.memory_space<smem>>
    %187 = arith.index_cast %186 : i32 to index
    %c0_62 = arith.constant 0 : index
    %188 = vector.load %arg6[%187, %c0_62] : memref<128x128xf32, #tpu.memory_space<vmem>>, vector<1x128xf32>
    %c30 = arith.constant 30 : index
    %c0_63 = arith.constant 0 : index
    %189 = vector.load %arg7[%c30, %c0_63] : memref<256x128xf32, #tpu.memory_space<vmem>>, vector<1x128xf32>
    tpu.vector_store %arg7[%c30, %c0_63], %188 {strides = array<i32>} : memref<256x128xf32, #tpu.memory_space<vmem>>, vector<1x128xf32>,
    %c31_i32 = arith.constant 31 : i32
    %190 = arith.addi %3, %c31_i32 : i32
    %191 = arith.index_cast %190 : i32 to index
    %192 = memref.load %arg1[%191] : memref<768xi32, #tpu.memory_space<smem>>
    %193 = arith.index_cast %192 : i32 to index
    %c0_64 = arith.constant 0 : index
    %194 = vector.load %arg6[%193, %c0_64] : memref<128x128xf32, #tpu.memory_space<vmem>>, vector<1x128xf32>
    %c31 = arith.constant 31 : index
    %c0_65 = arith.constant 0 : index
    %195 = vector.load %arg7[%c31, %c0_65] : memref<256x128xf32, #tpu.memory_space<vmem>>, vector<1x128xf32>
    tpu.vector_store %arg7[%c31, %c0_65], %194 {strides = array<i32>} : memref<256x128xf32, #tpu.memory_space<vmem>>, vector<1x128xf32>,
    %c32_i32 = arith.constant 32 : i32
    %196 = arith.addi %3, %c32_i32 : i32
    %197 = arith.index_cast %196 : i32 to index
    %198 = memref.load %arg1[%197] : memref<768xi32, #tpu.memory_space<smem>>
    %199 = arith.index_cast %198 : i32 to index
    %c0_66 = arith.constant 0 : index
    %200 = vector.load %arg6[%199, %c0_66] : memref<128x128xf32, #tpu.memory_space<vmem>>, vector<1x128xf32>
    %c32 = arith.constant 32 : index
    %c0_67 = arith.constant 0 : index
    %201 = vector.load %arg7[%c32, %c0_67] : memref<256x128xf32, #tpu.memory_space<vmem>>, vector<1x128xf32>
    tpu.vector_store %arg7[%c32, %c0_67], %200 {strides = array<i32>} : memref<256x128xf32, #tpu.memory_space<vmem>>, vector<1x128xf32>,
    %c33_i32 = arith.constant 33 : i32
    %202 = arith.addi %3, %c33_i32 : i32
    %203 = arith.index_cast %202 : i32 to index
    %204 = memref.load %arg1[%203] : memref<768xi32, #tpu.memory_space<smem>>
    %205 = arith.index_cast %204 : i32 to index
    %c0_68 = arith.constant 0 : index
    %206 = vector.load %arg6[%205, %c0_68] : memref<128x128xf32, #tpu.memory_space<vmem>>, vector<1x128xf32>
    %c33 = arith.constant 33 : index
    %c0_69 = arith.constant 0 : index
    %207 = vector.load %arg7[%c33, %c0_69] : memref<256x128xf32, #tpu.memory_space<vmem>>, vector<1x128xf32>
    tpu.vector_store %arg7[%c33, %c0_69], %206 {strides = array<i32>} : memref<256x128xf32, #tpu.memory_space<vmem>>, vector<1x128xf32>,
    %c34_i32 = arith.constant 34 : i32
    %208 = arith.addi %3, %c34_i32 : i32
    %209 = arith.index_cast %208 : i32 to index
    %210 = memref.load %arg1[%209] : memref<768xi32, #tpu.memory_space<smem>>
    %211 = arith.index_cast %210 : i32 to index
    %c0_70 = arith.constant 0 : index
    %212 = vector.load %arg6[%211, %c0_70] : memref<128x128xf32, #tpu.memory_space<vmem>>, vector<1x128xf32>
    %c34 = arith.constant 34 : index
    %c0_71 = arith.constant 0 : index
    %213 = vector.load %arg7[%c34, %c0_71] : memref<256x128xf32, #tpu.memory_space<vmem>>, vector<1x128xf32>
    tpu.vector_store %arg7[%c34, %c0_71], %212 {strides = array<i32>} : memref<256x128xf32, #tpu.memory_space<vmem>>, vector<1x128xf32>,
    %c35_i32 = arith.constant 35 : i32
    %214 = arith.addi %3, %c35_i32 : i32
    %215 = arith.index_cast %214 : i32 to index
    %216 = memref.load %arg1[%215] : memref<768xi32, #tpu.memory_space<smem>>
    %217 = arith.index_cast %216 : i32 to index
    %c0_72 = arith.constant 0 : index
    %218 = vector.load %arg6[%217, %c0_72] : memref<128x128xf32, #tpu.memory_space<vmem>>, vector<1x128xf32>
    %c35 = arith.constant 35 : index
    %c0_73 = arith.constant 0 : index
    %219 = vector.load %arg7[%c35, %c0_73] : memref<256x128xf32, #tpu.memory_space<vmem>>, vector<1x128xf32>
    tpu.vector_store %arg7[%c35, %c0_73], %218 {strides = array<i32>} : memref<256x128xf32, #tpu.memory_space<vmem>>, vector<1x128xf32>,
    %c36_i32 = arith.constant 36 : i32
    %220 = arith.addi %3, %c36_i32 : i32
    %221 = arith.index_cast %220 : i32 to index
    %222 = memref.load %arg1[%221] : memref<768xi32, #tpu.memory_space<smem>>
    %223 = arith.index_cast %222 : i32 to index
    %c0_74 = arith.constant 0 : index
    %224 = vector.load %arg6[%223, %c0_74] : memref<128x128xf32, #tpu.memory_space<vmem>>, vector<1x128xf32>
    %c36 = arith.constant 36 : index
    %c0_75 = arith.constant 0 : index
    %225 = vector.load %arg7[%c36, %c0_75] : memref<256x128xf32, #tpu.memory_space<vmem>>, vector<1x128xf32>
    tpu.vector_store %arg7[%c36, %c0_75], %224 {strides = array<i32>} : memref<256x128xf32, #tpu.memory_space<vmem>>, vector<1x128xf32>,
    %c37_i32 = arith.constant 37 : i32
    %226 = arith.addi %3, %c37_i32 : i32
    %227 = arith.index_cast %226 : i32 to index
    %228 = memref.load %arg1[%227] : memref<768xi32, #tpu.memory_space<smem>>
    %229 = arith.index_cast %228 : i32 to index
    %c0_76 = arith.constant 0 : index
    %230 = vector.load %arg6[%229, %c0_76] : memref<128x128xf32, #tpu.memory_space<vmem>>, vector<1x128xf32>
    %c37 = arith.constant 37 : index
    %c0_77 = arith.constant 0 : index
    %231 = vector.load %arg7[%c37, %c0_77] : memref<256x128xf32, #tpu.memory_space<vmem>>, vector<1x128xf32>
    tpu.vector_store %arg7[%c37, %c0_77], %230 {strides = array<i32>} : memref<256x128xf32, #tpu.memory_space<vmem>>, vector<1x128xf32>,
    %c38_i32 = arith.constant 38 : i32
    %232 = arith.addi %3, %c38_i32 : i32
    %233 = arith.index_cast %232 : i32 to index
    %234 = memref.load %arg1[%233] : memref<768xi32, #tpu.memory_space<smem>>
    %235 = arith.index_cast %234 : i32 to index
    %c0_78 = arith.constant 0 : index
    %236 = vector.load %arg6[%235, %c0_78] : memref<128x128xf32, #tpu.memory_space<vmem>>, vector<1x128xf32>
    %c38 = arith.constant 38 : index
    %c0_79 = arith.constant 0 : index
    %237 = vector.load %arg7[%c38, %c0_79] : memref<256x128xf32, #tpu.memory_space<vmem>>, vector<1x128xf32>
    tpu.vector_store %arg7[%c38, %c0_79], %236 {strides = array<i32>} : memref<256x128xf32, #tpu.memory_space<vmem>>, vector<1x128xf32>,
    %c39_i32 = arith.constant 39 : i32
    %238 = arith.addi %3, %c39_i32 : i32
    %239 = arith.index_cast %238 : i32 to index
    %240 = memref.load %arg1[%239] : memref<768xi32, #tpu.memory_space<smem>>
    %241 = arith.index_cast %240 : i32 to index
    %c0_80 = arith.constant 0 : index
    %242 = vector.load %arg6[%241, %c0_80] : memref<128x128xf32, #tpu.memory_space<vmem>>, vector<1x128xf32>
    %c39 = arith.constant 39 : index
    %c0_81 = arith.constant 0 : index
    %243 = vector.load %arg7[%c39, %c0_81] : memref<256x128xf32, #tpu.memory_space<vmem>>, vector<1x128xf32>
    tpu.vector_store %arg7[%c39, %c0_81], %242 {strides = array<i32>} : memref<256x128xf32, #tpu.memory_space<vmem>>, vector<1x128xf32>,
    %c40_i32 = arith.constant 40 : i32
    %244 = arith.addi %3, %c40_i32 : i32
    %245 = arith.index_cast %244 : i32 to index
    %246 = memref.load %arg1[%245] : memref<768xi32, #tpu.memory_space<smem>>
    %247 = arith.index_cast %246 : i32 to index
    %c0_82 = arith.constant 0 : index
    %248 = vector.load %arg6[%247, %c0_82] : memref<128x128xf32, #tpu.memory_space<vmem>>, vector<1x128xf32>
    %c40 = arith.constant 40 : index
    %c0_83 = arith.constant 0 : index
    %249 = vector.load %arg7[%c40, %c0_83] : memref<256x128xf32, #tpu.memory_space<vmem>>, vector<1x128xf32>
    tpu.vector_store %arg7[%c40, %c0_83], %248 {strides = array<i32>} : memref<256x128xf32, #tpu.memory_space<vmem>>, vector<1x128xf32>,
    %c41_i32 = arith.constant 41 : i32
    %250 = arith.addi %3, %c41_i32 : i32
    %251 = arith.index_cast %250 : i32 to index
    %252 = memref.load %arg1[%251] : memref<768xi32, #tpu.memory_space<smem>>
    %253 = arith.index_cast %252 : i32 to index
    %c0_84 = arith.constant 0 : index
    %254 = vector.load %arg6[%253, %c0_84] : memref<128x128xf32, #tpu.memory_space<vmem>>, vector<1x128xf32>
    %c41 = arith.constant 41 : index
    %c0_85 = arith.constant 0 : index
    %255 = vector.load %arg7[%c41, %c0_85] : memref<256x128xf32, #tpu.memory_space<vmem>>, vector<1x128xf32>
    tpu.vector_store %arg7[%c41, %c0_85], %254 {strides = array<i32>} : memref<256x128xf32, #tpu.memory_space<vmem>>, vector<1x128xf32>,
    %c42_i32 = arith.constant 42 : i32
    %256 = arith.addi %3, %c42_i32 : i32
    %257 = arith.index_cast %256 : i32 to index
    %258 = memref.load %arg1[%257] : memref<768xi32, #tpu.memory_space<smem>>
    %259 = arith.index_cast %258 : i32 to index
    %c0_86 = arith.constant 0 : index
    %260 = vector.load %arg6[%259, %c0_86] : memref<128x128xf32, #tpu.memory_space<vmem>>, vector<1x128xf32>
    %c42 = arith.constant 42 : index
    %c0_87 = arith.constant 0 : index
    %261 = vector.load %arg7[%c42, %c0_87] : memref<256x128xf32, #tpu.memory_space<vmem>>, vector<1x128xf32>
    tpu.vector_store %arg7[%c42, %c0_87], %260 {strides = array<i32>} : memref<256x128xf32, #tpu.memory_space<vmem>>, vector<1x128xf32>,
    %c43_i32 = arith.constant 43 : i32
    %262 = arith.addi %3, %c43_i32 : i32
    %263 = arith.index_cast %262 : i32 to index
    %264 = memref.load %arg1[%263] : memref<768xi32, #tpu.memory_space<smem>>
    %265 = arith.index_cast %264 : i32 to index
    %c0_88 = arith.constant 0 : index
    %266 = vector.load %arg6[%265, %c0_88] : memref<128x128xf32, #tpu.memory_space<vmem>>, vector<1x128xf32>
    %c43 = arith.constant 43 : index
    %c0_89 = arith.constant 0 : index
    %267 = vector.load %arg7[%c43, %c0_89] : memref<256x128xf32, #tpu.memory_space<vmem>>, vector<1x128xf32>
    tpu.vector_store %arg7[%c43, %c0_89], %266 {strides = array<i32>} : memref<256x128xf32, #tpu.memory_space<vmem>>, vector<1x128xf32>,
    %c44_i32 = arith.constant 44 : i32
    %268 = arith.addi %3, %c44_i32 : i32
    %269 = arith.index_cast %268 : i32 to index
    %270 = memref.load %arg1[%269] : memref<768xi32, #tpu.memory_space<smem>>
    %271 = arith.index_cast %270 : i32 to index
    %c0_90 = arith.constant 0 : index
    %272 = vector.load %arg6[%271, %c0_90] : memref<128x128xf32, #tpu.memory_space<vmem>>, vector<1x128xf32>
    %c44 = arith.constant 44 : index
    %c0_91 = arith.constant 0 : index
    %273 = vector.load %arg7[%c44, %c0_91] : memref<256x128xf32, #tpu.memory_space<vmem>>, vector<1x128xf32>
    tpu.vector_store %arg7[%c44, %c0_91], %272 {strides = array<i32>} : memref<256x128xf32, #tpu.memory_space<vmem>>, vector<1x128xf32>,
    %c45_i32 = arith.constant 45 : i32
    %274 = arith.addi %3, %c45_i32 : i32
    %275 = arith.index_cast %274 : i32 to index
    %276 = memref.load %arg1[%275] : memref<768xi32, #tpu.memory_space<smem>>
    %277 = arith.index_cast %276 : i32 to index
    %c0_92 = arith.constant 0 : index
    %278 = vector.load %arg6[%277, %c0_92] : memref<128x128xf32, #tpu.memory_space<vmem>>, vector<1x128xf32>
    %c45 = arith.constant 45 : index
    %c0_93 = arith.constant 0 : index
    %279 = vector.load %arg7[%c45, %c0_93] : memref<256x128xf32, #tpu.memory_space<vmem>>, vector<1x128xf32>
    tpu.vector_store %arg7[%c45, %c0_93], %278 {strides = array<i32>} : memref<256x128xf32, #tpu.memory_space<vmem>>, vector<1x128xf32>,
    %c46_i32 = arith.constant 46 : i32
    %280 = arith.addi %3, %c46_i32 : i32
    %281 = arith.index_cast %280 : i32 to index
    %282 = memref.load %arg1[%281] : memref<768xi32, #tpu.memory_space<smem>>
    %283 = arith.index_cast %282 : i32 to index
    %c0_94 = arith.constant 0 : index
    %284 = vector.load %arg6[%283, %c0_94] : memref<128x128xf32, #tpu.memory_space<vmem>>, vector<1x128xf32>
    %c46 = arith.constant 46 : index
    %c0_95 = arith.constant 0 : index
    %285 = vector.load %arg7[%c46, %c0_95] : memref<256x128xf32, #tpu.memory_space<vmem>>, vector<1x128xf32>
    tpu.vector_store %arg7[%c46, %c0_95], %284 {strides = array<i32>} : memref<256x128xf32, #tpu.memory_space<vmem>>, vector<1x128xf32>,
    %c47_i32 = arith.constant 47 : i32
    %286 = arith.addi %3, %c47_i32 : i32
    %287 = arith.index_cast %286 : i32 to index
    %288 = memref.load %arg1[%287] : memref<768xi32, #tpu.memory_space<smem>>
    %289 = arith.index_cast %288 : i32 to index
    %c0_96 = arith.constant 0 : index
    %290 = vector.load %arg6[%289, %c0_96] : memref<128x128xf32, #tpu.memory_space<vmem>>, vector<1x128xf32>
    %c47 = arith.constant 47 : index
    %c0_97 = arith.constant 0 : index
    %291 = vector.load %arg7[%c47, %c0_97] : memref<256x128xf32, #tpu.memory_space<vmem>>, vector<1x128xf32>
    tpu.vector_store %arg7[%c47, %c0_97], %290 {strides = array<i32>} : memref<256x128xf32, #tpu.memory_space<vmem>>, vector<1x128xf32>,
    %c48_i32 = arith.constant 48 : i32
    %292 = arith.addi %3, %c48_i32 : i32
    %293 = arith.index_cast %292 : i32 to index
    %294 = memref.load %arg1[%293] : memref<768xi32, #tpu.memory_space<smem>>
    %295 = arith.index_cast %294 : i32 to index
    %c0_98 = arith.constant 0 : index
    %296 = vector.load %arg6[%295, %c0_98] : memref<128x128xf32, #tpu.memory_space<vmem>>, vector<1x128xf32>
    %c48 = arith.constant 48 : index
    %c0_99 = arith.constant 0 : index
    %297 = vector.load %arg7[%c48, %c0_99] : memref<256x128xf32, #tpu.memory_space<vmem>>, vector<1x128xf32>
    tpu.vector_store %arg7[%c48, %c0_99], %296 {strides = array<i32>} : memref<256x128xf32, #tpu.memory_space<vmem>>, vector<1x128xf32>,
    %c49_i32 = arith.constant 49 : i32
    %298 = arith.addi %3, %c49_i32 : i32
    %299 = arith.index_cast %298 : i32 to index
    %300 = memref.load %arg1[%299] : memref<768xi32, #tpu.memory_space<smem>>
    %301 = arith.index_cast %300 : i32 to index
    %c0_100 = arith.constant 0 : index
    %302 = vector.load %arg6[%301, %c0_100] : memref<128x128xf32, #tpu.memory_space<vmem>>, vector<1x128xf32>
    %c49 = arith.constant 49 : index
    %c0_101 = arith.constant 0 : index
    %303 = vector.load %arg7[%c49, %c0_101] : memref<256x128xf32, #tpu.memory_space<vmem>>, vector<1x128xf32>
    tpu.vector_store %arg7[%c49, %c0_101], %302 {strides = array<i32>} : memref<256x128xf32, #tpu.memory_space<vmem>>, vector<1x128xf32>,
    %c50_i32 = arith.constant 50 : i32
    %304 = arith.addi %3, %c50_i32 : i32
    %305 = arith.index_cast %304 : i32 to index
    %306 = memref.load %arg1[%305] : memref<768xi32, #tpu.memory_space<smem>>
    %307 = arith.index_cast %306 : i32 to index
    %c0_102 = arith.constant 0 : index
    %308 = vector.load %arg6[%307, %c0_102] : memref<128x128xf32, #tpu.memory_space<vmem>>, vector<1x128xf32>
    %c50 = arith.constant 50 : index
    %c0_103 = arith.constant 0 : index
    %309 = vector.load %arg7[%c50, %c0_103] : memref<256x128xf32, #tpu.memory_space<vmem>>, vector<1x128xf32>
    tpu.vector_store %arg7[%c50, %c0_103], %308 {strides = array<i32>} : memref<256x128xf32, #tpu.memory_space<vmem>>, vector<1x128xf32>,
    %c51_i32 = arith.constant 51 : i32
    %310 = arith.addi %3, %c51_i32 : i32
    %311 = arith.index_cast %310 : i32 to index
    %312 = memref.load %arg1[%311] : memref<768xi32, #tpu.memory_space<smem>>
    %313 = arith.index_cast %312 : i32 to index
    %c0_104 = arith.constant 0 : index
    %314 = vector.load %arg6[%313, %c0_104] : memref<128x128xf32, #tpu.memory_space<vmem>>, vector<1x128xf32>
    %c51 = arith.constant 51 : index
    %c0_105 = arith.constant 0 : index
    %315 = vector.load %arg7[%c51, %c0_105] : memref<256x128xf32, #tpu.memory_space<vmem>>, vector<1x128xf32>
    tpu.vector_store %arg7[%c51, %c0_105], %314 {strides = array<i32>} : memref<256x128xf32, #tpu.memory_space<vmem>>, vector<1x128xf32>,
    %c52_i32 = arith.constant 52 : i32
    %316 = arith.addi %3, %c52_i32 : i32
    %317 = arith.index_cast %316 : i32 to index
    %318 = memref.load %arg1[%317] : memref<768xi32, #tpu.memory_space<smem>>
    %319 = arith.index_cast %318 : i32 to index
    %c0_106 = arith.constant 0 : index
    %320 = vector.load %arg6[%319, %c0_106] : memref<128x128xf32, #tpu.memory_space<vmem>>, vector<1x128xf32>
    %c52 = arith.constant 52 : index
    %c0_107 = arith.constant 0 : index
    %321 = vector.load %arg7[%c52, %c0_107] : memref<256x128xf32, #tpu.memory_space<vmem>>, vector<1x128xf32>
    tpu.vector_store %arg7[%c52, %c0_107], %320 {strides = array<i32>} : memref<256x128xf32, #tpu.memory_space<vmem>>, vector<1x128xf32>,
    %c53_i32 = arith.constant 53 : i32
    %322 = arith.addi %3, %c53_i32 : i32
    %323 = arith.index_cast %322 : i32 to index
    %324 = memref.load %arg1[%323] : memref<768xi32, #tpu.memory_space<smem>>
    %325 = arith.index_cast %324 : i32 to index
    %c0_108 = arith.constant 0 : index
    %326 = vector.load %arg6[%325, %c0_108] : memref<128x128xf32, #tpu.memory_space<vmem>>, vector<1x128xf32>
    %c53 = arith.constant 53 : index
    %c0_109 = arith.constant 0 : index
    %327 = vector.load %arg7[%c53, %c0_109] : memref<256x128xf32, #tpu.memory_space<vmem>>, vector<1x128xf32>
    tpu.vector_store %arg7[%c53, %c0_109], %326 {strides = array<i32>} : memref<256x128xf32, #tpu.memory_space<vmem>>, vector<1x128xf32>,
    %c54_i32 = arith.constant 54 : i32
    %328 = arith.addi %3, %c54_i32 : i32
    %329 = arith.index_cast %328 : i32 to index
    %330 = memref.load %arg1[%329] : memref<768xi32, #tpu.memory_space<smem>>
    %331 = arith.index_cast %330 : i32 to index
    %c0_110 = arith.constant 0 : index
    %332 = vector.load %arg6[%331, %c0_110] : memref<128x128xf32, #tpu.memory_space<vmem>>, vector<1x128xf32>
    %c54 = arith.constant 54 : index
    %c0_111 = arith.constant 0 : index
    %333 = vector.load %arg7[%c54, %c0_111] : memref<256x128xf32, #tpu.memory_space<vmem>>, vector<1x128xf32>
    tpu.vector_store %arg7[%c54, %c0_111], %332 {strides = array<i32>} : memref<256x128xf32, #tpu.memory_space<vmem>>, vector<1x128xf32>,
    %c55_i32 = arith.constant 55 : i32
    %334 = arith.addi %3, %c55_i32 : i32
    %335 = arith.index_cast %334 : i32 to index
    %336 = memref.load %arg1[%335] : memref<768xi32, #tpu.memory_space<smem>>
    %337 = arith.index_cast %336 : i32 to index
    %c0_112 = arith.constant 0 : index
    %338 = vector.load %arg6[%337, %c0_112] : memref<128x128xf32, #tpu.memory_space<vmem>>, vector<1x128xf32>
    %c55 = arith.constant 55 : index
    %c0_113 = arith.constant 0 : index
    %339 = vector.load %arg7[%c55, %c0_113] : memref<256x128xf32, #tpu.memory_space<vmem>>, vector<1x128xf32>
    tpu.vector_store %arg7[%c55, %c0_113], %338 {strides = array<i32>} : memref<256x128xf32, #tpu.memory_space<vmem>>, vector<1x128xf32>,
    %c56_i32 = arith.constant 56 : i32
    %340 = arith.addi %3, %c56_i32 : i32
    %341 = arith.index_cast %340 : i32 to index
    %342 = memref.load %arg1[%341] : memref<768xi32, #tpu.memory_space<smem>>
    %343 = arith.index_cast %342 : i32 to index
    %c0_114 = arith.constant 0 : index
    %344 = vector.load %arg6[%343, %c0_114] : memref<128x128xf32, #tpu.memory_space<vmem>>, vector<1x128xf32>
    %c56 = arith.constant 56 : index
    %c0_115 = arith.constant 0 : index
    %345 = vector.load %arg7[%c56, %c0_115] : memref<256x128xf32, #tpu.memory_space<vmem>>, vector<1x128xf32>
    tpu.vector_store %arg7[%c56, %c0_115], %344 {strides = array<i32>} : memref<256x128xf32, #tpu.memory_space<vmem>>, vector<1x128xf32>,
    %c57_i32 = arith.constant 57 : i32
    %346 = arith.addi %3, %c57_i32 : i32
    %347 = arith.index_cast %346 : i32 to index
    %348 = memref.load %arg1[%347] : memref<768xi32, #tpu.memory_space<smem>>
    %349 = arith.index_cast %348 : i32 to index
    %c0_116 = arith.constant 0 : index
    %350 = vector.load %arg6[%349, %c0_116] : memref<128x128xf32, #tpu.memory_space<vmem>>, vector<1x128xf32>
    %c57 = arith.constant 57 : index
    %c0_117 = arith.constant 0 : index
    %351 = vector.load %arg7[%c57, %c0_117] : memref<256x128xf32, #tpu.memory_space<vmem>>, vector<1x128xf32>
    tpu.vector_store %arg7[%c57, %c0_117], %350 {strides = array<i32>} : memref<256x128xf32, #tpu.memory_space<vmem>>, vector<1x128xf32>,
    %c58_i32 = arith.constant 58 : i32
    %352 = arith.addi %3, %c58_i32 : i32
    %353 = arith.index_cast %352 : i32 to index
    %354 = memref.load %arg1[%353] : memref<768xi32, #tpu.memory_space<smem>>
    %355 = arith.index_cast %354 : i32 to index
    %c0_118 = arith.constant 0 : index
    %356 = vector.load %arg6[%355, %c0_118] : memref<128x128xf32, #tpu.memory_space<vmem>>, vector<1x128xf32>
    %c58 = arith.constant 58 : index
    %c0_119 = arith.constant 0 : index
    %357 = vector.load %arg7[%c58, %c0_119] : memref<256x128xf32, #tpu.memory_space<vmem>>, vector<1x128xf32>
    tpu.vector_store %arg7[%c58, %c0_119], %356 {strides = array<i32>} : memref<256x128xf32, #tpu.memory_space<vmem>>, vector<1x128xf32>,
    %c59_i32 = arith.constant 59 : i32
    %358 = arith.addi %3, %c59_i32 : i32
    %359 = arith.index_cast %358 : i32 to index
    %360 = memref.load %arg1[%359] : memref<768xi32, #tpu.memory_space<smem>>
    %361 = arith.index_cast %360 : i32 to index
    %c0_120 = arith.constant 0 : index
    %362 = vector.load %arg6[%361, %c0_120] : memref<128x128xf32, #tpu.memory_space<vmem>>, vector<1x128xf32>
    %c59 = arith.constant 59 : index
    %c0_121 = arith.constant 0 : index
    %363 = vector.load %arg7[%c59, %c0_121] : memref<256x128xf32, #tpu.memory_space<vmem>>, vector<1x128xf32>
    tpu.vector_store %arg7[%c59, %c0_121], %362 {strides = array<i32>} : memref<256x128xf32, #tpu.memory_space<vmem>>, vector<1x128xf32>,
    %c60_i32 = arith.constant 60 : i32
    %364 = arith.addi %3, %c60_i32 : i32
    %365 = arith.index_cast %364 : i32 to index
    %366 = memref.load %arg1[%365] : memref<768xi32, #tpu.memory_space<smem>>
    %367 = arith.index_cast %366 : i32 to index
    %c0_122 = arith.constant 0 : index
    %368 = vector.load %arg6[%367, %c0_122] : memref<128x128xf32, #tpu.memory_space<vmem>>, vector<1x128xf32>
    %c60 = arith.constant 60 : index
    %c0_123 = arith.constant 0 : index
    %369 = vector.load %arg7[%c60, %c0_123] : memref<256x128xf32, #tpu.memory_space<vmem>>, vector<1x128xf32>
    tpu.vector_store %arg7[%c60, %c0_123], %368 {strides = array<i32>} : memref<256x128xf32, #tpu.memory_space<vmem>>, vector<1x128xf32>,
    %c61_i32 = arith.constant 61 : i32
    %370 = arith.addi %3, %c61_i32 : i32
    %371 = arith.index_cast %370 : i32 to index
    %372 = memref.load %arg1[%371] : memref<768xi32, #tpu.memory_space<smem>>
    %373 = arith.index_cast %372 : i32 to index
    %c0_124 = arith.constant 0 : index
    %374 = vector.load %arg6[%373, %c0_124] : memref<128x128xf32, #tpu.memory_space<vmem>>, vector<1x128xf32>
    %c61 = arith.constant 61 : index
    %c0_125 = arith.constant 0 : index
    %375 = vector.load %arg7[%c61, %c0_125] : memref<256x128xf32, #tpu.memory_space<vmem>>, vector<1x128xf32>
    tpu.vector_store %arg7[%c61, %c0_125], %374 {strides = array<i32>} : memref<256x128xf32, #tpu.memory_space<vmem>>, vector<1x128xf32>,
    %c62_i32 = arith.constant 62 : i32
    %376 = arith.addi %3, %c62_i32 : i32
    %377 = arith.index_cast %376 : i32 to index
    %378 = memref.load %arg1[%377] : memref<768xi32, #tpu.memory_space<smem>>
    %379 = arith.index_cast %378 : i32 to index
    %c0_126 = arith.constant 0 : index
    %380 = vector.load %arg6[%379, %c0_126] : memref<128x128xf32, #tpu.memory_space<vmem>>, vector<1x128xf32>
    %c62 = arith.constant 62 : index
    %c0_127 = arith.constant 0 : index
    %381 = vector.load %arg7[%c62, %c0_127] : memref<256x128xf32, #tpu.memory_space<vmem>>, vector<1x128xf32>
    tpu.vector_store %arg7[%c62, %c0_127], %380 {strides = array<i32>} : memref<256x128xf32, #tpu.memory_space<vmem>>, vector<1x128xf32>,
    %c63_i32 = arith.constant 63 : i32
    %382 = arith.addi %3, %c63_i32 : i32
    %383 = arith.index_cast %382 : i32 to index
    %384 = memref.load %arg1[%383] : memref<768xi32, #tpu.memory_space<smem>>
    %385 = arith.index_cast %384 : i32 to index
    %c0_128 = arith.constant 0 : index
    %386 = vector.load %arg6[%385, %c0_128] : memref<128x128xf32, #tpu.memory_space<vmem>>, vector<1x128xf32>
    %c63 = arith.constant 63 : index
    %c0_129 = arith.constant 0 : index
    %387 = vector.load %arg7[%c63, %c0_129] : memref<256x128xf32, #tpu.memory_space<vmem>>, vector<1x128xf32>
    tpu.vector_store %arg7[%c63, %c0_129], %386 {strides = array<i32>} : memref<256x128xf32, #tpu.memory_space<vmem>>, vector<1x128xf32>,
    %c64_i32 = arith.constant 64 : i32
    %388 = arith.addi %3, %c64_i32 : i32
    %389 = arith.index_cast %388 : i32 to index
    %390 = memref.load %arg1[%389] : memref<768xi32, #tpu.memory_space<smem>>
    %391 = arith.index_cast %390 : i32 to index
    %c0_130 = arith.constant 0 : index
    %392 = vector.load %arg6[%391, %c0_130] : memref<128x128xf32, #tpu.memory_space<vmem>>, vector<1x128xf32>
    %c64 = arith.constant 64 : index
    %c0_131 = arith.constant 0 : index
    %393 = vector.load %arg7[%c64, %c0_131] : memref<256x128xf32, #tpu.memory_space<vmem>>, vector<1x128xf32>
    tpu.vector_store %arg7[%c64, %c0_131], %392 {strides = array<i32>} : memref<256x128xf32, #tpu.memory_space<vmem>>, vector<1x128xf32>,
    %c65_i32 = arith.constant 65 : i32
    %394 = arith.addi %3, %c65_i32 : i32
    %395 = arith.index_cast %394 : i32 to index
    %396 = memref.load %arg1[%395] : memref<768xi32, #tpu.memory_space<smem>>
    %397 = arith.index_cast %396 : i32 to index
    %c0_132 = arith.constant 0 : index
    %398 = vector.load %arg6[%397, %c0_132] : memref<128x128xf32, #tpu.memory_space<vmem>>, vector<1x128xf32>
    %c65 = arith.constant 65 : index
    %c0_133 = arith.constant 0 : index
    %399 = vector.load %arg7[%c65, %c0_133] : memref<256x128xf32, #tpu.memory_space<vmem>>, vector<1x128xf32>
    tpu.vector_store %arg7[%c65, %c0_133], %398 {strides = array<i32>} : memref<256x128xf32, #tpu.memory_space<vmem>>, vector<1x128xf32>,
    %c66_i32 = arith.constant 66 : i32
    %400 = arith.addi %3, %c66_i32 : i32
    %401 = arith.index_cast %400 : i32 to index
    %402 = memref.load %arg1[%401] : memref<768xi32, #tpu.memory_space<smem>>
    %403 = arith.index_cast %402 : i32 to index
    %c0_134 = arith.constant 0 : index
    %404 = vector.load %arg6[%403, %c0_134] : memref<128x128xf32, #tpu.memory_space<vmem>>, vector<1x128xf32>
    %c66 = arith.constant 66 : index
    %c0_135 = arith.constant 0 : index
    %405 = vector.load %arg7[%c66, %c0_135] : memref<256x128xf32, #tpu.memory_space<vmem>>, vector<1x128xf32>
    tpu.vector_store %arg7[%c66, %c0_135], %404 {strides = array<i32>} : memref<256x128xf32, #tpu.memory_space<vmem>>, vector<1x128xf32>,
    %c67_i32 = arith.constant 67 : i32
    %406 = arith.addi %3, %c67_i32 : i32
    %407 = arith.index_cast %406 : i32 to index
    %408 = memref.load %arg1[%407] : memref<768xi32, #tpu.memory_space<smem>>
    %409 = arith.index_cast %408 : i32 to index
    %c0_136 = arith.constant 0 : index
    %410 = vector.load %arg6[%409, %c0_136] : memref<128x128xf32, #tpu.memory_space<vmem>>, vector<1x128xf32>
    %c67 = arith.constant 67 : index
    %c0_137 = arith.constant 0 : index
    %411 = vector.load %arg7[%c67, %c0_137] : memref<256x128xf32, #tpu.memory_space<vmem>>, vector<1x128xf32>
    tpu.vector_store %arg7[%c67, %c0_137], %410 {strides = array<i32>} : memref<256x128xf32, #tpu.memory_space<vmem>>, vector<1x128xf32>,
    %c68_i32 = arith.constant 68 : i32
    %412 = arith.addi %3, %c68_i32 : i32
    %413 = arith.index_cast %412 : i32 to index
    %414 = memref.load %arg1[%413] : memref<768xi32, #tpu.memory_space<smem>>
    %415 = arith.index_cast %414 : i32 to index
    %c0_138 = arith.constant 0 : index
    %416 = vector.load %arg6[%415, %c0_138] : memref<128x128xf32, #tpu.memory_space<vmem>>, vector<1x128xf32>
    %c68 = arith.constant 68 : index
    %c0_139 = arith.constant 0 : index
    %417 = vector.load %arg7[%c68, %c0_139] : memref<256x128xf32, #tpu.memory_space<vmem>>, vector<1x128xf32>
    tpu.vector_store %arg7[%c68, %c0_139], %416 {strides = array<i32>} : memref<256x128xf32, #tpu.memory_space<vmem>>, vector<1x128xf32>,
    %c69_i32 = arith.constant 69 : i32
    %418 = arith.addi %3, %c69_i32 : i32
    %419 = arith.index_cast %418 : i32 to index
    %420 = memref.load %arg1[%419] : memref<768xi32, #tpu.memory_space<smem>>
    %421 = arith.index_cast %420 : i32 to index
    %c0_140 = arith.constant 0 : index
    %422 = vector.load %arg6[%421, %c0_140] : memref<128x128xf32, #tpu.memory_space<vmem>>, vector<1x128xf32>
    %c69 = arith.constant 69 : index
    %c0_141 = arith.constant 0 : index
    %423 = vector.load %arg7[%c69, %c0_141] : memref<256x128xf32, #tpu.memory_space<vmem>>, vector<1x128xf32>
    tpu.vector_store %arg7[%c69, %c0_141], %422 {strides = array<i32>} : memref<256x128xf32, #tpu.memory_space<vmem>>, vector<1x128xf32>,
    %c70_i32 = arith.constant 70 : i32
    %424 = arith.addi %3, %c70_i32 : i32
    %425 = arith.index_cast %424 : i32 to index
    %426 = memref.load %arg1[%425] : memref<768xi32, #tpu.memory_space<smem>>
    %427 = arith.index_cast %426 : i32 to index
    %c0_142 = arith.constant 0 : index
    %428 = vector.load %arg6[%427, %c0_142] : memref<128x128xf32, #tpu.memory_space<vmem>>, vector<1x128xf32>
    %c70 = arith.constant 70 : index
    %c0_143 = arith.constant 0 : index
    %429 = vector.load %arg7[%c70, %c0_143] : memref<256x128xf32, #tpu.memory_space<vmem>>, vector<1x128xf32>
    tpu.vector_store %arg7[%c70, %c0_143], %428 {strides = array<i32>} : memref<256x128xf32, #tpu.memory_space<vmem>>, vector<1x128xf32>,
    %c71_i32 = arith.constant 71 : i32
    %430 = arith.addi %3, %c71_i32 : i32
    %431 = arith.index_cast %430 : i32 to index
    %432 = memref.load %arg1[%431] : memref<768xi32, #tpu.memory_space<smem>>
    %433 = arith.index_cast %432 : i32 to index
    %c0_144 = arith.constant 0 : index
    %434 = vector.load %arg6[%433, %c0_144] : memref<128x128xf32, #tpu.memory_space<vmem>>, vector<1x128xf32>
    %c71 = arith.constant 71 : index
    %c0_145 = arith.constant 0 : index
    %435 = vector.load %arg7[%c71, %c0_145] : memref<256x128xf32, #tpu.memory_space<vmem>>, vector<1x128xf32>
    tpu.vector_store %arg7[%c71, %c0_145], %434 {strides = array<i32>} : memref<256x128xf32, #tpu.memory_space<vmem>>, vector<1x128xf32>,
    %c72_i32 = arith.constant 72 : i32
    %436 = arith.addi %3, %c72_i32 : i32
    %437 = arith.index_cast %436 : i32 to index
    %438 = memref.load %arg1[%437] : memref<768xi32, #tpu.memory_space<smem>>
    %439 = arith.index_cast %438 : i32 to index
    %c0_146 = arith.constant 0 : index
    %440 = vector.load %arg6[%439, %c0_146] : memref<128x128xf32, #tpu.memory_space<vmem>>, vector<1x128xf32>
    %c72 = arith.constant 72 : index
    %c0_147 = arith.constant 0 : index
    %441 = vector.load %arg7[%c72, %c0_147] : memref<256x128xf32, #tpu.memory_space<vmem>>, vector<1x128xf32>
    tpu.vector_store %arg7[%c72, %c0_147], %440 {strides = array<i32>} : memref<256x128xf32, #tpu.memory_space<vmem>>, vector<1x128xf32>,
    %c73_i32 = arith.constant 73 : i32
    %442 = arith.addi %3, %c73_i32 : i32
    %443 = arith.index_cast %442 : i32 to index
    %444 = memref.load %arg1[%443] : memref<768xi32, #tpu.memory_space<smem>>
    %445 = arith.index_cast %444 : i32 to index
    %c0_148 = arith.constant 0 : index
    %446 = vector.load %arg6[%445, %c0_148] : memref<128x128xf32, #tpu.memory_space<vmem>>, vector<1x128xf32>
    %c73 = arith.constant 73 : index
    %c0_149 = arith.constant 0 : index
    %447 = vector.load %arg7[%c73, %c0_149] : memref<256x128xf32, #tpu.memory_space<vmem>>, vector<1x128xf32>
    tpu.vector_store %arg7[%c73, %c0_149], %446 {strides = array<i32>} : memref<256x128xf32, #tpu.memory_space<vmem>>, vector<1x128xf32>,
    %c74_i32 = arith.constant 74 : i32
    %448 = arith.addi %3, %c74_i32 : i32
    %449 = arith.index_cast %448 : i32 to index
    %450 = memref.load %arg1[%449] : memref<768xi32, #tpu.memory_space<smem>>
    %451 = arith.index_cast %450 : i32 to index
    %c0_150 = arith.constant 0 : index
    %452 = vector.load %arg6[%451, %c0_150] : memref<128x128xf32, #tpu.memory_space<vmem>>, vector<1x128xf32>
    %c74 = arith.constant 74 : index
    %c0_151 = arith.constant 0 : index
    %453 = vector.load %arg7[%c74, %c0_151] : memref<256x128xf32, #tpu.memory_space<vmem>>, vector<1x128xf32>
    tpu.vector_store %arg7[%c74, %c0_151], %452 {strides = array<i32>} : memref<256x128xf32, #tpu.memory_space<vmem>>, vector<1x128xf32>,
    %c75_i32 = arith.constant 75 : i32
    %454 = arith.addi %3, %c75_i32 : i32
    %455 = arith.index_cast %454 : i32 to index
    %456 = memref.load %arg1[%455] : memref<768xi32, #tpu.memory_space<smem>>
    %457 = arith.index_cast %456 : i32 to index
    %c0_152 = arith.constant 0 : index
    %458 = vector.load %arg6[%457, %c0_152] : memref<128x128xf32, #tpu.memory_space<vmem>>, vector<1x128xf32>
    %c75 = arith.constant 75 : index
    %c0_153 = arith.constant 0 : index
    %459 = vector.load %arg7[%c75, %c0_153] : memref<256x128xf32, #tpu.memory_space<vmem>>, vector<1x128xf32>
    tpu.vector_store %arg7[%c75, %c0_153], %458 {strides = array<i32>} : memref<256x128xf32, #tpu.memory_space<vmem>>, vector<1x128xf32>,
    %c76_i32 = arith.constant 76 : i32
    %460 = arith.addi %3, %c76_i32 : i32
    %461 = arith.index_cast %460 : i32 to index
    %462 = memref.load %arg1[%461] : memref<768xi32, #tpu.memory_space<smem>>
    %463 = arith.index_cast %462 : i32 to index
    %c0_154 = arith.constant 0 : index
    %464 = vector.load %arg6[%463, %c0_154] : memref<128x128xf32, #tpu.memory_space<vmem>>, vector<1x128xf32>
    %c76 = arith.constant 76 : index
    %c0_155 = arith.constant 0 : index
    %465 = vector.load %arg7[%c76, %c0_155] : memref<256x128xf32, #tpu.memory_space<vmem>>, vector<1x128xf32>
    tpu.vector_store %arg7[%c76, %c0_155], %464 {strides = array<i32>} : memref<256x128xf32, #tpu.memory_space<vmem>>, vector<1x128xf32>,
    %c77_i32 = arith.constant 77 : i32
    %466 = arith.addi %3, %c77_i32 : i32
    %467 = arith.index_cast %466 : i32 to index
    %468 = memref.load %arg1[%467] : memref<768xi32, #tpu.memory_space<smem>>
    %469 = arith.index_cast %468 : i32 to index
    %c0_156 = arith.constant 0 : index
    %470 = vector.load %arg6[%469, %c0_156] : memref<128x128xf32, #tpu.memory_space<vmem>>, vector<1x128xf32>
    %c77 = arith.constant 77 : index
    %c0_157 = arith.constant 0 : index
    %471 = vector.load %arg7[%c77, %c0_157] : memref<256x128xf32, #tpu.memory_space<vmem>>, vector<1x128xf32>
    tpu.vector_store %arg7[%c77, %c0_157], %470 {strides = array<i32>} : memref<256x128xf32, #tpu.memory_space<vmem>>, vector<1x128xf32>,
    %c78_i32 = arith.constant 78 : i32
    %472 = arith.addi %3, %c78_i32 : i32
    %473 = arith.index_cast %472 : i32 to index
    %474 = memref.load %arg1[%473] : memref<768xi32, #tpu.memory_space<smem>>
    %475 = arith.index_cast %474 : i32 to index
    %c0_158 = arith.constant 0 : index
    %476 = vector.load %arg6[%475, %c0_158] : memref<128x128xf32, #tpu.memory_space<vmem>>, vector<1x128xf32>
    %c78 = arith.constant 78 : index
    %c0_159 = arith.constant 0 : index
    %477 = vector.load %arg7[%c78, %c0_159] : memref<256x128xf32, #tpu.memory_space<vmem>>, vector<1x128xf32>
    tpu.vector_store %arg7[%c78, %c0_159], %476 {strides = array<i32>} : memref<256x128xf32, #tpu.memory_space<vmem>>, vector<1x128xf32>,
    %c79_i32 = arith.constant 79 : i32
    %478 = arith.addi %3, %c79_i32 : i32
    %479 = arith.index_cast %478 : i32 to index
    %480 = memref.load %arg1[%479] : memref<768xi32, #tpu.memory_space<smem>>
    %481 = arith.index_cast %480 : i32 to index
    %c0_160 = arith.constant 0 : index
    %482 = vector.load %arg6[%481, %c0_160] : memref<128x128xf32, #tpu.memory_space<vmem>>, vector<1x128xf32>
    %c79 = arith.constant 79 : index
    %c0_161 = arith.constant 0 : index
    %483 = vector.load %arg7[%c79, %c0_161] : memref<256x128xf32, #tpu.memory_space<vmem>>, vector<1x128xf32>
    tpu.vector_store %arg7[%c79, %c0_161], %482 {strides = array<i32>} : memref<256x128xf32, #tpu.memory_space<vmem>>, vector<1x128xf32>,
    %c80_i32 = arith.constant 80 : i32
    %484 = arith.addi %3, %c80_i32 : i32
    %485 = arith.index_cast %484 : i32 to index
    %486 = memref.load %arg1[%485] : memref<768xi32, #tpu.memory_space<smem>>
    %487 = arith.index_cast %486 : i32 to index
    %c0_162 = arith.constant 0 : index
    %488 = vector.load %arg6[%487, %c0_162] : memref<128x128xf32, #tpu.memory_space<vmem>>, vector<1x128xf32>
    %c80 = arith.constant 80 : index
    %c0_163 = arith.constant 0 : index
    %489 = vector.load %arg7[%c80, %c0_163] : memref<256x128xf32, #tpu.memory_space<vmem>>, vector<1x128xf32>
    tpu.vector_store %arg7[%c80, %c0_163], %488 {strides = array<i32>} : memref<256x128xf32, #tpu.memory_space<vmem>>, vector<1x128xf32>,
    %c81_i32 = arith.constant 81 : i32
    %490 = arith.addi %3, %c81_i32 : i32
    %491 = arith.index_cast %490 : i32 to index
    %492 = memref.load %arg1[%491] : memref<768xi32, #tpu.memory_space<smem>>
    %493 = arith.index_cast %492 : i32 to index
    %c0_164 = arith.constant 0 : index
    %494 = vector.load %arg6[%493, %c0_164] : memref<128x128xf32, #tpu.memory_space<vmem>>, vector<1x128xf32>
    %c81 = arith.constant 81 : index
    %c0_165 = arith.constant 0 : index
    %495 = vector.load %arg7[%c81, %c0_165] : memref<256x128xf32, #tpu.memory_space<vmem>>, vector<1x128xf32>
    tpu.vector_store %arg7[%c81, %c0_165], %494 {strides = array<i32>} : memref<256x128xf32, #tpu.memory_space<vmem>>, vector<1x128xf32>,
    %c82_i32 = arith.constant 82 : i32
    %496 = arith.addi %3, %c82_i32 : i32
    %497 = arith.index_cast %496 : i32 to index
    %498 = memref.load %arg1[%497] : memref<768xi32, #tpu.memory_space<smem>>
    %499 = arith.index_cast %498 : i32 to index
    %c0_166 = arith.constant 0 : index
    %500 = vector.load %arg6[%499, %c0_166] : memref<128x128xf32, #tpu.memory_space<vmem>>, vector<1x128xf32>
    %c82 = arith.constant 82 : index
    %c0_167 = arith.constant 0 : index
    %501 = vector.load %arg7[%c82, %c0_167] : memref<256x128xf32, #tpu.memory_space<vmem>>, vector<1x128xf32>
    tpu.vector_store %arg7[%c82, %c0_167], %500 {strides = array<i32>} : memref<256x128xf32, #tpu.memory_space<vmem>>, vector<1x128xf32>,
    %c83_i32 = arith.constant 83 : i32
    %502 = arith.addi %3, %c83_i32 : i32
    %503 = arith.index_cast %502 : i32 to index
    %504 = memref.load %arg1[%503] : memref<768xi32, #tpu.memory_space<smem>>
    %505 = arith.index_cast %504 : i32 to index
    %c0_168 = arith.constant 0 : index
    %506 = vector.load %arg6[%505, %c0_168] : memref<128x128xf32, #tpu.memory_space<vmem>>, vector<1x128xf32>
    %c83 = arith.constant 83 : index
    %c0_169 = arith.constant 0 : index
    %507 = vector.load %arg7[%c83, %c0_169] : memref<256x128xf32, #tpu.memory_space<vmem>>, vector<1x128xf32>
    tpu.vector_store %arg7[%c83, %c0_169], %506 {strides = array<i32>} : memref<256x128xf32, #tpu.memory_space<vmem>>, vector<1x128xf32>,
    %c84_i32 = arith.constant 84 : i32
    %508 = arith.addi %3, %c84_i32 : i32
    %509 = arith.index_cast %508 : i32 to index
    %510 = memref.load %arg1[%509] : memref<768xi32, #tpu.memory_space<smem>>
    %511 = arith.index_cast %510 : i32 to index
    %c0_170 = arith.constant 0 : index
    %512 = vector.load %arg6[%511, %c0_170] : memref<128x128xf32, #tpu.memory_space<vmem>>, vector<1x128xf32>
    %c84 = arith.constant 84 : index
    %c0_171 = arith.constant 0 : index
    %513 = vector.load %arg7[%c84, %c0_171] : memref<256x128xf32, #tpu.memory_space<vmem>>, vector<1x128xf32>
    tpu.vector_store %arg7[%c84, %c0_171], %512 {strides = array<i32>} : memref<256x128xf32, #tpu.memory_space<vmem>>, vector<1x128xf32>,
    %c85_i32 = arith.constant 85 : i32
    %514 = arith.addi %3, %c85_i32 : i32
    %515 = arith.index_cast %514 : i32 to index
    %516 = memref.load %arg1[%515] : memref<768xi32, #tpu.memory_space<smem>>
    %517 = arith.index_cast %516 : i32 to index
    %c0_172 = arith.constant 0 : index
    %518 = vector.load %arg6[%517, %c0_172] : memref<128x128xf32, #tpu.memory_space<vmem>>, vector<1x128xf32>
    %c85 = arith.constant 85 : index
    %c0_173 = arith.constant 0 : index
    %519 = vector.load %arg7[%c85, %c0_173] : memref<256x128xf32, #tpu.memory_space<vmem>>, vector<1x128xf32>
    tpu.vector_store %arg7[%c85, %c0_173], %518 {strides = array<i32>} : memref<256x128xf32, #tpu.memory_space<vmem>>, vector<1x128xf32>,
    %c86_i32 = arith.constant 86 : i32
    %520 = arith.addi %3, %c86_i32 : i32
    %521 = arith.index_cast %520 : i32 to index
    %522 = memref.load %arg1[%521] : memref<768xi32, #tpu.memory_space<smem>>
    %523 = arith.index_cast %522 : i32 to index
    %c0_174 = arith.constant 0 : index
    %524 = vector.load %arg6[%523, %c0_174] : memref<128x128xf32, #tpu.memory_space<vmem>>, vector<1x128xf32>
    %c86 = arith.constant 86 : index
    %c0_175 = arith.constant 0 : index
    %525 = vector.load %arg7[%c86, %c0_175] : memref<256x128xf32, #tpu.memory_space<vmem>>, vector<1x128xf32>
    tpu.vector_store %arg7[%c86, %c0_175], %524 {strides = array<i32>} : memref<256x128xf32, #tpu.memory_space<vmem>>, vector<1x128xf32>,
    %c87_i32 = arith.constant 87 : i32
    %526 = arith.addi %3, %c87_i32 : i32
    %527 = arith.index_cast %526 : i32 to index
    %528 = memref.load %arg1[%527] : memref<768xi32, #tpu.memory_space<smem>>
    %529 = arith.index_cast %528 : i32 to index
    %c0_176 = arith.constant 0 : index
    %530 = vector.load %arg6[%529, %c0_176] : memref<128x128xf32, #tpu.memory_space<vmem>>, vector<1x128xf32>
    %c87 = arith.constant 87 : index
    %c0_177 = arith.constant 0 : index
    %531 = vector.load %arg7[%c87, %c0_177] : memref<256x128xf32, #tpu.memory_space<vmem>>, vector<1x128xf32>
    tpu.vector_store %arg7[%c87, %c0_177], %530 {strides = array<i32>} : memref<256x128xf32, #tpu.memory_space<vmem>>, vector<1x128xf32>,
    %c88_i32 = arith.constant 88 : i32
    %532 = arith.addi %3, %c88_i32 : i32
    %533 = arith.index_cast %532 : i32 to index
    %534 = memref.load %arg1[%533] : memref<768xi32, #tpu.memory_space<smem>>
    %535 = arith.index_cast %534 : i32 to index
    %c0_178 = arith.constant 0 : index
    %536 = vector.load %arg6[%535, %c0_178] : memref<128x128xf32, #tpu.memory_space<vmem>>, vector<1x128xf32>
    %c88 = arith.constant 88 : index
    %c0_179 = arith.constant 0 : index
    %537 = vector.load %arg7[%c88, %c0_179] : memref<256x128xf32, #tpu.memory_space<vmem>>, vector<1x128xf32>
    tpu.vector_store %arg7[%c88, %c0_179], %536 {strides = array<i32>} : memref<256x128xf32, #tpu.memory_space<vmem>>, vector<1x128xf32>,
    %c89_i32 = arith.constant 89 : i32
    %538 = arith.addi %3, %c89_i32 : i32
    %539 = arith.index_cast %538 : i32 to index
    %540 = memref.load %arg1[%539] : memref<768xi32, #tpu.memory_space<smem>>
    %541 = arith.index_cast %540 : i32 to index
    %c0_180 = arith.constant 0 : index
    %542 = vector.load %arg6[%541, %c0_180] : memref<128x128xf32, #tpu.memory_space<vmem>>, vector<1x128xf32>
    %c89 = arith.constant 89 : index
    %c0_181 = arith.constant 0 : index
    %543 = vector.load %arg7[%c89, %c0_181] : memref<256x128xf32, #tpu.memory_space<vmem>>, vector<1x128xf32>
    tpu.vector_store %arg7[%c89, %c0_181], %542 {strides = array<i32>} : memref<256x128xf32, #tpu.memory_space<vmem>>, vector<1x128xf32>,
    %c90_i32 = arith.constant 90 : i32
    %544 = arith.addi %3, %c90_i32 : i32
    %545 = arith.index_cast %544 : i32 to index
    %546 = memref.load %arg1[%545] : memref<768xi32, #tpu.memory_space<smem>>
    %547 = arith.index_cast %546 : i32 to index
    %c0_182 = arith.constant 0 : index
    %548 = vector.load %arg6[%547, %c0_182] : memref<128x128xf32, #tpu.memory_space<vmem>>, vector<1x128xf32>
    %c90 = arith.constant 90 : index
    %c0_183 = arith.constant 0 : index
    %549 = vector.load %arg7[%c90, %c0_183] : memref<256x128xf32, #tpu.memory_space<vmem>>, vector<1x128xf32>
    tpu.vector_store %arg7[%c90, %c0_183], %548 {strides = array<i32>} : memref<256x128xf32, #tpu.memory_space<vmem>>, vector<1x128xf32>,
    %c91_i32 = arith.constant 91 : i32
    %550 = arith.addi %3, %c91_i32 : i32
    %551 = arith.index_cast %550 : i32 to index
    %552 = memref.load %arg1[%551] : memref<768xi32, #tpu.memory_space<smem>>
    %553 = arith.index_cast %552 : i32 to index
    %c0_184 = arith.constant 0 : index
    %554 = vector.load %arg6[%553, %c0_184] : memref<128x128xf32, #tpu.memory_space<vmem>>, vector<1x128xf32>
    %c91 = arith.constant 91 : index
    %c0_185 = arith.constant 0 : index
    %555 = vector.load %arg7[%c91, %c0_185] : memref<256x128xf32, #tpu.memory_space<vmem>>, vector<1x128xf32>
    tpu.vector_store %arg7[%c91, %c0_185], %554 {strides = array<i32>} : memref<256x128xf32, #tpu.memory_space<vmem>>, vector<1x128xf32>,
    %c92_i32 = arith.constant 92 : i32
    %556 = arith.addi %3, %c92_i32 : i32
    %557 = arith.index_cast %556 : i32 to index
    %558 = memref.load %arg1[%557] : memref<768xi32, #tpu.memory_space<smem>>
    %559 = arith.index_cast %558 : i32 to index
    %c0_186 = arith.constant 0 : index
    %560 = vector.load %arg6[%559, %c0_186] : memref<128x128xf32, #tpu.memory_space<vmem>>, vector<1x128xf32>
    %c92 = arith.constant 92 : index
    %c0_187 = arith.constant 0 : index
    %561 = vector.load %arg7[%c92, %c0_187] : memref<256x128xf32, #tpu.memory_space<vmem>>, vector<1x128xf32>
    tpu.vector_store %arg7[%c92, %c0_187], %560 {strides = array<i32>} : memref<256x128xf32, #tpu.memory_space<vmem>>, vector<1x128xf32>,
    %c93_i32 = arith.constant 93 : i32
    %562 = arith.addi %3, %c93_i32 : i32
    %563 = arith.index_cast %562 : i32 to index
    %564 = memref.load %arg1[%563] : memref<768xi32, #tpu.memory_space<smem>>
    %565 = arith.index_cast %564 : i32 to index
    %c0_188 = arith.constant 0 : index
    %566 = vector.load %arg6[%565, %c0_188] : memref<128x128xf32, #tpu.memory_space<vmem>>, vector<1x128xf32>
    %c93 = arith.constant 93 : index
    %c0_189 = arith.constant 0 : index
    %567 = vector.load %arg7[%c93, %c0_189] : memref<256x128xf32, #tpu.memory_space<vmem>>, vector<1x128xf32>
    tpu.vector_store %arg7[%c93, %c0_189], %566 {strides = array<i32>} : memref<256x128xf32, #tpu.memory_space<vmem>>, vector<1x128xf32>,
    %c94_i32 = arith.constant 94 : i32
    %568 = arith.addi %3, %c94_i32 : i32
    %569 = arith.index_cast %568 : i32 to index
    %570 = memref.load %arg1[%569] : memref<768xi32, #tpu.memory_space<smem>>
    %571 = arith.index_cast %570 : i32 to index
    %c0_190 = arith.constant 0 : index
    %572 = vector.load %arg6[%571, %c0_190] : memref<128x128xf32, #tpu.memory_space<vmem>>, vector<1x128xf32>
    %c94 = arith.constant 94 : index
    %c0_191 = arith.constant 0 : index
    %573 = vector.load %arg7[%c94, %c0_191] : memref<256x128xf32, #tpu.memory_space<vmem>>, vector<1x128xf32>
    tpu.vector_store %arg7[%c94, %c0_191], %572 {strides = array<i32>} : memref<256x128xf32, #tpu.memory_space<vmem>>, vector<1x128xf32>,
    %c95_i32 = arith.constant 95 : i32
    %574 = arith.addi %3, %c95_i32 : i32
    %575 = arith.index_cast %574 : i32 to index
    %576 = memref.load %arg1[%575] : memref<768xi32, #tpu.memory_space<smem>>
    %577 = arith.index_cast %576 : i32 to index
    %c0_192 = arith.constant 0 : index
    %578 = vector.load %arg6[%577, %c0_192] : memref<128x128xf32, #tpu.memory_space<vmem>>, vector<1x128xf32>
    %c95 = arith.constant 95 : index
    %c0_193 = arith.constant 0 : index
    %579 = vector.load %arg7[%c95, %c0_193] : memref<256x128xf32, #tpu.memory_space<vmem>>, vector<1x128xf32>
    tpu.vector_store %arg7[%c95, %c0_193], %578 {strides = array<i32>} : memref<256x128xf32, #tpu.memory_space<vmem>>, vector<1x128xf32>,
    %c96_i32 = arith.constant 96 : i32
    %580 = arith.addi %3, %c96_i32 : i32
    %581 = arith.index_cast %580 : i32 to index
    %582 = memref.load %arg1[%581] : memref<768xi32, #tpu.memory_space<smem>>
    %583 = arith.index_cast %582 : i32 to index
    %c0_194 = arith.constant 0 : index
    %584 = vector.load %arg6[%583, %c0_194] : memref<128x128xf32, #tpu.memory_space<vmem>>, vector<1x128xf32>
    %c96 = arith.constant 96 : index
    %c0_195 = arith.constant 0 : index
    %585 = vector.load %arg7[%c96, %c0_195] : memref<256x128xf32, #tpu.memory_space<vmem>>, vector<1x128xf32>
    tpu.vector_store %arg7[%c96, %c0_195], %584 {strides = array<i32>} : memref<256x128xf32, #tpu.memory_space<vmem>>, vector<1x128xf32>,
    %c97_i32 = arith.constant 97 : i32
    %586 = arith.addi %3, %c97_i32 : i32
    %587 = arith.index_cast %586 : i32 to index
    %588 = memref.load %arg1[%587] : memref<768xi32, #tpu.memory_space<smem>>
    %589 = arith.index_cast %588 : i32 to index
    %c0_196 = arith.constant 0 : index
    %590 = vector.load %arg6[%589, %c0_196] : memref<128x128xf32, #tpu.memory_space<vmem>>, vector<1x128xf32>
    %c97 = arith.constant 97 : index
    %c0_197 = arith.constant 0 : index
    %591 = vector.load %arg7[%c97, %c0_197] : memref<256x128xf32, #tpu.memory_space<vmem>>, vector<1x128xf32>
    tpu.vector_store %arg7[%c97, %c0_197], %590 {strides = array<i32>} : memref<256x128xf32, #tpu.memory_space<vmem>>, vector<1x128xf32>,
    %c98_i32 = arith.constant 98 : i32
    %592 = arith.addi %3, %c98_i32 : i32
    %593 = arith.index_cast %592 : i32 to index
    %594 = memref.load %arg1[%593] : memref<768xi32, #tpu.memory_space<smem>>
    %595 = arith.index_cast %594 : i32 to index
    %c0_198 = arith.constant 0 : index
    %596 = vector.load %arg6[%595, %c0_198] : memref<128x128xf32, #tpu.memory_space<vmem>>, vector<1x128xf32>
    %c98 = arith.constant 98 : index
    %c0_199 = arith.constant 0 : index
    %597 = vector.load %arg7[%c98, %c0_199] : memref<256x128xf32, #tpu.memory_space<vmem>>, vector<1x128xf32>
    tpu.vector_store %arg7[%c98, %c0_199], %596 {strides = array<i32>} : memref<256x128xf32, #tpu.memory_space<vmem>>, vector<1x128xf32>,
    %c99_i32 = arith.constant 99 : i32
    %598 = arith.addi %3, %c99_i32 : i32
    %599 = arith.index_cast %598 : i32 to index
    %600 = memref.load %arg1[%599] : memref<768xi32, #tpu.memory_space<smem>>
    %601 = arith.index_cast %600 : i32 to index
    %c0_200 = arith.constant 0 : index
    %602 = vector.load %arg6[%601, %c0_200] : memref<128x128xf32, #tpu.memory_space<vmem>>, vector<1x128xf32>
    %c99 = arith.constant 99 : index
    %c0_201 = arith.constant 0 : index
    %603 = vector.load %arg7[%c99, %c0_201] : memref<256x128xf32, #tpu.memory_space<vmem>>, vector<1x128xf32>
    tpu.vector_store %arg7[%c99, %c0_201], %602 {strides = array<i32>} : memref<256x128xf32, #tpu.memory_space<vmem>>, vector<1x128xf32>,
    %c100_i32 = arith.constant 100 : i32
    %604 = arith.addi %3, %c100_i32 : i32
    %605 = arith.index_cast %604 : i32 to index
    %606 = memref.load %arg1[%605] : memref<768xi32, #tpu.memory_space<smem>>
    %607 = arith.index_cast %606 : i32 to index
    %c0_202 = arith.constant 0 : index
    %608 = vector.load %arg6[%607, %c0_202] : memref<128x128xf32, #tpu.memory_space<vmem>>, vector<1x128xf32>
    %c100 = arith.constant 100 : index
    %c0_203 = arith.constant 0 : index
    %609 = vector.load %arg7[%c100, %c0_203] : memref<256x128xf32, #tpu.memory_space<vmem>>, vector<1x128xf32>
    tpu.vector_store %arg7[%c100, %c0_203], %608 {strides = array<i32>} : memref<256x128xf32, #tpu.memory_space<vmem>>, vector<1x128xf32>,
    %c101_i32 = arith.constant 101 : i32
    %610 = arith.addi %3, %c101_i32 : i32
    %611 = arith.index_cast %610 : i32 to index
    %612 = memref.load %arg1[%611] : memref<768xi32, #tpu.memory_space<smem>>
    %613 = arith.index_cast %612 : i32 to index
    %c0_204 = arith.constant 0 : index
    %614 = vector.load %arg6[%613, %c0_204] : memref<128x128xf32, #tpu.memory_space<vmem>>, vector<1x128xf32>
    %c101 = arith.constant 101 : index
    %c0_205 = arith.constant 0 : index
    %615 = vector.load %arg7[%c101, %c0_205] : memref<256x128xf32, #tpu.memory_space<vmem>>, vector<1x128xf32>
    tpu.vector_store %arg7[%c101, %c0_205], %614 {strides = array<i32>} : memref<256x128xf32, #tpu.memory_space<vmem>>, vector<1x128xf32>,
    %c102_i32 = arith.constant 102 : i32
    %616 = arith.addi %3, %c102_i32 : i32
    %617 = arith.index_cast %616 : i32 to index
    %618 = memref.load %arg1[%617] : memref<768xi32, #tpu.memory_space<smem>>
    %619 = arith.index_cast %618 : i32 to index
    %c0_206 = arith.constant 0 : index
    %620 = vector.load %arg6[%619, %c0_206] : memref<128x128xf32, #tpu.memory_space<vmem>>, vector<1x128xf32>
    %c102 = arith.constant 102 : index
    %c0_207 = arith.constant 0 : index
    %621 = vector.load %arg7[%c102, %c0_207] : memref<256x128xf32, #tpu.memory_space<vmem>>, vector<1x128xf32>
    tpu.vector_store %arg7[%c102, %c0_207], %620 {strides = array<i32>} : memref<256x128xf32, #tpu.memory_space<vmem>>, vector<1x128xf32>,
    %c103_i32 = arith.constant 103 : i32
    %622 = arith.addi %3, %c103_i32 : i32
    %623 = arith.index_cast %622 : i32 to index
    %624 = memref.load %arg1[%623] : memref<768xi32, #tpu.memory_space<smem>>
    %625 = arith.index_cast %624 : i32 to index
    %c0_208 = arith.constant 0 : index
    %626 = vector.load %arg6[%625, %c0_208] : memref<128x128xf32, #tpu.memory_space<vmem>>, vector<1x128xf32>
    %c103 = arith.constant 103 : index
    %c0_209 = arith.constant 0 : index
    %627 = vector.load %arg7[%c103, %c0_209] : memref<256x128xf32, #tpu.memory_space<vmem>>, vector<1x128xf32>
    tpu.vector_store %arg7[%c103, %c0_209], %626 {strides = array<i32>} : memref<256x128xf32, #tpu.memory_space<vmem>>, vector<1x128xf32>,
    %c104_i32 = arith.constant 104 : i32
    %628 = arith.addi %3, %c104_i32 : i32
    %629 = arith.index_cast %628 : i32 to index
    %630 = memref.load %arg1[%629] : memref<768xi32, #tpu.memory_space<smem>>
    %631 = arith.index_cast %630 : i32 to index
    %c0_210 = arith.constant 0 : index
    %632 = vector.load %arg6[%631, %c0_210] : memref<128x128xf32, #tpu.memory_space<vmem>>, vector<1x128xf32>
    %c104 = arith.constant 104 : index
    %c0_211 = arith.constant 0 : index
    %633 = vector.load %arg7[%c104, %c0_211] : memref<256x128xf32, #tpu.memory_space<vmem>>, vector<1x128xf32>
    tpu.vector_store %arg7[%c104, %c0_211], %632 {strides = array<i32>} : memref<256x128xf32, #tpu.memory_space<vmem>>, vector<1x128xf32>,
    %c105_i32 = arith.constant 105 : i32
    %634 = arith.addi %3, %c105_i32 : i32
    %635 = arith.index_cast %634 : i32 to index
    %636 = memref.load %arg1[%635] : memref<768xi32, #tpu.memory_space<smem>>
    %637 = arith.index_cast %636 : i32 to index
    %c0_212 = arith.constant 0 : index
    %638 = vector.load %arg6[%637, %c0_212] : memref<128x128xf32, #tpu.memory_space<vmem>>, vector<1x128xf32>
    %c105 = arith.constant 105 : index
    %c0_213 = arith.constant 0 : index
    %639 = vector.load %arg7[%c105, %c0_213] : memref<256x128xf32, #tpu.memory_space<vmem>>, vector<1x128xf32>
    tpu.vector_store %arg7[%c105, %c0_213], %638 {strides = array<i32>} : memref<256x128xf32, #tpu.memory_space<vmem>>, vector<1x128xf32>,
    %c106_i32 = arith.constant 106 : i32
    %640 = arith.addi %3, %c106_i32 : i32
    %641 = arith.index_cast %640 : i32 to index
    %642 = memref.load %arg1[%641] : memref<768xi32, #tpu.memory_space<smem>>
    %643 = arith.index_cast %642 : i32 to index
    %c0_214 = arith.constant 0 : index
    %644 = vector.load %arg6[%643, %c0_214] : memref<128x128xf32, #tpu.memory_space<vmem>>, vector<1x128xf32>
    %c106 = arith.constant 106 : index
    %c0_215 = arith.constant 0 : index
    %645 = vector.load %arg7[%c106, %c0_215] : memref<256x128xf32, #tpu.memory_space<vmem>>, vector<1x128xf32>
    tpu.vector_store %arg7[%c106, %c0_215], %644 {strides = array<i32>} : memref<256x128xf32, #tpu.memory_space<vmem>>, vector<1x128xf32>,
    %c107_i32 = arith.constant 107 : i32
    %646 = arith.addi %3, %c107_i32 : i32
    %647 = arith.index_cast %646 : i32 to index
    %648 = memref.load %arg1[%647] : memref<768xi32, #tpu.memory_space<smem>>
    %649 = arith.index_cast %648 : i32 to index
    %c0_216 = arith.constant 0 : index
    %650 = vector.load %arg6[%649, %c0_216] : memref<128x128xf32, #tpu.memory_space<vmem>>, vector<1x128xf32>
    %c107 = arith.constant 107 : index
    %c0_217 = arith.constant 0 : index
    %651 = vector.load %arg7[%c107, %c0_217] : memref<256x128xf32, #tpu.memory_space<vmem>>, vector<1x128xf32>
    tpu.vector_store %arg7[%c107, %c0_217], %650 {strides = array<i32>} : memref<256x128xf32, #tpu.memory_space<vmem>>, vector<1x128xf32>,
    %c108_i32 = arith.constant 108 : i32
    %652 = arith.addi %3, %c108_i32 : i32
    %653 = arith.index_cast %652 : i32 to index
    %654 = memref.load %arg1[%653] : memref<768xi32, #tpu.memory_space<smem>>
    %655 = arith.index_cast %654 : i32 to index
    %c0_218 = arith.constant 0 : index
    %656 = vector.load %arg6[%655, %c0_218] : memref<128x128xf32, #tpu.memory_space<vmem>>, vector<1x128xf32>
    %c108 = arith.constant 108 : index
    %c0_219 = arith.constant 0 : index
    %657 = vector.load %arg7[%c108, %c0_219] : memref<256x128xf32, #tpu.memory_space<vmem>>, vector<1x128xf32>
    tpu.vector_store %arg7[%c108, %c0_219], %656 {strides = array<i32>} : memref<256x128xf32, #tpu.memory_space<vmem>>, vector<1x128xf32>,
    %c109_i32 = arith.constant 109 : i32
    %658 = arith.addi %3, %c109_i32 : i32
    %659 = arith.index_cast %658 : i32 to index
    %660 = memref.load %arg1[%659] : memref<768xi32, #tpu.memory_space<smem>>
    %661 = arith.index_cast %660 : i32 to index
    %c0_220 = arith.constant 0 : index
    %662 = vector.load %arg6[%661, %c0_220] : memref<128x128xf32, #tpu.memory_space<vmem>>, vector<1x128xf32>
    %c109 = arith.constant 109 : index
    %c0_221 = arith.constant 0 : index
    %663 = vector.load %arg7[%c109, %c0_221] : memref<256x128xf32, #tpu.memory_space<vmem>>, vector<1x128xf32>
    tpu.vector_store %arg7[%c109, %c0_221], %662 {strides = array<i32>} : memref<256x128xf32, #tpu.memory_space<vmem>>, vector<1x128xf32>,
    %c110_i32 = arith.constant 110 : i32
    %664 = arith.addi %3, %c110_i32 : i32
    %665 = arith.index_cast %664 : i32 to index
    %666 = memref.load %arg1[%665] : memref<768xi32, #tpu.memory_space<smem>>
    %667 = arith.index_cast %666 : i32 to index
    %c0_222 = arith.constant 0 : index
    %668 = vector.load %arg6[%667, %c0_222] : memref<128x128xf32, #tpu.memory_space<vmem>>, vector<1x128xf32>
    %c110 = arith.constant 110 : index
    %c0_223 = arith.constant 0 : index
    %669 = vector.load %arg7[%c110, %c0_223] : memref<256x128xf32, #tpu.memory_space<vmem>>, vector<1x128xf32>
    tpu.vector_store %arg7[%c110, %c0_223], %668 {strides = array<i32>} : memref<256x128xf32, #tpu.memory_space<vmem>>, vector<1x128xf32>,
    %c111_i32 = arith.constant 111 : i32
    %670 = arith.addi %3, %c111_i32 : i32
    %671 = arith.index_cast %670 : i32 to index
    %672 = memref.load %arg1[%671] : memref<768xi32, #tpu.memory_space<smem>>
    %673 = arith.index_cast %672 : i32 to index
    %c0_224 = arith.constant 0 : index
    %674 = vector.load %arg6[%673, %c0_224] : memref<128x128xf32, #tpu.memory_space<vmem>>, vector<1x128xf32>
    %c111 = arith.constant 111 : index
    %c0_225 = arith.constant 0 : index
    %675 = vector.load %arg7[%c111, %c0_225] : memref<256x128xf32, #tpu.memory_space<vmem>>, vector<1x128xf32>
    tpu.vector_store %arg7[%c111, %c0_225], %674 {strides = array<i32>} : memref<256x128xf32, #tpu.memory_space<vmem>>, vector<1x128xf32>,
    %c112_i32 = arith.constant 112 : i32
    %676 = arith.addi %3, %c112_i32 : i32
    %677 = arith.index_cast %676 : i32 to index
    %678 = memref.load %arg1[%677] : memref<768xi32, #tpu.memory_space<smem>>
    %679 = arith.index_cast %678 : i32 to index
    %c0_226 = arith.constant 0 : index
    %680 = vector.load %arg6[%679, %c0_226] : memref<128x128xf32, #tpu.memory_space<vmem>>, vector<1x128xf32>
    %c112 = arith.constant 112 : index
    %c0_227 = arith.constant 0 : index
    %681 = vector.load %arg7[%c112, %c0_227] : memref<256x128xf32, #tpu.memory_space<vmem>>, vector<1x128xf32>
    tpu.vector_store %arg7[%c112, %c0_227], %680 {strides = array<i32>} : memref<256x128xf32, #tpu.memory_space<vmem>>, vector<1x128xf32>,
    %c113_i32 = arith.constant 113 : i32
    %682 = arith.addi %3, %c113_i32 : i32
    %683 = arith.index_cast %682 : i32 to index
    %684 = memref.load %arg1[%683] : memref<768xi32, #tpu.memory_space<smem>>
    %685 = arith.index_cast %684 : i32 to index
    %c0_228 = arith.constant 0 : index
    %686 = vector.load %arg6[%685, %c0_228] : memref<128x128xf32, #tpu.memory_space<vmem>>, vector<1x128xf32>
    %c113 = arith.constant 113 : index
    %c0_229 = arith.constant 0 : index
    %687 = vector.load %arg7[%c113, %c0_229] : memref<256x128xf32, #tpu.memory_space<vmem>>, vector<1x128xf32>
    tpu.vector_store %arg7[%c113, %c0_229], %686 {strides = array<i32>} : memref<256x128xf32, #tpu.memory_space<vmem>>, vector<1x128xf32>,
    %c114_i32 = arith.constant 114 : i32
    %688 = arith.addi %3, %c114_i32 : i32
    %689 = arith.index_cast %688 : i32 to index
    %690 = memref.load %arg1[%689] : memref<768xi32, #tpu.memory_space<smem>>
    %691 = arith.index_cast %690 : i32 to index
    %c0_230 = arith.constant 0 : index
    %692 = vector.load %arg6[%691, %c0_230] : memref<128x128xf32, #tpu.memory_space<vmem>>, vector<1x128xf32>
    %c114 = arith.constant 114 : index
    %c0_231 = arith.constant 0 : index
    %693 = vector.load %arg7[%c114, %c0_231] : memref<256x128xf32, #tpu.memory_space<vmem>>, vector<1x128xf32>
    tpu.vector_store %arg7[%c114, %c0_231], %692 {strides = array<i32>} : memref<256x128xf32, #tpu.memory_space<vmem>>, vector<1x128xf32>,
    %c115_i32 = arith.constant 115 : i32
    %694 = arith.addi %3, %c115_i32 : i32
    %695 = arith.index_cast %694 : i32 to index
    %696 = memref.load %arg1[%695] : memref<768xi32, #tpu.memory_space<smem>>
    %697 = arith.index_cast %696 : i32 to index
    %c0_232 = arith.constant 0 : index
    %698 = vector.load %arg6[%697, %c0_232] : memref<128x128xf32, #tpu.memory_space<vmem>>, vector<1x128xf32>
    %c115 = arith.constant 115 : index
    %c0_233 = arith.constant 0 : index
    %699 = vector.load %arg7[%c115, %c0_233] : memref<256x128xf32, #tpu.memory_space<vmem>>, vector<1x128xf32>
    tpu.vector_store %arg7[%c115, %c0_233], %698 {strides = array<i32>} : memref<256x128xf32, #tpu.memory_space<vmem>>, vector<1x128xf32>,
    %c116_i32 = arith.constant 116 : i32
    %700 = arith.addi %3, %c116_i32 : i32
    %701 = arith.index_cast %700 : i32 to index
    %702 = memref.load %arg1[%701] : memref<768xi32, #tpu.memory_space<smem>>
    %703 = arith.index_cast %702 : i32 to index
    %c0_234 = arith.constant 0 : index
    %704 = vector.load %arg6[%703, %c0_234] : memref<128x128xf32, #tpu.memory_space<vmem>>, vector<1x128xf32>
    %c116 = arith.constant 116 : index
    %c0_235 = arith.constant 0 : index
    %705 = vector.load %arg7[%c116, %c0_235] : memref<256x128xf32, #tpu.memory_space<vmem>>, vector<1x128xf32>
    tpu.vector_store %arg7[%c116, %c0_235], %704 {strides = array<i32>} : memref<256x128xf32, #tpu.memory_space<vmem>>, vector<1x128xf32>,
    %c117_i32 = arith.constant 117 : i32
    %706 = arith.addi %3, %c117_i32 : i32
    %707 = arith.index_cast %706 : i32 to index
    %708 = memref.load %arg1[%707] : memref<768xi32, #tpu.memory_space<smem>>
    %709 = arith.index_cast %708 : i32 to index
    %c0_236 = arith.constant 0 : index
    %710 = vector.load %arg6[%709, %c0_236] : memref<128x128xf32, #tpu.memory_space<vmem>>, vector<1x128xf32>
    %c117 = arith.constant 117 : index
    %c0_237 = arith.constant 0 : index
    %711 = vector.load %arg7[%c117, %c0_237] : memref<256x128xf32, #tpu.memory_space<vmem>>, vector<1x128xf32>
    tpu.vector_store %arg7[%c117, %c0_237], %710 {strides = array<i32>} : memref<256x128xf32, #tpu.memory_space<vmem>>, vector<1x128xf32>,
    %c118_i32 = arith.constant 118 : i32
    %712 = arith.addi %3, %c118_i32 : i32
    %713 = arith.index_cast %712 : i32 to index
    %714 = memref.load %arg1[%713] : memref<768xi32, #tpu.memory_space<smem>>
    %715 = arith.index_cast %714 : i32 to index
    %c0_238 = arith.constant 0 : index
    %716 = vector.load %arg6[%715, %c0_238] : memref<128x128xf32, #tpu.memory_space<vmem>>, vector<1x128xf32>
    %c118 = arith.constant 118 : index
    %c0_239 = arith.constant 0 : index
    %717 = vector.load %arg7[%c118, %c0_239] : memref<256x128xf32, #tpu.memory_space<vmem>>, vector<1x128xf32>
    tpu.vector_store %arg7[%c118, %c0_239], %716 {strides = array<i32>} : memref<256x128xf32, #tpu.memory_space<vmem>>, vector<1x128xf32>,
    %c119_i32 = arith.constant 119 : i32
    %718 = arith.addi %3, %c119_i32 : i32
    %719 = arith.index_cast %718 : i32 to index
    %720 = memref.load %arg1[%719] : memref<768xi32, #tpu.memory_space<smem>>
    %721 = arith.index_cast %720 : i32 to index
    %c0_240 = arith.constant 0 : index
    %722 = vector.load %arg6[%721, %c0_240] : memref<128x128xf32, #tpu.memory_space<vmem>>, vector<1x128xf32>
    %c119 = arith.constant 119 : index
    %c0_241 = arith.constant 0 : index
    %723 = vector.load %arg7[%c119, %c0_241] : memref<256x128xf32, #tpu.memory_space<vmem>>, vector<1x128xf32>
    tpu.vector_store %arg7[%c119, %c0_241], %722 {strides = array<i32>} : memref<256x128xf32, #tpu.memory_space<vmem>>, vector<1x128xf32>,
    %c120_i32 = arith.constant 120 : i32
    %724 = arith.addi %3, %c120_i32 : i32
    %725 = arith.index_cast %724 : i32 to index
    %726 = memref.load %arg1[%725] : memref<768xi32, #tpu.memory_space<smem>>
    %727 = arith.index_cast %726 : i32 to index
    %c0_242 = arith.constant 0 : index
    %728 = vector.load %arg6[%727, %c0_242] : memref<128x128xf32, #tpu.memory_space<vmem>>, vector<1x128xf32>
    %c120 = arith.constant 120 : index
    %c0_243 = arith.constant 0 : index
    %729 = vector.load %arg7[%c120, %c0_243] : memref<256x128xf32, #tpu.memory_space<vmem>>, vector<1x128xf32>
    tpu.vector_store %arg7[%c120, %c0_243], %728 {strides = array<i32>} : memref<256x128xf32, #tpu.memory_space<vmem>>, vector<1x128xf32>,
    %c121_i32 = arith.constant 121 : i32
    %730 = arith.addi %3, %c121_i32 : i32
    %731 = arith.index_cast %730 : i32 to index
    %732 = memref.load %arg1[%731] : memref<768xi32, #tpu.memory_space<smem>>
    %733 = arith.index_cast %732 : i32 to index
    %c0_244 = arith.constant 0 : index
    %734 = vector.load %arg6[%733, %c0_244] : memref<128x128xf32, #tpu.memory_space<vmem>>, vector<1x128xf32>
    %c121 = arith.constant 121 : index
    %c0_245 = arith.constant 0 : index
    %735 = vector.load %arg7[%c121, %c0_245] : memref<256x128xf32, #tpu.memory_space<vmem>>, vector<1x128xf32>
    tpu.vector_store %arg7[%c121, %c0_245], %734 {strides = array<i32>} : memref<256x128xf32, #tpu.memory_space<vmem>>, vector<1x128xf32>,
    %c122_i32 = arith.constant 122 : i32
    %736 = arith.addi %3, %c122_i32 : i32
    %737 = arith.index_cast %736 : i32 to index
    %738 = memref.load %arg1[%737] : memref<768xi32, #tpu.memory_space<smem>>
    %739 = arith.index_cast %738 : i32 to index
    %c0_246 = arith.constant 0 : index
    %740 = vector.load %arg6[%739, %c0_246] : memref<128x128xf32, #tpu.memory_space<vmem>>, vector<1x128xf32>
    %c122 = arith.constant 122 : index
    %c0_247 = arith.constant 0 : index
    %741 = vector.load %arg7[%c122, %c0_247] : memref<256x128xf32, #tpu.memory_space<vmem>>, vector<1x128xf32>
    tpu.vector_store %arg7[%c122, %c0_247], %740 {strides = array<i32>} : memref<256x128xf32, #tpu.memory_space<vmem>>, vector<1x128xf32>,
    %c123_i32 = arith.constant 123 : i32
    %742 = arith.addi %3, %c123_i32 : i32
    %743 = arith.index_cast %742 : i32 to index
    %744 = memref.load %arg1[%743] : memref<768xi32, #tpu.memory_space<smem>>
    %745 = arith.index_cast %744 : i32 to index
    %c0_248 = arith.constant 0 : index
    %746 = vector.load %arg6[%745, %c0_248] : memref<128x128xf32, #tpu.memory_space<vmem>>, vector<1x128xf32>
    %c123 = arith.constant 123 : index
    %c0_249 = arith.constant 0 : index
    %747 = vector.load %arg7[%c123, %c0_249] : memref<256x128xf32, #tpu.memory_space<vmem>>, vector<1x128xf32>
    tpu.vector_store %arg7[%c123, %c0_249], %746 {strides = array<i32>} : memref<256x128xf32, #tpu.memory_space<vmem>>, vector<1x128xf32>,
    %c124_i32 = arith.constant 124 : i32
    %748 = arith.addi %3, %c124_i32 : i32
    %749 = arith.index_cast %748 : i32 to index
    %750 = memref.load %arg1[%749] : memref<768xi32, #tpu.memory_space<smem>>
    %751 = arith.index_cast %750 : i32 to index
    %c0_250 = arith.constant 0 : index
    %752 = vector.load %arg6[%751, %c0_250] : memref<128x128xf32, #tpu.memory_space<vmem>>, vector<1x128xf32>
    %c124 = arith.constant 124 : index
    %c0_251 = arith.constant 0 : index
    %753 = vector.load %arg7[%c124, %c0_251] : memref<256x128xf32, #tpu.memory_space<vmem>>, vector<1x128xf32>
    tpu.vector_store %arg7[%c124, %c0_251], %752 {strides = array<i32>} : memref<256x128xf32, #tpu.memory_space<vmem>>, vector<1x128xf32>,
    %c125_i32 = arith.constant 125 : i32
    %754 = arith.addi %3, %c125_i32 : i32
    %755 = arith.index_cast %754 : i32 to index
    %756 = memref.load %arg1[%755] : memref<768xi32, #tpu.memory_space<smem>>
    %757 = arith.index_cast %756 : i32 to index
    %c0_252 = arith.constant 0 : index
    %758 = vector.load %arg6[%757, %c0_252] : memref<128x128xf32, #tpu.memory_space<vmem>>, vector<1x128xf32>
    %c125 = arith.constant 125 : index
    %c0_253 = arith.constant 0 : index
    %759 = vector.load %arg7[%c125, %c0_253] : memref<256x128xf32, #tpu.memory_space<vmem>>, vector<1x128xf32>
    tpu.vector_store %arg7[%c125, %c0_253], %758 {strides = array<i32>} : memref<256x128xf32, #tpu.memory_space<vmem>>, vector<1x128xf32>,
    %c126_i32 = arith.constant 126 : i32
    %760 = arith.addi %3, %c126_i32 : i32
    %761 = arith.index_cast %760 : i32 to index
    %762 = memref.load %arg1[%761] : memref<768xi32, #tpu.memory_space<smem>>
    %763 = arith.index_cast %762 : i32 to index
    %c0_254 = arith.constant 0 : index
    %764 = vector.load %arg6[%763, %c0_254] : memref<128x128xf32, #tpu.memory_space<vmem>>, vector<1x128xf32>
    %c126 = arith.constant 126 : index
    %c0_255 = arith.constant 0 : index
    %765 = vector.load %arg7[%c126, %c0_255] : memref<256x128xf32, #tpu.memory_space<vmem>>, vector<1x128xf32>
    tpu.vector_store %arg7[%c126, %c0_255], %764 {strides = array<i32>} : memref<256x128xf32, #tpu.memory_space<vmem>>, vector<1x128xf32>,
    %c127_i32 = arith.constant 127 : i32
    %766 = arith.addi %3, %c127_i32 : i32
    %767 = arith.index_cast %766 : i32 to index
    %768 = memref.load %arg1[%767] : memref<768xi32, #tpu.memory_space<smem>>
    %769 = arith.index_cast %768 : i32 to index
    %c0_256 = arith.constant 0 : index
    %770 = vector.load %arg6[%769, %c0_256] : memref<128x128xf32, #tpu.memory_space<vmem>>, vector<1x128xf32>
    %c127 = arith.constant 127 : index
    %c0_257 = arith.constant 0 : index
    %771 = vector.load %arg7[%c127, %c0_257] : memref<256x128xf32, #tpu.memory_space<vmem>>, vector<1x128xf32>
    tpu.vector_store %arg7[%c127, %c0_257], %770 {strides = array<i32>} : memref<256x128xf32, #tpu.memory_space<vmem>>, vector<1x128xf32>,
    %c128_i32 = arith.constant 128 : i32
    %772 = arith.addi %3, %c128_i32 : i32
    %773 = arith.index_cast %772 : i32 to index
    %774 = memref.load %arg1[%773] : memref<768xi32, #tpu.memory_space<smem>>
    %775 = arith.index_cast %774 : i32 to index
    %c0_258 = arith.constant 0 : index
    %776 = vector.load %arg6[%775, %c0_258] : memref<128x128xf32, #tpu.memory_space<vmem>>, vector<1x128xf32>
    %c128 = arith.constant 128 : index
    %c0_259 = arith.constant 0 : index
    %777 = vector.load %arg7[%c128, %c0_259] : memref<256x128xf32, #tpu.memory_space<vmem>>, vector<1x128xf32>
    tpu.vector_store %arg7[%c128, %c0_259], %776 {strides = array<i32>} : memref<256x128xf32, #tpu.memory_space<vmem>>, vector<1x128xf32>,
    %c129_i32 = arith.constant 129 : i32
    %778 = arith.addi %3, %c129_i32 : i32
    %779 = arith.index_cast %778 : i32 to index
    %780 = memref.load %arg1[%779] : memref<768xi32, #tpu.memory_space<smem>>
    %781 = arith.index_cast %780 : i32 to index
    %c0_260 = arith.constant 0 : index
    %782 = vector.load %arg6[%781, %c0_260] : memref<128x128xf32, #tpu.memory_space<vmem>>, vector<1x128xf32>
    %c129 = arith.constant 129 : index
    %c0_261 = arith.constant 0 : index
    %783 = vector.load %arg7[%c129, %c0_261] : memref<256x128xf32, #tpu.memory_space<vmem>>, vector<1x128xf32>
    tpu.vector_store %arg7[%c129, %c0_261], %782 {strides = array<i32>} : memref<256x128xf32, #tpu.memory_space<vmem>>, vector<1x128xf32>,
    %c130_i32 = arith.constant 130 : i32
    %784 = arith.addi %3, %c130_i32 : i32
    %785 = arith.index_cast %784 : i32 to index
    %786 = memref.load %arg1[%785] : memref<768xi32, #tpu.memory_space<smem>>
    %787 = arith.index_cast %786 : i32 to index
    %c0_262 = arith.constant 0 : index
    %788 = vector.load %arg6[%787, %c0_262] : memref<128x128xf32, #tpu.memory_space<vmem>>, vector<1x128xf32>
    %c130 = arith.constant 130 : index
    %c0_263 = arith.constant 0 : index
    %789 = vector.load %arg7[%c130, %c0_263] : memref<256x128xf32, #tpu.memory_space<vmem>>, vector<1x128xf32>
    tpu.vector_store %arg7[%c130, %c0_263], %788 {strides = array<i32>} : memref<256x128xf32, #tpu.memory_space<vmem>>, vector<1x128xf32>,
    %c131_i32 = arith.constant 131 : i32
    %790 = arith.addi %3, %c131_i32 : i32
    %791 = arith.index_cast %790 : i32 to index
    %792 = memref.load %arg1[%791] : memref<768xi32, #tpu.memory_space<smem>>
    %793 = arith.index_cast %792 : i32 to index
    %c0_264 = arith.constant 0 : index
    %794 = vector.load %arg6[%793, %c0_264] : memref<128x128xf32, #tpu.memory_space<vmem>>, vector<1x128xf32>
    %c131 = arith.constant 131 : index
    %c0_265 = arith.constant 0 : index
    %795 = vector.load %arg7[%c131, %c0_265] : memref<256x128xf32, #tpu.memory_space<vmem>>, vector<1x128xf32>
    tpu.vector_store %arg7[%c131, %c0_265], %794 {strides = array<i32>} : memref<256x128xf32, #tpu.memory_space<vmem>>, vector<1x128xf32>,
    %c132_i32 = arith.constant 132 : i32
    %796 = arith.addi %3, %c132_i32 : i32
    %797 = arith.index_cast %796 : i32 to index
    %798 = memref.load %arg1[%797] : memref<768xi32, #tpu.memory_space<smem>>
    %799 = arith.index_cast %798 : i32 to index
    %c0_266 = arith.constant 0 : index
    %800 = vector.load %arg6[%799, %c0_266] : memref<128x128xf32, #tpu.memory_space<vmem>>, vector<1x128xf32>
    %c132 = arith.constant 132 : index
    %c0_267 = arith.constant 0 : index
    %801 = vector.load %arg7[%c132, %c0_267] : memref<256x128xf32, #tpu.memory_space<vmem>>, vector<1x128xf32>
    tpu.vector_store %arg7[%c132, %c0_267], %800 {strides = array<i32>} : memref<256x128xf32, #tpu.memory_space<vmem>>, vector<1x128xf32>,
    %c133_i32 = arith.constant 133 : i32
    %802 = arith.addi %3, %c133_i32 : i32
    %803 = arith.index_cast %802 : i32 to index
    %804 = memref.load %arg1[%803] : memref<768xi32, #tpu.memory_space<smem>>
    %805 = arith.index_cast %804 : i32 to index
    %c0_268 = arith.constant 0 : index
    %806 = vector.load %arg6[%805, %c0_268] : memref<128x128xf32, #tpu.memory_space<vmem>>, vector<1x128xf32>
    %c133 = arith.constant 133 : index
    %c0_269 = arith.constant 0 : index
    %807 = vector.load %arg7[%c133, %c0_269] : memref<256x128xf32, #tpu.memory_space<vmem>>, vector<1x128xf32>
    tpu.vector_store %arg7[%c133, %c0_269], %806 {strides = array<i32>} : memref<256x128xf32, #tpu.memory_space<vmem>>, vector<1x128xf32>,
    %c134_i32 = arith.constant 134 : i32
    %808 = arith.addi %3, %c134_i32 : i32
    %809 = arith.index_cast %808 : i32 to index
    %810 = memref.load %arg1[%809] : memref<768xi32, #tpu.memory_space<smem>>
    %811 = arith.index_cast %810 : i32 to index
    %c0_270 = arith.constant 0 : index
    %812 = vector.load %arg6[%811, %c0_270] : memref<128x128xf32, #tpu.memory_space<vmem>>, vector<1x128xf32>
    %c134 = arith.constant 134 : index
    %c0_271 = arith.constant 0 : index
    %813 = vector.load %arg7[%c134, %c0_271] : memref<256x128xf32, #tpu.memory_space<vmem>>, vector<1x128xf32>
    tpu.vector_store %arg7[%c134, %c0_271], %812 {strides = array<i32>} : memref<256x128xf32, #tpu.memory_space<vmem>>, vector<1x128xf32>,
    %c135_i32 = arith.constant 135 : i32
    %814 = arith.addi %3, %c135_i32 : i32
    %815 = arith.index_cast %814 : i32 to index
    %816 = memref.load %arg1[%815] : memref<768xi32, #tpu.memory_space<smem>>
    %817 = arith.index_cast %816 : i32 to index
    %c0_272 = arith.constant 0 : index
    %818 = vector.load %arg6[%817, %c0_272] : memref<128x128xf32, #tpu.memory_space<vmem>>, vector<1x128xf32>
    %c135 = arith.constant 135 : index
    %c0_273 = arith.constant 0 : index
    %819 = vector.load %arg7[%c135, %c0_273] : memref<256x128xf32, #tpu.memory_space<vmem>>, vector<1x128xf32>
    tpu.vector_store %arg7[%c135, %c0_273], %818 {strides = array<i32>} : memref<256x128xf32, #tpu.memory_space<vmem>>, vector<1x128xf32>,
    %c136_i32 = arith.constant 136 : i32
    %820 = arith.addi %3, %c136_i32 : i32
    %821 = arith.index_cast %820 : i32 to index
    %822 = memref.load %arg1[%821] : memref<768xi32, #tpu.memory_space<smem>>
    %823 = arith.index_cast %822 : i32 to index
    %c0_274 = arith.constant 0 : index
    %824 = vector.load %arg6[%823, %c0_274] : memref<128x128xf32, #tpu.memory_space<vmem>>, vector<1x128xf32>
    %c136 = arith.constant 136 : index
    %c0_275 = arith.constant 0 : index
    %825 = vector.load %arg7[%c136, %c0_275] : memref<256x128xf32, #tpu.memory_space<vmem>>, vector<1x128xf32>
    tpu.vector_store %arg7[%c136, %c0_275], %824 {strides = array<i32>} : memref<256x128xf32, #tpu.memory_space<vmem>>, vector<1x128xf32>,
    %c137_i32 = arith.constant 137 : i32
    %826 = arith.addi %3, %c137_i32 : i32
    %827 = arith.index_cast %826 : i32 to index
    %828 = memref.load %arg1[%827] : memref<768xi32, #tpu.memory_space<smem>>
    %829 = arith.index_cast %828 : i32 to index
    %c0_276 = arith.constant 0 : index
    %830 = vector.load %arg6[%829, %c0_276] : memref<128x128xf32, #tpu.memory_space<vmem>>, vector<1x128xf32>
    %c137 = arith.constant 137 : index
    %c0_277 = arith.constant 0 : index
    %831 = vector.load %arg7[%c137, %c0_277] : memref<256x128xf32, #tpu.memory_space<vmem>>, vector<1x128xf32>
    tpu.vector_store %arg7[%c137, %c0_277], %830 {strides = array<i32>} : memref<256x128xf32, #tpu.memory_space<vmem>>, vector<1x128xf32>,
    %c138_i32 = arith.constant 138 : i32
    %832 = arith.addi %3, %c138_i32 : i32
    %833 = arith.index_cast %832 : i32 to index
    %834 = memref.load %arg1[%833] : memref<768xi32, #tpu.memory_space<smem>>
    %835 = arith.index_cast %834 : i32 to index
    %c0_278 = arith.constant 0 : index
    %836 = vector.load %arg6[%835, %c0_278] : memref<128x128xf32, #tpu.memory_space<vmem>>, vector<1x128xf32>
    %c138 = arith.constant 138 : index
    %c0_279 = arith.constant 0 : index
    %837 = vector.load %arg7[%c138, %c0_279] : memref<256x128xf32, #tpu.memory_space<vmem>>, vector<1x128xf32>
    tpu.vector_store %arg7[%c138, %c0_279], %836 {strides = array<i32>} : memref<256x128xf32, #tpu.memory_space<vmem>>, vector<1x128xf32>,
    %c139_i32 = arith.constant 139 : i32
    %838 = arith.addi %3, %c139_i32 : i32
    %839 = arith.index_cast %838 : i32 to index
    %840 = memref.load %arg1[%839] : memref<768xi32, #tpu.memory_space<smem>>
    %841 = arith.index_cast %840 : i32 to index
    %c0_280 = arith.constant 0 : index
    %842 = vector.load %arg6[%841, %c0_280] : memref<128x128xf32, #tpu.memory_space<vmem>>, vector<1x128xf32>
    %c139 = arith.constant 139 : index
    %c0_281 = arith.constant 0 : index
    %843 = vector.load %arg7[%c139, %c0_281] : memref<256x128xf32, #tpu.memory_space<vmem>>, vector<1x128xf32>
    tpu.vector_store %arg7[%c139, %c0_281], %842 {strides = array<i32>} : memref<256x128xf32, #tpu.memory_space<vmem>>, vector<1x128xf32>,
    %c140_i32 = arith.constant 140 : i32
    %844 = arith.addi %3, %c140_i32 : i32
    %845 = arith.index_cast %844 : i32 to index
    %846 = memref.load %arg1[%845] : memref<768xi32, #tpu.memory_space<smem>>
    %847 = arith.index_cast %846 : i32 to index
    %c0_282 = arith.constant 0 : index
    %848 = vector.load %arg6[%847, %c0_282] : memref<128x128xf32, #tpu.memory_space<vmem>>, vector<1x128xf32>
    %c140 = arith.constant 140 : index
    %c0_283 = arith.constant 0 : index
    %849 = vector.load %arg7[%c140, %c0_283] : memref<256x128xf32, #tpu.memory_space<vmem>>, vector<1x128xf32>
    tpu.vector_store %arg7[%c140, %c0_283], %848 {strides = array<i32>} : memref<256x128xf32, #tpu.memory_space<vmem>>, vector<1x128xf32>,
    %c141_i32 = arith.constant 141 : i32
    %850 = arith.addi %3, %c141_i32 : i32
    %851 = arith.index_cast %850 : i32 to index
    %852 = memref.load %arg1[%851] : memref<768xi32, #tpu.memory_space<smem>>
    %853 = arith.index_cast %852 : i32 to index
    %c0_284 = arith.constant 0 : index
    %854 = vector.load %arg6[%853, %c0_284] : memref<128x128xf32, #tpu.memory_space<vmem>>, vector<1x128xf32>
    %c141 = arith.constant 141 : index
    %c0_285 = arith.constant 0 : index
    %855 = vector.load %arg7[%c141, %c0_285] : memref<256x128xf32, #tpu.memory_space<vmem>>, vector<1x128xf32>
    tpu.vector_store %arg7[%c141, %c0_285], %854 {strides = array<i32>} : memref<256x128xf32, #tpu.memory_space<vmem>>, vector<1x128xf32>,
    %c142_i32 = arith.constant 142 : i32
    %856 = arith.addi %3, %c142_i32 : i32
    %857 = arith.index_cast %856 : i32 to index
    %858 = memref.load %arg1[%857] : memref<768xi32, #tpu.memory_space<smem>>
    %859 = arith.index_cast %858 : i32 to index
    %c0_286 = arith.constant 0 : index
    %860 = vector.load %arg6[%859, %c0_286] : memref<128x128xf32, #tpu.memory_space<vmem>>, vector<1x128xf32>
    %c142 = arith.constant 142 : index
    %c0_287 = arith.constant 0 : index
    %861 = vector.load %arg7[%c142, %c0_287] : memref<256x128xf32, #tpu.memory_space<vmem>>, vector<1x128xf32>
    tpu.vector_store %arg7[%c142, %c0_287], %860 {strides = array<i32>} : memref<256x128xf32, #tpu.memory_space<vmem>>, vector<1x128xf32>,
    %c143_i32 = arith.constant 143 : i32
    %862 = arith.addi %3, %c143_i32 : i32
    %863 = arith.index_cast %862 : i32 to index
    %864 = memref.load %arg1[%863] : memref<768xi32, #tpu.memory_space<smem>>
    %865 = arith.index_cast %864 : i32 to index
    %c0_288 = arith.constant 0 : index
    %866 = vector.load %arg6[%865, %c0_288] : memref<128x128xf32, #tpu.memory_space<vmem>>, vector<1x128xf32>
    %c143 = arith.constant 143 : index
    %c0_289 = arith.constant 0 : index
    %867 = vector.load %arg7[%c143, %c0_289] : memref<256x128xf32, #tpu.memory_space<vmem>>, vector<1x128xf32>
    tpu.vector_store %arg7[%c143, %c0_289], %866 {strides = array<i32>} : memref<256x128xf32, #tpu.memory_space<vmem>>, vector<1x128xf32>,
    %c144_i32 = arith.constant 144 : i32
    %868 = arith.addi %3, %c144_i32 : i32
    %869 = arith.index_cast %868 : i32 to index
    %870 = memref.load %arg1[%869] : memref<768xi32, #tpu.memory_space<smem>>
    %871 = arith.index_cast %870 : i32 to index
    %c0_290 = arith.constant 0 : index
    %872 = vector.load %arg6[%871, %c0_290] : memref<128x128xf32, #tpu.memory_space<vmem>>, vector<1x128xf32>
    %c144 = arith.constant 144 : index
    %c0_291 = arith.constant 0 : index
    %873 = vector.load %arg7[%c144, %c0_291] : memref<256x128xf32, #tpu.memory_space<vmem>>, vector<1x128xf32>
    tpu.vector_store %arg7[%c144, %c0_291], %872 {strides = array<i32>} : memref<256x128xf32, #tpu.memory_space<vmem>>, vector<1x128xf32>,
    %c145_i32 = arith.constant 145 : i32
    %874 = arith.addi %3, %c145_i32 : i32
    %875 = arith.index_cast %874 : i32 to index
    %876 = memref.load %arg1[%875] : memref<768xi32, #tpu.memory_space<smem>>
    %877 = arith.index_cast %876 : i32 to index
    %c0_292 = arith.constant 0 : index
    %878 = vector.load %arg6[%877, %c0_292] : memref<128x128xf32, #tpu.memory_space<vmem>>, vector<1x128xf32>
    %c145 = arith.constant 145 : index
    %c0_293 = arith.constant 0 : index
    %879 = vector.load %arg7[%c145, %c0_293] : memref<256x128xf32, #tpu.memory_space<vmem>>, vector<1x128xf32>
    tpu.vector_store %arg7[%c145, %c0_293], %878 {strides = array<i32>} : memref<256x128xf32, #tpu.memory_space<vmem>>, vector<1x128xf32>,
    %c146_i32 = arith.constant 146 : i32
    %880 = arith.addi %3, %c146_i32 : i32
    %881 = arith.index_cast %880 : i32 to index
    %882 = memref.load %arg1[%881] : memref<768xi32, #tpu.memory_space<smem>>
    %883 = arith.index_cast %882 : i32 to index
    %c0_294 = arith.constant 0 : index
    %884 = vector.load %arg6[%883, %c0_294] : memref<128x128xf32, #tpu.memory_space<vmem>>, vector<1x128xf32>
    %c146 = arith.constant 146 : index
    %c0_295 = arith.constant 0 : index
    %885 = vector.load %arg7[%c146, %c0_295] : memref<256x128xf32, #tpu.memory_space<vmem>>, vector<1x128xf32>
    tpu.vector_store %arg7[%c146, %c0_295], %884 {strides = array<i32>} : memref<256x128xf32, #tpu.memory_space<vmem>>, vector<1x128xf32>,
    %c147_i32 = arith.constant 147 : i32
    %886 = arith.addi %3, %c147_i32 : i32
    %887 = arith.index_cast %886 : i32 to index
    %888 = memref.load %arg1[%887] : memref<768xi32, #tpu.memory_space<smem>>
    %889 = arith.index_cast %888 : i32 to index
    %c0_296 = arith.constant 0 : index
    %890 = vector.load %arg6[%889, %c0_296] : memref<128x128xf32, #tpu.memory_space<vmem>>, vector<1x128xf32>
    %c147 = arith.constant 147 : index
    %c0_297 = arith.constant 0 : index
    %891 = vector.load %arg7[%c147, %c0_297] : memref<256x128xf32, #tpu.memory_space<vmem>>, vector<1x128xf32>
    tpu.vector_store %arg7[%c147, %c0_297], %890 {strides = array<i32>} : memref<256x128xf32, #tpu.memory_space<vmem>>, vector<1x128xf32>,
    %c148_i32 = arith.constant 148 : i32
    %892 = arith.addi %3, %c148_i32 : i32
    %893 = arith.index_cast %892 : i32 to index
    %894 = memref.load %arg1[%893] : memref<768xi32, #tpu.memory_space<smem>>
    %895 = arith.index_cast %894 : i32 to index
    %c0_298 = arith.constant 0 : index
    %896 = vector.load %arg6[%895, %c0_298] : memref<128x128xf32, #tpu.memory_space<vmem>>, vector<1x128xf32>
    %c148 = arith.constant 148 : index
    %c0_299 = arith.constant 0 : index
    %897 = vector.load %arg7[%c148, %c0_299] : memref<256x128xf32, #tpu.memory_space<vmem>>, vector<1x128xf32>
    tpu.vector_store %arg7[%c148, %c0_299], %896 {strides = array<i32>} : memref<256x128xf32, #tpu.memory_space<vmem>>, vector<1x128xf32>,
    %c149_i32 = arith.constant 149 : i32
    %898 = arith.addi %3, %c149_i32 : i32
    %899 = arith.index_cast %898 : i32 to index
    %900 = memref.load %arg1[%899] : memref<768xi32, #tpu.memory_space<smem>>
    %901 = arith.index_cast %900 : i32 to index
    %c0_300 = arith.constant 0 : index
    %902 = vector.load %arg6[%901, %c0_300] : memref<128x128xf32, #tpu.memory_space<vmem>>, vector<1x128xf32>
    %c149 = arith.constant 149 : index
    %c0_301 = arith.constant 0 : index
    %903 = vector.load %arg7[%c149, %c0_301] : memref<256x128xf32, #tpu.memory_space<vmem>>, vector<1x128xf32>
    tpu.vector_store %arg7[%c149, %c0_301], %902 {strides = array<i32>} : memref<256x128xf32, #tpu.memory_space<vmem>>, vector<1x128xf32>,
    %c150_i32 = arith.constant 150 : i32
    %904 = arith.addi %3, %c150_i32 : i32
    %905 = arith.index_cast %904 : i32 to index
    %906 = memref.load %arg1[%905] : memref<768xi32, #tpu.memory_space<smem>>
    %907 = arith.index_cast %906 : i32 to index
    %c0_302 = arith.constant 0 : index
    %908 = vector.load %arg6[%907, %c0_302] : memref<128x128xf32, #tpu.memory_space<vmem>>, vector<1x128xf32>
    %c150 = arith.constant 150 : index
    %c0_303 = arith.constant 0 : index
    %909 = vector.load %arg7[%c150, %c0_303] : memref<256x128xf32, #tpu.memory_space<vmem>>, vector<1x128xf32>
    tpu.vector_store %arg7[%c150, %c0_303], %908 {strides = array<i32>} : memref<256x128xf32, #tpu.memory_space<vmem>>, vector<1x128xf32>,
    %c151_i32 = arith.constant 151 : i32
    %910 = arith.addi %3, %c151_i32 : i32
    %911 = arith.index_cast %910 : i32 to index
    %912 = memref.load %arg1[%911] : memref<768xi32, #tpu.memory_space<smem>>
    %913 = arith.index_cast %912 : i32 to index
    %c0_304 = arith.constant 0 : index
    %914 = vector.load %arg6[%913, %c0_304] : memref<128x128xf32, #tpu.memory_space<vmem>>, vector<1x128xf32>
    %c151 = arith.constant 151 : index
    %c0_305 = arith.constant 0 : index
    %915 = vector.load %arg7[%c151, %c0_305] : memref<256x128xf32, #tpu.memory_space<vmem>>, vector<1x128xf32>
    tpu.vector_store %arg7[%c151, %c0_305], %914 {strides = array<i32>} : memref<256x128xf32, #tpu.memory_space<vmem>>, vector<1x128xf32>,
    %c152_i32 = arith.constant 152 : i32
    %916 = arith.addi %3, %c152_i32 : i32
    %917 = arith.index_cast %916 : i32 to index
    %918 = memref.load %arg1[%917] : memref<768xi32, #tpu.memory_space<smem>>
    %919 = arith.index_cast %918 : i32 to index
    %c0_306 = arith.constant 0 : index
    %920 = vector.load %arg6[%919, %c0_306] : memref<128x128xf32, #tpu.memory_space<vmem>>, vector<1x128xf32>
    %c152 = arith.constant 152 : index
    %c0_307 = arith.constant 0 : index
    %921 = vector.load %arg7[%c152, %c0_307] : memref<256x128xf32, #tpu.memory_space<vmem>>, vector<1x128xf32>
    tpu.vector_store %arg7[%c152, %c0_307], %920 {strides = array<i32>} : memref<256x128xf32, #tpu.memory_space<vmem>>, vector<1x128xf32>,
    %c153_i32 = arith.constant 153 : i32
    %922 = arith.addi %3, %c153_i32 : i32
    %923 = arith.index_cast %922 : i32 to index
    %924 = memref.load %arg1[%923] : memref<768xi32, #tpu.memory_space<smem>>
    %925 = arith.index_cast %924 : i32 to index
    %c0_308 = arith.constant 0 : index
    %926 = vector.load %arg6[%925, %c0_308] : memref<128x128xf32, #tpu.memory_space<vmem>>, vector<1x128xf32>
    %c153 = arith.constant 153 : index
    %c0_309 = arith.constant 0 : index
    %927 = vector.load %arg7[%c153, %c0_309] : memref<256x128xf32, #tpu.memory_space<vmem>>, vector<1x128xf32>
    tpu.vector_store %arg7[%c153, %c0_309], %926 {strides = array<i32>} : memref<256x128xf32, #tpu.memory_space<vmem>>, vector<1x128xf32>,
    %c154_i32 = arith.constant 154 : i32
    %928 = arith.addi %3, %c154_i32 : i32
    %929 = arith.index_cast %928 : i32 to index
    %930 = memref.load %arg1[%929] : memref<768xi32, #tpu.memory_space<smem>>
    %931 = arith.index_cast %930 : i32 to index
    %c0_310 = arith.constant 0 : index
    %932 = vector.load %arg6[%931, %c0_310] : memref<128x128xf32, #tpu.memory_space<vmem>>, vector<1x128xf32>
    %c154 = arith.constant 154 : index
    %c0_311 = arith.constant 0 : index
    %933 = vector.load %arg7[%c154, %c0_311] : memref<256x128xf32, #tpu.memory_space<vmem>>, vector<1x128xf32>
    tpu.vector_store %arg7[%c154, %c0_311], %932 {strides = array<i32>} : memref<256x128xf32, #tpu.memory_space<vmem>>, vector<1x128xf32>,
    %c155_i32 = arith.constant 155 : i32
    %934 = arith.addi %3, %c155_i32 : i32
    %935 = arith.index_cast %934 : i32 to index
    %936 = memref.load %arg1[%935] : memref<768xi32, #tpu.memory_space<smem>>
    %937 = arith.index_cast %936 : i32 to index
    %c0_312 = arith.constant 0 : index
    %938 = vector.load %arg6[%937, %c0_312] : memref<128x128xf32, #tpu.memory_space<vmem>>, vector<1x128xf32>
    %c155 = arith.constant 155 : index
    %c0_313 = arith.constant 0 : index
    %939 = vector.load %arg7[%c155, %c0_313] : memref<256x128xf32, #tpu.memory_space<vmem>>, vector<1x128xf32>
    tpu.vector_store %arg7[%c155, %c0_313], %938 {strides = array<i32>} : memref<256x128xf32, #tpu.memory_space<vmem>>, vector<1x128xf32>,
    %c156_i32 = arith.constant 156 : i32
    %940 = arith.addi %3, %c156_i32 : i32
    %941 = arith.index_cast %940 : i32 to index
    %942 = memref.load %arg1[%941] : memref<768xi32, #tpu.memory_space<smem>>
    %943 = arith.index_cast %942 : i32 to index
    %c0_314 = arith.constant 0 : index
    %944 = vector.load %arg6[%943, %c0_314] : memref<128x128xf32, #tpu.memory_space<vmem>>, vector<1x128xf32>
    %c156 = arith.constant 156 : index
    %c0_315 = arith.constant 0 : index
    %945 = vector.load %arg7[%c156, %c0_315] : memref<256x128xf32, #tpu.memory_space<vmem>>, vector<1x128xf32>
    tpu.vector_store %arg7[%c156, %c0_315], %944 {strides = array<i32>} : memref<256x128xf32, #tpu.memory_space<vmem>>, vector<1x128xf32>,
    %c157_i32 = arith.constant 157 : i32
    %946 = arith.addi %3, %c157_i32 : i32
    %947 = arith.index_cast %946 : i32 to index
    %948 = memref.load %arg1[%947] : memref<768xi32, #tpu.memory_space<smem>>
    %949 = arith.index_cast %948 : i32 to index
    %c0_316 = arith.constant 0 : index
    %950 = vector.load %arg6[%949, %c0_316] : memref<128x128xf32, #tpu.memory_space<vmem>>, vector<1x128xf32>
    %c157 = arith.constant 157 : index
    %c0_317 = arith.constant 0 : index
    %951 = vector.load %arg7[%c157, %c0_317] : memref<256x128xf32, #tpu.memory_space<vmem>>, vector<1x128xf32>
    tpu.vector_store %arg7[%c157, %c0_317], %950 {strides = array<i32>} : memref<256x128xf32, #tpu.memory_space<vmem>>, vector<1x128xf32>,
    %c158_i32 = arith.constant 158 : i32
    %952 = arith.addi %3, %c158_i32 : i32
    %953 = arith.index_cast %952 : i32 to index
    %954 = memref.load %arg1[%953] : memref<768xi32, #tpu.memory_space<smem>>
    %955 = arith.index_cast %954 : i32 to index
    %c0_318 = arith.constant 0 : index
    %956 = vector.load %arg6[%955, %c0_318] : memref<128x128xf32, #tpu.memory_space<vmem>>, vector<1x128xf32>
    %c158 = arith.constant 158 : index
    %c0_319 = arith.constant 0 : index
    %957 = vector.load %arg7[%c158, %c0_319] : memref<256x128xf32, #tpu.memory_space<vmem>>, vector<1x128xf32>
    tpu.vector_store %arg7[%c158, %c0_319], %956 {strides = array<i32>} : memref<256x128xf32, #tpu.memory_space<vmem>>, vector<1x128xf32>,
    %c159_i32 = arith.constant 159 : i32
    %958 = arith.addi %3, %c159_i32 : i32
    %959 = arith.index_cast %958 : i32 to index
    %960 = memref.load %arg1[%959] : memref<768xi32, #tpu.memory_space<smem>>
    %961 = arith.index_cast %960 : i32 to index
    %c0_320 = arith.constant 0 : index
    %962 = vector.load %arg6[%961, %c0_320] : memref<128x128xf32, #tpu.memory_space<vmem>>, vector<1x128xf32>
    %c159 = arith.constant 159 : index
    %c0_321 = arith.constant 0 : index
    %963 = vector.load %arg7[%c159, %c0_321] : memref<256x128xf32, #tpu.memory_space<vmem>>, vector<1x128xf32>
    tpu.vector_store %arg7[%c159, %c0_321], %962 {strides = array<i32>} : memref<256x128xf32, #tpu.memory_space<vmem>>, vector<1x128xf32>,
    %c160_i32 = arith.constant 160 : i32
    %964 = arith.addi %3, %c160_i32 : i32
    %965 = arith.index_cast %964 : i32 to index
    %966 = memref.load %arg1[%965] : memref<768xi32, #tpu.memory_space<smem>>
    %967 = arith.index_cast %966 : i32 to index
    %c0_322 = arith.constant 0 : index
    %968 = vector.load %arg6[%967, %c0_322] : memref<128x128xf32, #tpu.memory_space<vmem>>, vector<1x128xf32>
    %c160 = arith.constant 160 : index
    %c0_323 = arith.constant 0 : index
    %969 = vector.load %arg7[%c160, %c0_323] : memref<256x128xf32, #tpu.memory_space<vmem>>, vector<1x128xf32>
    tpu.vector_store %arg7[%c160, %c0_323], %968 {strides = array<i32>} : memref<256x128xf32, #tpu.memory_space<vmem>>, vector<1x128xf32>,
    %c161_i32 = arith.constant 161 : i32
    %970 = arith.addi %3, %c161_i32 : i32
    %971 = arith.index_cast %970 : i32 to index
    %972 = memref.load %arg1[%971] : memref<768xi32, #tpu.memory_space<smem>>
    %973 = arith.index_cast %972 : i32 to index
    %c0_324 = arith.constant 0 : index
    %974 = vector.load %arg6[%973, %c0_324] : memref<128x128xf32, #tpu.memory_space<vmem>>, vector<1x128xf32>
    %c161 = arith.constant 161 : index
    %c0_325 = arith.constant 0 : index
    %975 = vector.load %arg7[%c161, %c0_325] : memref<256x128xf32, #tpu.memory_space<vmem>>, vector<1x128xf32>
    tpu.vector_store %arg7[%c161, %c0_325], %974 {strides = array<i32>} : memref<256x128xf32, #tpu.memory_space<vmem>>, vector<1x128xf32>,
    %c162_i32 = arith.constant 162 : i32
    %976 = arith.addi %3, %c162_i32 : i32
    %977 = arith.index_cast %976 : i32 to index
    %978 = memref.load %arg1[%977] : memref<768xi32, #tpu.memory_space<smem>>
    %979 = arith.index_cast %978 : i32 to index
    %c0_326 = arith.constant 0 : index
    %980 = vector.load %arg6[%979, %c0_326] : memref<128x128xf32, #tpu.memory_space<vmem>>, vector<1x128xf32>
    %c162 = arith.constant 162 : index
    %c0_327 = arith.constant 0 : index
    %981 = vector.load %arg7[%c162, %c0_327] : memref<256x128xf32, #tpu.memory_space<vmem>>, vector<1x128xf32>
    tpu.vector_store %arg7[%c162, %c0_327], %980 {strides = array<i32>} : memref<256x128xf32, #tpu.memory_space<vmem>>, vector<1x128xf32>,
    %c163_i32 = arith.constant 163 : i32
    %982 = arith.addi %3, %c163_i32 : i32
    %983 = arith.index_cast %982 : i32 to index
    %984 = memref.load %arg1[%983] : memref<768xi32, #tpu.memory_space<smem>>
    %985 = arith.index_cast %984 : i32 to index
    %c0_328 = arith.constant 0 : index
    %986 = vector.load %arg6[%985, %c0_328] : memref<128x128xf32, #tpu.memory_space<vmem>>, vector<1x128xf32>
    %c163 = arith.constant 163 : index
    %c0_329 = arith.constant 0 : index
    %987 = vector.load %arg7[%c163, %c0_329] : memref<256x128xf32, #tpu.memory_space<vmem>>, vector<1x128xf32>
    tpu.vector_store %arg7[%c163, %c0_329], %986 {strides = array<i32>} : memref<256x128xf32, #tpu.memory_space<vmem>>, vector<1x128xf32>,
    %c164_i32 = arith.constant 164 : i32
    %988 = arith.addi %3, %c164_i32 : i32
    %989 = arith.index_cast %988 : i32 to index
    %990 = memref.load %arg1[%989] : memref<768xi32, #tpu.memory_space<smem>>
    %991 = arith.index_cast %990 : i32 to index
    %c0_330 = arith.constant 0 : index
    %992 = vector.load %arg6[%991, %c0_330] : memref<128x128xf32, #tpu.memory_space<vmem>>, vector<1x128xf32>
    %c164 = arith.constant 164 : index
    %c0_331 = arith.constant 0 : index
    %993 = vector.load %arg7[%c164, %c0_331] : memref<256x128xf32, #tpu.memory_space<vmem>>, vector<1x128xf32>
    tpu.vector_store %arg7[%c164, %c0_331], %992 {strides = array<i32>} : memref<256x128xf32, #tpu.memory_space<vmem>>, vector<1x128xf32>,
    %c165_i32 = arith.constant 165 : i32
    %994 = arith.addi %3, %c165_i32 : i32
    %995 = arith.index_cast %994 : i32 to index
    %996 = memref.load %arg1[%995] : memref<768xi32, #tpu.memory_space<smem>>
    %997 = arith.index_cast %996 : i32 to index
    %c0_332 = arith.constant 0 : index
    %998 = vector.load %arg6[%997, %c0_332] : memref<128x128xf32, #tpu.memory_space<vmem>>, vector<1x128xf32>
    %c165 = arith.constant 165 : index
    %c0_333 = arith.constant 0 : index
    %999 = vector.load %arg7[%c165, %c0_333] : memref<256x128xf32, #tpu.memory_space<vmem>>, vector<1x128xf32>
    tpu.vector_store %arg7[%c165, %c0_333], %998 {strides = array<i32>} : memref<256x128xf32, #tpu.memory_space<vmem>>, vector<1x128xf32>,
    %c166_i32 = arith.constant 166 : i32
    %1000 = arith.addi %3, %c166_i32 : i32
    %1001 = arith.index_cast %1000 : i32 to index
    %1002 = memref.load %arg1[%1001] : memref<768xi32, #tpu.memory_space<smem>>
    %1003 = arith.index_cast %1002 : i32 to index
    %c0_334 = arith.constant 0 : index
    %1004 = vector.load %arg6[%1003, %c0_334] : memref<128x128xf32, #tpu.memory_space<vmem>>, vector<1x128xf32>
    %c166 = arith.constant 166 : index
    %c0_335 = arith.constant 0 : index
    %1005 = vector.load %arg7[%c166, %c0_335] : memref<256x128xf32, #tpu.memory_space<vmem>>, vector<1x128xf32>
    tpu.vector_store %arg7[%c166, %c0_335], %1004 {strides = array<i32>} : memref<256x128xf32, #tpu.memory_space<vmem>>, vector<1x128xf32>,
    %c167_i32 = arith.constant 167 : i32
    %1006 = arith.addi %3, %c167_i32 : i32
    %1007 = arith.index_cast %1006 : i32 to index
    %1008 = memref.load %arg1[%1007] : memref<768xi32, #tpu.memory_space<smem>>
    %1009 = arith.index_cast %1008 : i32 to index
    %c0_336 = arith.constant 0 : index
    %1010 = vector.load %arg6[%1009, %c0_336] : memref<128x128xf32, #tpu.memory_space<vmem>>, vector<1x128xf32>
    %c167 = arith.constant 167 : index
    %c0_337 = arith.constant 0 : index
    %1011 = vector.load %arg7[%c167, %c0_337] : memref<256x128xf32, #tpu.memory_space<vmem>>, vector<1x128xf32>
    tpu.vector_store %arg7[%c167, %c0_337], %1010 {strides = array<i32>} : memref<256x128xf32, #tpu.memory_space<vmem>>, vector<1x128xf32>,
    %c168_i32 = arith.constant 168 : i32
    %1012 = arith.addi %3, %c168_i32 : i32
    %1013 = arith.index_cast %1012 : i32 to index
    %1014 = memref.load %arg1[%1013] : memref<768xi32, #tpu.memory_space<smem>>
    %1015 = arith.index_cast %1014 : i32 to index
    %c0_338 = arith.constant 0 : index
    %1016 = vector.load %arg6[%1015, %c0_338] : memref<128x128xf32, #tpu.memory_space<vmem>>, vector<1x128xf32>
    %c168 = arith.constant 168 : index
    %c0_339 = arith.constant 0 : index
    %1017 = vector.load %arg7[%c168, %c0_339] : memref<256x128xf32, #tpu.memory_space<vmem>>, vector<1x128xf32>
    tpu.vector_store %arg7[%c168, %c0_339], %1016 {strides = array<i32>} : memref<256x128xf32, #tpu.memory_space<vmem>>, vector<1x128xf32>,
    %c169_i32 = arith.constant 169 : i32
    %1018 = arith.addi %3, %c169_i32 : i32
    %1019 = arith.index_cast %1018 : i32 to index
    %1020 = memref.load %arg1[%1019] : memref<768xi32, #tpu.memory_space<smem>>
    %1021 = arith.index_cast %1020 : i32 to index
    %c0_340 = arith.constant 0 : index
    %1022 = vector.load %arg6[%1021, %c0_340] : memref<128x128xf32, #tpu.memory_space<vmem>>, vector<1x128xf32>
    %c169 = arith.constant 169 : index
    %c0_341 = arith.constant 0 : index
    %1023 = vector.load %arg7[%c169, %c0_341] : memref<256x128xf32, #tpu.memory_space<vmem>>, vector<1x128xf32>
    tpu.vector_store %arg7[%c169, %c0_341], %1022 {strides = array<i32>} : memref<256x128xf32, #tpu.memory_space<vmem>>, vector<1x128xf32>,
    %c170_i32 = arith.constant 170 : i32
    %1024 = arith.addi %3, %c170_i32 : i32
    %1025 = arith.index_cast %1024 : i32 to index
    %1026 = memref.load %arg1[%1025] : memref<768xi32, #tpu.memory_space<smem>>
    %1027 = arith.index_cast %1026 : i32 to index
    %c0_342 = arith.constant 0 : index
    %1028 = vector.load %arg6[%1027, %c0_342] : memref<128x128xf32, #tpu.memory_space<vmem>>, vector<1x128xf32>
    %c170 = arith.constant 170 : index
    %c0_343 = arith.constant 0 : index
    %1029 = vector.load %arg7[%c170, %c0_343] : memref<256x128xf32, #tpu.memory_space<vmem>>, vector<1x128xf32>
    tpu.vector_store %arg7[%c170, %c0_343], %1028 {strides = array<i32>} : memref<256x128xf32, #tpu.memory_space<vmem>>, vector<1x128xf32>,
    %c171_i32 = arith.constant 171 : i32
    %1030 = arith.addi %3, %c171_i32 : i32
    %1031 = arith.index_cast %1030 : i32 to index
    %1032 = memref.load %arg1[%1031] : memref<768xi32, #tpu.memory_space<smem>>
    %1033 = arith.index_cast %1032 : i32 to index
    %c0_344 = arith.constant 0 : index
    %1034 = vector.load %arg6[%1033, %c0_344] : memref<128x128xf32, #tpu.memory_space<vmem>>, vector<1x128xf32>
    %c171 = arith.constant 171 : index
    %c0_345 = arith.constant 0 : index
    %1035 = vector.load %arg7[%c171, %c0_345] : memref<256x128xf32, #tpu.memory_space<vmem>>, vector<1x128xf32>
    tpu.vector_store %arg7[%c171, %c0_345], %1034 {strides = array<i32>} : memref<256x128xf32, #tpu.memory_space<vmem>>, vector<1x128xf32>,
    %c172_i32 = arith.constant 172 : i32
    %1036 = arith.addi %3, %c172_i32 : i32
    %1037 = arith.index_cast %1036 : i32 to index
    %1038 = memref.load %arg1[%1037] : memref<768xi32, #tpu.memory_space<smem>>
    %1039 = arith.index_cast %1038 : i32 to index
    %c0_346 = arith.constant 0 : index
    %1040 = vector.load %arg6[%1039, %c0_346] : memref<128x128xf32, #tpu.memory_space<vmem>>, vector<1x128xf32>
    %c172 = arith.constant 172 : index
    %c0_347 = arith.constant 0 : index
    %1041 = vector.load %arg7[%c172, %c0_347] : memref<256x128xf32, #tpu.memory_space<vmem>>, vector<1x128xf32>
    tpu.vector_store %arg7[%c172, %c0_347], %1040 {strides = array<i32>} : memref<256x128xf32, #tpu.memory_space<vmem>>, vector<1x128xf32>,
    %c173_i32 = arith.constant 173 : i32
    %1042 = arith.addi %3, %c173_i32 : i32
    %1043 = arith.index_cast %1042 : i32 to index
    %1044 = memref.load %arg1[%1043] : memref<768xi32, #tpu.memory_space<smem>>
    %1045 = arith.index_cast %1044 : i32 to index
    %c0_348 = arith.constant 0 : index
    %1046 = vector.load %arg6[%1045, %c0_348] : memref<128x128xf32, #tpu.memory_space<vmem>>, vector<1x128xf32>
    %c173 = arith.constant 173 : index
    %c0_349 = arith.constant 0 : index
    %1047 = vector.load %arg7[%c173, %c0_349] : memref<256x128xf32, #tpu.memory_space<vmem>>, vector<1x128xf32>
    tpu.vector_store %arg7[%c173, %c0_349], %1046 {strides = array<i32>} : memref<256x128xf32, #tpu.memory_space<vmem>>, vector<1x128xf32>,
    %c174_i32 = arith.constant 174 : i32
    %1048 = arith.addi %3, %c174_i32 : i32
    %1049 = arith.index_cast %1048 : i32 to index
    %1050 = memref.load %arg1[%1049] : memref<768xi32, #tpu.memory_space<smem>>
    %1051 = arith.index_cast %1050 : i32 to index
    %c0_350 = arith.constant 0 : index
    %1052 = vector.load %arg6[%1051, %c0_350] : memref<128x128xf32, #tpu.memory_space<vmem>>, vector<1x128xf32>
    %c174 = arith.constant 174 : index
    %c0_351 = arith.constant 0 : index
    %1053 = vector.load %arg7[%c174, %c0_351] : memref<256x128xf32, #tpu.memory_space<vmem>>, vector<1x128xf32>
    tpu.vector_store %arg7[%c174, %c0_351], %1052 {strides = array<i32>} : memref<256x128xf32, #tpu.memory_space<vmem>>, vector<1x128xf32>,
    %c175_i32 = arith.constant 175 : i32
    %1054 = arith.addi %3, %c175_i32 : i32
    %1055 = arith.index_cast %1054 : i32 to index
    %1056 = memref.load %arg1[%1055] : memref<768xi32, #tpu.memory_space<smem>>
    %1057 = arith.index_cast %1056 : i32 to index
    %c0_352 = arith.constant 0 : index
    %1058 = vector.load %arg6[%1057, %c0_352] : memref<128x128xf32, #tpu.memory_space<vmem>>, vector<1x128xf32>
    %c175 = arith.constant 175 : index
    %c0_353 = arith.constant 0 : index
    %1059 = vector.load %arg7[%c175, %c0_353] : memref<256x128xf32, #tpu.memory_space<vmem>>, vector<1x128xf32>
    tpu.vector_store %arg7[%c175, %c0_353], %1058 {strides = array<i32>} : memref<256x128xf32, #tpu.memory_space<vmem>>, vector<1x128xf32>,
    %c176_i32 = arith.constant 176 : i32
    %1060 = arith.addi %3, %c176_i32 : i32
    %1061 = arith.index_cast %1060 : i32 to index
    %1062 = memref.load %arg1[%1061] : memref<768xi32, #tpu.memory_space<smem>>
    %1063 = arith.index_cast %1062 : i32 to index
    %c0_354 = arith.constant 0 : index
    %1064 = vector.load %arg6[%1063, %c0_354] : memref<128x128xf32, #tpu.memory_space<vmem>>, vector<1x128xf32>
    %c176 = arith.constant 176 : index
    %c0_355 = arith.constant 0 : index
    %1065 = vector.load %arg7[%c176, %c0_355] : memref<256x128xf32, #tpu.memory_space<vmem>>, vector<1x128xf32>
    tpu.vector_store %arg7[%c176, %c0_355], %1064 {strides = array<i32>} : memref<256x128xf32, #tpu.memory_space<vmem>>, vector<1x128xf32>,
    %c177_i32 = arith.constant 177 : i32
    %1066 = arith.addi %3, %c177_i32 : i32
    %1067 = arith.index_cast %1066 : i32 to index
    %1068 = memref.load %arg1[%1067] : memref<768xi32, #tpu.memory_space<smem>>
    %1069 = arith.index_cast %1068 : i32 to index
    %c0_356 = arith.constant 0 : index
    %1070 = vector.load %arg6[%1069, %c0_356] : memref<128x128xf32, #tpu.memory_space<vmem>>, vector<1x128xf32>
    %c177 = arith.constant 177 : index
    %c0_357 = arith.constant 0 : index
    %1071 = vector.load %arg7[%c177, %c0_357] : memref<256x128xf32, #tpu.memory_space<vmem>>, vector<1x128xf32>
    tpu.vector_store %arg7[%c177, %c0_357], %1070 {strides = array<i32>} : memref<256x128xf32, #tpu.memory_space<vmem>>, vector<1x128xf32>,
    %c178_i32 = arith.constant 178 : i32
    %1072 = arith.addi %3, %c178_i32 : i32
    %1073 = arith.index_cast %1072 : i32 to index
    %1074 = memref.load %arg1[%1073] : memref<768xi32, #tpu.memory_space<smem>>
    %1075 = arith.index_cast %1074 : i32 to index
    %c0_358 = arith.constant 0 : index
    %1076 = vector.load %arg6[%1075, %c0_358] : memref<128x128xf32, #tpu.memory_space<vmem>>, vector<1x128xf32>
    %c178 = arith.constant 178 : index
    %c0_359 = arith.constant 0 : index
    %1077 = vector.load %arg7[%c178, %c0_359] : memref<256x128xf32, #tpu.memory_space<vmem>>, vector<1x128xf32>
    tpu.vector_store %arg7[%c178, %c0_359], %1076 {strides = array<i32>} : memref<256x128xf32, #tpu.memory_space<vmem>>, vector<1x128xf32>,
    %c179_i32 = arith.constant 179 : i32
    %1078 = arith.addi %3, %c179_i32 : i32
    %1079 = arith.index_cast %1078 : i32 to index
    %1080 = memref.load %arg1[%1079] : memref<768xi32, #tpu.memory_space<smem>>
    %1081 = arith.index_cast %1080 : i32 to index
    %c0_360 = arith.constant 0 : index
    %1082 = vector.load %arg6[%1081, %c0_360] : memref<128x128xf32, #tpu.memory_space<vmem>>, vector<1x128xf32>
    %c179 = arith.constant 179 : index
    %c0_361 = arith.constant 0 : index
    %1083 = vector.load %arg7[%c179, %c0_361] : memref<256x128xf32, #tpu.memory_space<vmem>>, vector<1x128xf32>
    tpu.vector_store %arg7[%c179, %c0_361], %1082 {strides = array<i32>} : memref<256x128xf32, #tpu.memory_space<vmem>>, vector<1x128xf32>,
    %c180_i32 = arith.constant 180 : i32
    %1084 = arith.addi %3, %c180_i32 : i32
    %1085 = arith.index_cast %1084 : i32 to index
    %1086 = memref.load %arg1[%1085] : memref<768xi32, #tpu.memory_space<smem>>
    %1087 = arith.index_cast %1086 : i32 to index
    %c0_362 = arith.constant 0 : index
    %1088 = vector.load %arg6[%1087, %c0_362] : memref<128x128xf32, #tpu.memory_space<vmem>>, vector<1x128xf32>
    %c180 = arith.constant 180 : index
    %c0_363 = arith.constant 0 : index
    %1089 = vector.load %arg7[%c180, %c0_363] : memref<256x128xf32, #tpu.memory_space<vmem>>, vector<1x128xf32>
    tpu.vector_store %arg7[%c180, %c0_363], %1088 {strides = array<i32>} : memref<256x128xf32, #tpu.memory_space<vmem>>, vector<1x128xf32>,
    %c181_i32 = arith.constant 181 : i32
    %1090 = arith.addi %3, %c181_i32 : i32
    %1091 = arith.index_cast %1090 : i32 to index
    %1092 = memref.load %arg1[%1091] : memref<768xi32, #tpu.memory_space<smem>>
    %1093 = arith.index_cast %1092 : i32 to index
    %c0_364 = arith.constant 0 : index
    %1094 = vector.load %arg6[%1093, %c0_364] : memref<128x128xf32, #tpu.memory_space<vmem>>, vector<1x128xf32>
    %c181 = arith.constant 181 : index
    %c0_365 = arith.constant 0 : index
    %1095 = vector.load %arg7[%c181, %c0_365] : memref<256x128xf32, #tpu.memory_space<vmem>>, vector<1x128xf32>
    tpu.vector_store %arg7[%c181, %c0_365], %1094 {strides = array<i32>} : memref<256x128xf32, #tpu.memory_space<vmem>>, vector<1x128xf32>,
    %c182_i32 = arith.constant 182 : i32
    %1096 = arith.addi %3, %c182_i32 : i32
    %1097 = arith.index_cast %1096 : i32 to index
    %1098 = memref.load %arg1[%1097] : memref<768xi32, #tpu.memory_space<smem>>
    %1099 = arith.index_cast %1098 : i32 to index
    %c0_366 = arith.constant 0 : index
    %1100 = vector.load %arg6[%1099, %c0_366] : memref<128x128xf32, #tpu.memory_space<vmem>>, vector<1x128xf32>
    %c182 = arith.constant 182 : index
    %c0_367 = arith.constant 0 : index
    %1101 = vector.load %arg7[%c182, %c0_367] : memref<256x128xf32, #tpu.memory_space<vmem>>, vector<1x128xf32>
    tpu.vector_store %arg7[%c182, %c0_367], %1100 {strides = array<i32>} : memref<256x128xf32, #tpu.memory_space<vmem>>, vector<1x128xf32>,
    %c183_i32 = arith.constant 183 : i32
    %1102 = arith.addi %3, %c183_i32 : i32
    %1103 = arith.index_cast %1102 : i32 to index
    %1104 = memref.load %arg1[%1103] : memref<768xi32, #tpu.memory_space<smem>>
    %1105 = arith.index_cast %1104 : i32 to index
    %c0_368 = arith.constant 0 : index
    %1106 = vector.load %arg6[%1105, %c0_368] : memref<128x128xf32, #tpu.memory_space<vmem>>, vector<1x128xf32>
    %c183 = arith.constant 183 : index
    %c0_369 = arith.constant 0 : index
    %1107 = vector.load %arg7[%c183, %c0_369] : memref<256x128xf32, #tpu.memory_space<vmem>>, vector<1x128xf32>
    tpu.vector_store %arg7[%c183, %c0_369], %1106 {strides = array<i32>} : memref<256x128xf32, #tpu.memory_space<vmem>>, vector<1x128xf32>,
    %c184_i32 = arith.constant 184 : i32
    %1108 = arith.addi %3, %c184_i32 : i32
    %1109 = arith.index_cast %1108 : i32 to index
    %1110 = memref.load %arg1[%1109] : memref<768xi32, #tpu.memory_space<smem>>
    %1111 = arith.index_cast %1110 : i32 to index
    %c0_370 = arith.constant 0 : index
    %1112 = vector.load %arg6[%1111, %c0_370] : memref<128x128xf32, #tpu.memory_space<vmem>>, vector<1x128xf32>
    %c184 = arith.constant 184 : index
    %c0_371 = arith.constant 0 : index
    %1113 = vector.load %arg7[%c184, %c0_371] : memref<256x128xf32, #tpu.memory_space<vmem>>, vector<1x128xf32>
    tpu.vector_store %arg7[%c184, %c0_371], %1112 {strides = array<i32>} : memref<256x128xf32, #tpu.memory_space<vmem>>, vector<1x128xf32>,
    %c185_i32 = arith.constant 185 : i32
    %1114 = arith.addi %3, %c185_i32 : i32
    %1115 = arith.index_cast %1114 : i32 to index
    %1116 = memref.load %arg1[%1115] : memref<768xi32, #tpu.memory_space<smem>>
    %1117 = arith.index_cast %1116 : i32 to index
    %c0_372 = arith.constant 0 : index
    %1118 = vector.load %arg6[%1117, %c0_372] : memref<128x128xf32, #tpu.memory_space<vmem>>, vector<1x128xf32>
    %c185 = arith.constant 185 : index
    %c0_373 = arith.constant 0 : index
    %1119 = vector.load %arg7[%c185, %c0_373] : memref<256x128xf32, #tpu.memory_space<vmem>>, vector<1x128xf32>
    tpu.vector_store %arg7[%c185, %c0_373], %1118 {strides = array<i32>} : memref<256x128xf32, #tpu.memory_space<vmem>>, vector<1x128xf32>,
    %c186_i32 = arith.constant 186 : i32
    %1120 = arith.addi %3, %c186_i32 : i32
    %1121 = arith.index_cast %1120 : i32 to index
    %1122 = memref.load %arg1[%1121] : memref<768xi32, #tpu.memory_space<smem>>
    %1123 = arith.index_cast %1122 : i32 to index
    %c0_374 = arith.constant 0 : index
    %1124 = vector.load %arg6[%1123, %c0_374] : memref<128x128xf32, #tpu.memory_space<vmem>>, vector<1x128xf32>
    %c186 = arith.constant 186 : index
    %c0_375 = arith.constant 0 : index
    %1125 = vector.load %arg7[%c186, %c0_375] : memref<256x128xf32, #tpu.memory_space<vmem>>, vector<1x128xf32>
    tpu.vector_store %arg7[%c186, %c0_375], %1124 {strides = array<i32>} : memref<256x128xf32, #tpu.memory_space<vmem>>, vector<1x128xf32>,
    %c187_i32 = arith.constant 187 : i32
    %1126 = arith.addi %3, %c187_i32 : i32
    %1127 = arith.index_cast %1126 : i32 to index
    %1128 = memref.load %arg1[%1127] : memref<768xi32, #tpu.memory_space<smem>>
    %1129 = arith.index_cast %1128 : i32 to index
    %c0_376 = arith.constant 0 : index
    %1130 = vector.load %arg6[%1129, %c0_376] : memref<128x128xf32, #tpu.memory_space<vmem>>, vector<1x128xf32>
    %c187 = arith.constant 187 : index
    %c0_377 = arith.constant 0 : index
    %1131 = vector.load %arg7[%c187, %c0_377] : memref<256x128xf32, #tpu.memory_space<vmem>>, vector<1x128xf32>
    tpu.vector_store %arg7[%c187, %c0_377], %1130 {strides = array<i32>} : memref<256x128xf32, #tpu.memory_space<vmem>>, vector<1x128xf32>,
    %c188_i32 = arith.constant 188 : i32
    %1132 = arith.addi %3, %c188_i32 : i32
    %1133 = arith.index_cast %1132 : i32 to index
    %1134 = memref.load %arg1[%1133] : memref<768xi32, #tpu.memory_space<smem>>
    %1135 = arith.index_cast %1134 : i32 to index
    %c0_378 = arith.constant 0 : index
    %1136 = vector.load %arg6[%1135, %c0_378] : memref<128x128xf32, #tpu.memory_space<vmem>>, vector<1x128xf32>
    %c188 = arith.constant 188 : index
    %c0_379 = arith.constant 0 : index
    %1137 = vector.load %arg7[%c188, %c0_379] : memref<256x128xf32, #tpu.memory_space<vmem>>, vector<1x128xf32>
    tpu.vector_store %arg7[%c188, %c0_379], %1136 {strides = array<i32>} : memref<256x128xf32, #tpu.memory_space<vmem>>, vector<1x128xf32>,
    %c189_i32 = arith.constant 189 : i32
    %1138 = arith.addi %3, %c189_i32 : i32
    %1139 = arith.index_cast %1138 : i32 to index
    %1140 = memref.load %arg1[%1139] : memref<768xi32, #tpu.memory_space<smem>>
    %1141 = arith.index_cast %1140 : i32 to index
    %c0_380 = arith.constant 0 : index
    %1142 = vector.load %arg6[%1141, %c0_380] : memref<128x128xf32, #tpu.memory_space<vmem>>, vector<1x128xf32>
    %c189 = arith.constant 189 : index
    %c0_381 = arith.constant 0 : index
    %1143 = vector.load %arg7[%c189, %c0_381] : memref<256x128xf32, #tpu.memory_space<vmem>>, vector<1x128xf32>
    tpu.vector_store %arg7[%c189, %c0_381], %1142 {strides = array<i32>} : memref<256x128xf32, #tpu.memory_space<vmem>>, vector<1x128xf32>,
    %c190_i32 = arith.constant 190 : i32
    %1144 = arith.addi %3, %c190_i32 : i32
    %1145 = arith.index_cast %1144 : i32 to index
    %1146 = memref.load %arg1[%1145] : memref<768xi32, #tpu.memory_space<smem>>
    %1147 = arith.index_cast %1146 : i32 to index
    %c0_382 = arith.constant 0 : index
    %1148 = vector.load %arg6[%1147, %c0_382] : memref<128x128xf32, #tpu.memory_space<vmem>>, vector<1x128xf32>
    %c190 = arith.constant 190 : index
    %c0_383 = arith.constant 0 : index
    %1149 = vector.load %arg7[%c190, %c0_383] : memref<256x128xf32, #tpu.memory_space<vmem>>, vector<1x128xf32>
    tpu.vector_store %arg7[%c190, %c0_383], %1148 {strides = array<i32>} : memref<256x128xf32, #tpu.memory_space<vmem>>, vector<1x128xf32>,
    %c191_i32 = arith.constant 191 : i32
    %1150 = arith.addi %3, %c191_i32 : i32
    %1151 = arith.index_cast %1150 : i32 to index
    %1152 = memref.load %arg1[%1151] : memref<768xi32, #tpu.memory_space<smem>>
    %1153 = arith.index_cast %1152 : i32 to index
    %c0_384 = arith.constant 0 : index
    %1154 = vector.load %arg6[%1153, %c0_384] : memref<128x128xf32, #tpu.memory_space<vmem>>, vector<1x128xf32>
    %c191 = arith.constant 191 : index
    %c0_385 = arith.constant 0 : index
    %1155 = vector.load %arg7[%c191, %c0_385] : memref<256x128xf32, #tpu.memory_space<vmem>>, vector<1x128xf32>
    tpu.vector_store %arg7[%c191, %c0_385], %1154 {strides = array<i32>} : memref<256x128xf32, #tpu.memory_space<vmem>>, vector<1x128xf32>,
    %c192_i32 = arith.constant 192 : i32
    %1156 = arith.addi %3, %c192_i32 : i32
    %1157 = arith.index_cast %1156 : i32 to index
    %1158 = memref.load %arg1[%1157] : memref<768xi32, #tpu.memory_space<smem>>
    %1159 = arith.index_cast %1158 : i32 to index
    %c0_386 = arith.constant 0 : index
    %1160 = vector.load %arg6[%1159, %c0_386] : memref<128x128xf32, #tpu.memory_space<vmem>>, vector<1x128xf32>
    %c192 = arith.constant 192 : index
    %c0_387 = arith.constant 0 : index
    %1161 = vector.load %arg7[%c192, %c0_387] : memref<256x128xf32, #tpu.memory_space<vmem>>, vector<1x128xf32>
    tpu.vector_store %arg7[%c192, %c0_387], %1160 {strides = array<i32>} : memref<256x128xf32, #tpu.memory_space<vmem>>, vector<1x128xf32>,
    %c193_i32 = arith.constant 193 : i32
    %1162 = arith.addi %3, %c193_i32 : i32
    %1163 = arith.index_cast %1162 : i32 to index
    %1164 = memref.load %arg1[%1163] : memref<768xi32, #tpu.memory_space<smem>>
    %1165 = arith.index_cast %1164 : i32 to index
    %c0_388 = arith.constant 0 : index
    %1166 = vector.load %arg6[%1165, %c0_388] : memref<128x128xf32, #tpu.memory_space<vmem>>, vector<1x128xf32>
    %c193 = arith.constant 193 : index
    %c0_389 = arith.constant 0 : index
    %1167 = vector.load %arg7[%c193, %c0_389] : memref<256x128xf32, #tpu.memory_space<vmem>>, vector<1x128xf32>
    tpu.vector_store %arg7[%c193, %c0_389], %1166 {strides = array<i32>} : memref<256x128xf32, #tpu.memory_space<vmem>>, vector<1x128xf32>,
    %c194_i32 = arith.constant 194 : i32
    %1168 = arith.addi %3, %c194_i32 : i32
    %1169 = arith.index_cast %1168 : i32 to index
    %1170 = memref.load %arg1[%1169] : memref<768xi32, #tpu.memory_space<smem>>
    %1171 = arith.index_cast %1170 : i32 to index
    %c0_390 = arith.constant 0 : index
    %1172 = vector.load %arg6[%1171, %c0_390] : memref<128x128xf32, #tpu.memory_space<vmem>>, vector<1x128xf32>
    %c194 = arith.constant 194 : index
    %c0_391 = arith.constant 0 : index
    %1173 = vector.load %arg7[%c194, %c0_391] : memref<256x128xf32, #tpu.memory_space<vmem>>, vector<1x128xf32>
    tpu.vector_store %arg7[%c194, %c0_391], %1172 {strides = array<i32>} : memref<256x128xf32, #tpu.memory_space<vmem>>, vector<1x128xf32>,
    %c195_i32 = arith.constant 195 : i32
    %1174 = arith.addi %3, %c195_i32 : i32
    %1175 = arith.index_cast %1174 : i32 to index
    %1176 = memref.load %arg1[%1175] : memref<768xi32, #tpu.memory_space<smem>>
    %1177 = arith.index_cast %1176 : i32 to index
    %c0_392 = arith.constant 0 : index
    %1178 = vector.load %arg6[%1177, %c0_392] : memref<128x128xf32, #tpu.memory_space<vmem>>, vector<1x128xf32>
    %c195 = arith.constant 195 : index
    %c0_393 = arith.constant 0 : index
    %1179 = vector.load %arg7[%c195, %c0_393] : memref<256x128xf32, #tpu.memory_space<vmem>>, vector<1x128xf32>
    tpu.vector_store %arg7[%c195, %c0_393], %1178 {strides = array<i32>} : memref<256x128xf32, #tpu.memory_space<vmem>>, vector<1x128xf32>,
    %c196_i32 = arith.constant 196 : i32
    %1180 = arith.addi %3, %c196_i32 : i32
    %1181 = arith.index_cast %1180 : i32 to index
    %1182 = memref.load %arg1[%1181] : memref<768xi32, #tpu.memory_space<smem>>
    %1183 = arith.index_cast %1182 : i32 to index
    %c0_394 = arith.constant 0 : index
    %1184 = vector.load %arg6[%1183, %c0_394] : memref<128x128xf32, #tpu.memory_space<vmem>>, vector<1x128xf32>
    %c196 = arith.constant 196 : index
    %c0_395 = arith.constant 0 : index
    %1185 = vector.load %arg7[%c196, %c0_395] : memref<256x128xf32, #tpu.memory_space<vmem>>, vector<1x128xf32>
    tpu.vector_store %arg7[%c196, %c0_395], %1184 {strides = array<i32>} : memref<256x128xf32, #tpu.memory_space<vmem>>, vector<1x128xf32>,
    %c197_i32 = arith.constant 197 : i32
    %1186 = arith.addi %3, %c197_i32 : i32
    %1187 = arith.index_cast %1186 : i32 to index
    %1188 = memref.load %arg1[%1187] : memref<768xi32, #tpu.memory_space<smem>>
    %1189 = arith.index_cast %1188 : i32 to index
    %c0_396 = arith.constant 0 : index
    %1190 = vector.load %arg6[%1189, %c0_396] : memref<128x128xf32, #tpu.memory_space<vmem>>, vector<1x128xf32>
    %c197 = arith.constant 197 : index
    %c0_397 = arith.constant 0 : index
    %1191 = vector.load %arg7[%c197, %c0_397] : memref<256x128xf32, #tpu.memory_space<vmem>>, vector<1x128xf32>
    tpu.vector_store %arg7[%c197, %c0_397], %1190 {strides = array<i32>} : memref<256x128xf32, #tpu.memory_space<vmem>>, vector<1x128xf32>,
    %c198_i32 = arith.constant 198 : i32
    %1192 = arith.addi %3, %c198_i32 : i32
    %1193 = arith.index_cast %1192 : i32 to index
    %1194 = memref.load %arg1[%1193] : memref<768xi32, #tpu.memory_space<smem>>
    %1195 = arith.index_cast %1194 : i32 to index
    %c0_398 = arith.constant 0 : index
    %1196 = vector.load %arg6[%1195, %c0_398] : memref<128x128xf32, #tpu.memory_space<vmem>>, vector<1x128xf32>
    %c198 = arith.constant 198 : index
    %c0_399 = arith.constant 0 : index
    %1197 = vector.load %arg7[%c198, %c0_399] : memref<256x128xf32, #tpu.memory_space<vmem>>, vector<1x128xf32>
    tpu.vector_store %arg7[%c198, %c0_399], %1196 {strides = array<i32>} : memref<256x128xf32, #tpu.memory_space<vmem>>, vector<1x128xf32>,
    %c199_i32 = arith.constant 199 : i32
    %1198 = arith.addi %3, %c199_i32 : i32
    %1199 = arith.index_cast %1198 : i32 to index
    %1200 = memref.load %arg1[%1199] : memref<768xi32, #tpu.memory_space<smem>>
    %1201 = arith.index_cast %1200 : i32 to index
    %c0_400 = arith.constant 0 : index
    %1202 = vector.load %arg6[%1201, %c0_400] : memref<128x128xf32, #tpu.memory_space<vmem>>, vector<1x128xf32>
    %c199 = arith.constant 199 : index
    %c0_401 = arith.constant 0 : index
    %1203 = vector.load %arg7[%c199, %c0_401] : memref<256x128xf32, #tpu.memory_space<vmem>>, vector<1x128xf32>
    tpu.vector_store %arg7[%c199, %c0_401], %1202 {strides = array<i32>} : memref<256x128xf32, #tpu.memory_space<vmem>>, vector<1x128xf32>,
    %c200_i32 = arith.constant 200 : i32
    %1204 = arith.addi %3, %c200_i32 : i32
    %1205 = arith.index_cast %1204 : i32 to index
    %1206 = memref.load %arg1[%1205] : memref<768xi32, #tpu.memory_space<smem>>
    %1207 = arith.index_cast %1206 : i32 to index
    %c0_402 = arith.constant 0 : index
    %1208 = vector.load %arg6[%1207, %c0_402] : memref<128x128xf32, #tpu.memory_space<vmem>>, vector<1x128xf32>
    %c200 = arith.constant 200 : index
    %c0_403 = arith.constant 0 : index
    %1209 = vector.load %arg7[%c200, %c0_403] : memref<256x128xf32, #tpu.memory_space<vmem>>, vector<1x128xf32>
    tpu.vector_store %arg7[%c200, %c0_403], %1208 {strides = array<i32>} : memref<256x128xf32, #tpu.memory_space<vmem>>, vector<1x128xf32>,
    %c201_i32 = arith.constant 201 : i32
    %1210 = arith.addi %3, %c201_i32 : i32
    %1211 = arith.index_cast %1210 : i32 to index
    %1212 = memref.load %arg1[%1211] : memref<768xi32, #tpu.memory_space<smem>>
    %1213 = arith.index_cast %1212 : i32 to index
    %c0_404 = arith.constant 0 : index
    %1214 = vector.load %arg6[%1213, %c0_404] : memref<128x128xf32, #tpu.memory_space<vmem>>, vector<1x128xf32>
    %c201 = arith.constant 201 : index
    %c0_405 = arith.constant 0 : index
    %1215 = vector.load %arg7[%c201, %c0_405] : memref<256x128xf32, #tpu.memory_space<vmem>>, vector<1x128xf32>
    tpu.vector_store %arg7[%c201, %c0_405], %1214 {strides = array<i32>} : memref<256x128xf32, #tpu.memory_space<vmem>>, vector<1x128xf32>,
    %c202_i32 = arith.constant 202 : i32
    %1216 = arith.addi %3, %c202_i32 : i32
    %1217 = arith.index_cast %1216 : i32 to index
    %1218 = memref.load %arg1[%1217] : memref<768xi32, #tpu.memory_space<smem>>
    %1219 = arith.index_cast %1218 : i32 to index
    %c0_406 = arith.constant 0 : index
    %1220 = vector.load %arg6[%1219, %c0_406] : memref<128x128xf32, #tpu.memory_space<vmem>>, vector<1x128xf32>
    %c202 = arith.constant 202 : index
    %c0_407 = arith.constant 0 : index
    %1221 = vector.load %arg7[%c202, %c0_407] : memref<256x128xf32, #tpu.memory_space<vmem>>, vector<1x128xf32>
    tpu.vector_store %arg7[%c202, %c0_407], %1220 {strides = array<i32>} : memref<256x128xf32, #tpu.memory_space<vmem>>, vector<1x128xf32>,
    %c203_i32 = arith.constant 203 : i32
    %1222 = arith.addi %3, %c203_i32 : i32
    %1223 = arith.index_cast %1222 : i32 to index
    %1224 = memref.load %arg1[%1223] : memref<768xi32, #tpu.memory_space<smem>>
    %1225 = arith.index_cast %1224 : i32 to index
    %c0_408 = arith.constant 0 : index
    %1226 = vector.load %arg6[%1225, %c0_408] : memref<128x128xf32, #tpu.memory_space<vmem>>, vector<1x128xf32>
    %c203 = arith.constant 203 : index
    %c0_409 = arith.constant 0 : index
    %1227 = vector.load %arg7[%c203, %c0_409] : memref<256x128xf32, #tpu.memory_space<vmem>>, vector<1x128xf32>
    tpu.vector_store %arg7[%c203, %c0_409], %1226 {strides = array<i32>} : memref<256x128xf32, #tpu.memory_space<vmem>>, vector<1x128xf32>,
    %c204_i32 = arith.constant 204 : i32
    %1228 = arith.addi %3, %c204_i32 : i32
    %1229 = arith.index_cast %1228 : i32 to index
    %1230 = memref.load %arg1[%1229] : memref<768xi32, #tpu.memory_space<smem>>
    %1231 = arith.index_cast %1230 : i32 to index
    %c0_410 = arith.constant 0 : index
    %1232 = vector.load %arg6[%1231, %c0_410] : memref<128x128xf32, #tpu.memory_space<vmem>>, vector<1x128xf32>
    %c204 = arith.constant 204 : index
    %c0_411 = arith.constant 0 : index
    %1233 = vector.load %arg7[%c204, %c0_411] : memref<256x128xf32, #tpu.memory_space<vmem>>, vector<1x128xf32>
    tpu.vector_store %arg7[%c204, %c0_411], %1232 {strides = array<i32>} : memref<256x128xf32, #tpu.memory_space<vmem>>, vector<1x128xf32>,
    %c205_i32 = arith.constant 205 : i32
    %1234 = arith.addi %3, %c205_i32 : i32
    %1235 = arith.index_cast %1234 : i32 to index
    %1236 = memref.load %arg1[%1235] : memref<768xi32, #tpu.memory_space<smem>>
    %1237 = arith.index_cast %1236 : i32 to index
    %c0_412 = arith.constant 0 : index
    %1238 = vector.load %arg6[%1237, %c0_412] : memref<128x128xf32, #tpu.memory_space<vmem>>, vector<1x128xf32>
    %c205 = arith.constant 205 : index
    %c0_413 = arith.constant 0 : index
    %1239 = vector.load %arg7[%c205, %c0_413] : memref<256x128xf32, #tpu.memory_space<vmem>>, vector<1x128xf32>
    tpu.vector_store %arg7[%c205, %c0_413], %1238 {strides = array<i32>} : memref<256x128xf32, #tpu.memory_space<vmem>>, vector<1x128xf32>,
    %c206_i32 = arith.constant 206 : i32
    %1240 = arith.addi %3, %c206_i32 : i32
    %1241 = arith.index_cast %1240 : i32 to index
    %1242 = memref.load %arg1[%1241] : memref<768xi32, #tpu.memory_space<smem>>
    %1243 = arith.index_cast %1242 : i32 to index
    %c0_414 = arith.constant 0 : index
    %1244 = vector.load %arg6[%1243, %c0_414] : memref<128x128xf32, #tpu.memory_space<vmem>>, vector<1x128xf32>
    %c206 = arith.constant 206 : index
    %c0_415 = arith.constant 0 : index
    %1245 = vector.load %arg7[%c206, %c0_415] : memref<256x128xf32, #tpu.memory_space<vmem>>, vector<1x128xf32>
    tpu.vector_store %arg7[%c206, %c0_415], %1244 {strides = array<i32>} : memref<256x128xf32, #tpu.memory_space<vmem>>, vector<1x128xf32>,
    %c207_i32 = arith.constant 207 : i32
    %1246 = arith.addi %3, %c207_i32 : i32
    %1247 = arith.index_cast %1246 : i32 to index
    %1248 = memref.load %arg1[%1247] : memref<768xi32, #tpu.memory_space<smem>>
    %1249 = arith.index_cast %1248 : i32 to index
    %c0_416 = arith.constant 0 : index
    %1250 = vector.load %arg6[%1249, %c0_416] : memref<128x128xf32, #tpu.memory_space<vmem>>, vector<1x128xf32>
    %c207 = arith.constant 207 : index
    %c0_417 = arith.constant 0 : index
    %1251 = vector.load %arg7[%c207, %c0_417] : memref<256x128xf32, #tpu.memory_space<vmem>>, vector<1x128xf32>
    tpu.vector_store %arg7[%c207, %c0_417], %1250 {strides = array<i32>} : memref<256x128xf32, #tpu.memory_space<vmem>>, vector<1x128xf32>,
    %c208_i32 = arith.constant 208 : i32
    %1252 = arith.addi %3, %c208_i32 : i32
    %1253 = arith.index_cast %1252 : i32 to index
    %1254 = memref.load %arg1[%1253] : memref<768xi32, #tpu.memory_space<smem>>
    %1255 = arith.index_cast %1254 : i32 to index
    %c0_418 = arith.constant 0 : index
    %1256 = vector.load %arg6[%1255, %c0_418] : memref<128x128xf32, #tpu.memory_space<vmem>>, vector<1x128xf32>
    %c208 = arith.constant 208 : index
    %c0_419 = arith.constant 0 : index
    %1257 = vector.load %arg7[%c208, %c0_419] : memref<256x128xf32, #tpu.memory_space<vmem>>, vector<1x128xf32>
    tpu.vector_store %arg7[%c208, %c0_419], %1256 {strides = array<i32>} : memref<256x128xf32, #tpu.memory_space<vmem>>, vector<1x128xf32>,
    %c209_i32 = arith.constant 209 : i32
    %1258 = arith.addi %3, %c209_i32 : i32
    %1259 = arith.index_cast %1258 : i32 to index
    %1260 = memref.load %arg1[%1259] : memref<768xi32, #tpu.memory_space<smem>>
    %1261 = arith.index_cast %1260 : i32 to index
    %c0_420 = arith.constant 0 : index
    %1262 = vector.load %arg6[%1261, %c0_420] : memref<128x128xf32, #tpu.memory_space<vmem>>, vector<1x128xf32>
    %c209 = arith.constant 209 : index
    %c0_421 = arith.constant 0 : index
    %1263 = vector.load %arg7[%c209, %c0_421] : memref<256x128xf32, #tpu.memory_space<vmem>>, vector<1x128xf32>
    tpu.vector_store %arg7[%c209, %c0_421], %1262 {strides = array<i32>} : memref<256x128xf32, #tpu.memory_space<vmem>>, vector<1x128xf32>,
    %c210_i32 = arith.constant 210 : i32
    %1264 = arith.addi %3, %c210_i32 : i32
    %1265 = arith.index_cast %1264 : i32 to index
    %1266 = memref.load %arg1[%1265] : memref<768xi32, #tpu.memory_space<smem>>
    %1267 = arith.index_cast %1266 : i32 to index
    %c0_422 = arith.constant 0 : index
    %1268 = vector.load %arg6[%1267, %c0_422] : memref<128x128xf32, #tpu.memory_space<vmem>>, vector<1x128xf32>
    %c210 = arith.constant 210 : index
    %c0_423 = arith.constant 0 : index
    %1269 = vector.load %arg7[%c210, %c0_423] : memref<256x128xf32, #tpu.memory_space<vmem>>, vector<1x128xf32>
    tpu.vector_store %arg7[%c210, %c0_423], %1268 {strides = array<i32>} : memref<256x128xf32, #tpu.memory_space<vmem>>, vector<1x128xf32>,
    %c211_i32 = arith.constant 211 : i32
    %1270 = arith.addi %3, %c211_i32 : i32
    %1271 = arith.index_cast %1270 : i32 to index
    %1272 = memref.load %arg1[%1271] : memref<768xi32, #tpu.memory_space<smem>>
    %1273 = arith.index_cast %1272 : i32 to index
    %c0_424 = arith.constant 0 : index
    %1274 = vector.load %arg6[%1273, %c0_424] : memref<128x128xf32, #tpu.memory_space<vmem>>, vector<1x128xf32>
    %c211 = arith.constant 211 : index
    %c0_425 = arith.constant 0 : index
    %1275 = vector.load %arg7[%c211, %c0_425] : memref<256x128xf32, #tpu.memory_space<vmem>>, vector<1x128xf32>
    tpu.vector_store %arg7[%c211, %c0_425], %1274 {strides = array<i32>} : memref<256x128xf32, #tpu.memory_space<vmem>>, vector<1x128xf32>,
    %c212_i32 = arith.constant 212 : i32
    %1276 = arith.addi %3, %c212_i32 : i32
    %1277 = arith.index_cast %1276 : i32 to index
    %1278 = memref.load %arg1[%1277] : memref<768xi32, #tpu.memory_space<smem>>
    %1279 = arith.index_cast %1278 : i32 to index
    %c0_426 = arith.constant 0 : index
    %1280 = vector.load %arg6[%1279, %c0_426] : memref<128x128xf32, #tpu.memory_space<vmem>>, vector<1x128xf32>
    %c212 = arith.constant 212 : index
    %c0_427 = arith.constant 0 : index
    %1281 = vector.load %arg7[%c212, %c0_427] : memref<256x128xf32, #tpu.memory_space<vmem>>, vector<1x128xf32>
    tpu.vector_store %arg7[%c212, %c0_427], %1280 {strides = array<i32>} : memref<256x128xf32, #tpu.memory_space<vmem>>, vector<1x128xf32>,
    %c213_i32 = arith.constant 213 : i32
    %1282 = arith.addi %3, %c213_i32 : i32
    %1283 = arith.index_cast %1282 : i32 to index
    %1284 = memref.load %arg1[%1283] : memref<768xi32, #tpu.memory_space<smem>>
    %1285 = arith.index_cast %1284 : i32 to index
    %c0_428 = arith.constant 0 : index
    %1286 = vector.load %arg6[%1285, %c0_428] : memref<128x128xf32, #tpu.memory_space<vmem>>, vector<1x128xf32>
    %c213 = arith.constant 213 : index
    %c0_429 = arith.constant 0 : index
    %1287 = vector.load %arg7[%c213, %c0_429] : memref<256x128xf32, #tpu.memory_space<vmem>>, vector<1x128xf32>
    tpu.vector_store %arg7[%c213, %c0_429], %1286 {strides = array<i32>} : memref<256x128xf32, #tpu.memory_space<vmem>>, vector<1x128xf32>,
    %c214_i32 = arith.constant 214 : i32
    %1288 = arith.addi %3, %c214_i32 : i32
    %1289 = arith.index_cast %1288 : i32 to index
    %1290 = memref.load %arg1[%1289] : memref<768xi32, #tpu.memory_space<smem>>
    %1291 = arith.index_cast %1290 : i32 to index
    %c0_430 = arith.constant 0 : index
    %1292 = vector.load %arg6[%1291, %c0_430] : memref<128x128xf32, #tpu.memory_space<vmem>>, vector<1x128xf32>
    %c214 = arith.constant 214 : index
    %c0_431 = arith.constant 0 : index
    %1293 = vector.load %arg7[%c214, %c0_431] : memref<256x128xf32, #tpu.memory_space<vmem>>, vector<1x128xf32>
    tpu.vector_store %arg7[%c214, %c0_431], %1292 {strides = array<i32>} : memref<256x128xf32, #tpu.memory_space<vmem>>, vector<1x128xf32>,
    %c215_i32 = arith.constant 215 : i32
    %1294 = arith.addi %3, %c215_i32 : i32
    %1295 = arith.index_cast %1294 : i32 to index
    %1296 = memref.load %arg1[%1295] : memref<768xi32, #tpu.memory_space<smem>>
    %1297 = arith.index_cast %1296 : i32 to index
    %c0_432 = arith.constant 0 : index
    %1298 = vector.load %arg6[%1297, %c0_432] : memref<128x128xf32, #tpu.memory_space<vmem>>, vector<1x128xf32>
    %c215 = arith.constant 215 : index
    %c0_433 = arith.constant 0 : index
    %1299 = vector.load %arg7[%c215, %c0_433] : memref<256x128xf32, #tpu.memory_space<vmem>>, vector<1x128xf32>
    tpu.vector_store %arg7[%c215, %c0_433], %1298 {strides = array<i32>} : memref<256x128xf32, #tpu.memory_space<vmem>>, vector<1x128xf32>,
    %c216_i32 = arith.constant 216 : i32
    %1300 = arith.addi %3, %c216_i32 : i32
    %1301 = arith.index_cast %1300 : i32 to index
    %1302 = memref.load %arg1[%1301] : memref<768xi32, #tpu.memory_space<smem>>
    %1303 = arith.index_cast %1302 : i32 to index
    %c0_434 = arith.constant 0 : index
    %1304 = vector.load %arg6[%1303, %c0_434] : memref<128x128xf32, #tpu.memory_space<vmem>>, vector<1x128xf32>
    %c216 = arith.constant 216 : index
    %c0_435 = arith.constant 0 : index
    %1305 = vector.load %arg7[%c216, %c0_435] : memref<256x128xf32, #tpu.memory_space<vmem>>, vector<1x128xf32>
    tpu.vector_store %arg7[%c216, %c0_435], %1304 {strides = array<i32>} : memref<256x128xf32, #tpu.memory_space<vmem>>, vector<1x128xf32>,
    %c217_i32 = arith.constant 217 : i32
    %1306 = arith.addi %3, %c217_i32 : i32
    %1307 = arith.index_cast %1306 : i32 to index
    %1308 = memref.load %arg1[%1307] : memref<768xi32, #tpu.memory_space<smem>>
    %1309 = arith.index_cast %1308 : i32 to index
    %c0_436 = arith.constant 0 : index
    %1310 = vector.load %arg6[%1309, %c0_436] : memref<128x128xf32, #tpu.memory_space<vmem>>, vector<1x128xf32>
    %c217 = arith.constant 217 : index
    %c0_437 = arith.constant 0 : index
    %1311 = vector.load %arg7[%c217, %c0_437] : memref<256x128xf32, #tpu.memory_space<vmem>>, vector<1x128xf32>
    tpu.vector_store %arg7[%c217, %c0_437], %1310 {strides = array<i32>} : memref<256x128xf32, #tpu.memory_space<vmem>>, vector<1x128xf32>,
    %c218_i32 = arith.constant 218 : i32
    %1312 = arith.addi %3, %c218_i32 : i32
    %1313 = arith.index_cast %1312 : i32 to index
    %1314 = memref.load %arg1[%1313] : memref<768xi32, #tpu.memory_space<smem>>
    %1315 = arith.index_cast %1314 : i32 to index
    %c0_438 = arith.constant 0 : index
    %1316 = vector.load %arg6[%1315, %c0_438] : memref<128x128xf32, #tpu.memory_space<vmem>>, vector<1x128xf32>
    %c218 = arith.constant 218 : index
    %c0_439 = arith.constant 0 : index
    %1317 = vector.load %arg7[%c218, %c0_439] : memref<256x128xf32, #tpu.memory_space<vmem>>, vector<1x128xf32>
    tpu.vector_store %arg7[%c218, %c0_439], %1316 {strides = array<i32>} : memref<256x128xf32, #tpu.memory_space<vmem>>, vector<1x128xf32>,
    %c219_i32 = arith.constant 219 : i32
    %1318 = arith.addi %3, %c219_i32 : i32
    %1319 = arith.index_cast %1318 : i32 to index
    %1320 = memref.load %arg1[%1319] : memref<768xi32, #tpu.memory_space<smem>>
    %1321 = arith.index_cast %1320 : i32 to index
    %c0_440 = arith.constant 0 : index
    %1322 = vector.load %arg6[%1321, %c0_440] : memref<128x128xf32, #tpu.memory_space<vmem>>, vector<1x128xf32>
    %c219 = arith.constant 219 : index
    %c0_441 = arith.constant 0 : index
    %1323 = vector.load %arg7[%c219, %c0_441] : memref<256x128xf32, #tpu.memory_space<vmem>>, vector<1x128xf32>
    tpu.vector_store %arg7[%c219, %c0_441], %1322 {strides = array<i32>} : memref<256x128xf32, #tpu.memory_space<vmem>>, vector<1x128xf32>,
    %c220_i32 = arith.constant 220 : i32
    %1324 = arith.addi %3, %c220_i32 : i32
    %1325 = arith.index_cast %1324 : i32 to index
    %1326 = memref.load %arg1[%1325] : memref<768xi32, #tpu.memory_space<smem>>
    %1327 = arith.index_cast %1326 : i32 to index
    %c0_442 = arith.constant 0 : index
    %1328 = vector.load %arg6[%1327, %c0_442] : memref<128x128xf32, #tpu.memory_space<vmem>>, vector<1x128xf32>
    %c220 = arith.constant 220 : index
    %c0_443 = arith.constant 0 : index
    %1329 = vector.load %arg7[%c220, %c0_443] : memref<256x128xf32, #tpu.memory_space<vmem>>, vector<1x128xf32>
    tpu.vector_store %arg7[%c220, %c0_443], %1328 {strides = array<i32>} : memref<256x128xf32, #tpu.memory_space<vmem>>, vector<1x128xf32>,
    %c221_i32 = arith.constant 221 : i32
    %1330 = arith.addi %3, %c221_i32 : i32
    %1331 = arith.index_cast %1330 : i32 to index
    %1332 = memref.load %arg1[%1331] : memref<768xi32, #tpu.memory_space<smem>>
    %1333 = arith.index_cast %1332 : i32 to index
    %c0_444 = arith.constant 0 : index
    %1334 = vector.load %arg6[%1333, %c0_444] : memref<128x128xf32, #tpu.memory_space<vmem>>, vector<1x128xf32>
    %c221 = arith.constant 221 : index
    %c0_445 = arith.constant 0 : index
    %1335 = vector.load %arg7[%c221, %c0_445] : memref<256x128xf32, #tpu.memory_space<vmem>>, vector<1x128xf32>
    tpu.vector_store %arg7[%c221, %c0_445], %1334 {strides = array<i32>} : memref<256x128xf32, #tpu.memory_space<vmem>>, vector<1x128xf32>,
    %c222_i32 = arith.constant 222 : i32
    %1336 = arith.addi %3, %c222_i32 : i32
    %1337 = arith.index_cast %1336 : i32 to index
    %1338 = memref.load %arg1[%1337] : memref<768xi32, #tpu.memory_space<smem>>
    %1339 = arith.index_cast %1338 : i32 to index
    %c0_446 = arith.constant 0 : index
    %1340 = vector.load %arg6[%1339, %c0_446] : memref<128x128xf32, #tpu.memory_space<vmem>>, vector<1x128xf32>
    %c222 = arith.constant 222 : index
    %c0_447 = arith.constant 0 : index
    %1341 = vector.load %arg7[%c222, %c0_447] : memref<256x128xf32, #tpu.memory_space<vmem>>, vector<1x128xf32>
    tpu.vector_store %arg7[%c222, %c0_447], %1340 {strides = array<i32>} : memref<256x128xf32, #tpu.memory_space<vmem>>, vector<1x128xf32>,
    %c223_i32 = arith.constant 223 : i32
    %1342 = arith.addi %3, %c223_i32 : i32
    %1343 = arith.index_cast %1342 : i32 to index
    %1344 = memref.load %arg1[%1343] : memref<768xi32, #tpu.memory_space<smem>>
    %1345 = arith.index_cast %1344 : i32 to index
    %c0_448 = arith.constant 0 : index
    %1346 = vector.load %arg6[%1345, %c0_448] : memref<128x128xf32, #tpu.memory_space<vmem>>, vector<1x128xf32>
    %c223 = arith.constant 223 : index
    %c0_449 = arith.constant 0 : index
    %1347 = vector.load %arg7[%c223, %c0_449] : memref<256x128xf32, #tpu.memory_space<vmem>>, vector<1x128xf32>
    tpu.vector_store %arg7[%c223, %c0_449], %1346 {strides = array<i32>} : memref<256x128xf32, #tpu.memory_space<vmem>>, vector<1x128xf32>,
    %c224_i32 = arith.constant 224 : i32
    %1348 = arith.addi %3, %c224_i32 : i32
    %1349 = arith.index_cast %1348 : i32 to index
    %1350 = memref.load %arg1[%1349] : memref<768xi32, #tpu.memory_space<smem>>
    %1351 = arith.index_cast %1350 : i32 to index
    %c0_450 = arith.constant 0 : index
    %1352 = vector.load %arg6[%1351, %c0_450] : memref<128x128xf32, #tpu.memory_space<vmem>>, vector<1x128xf32>
    %c224 = arith.constant 224 : index
    %c0_451 = arith.constant 0 : index
    %1353 = vector.load %arg7[%c224, %c0_451] : memref<256x128xf32, #tpu.memory_space<vmem>>, vector<1x128xf32>
    tpu.vector_store %arg7[%c224, %c0_451], %1352 {strides = array<i32>} : memref<256x128xf32, #tpu.memory_space<vmem>>, vector<1x128xf32>,
    %c225_i32 = arith.constant 225 : i32
    %1354 = arith.addi %3, %c225_i32 : i32
    %1355 = arith.index_cast %1354 : i32 to index
    %1356 = memref.load %arg1[%1355] : memref<768xi32, #tpu.memory_space<smem>>
    %1357 = arith.index_cast %1356 : i32 to index
    %c0_452 = arith.constant 0 : index
    %1358 = vector.load %arg6[%1357, %c0_452] : memref<128x128xf32, #tpu.memory_space<vmem>>, vector<1x128xf32>
    %c225 = arith.constant 225 : index
    %c0_453 = arith.constant 0 : index
    %1359 = vector.load %arg7[%c225, %c0_453] : memref<256x128xf32, #tpu.memory_space<vmem>>, vector<1x128xf32>
    tpu.vector_store %arg7[%c225, %c0_453], %1358 {strides = array<i32>} : memref<256x128xf32, #tpu.memory_space<vmem>>, vector<1x128xf32>,
    %c226_i32 = arith.constant 226 : i32
    %1360 = arith.addi %3, %c226_i32 : i32
    %1361 = arith.index_cast %1360 : i32 to index
    %1362 = memref.load %arg1[%1361] : memref<768xi32, #tpu.memory_space<smem>>
    %1363 = arith.index_cast %1362 : i32 to index
    %c0_454 = arith.constant 0 : index
    %1364 = vector.load %arg6[%1363, %c0_454] : memref<128x128xf32, #tpu.memory_space<vmem>>, vector<1x128xf32>
    %c226 = arith.constant 226 : index
    %c0_455 = arith.constant 0 : index
    %1365 = vector.load %arg7[%c226, %c0_455] : memref<256x128xf32, #tpu.memory_space<vmem>>, vector<1x128xf32>
    tpu.vector_store %arg7[%c226, %c0_455], %1364 {strides = array<i32>} : memref<256x128xf32, #tpu.memory_space<vmem>>, vector<1x128xf32>,
    %c227_i32 = arith.constant 227 : i32
    %1366 = arith.addi %3, %c227_i32 : i32
    %1367 = arith.index_cast %1366 : i32 to index
    %1368 = memref.load %arg1[%1367] : memref<768xi32, #tpu.memory_space<smem>>
    %1369 = arith.index_cast %1368 : i32 to index
    %c0_456 = arith.constant 0 : index
    %1370 = vector.load %arg6[%1369, %c0_456] : memref<128x128xf32, #tpu.memory_space<vmem>>, vector<1x128xf32>
    %c227 = arith.constant 227 : index
    %c0_457 = arith.constant 0 : index
    %1371 = vector.load %arg7[%c227, %c0_457] : memref<256x128xf32, #tpu.memory_space<vmem>>, vector<1x128xf32>
    tpu.vector_store %arg7[%c227, %c0_457], %1370 {strides = array<i32>} : memref<256x128xf32, #tpu.memory_space<vmem>>, vector<1x128xf32>,
    %c228_i32 = arith.constant 228 : i32
    %1372 = arith.addi %3, %c228_i32 : i32
    %1373 = arith.index_cast %1372 : i32 to index
    %1374 = memref.load %arg1[%1373] : memref<768xi32, #tpu.memory_space<smem>>
    %1375 = arith.index_cast %1374 : i32 to index
    %c0_458 = arith.constant 0 : index
    %1376 = vector.load %arg6[%1375, %c0_458] : memref<128x128xf32, #tpu.memory_space<vmem>>, vector<1x128xf32>
    %c228 = arith.constant 228 : index
    %c0_459 = arith.constant 0 : index
    %1377 = vector.load %arg7[%c228, %c0_459] : memref<256x128xf32, #tpu.memory_space<vmem>>, vector<1x128xf32>
    tpu.vector_store %arg7[%c228, %c0_459], %1376 {strides = array<i32>} : memref<256x128xf32, #tpu.memory_space<vmem>>, vector<1x128xf32>,
    %c229_i32 = arith.constant 229 : i32
    %1378 = arith.addi %3, %c229_i32 : i32
    %1379 = arith.index_cast %1378 : i32 to index
    %1380 = memref.load %arg1[%1379] : memref<768xi32, #tpu.memory_space<smem>>
    %1381 = arith.index_cast %1380 : i32 to index
    %c0_460 = arith.constant 0 : index
    %1382 = vector.load %arg6[%1381, %c0_460] : memref<128x128xf32, #tpu.memory_space<vmem>>, vector<1x128xf32>
    %c229 = arith.constant 229 : index
    %c0_461 = arith.constant 0 : index
    %1383 = vector.load %arg7[%c229, %c0_461] : memref<256x128xf32, #tpu.memory_space<vmem>>, vector<1x128xf32>
    tpu.vector_store %arg7[%c229, %c0_461], %1382 {strides = array<i32>} : memref<256x128xf32, #tpu.memory_space<vmem>>, vector<1x128xf32>,
    %c230_i32 = arith.constant 230 : i32
    %1384 = arith.addi %3, %c230_i32 : i32
    %1385 = arith.index_cast %1384 : i32 to index
    %1386 = memref.load %arg1[%1385] : memref<768xi32, #tpu.memory_space<smem>>
    %1387 = arith.index_cast %1386 : i32 to index
    %c0_462 = arith.constant 0 : index
    %1388 = vector.load %arg6[%1387, %c0_462] : memref<128x128xf32, #tpu.memory_space<vmem>>, vector<1x128xf32>
    %c230 = arith.constant 230 : index
    %c0_463 = arith.constant 0 : index
    %1389 = vector.load %arg7[%c230, %c0_463] : memref<256x128xf32, #tpu.memory_space<vmem>>, vector<1x128xf32>
    tpu.vector_store %arg7[%c230, %c0_463], %1388 {strides = array<i32>} : memref<256x128xf32, #tpu.memory_space<vmem>>, vector<1x128xf32>,
    %c231_i32 = arith.constant 231 : i32
    %1390 = arith.addi %3, %c231_i32 : i32
    %1391 = arith.index_cast %1390 : i32 to index
    %1392 = memref.load %arg1[%1391] : memref<768xi32, #tpu.memory_space<smem>>
    %1393 = arith.index_cast %1392 : i32 to index
    %c0_464 = arith.constant 0 : index
    %1394 = vector.load %arg6[%1393, %c0_464] : memref<128x128xf32, #tpu.memory_space<vmem>>, vector<1x128xf32>
    %c231 = arith.constant 231 : index
    %c0_465 = arith.constant 0 : index
    %1395 = vector.load %arg7[%c231, %c0_465] : memref<256x128xf32, #tpu.memory_space<vmem>>, vector<1x128xf32>
    tpu.vector_store %arg7[%c231, %c0_465], %1394 {strides = array<i32>} : memref<256x128xf32, #tpu.memory_space<vmem>>, vector<1x128xf32>,
    %c232_i32 = arith.constant 232 : i32
    %1396 = arith.addi %3, %c232_i32 : i32
    %1397 = arith.index_cast %1396 : i32 to index
    %1398 = memref.load %arg1[%1397] : memref<768xi32, #tpu.memory_space<smem>>
    %1399 = arith.index_cast %1398 : i32 to index
    %c0_466 = arith.constant 0 : index
    %1400 = vector.load %arg6[%1399, %c0_466] : memref<128x128xf32, #tpu.memory_space<vmem>>, vector<1x128xf32>
    %c232 = arith.constant 232 : index
    %c0_467 = arith.constant 0 : index
    %1401 = vector.load %arg7[%c232, %c0_467] : memref<256x128xf32, #tpu.memory_space<vmem>>, vector<1x128xf32>
    tpu.vector_store %arg7[%c232, %c0_467], %1400 {strides = array<i32>} : memref<256x128xf32, #tpu.memory_space<vmem>>, vector<1x128xf32>,
    %c233_i32 = arith.constant 233 : i32
    %1402 = arith.addi %3, %c233_i32 : i32
    %1403 = arith.index_cast %1402 : i32 to index
    %1404 = memref.load %arg1[%1403] : memref<768xi32, #tpu.memory_space<smem>>
    %1405 = arith.index_cast %1404 : i32 to index
    %c0_468 = arith.constant 0 : index
    %1406 = vector.load %arg6[%1405, %c0_468] : memref<128x128xf32, #tpu.memory_space<vmem>>, vector<1x128xf32>
    %c233 = arith.constant 233 : index
    %c0_469 = arith.constant 0 : index
    %1407 = vector.load %arg7[%c233, %c0_469] : memref<256x128xf32, #tpu.memory_space<vmem>>, vector<1x128xf32>
    tpu.vector_store %arg7[%c233, %c0_469], %1406 {strides = array<i32>} : memref<256x128xf32, #tpu.memory_space<vmem>>, vector<1x128xf32>,
    %c234_i32 = arith.constant 234 : i32
    %1408 = arith.addi %3, %c234_i32 : i32
    %1409 = arith.index_cast %1408 : i32 to index
    %1410 = memref.load %arg1[%1409] : memref<768xi32, #tpu.memory_space<smem>>
    %1411 = arith.index_cast %1410 : i32 to index
    %c0_470 = arith.constant 0 : index
    %1412 = vector.load %arg6[%1411, %c0_470] : memref<128x128xf32, #tpu.memory_space<vmem>>, vector<1x128xf32>
    %c234 = arith.constant 234 : index
    %c0_471 = arith.constant 0 : index
    %1413 = vector.load %arg7[%c234, %c0_471] : memref<256x128xf32, #tpu.memory_space<vmem>>, vector<1x128xf32>
    tpu.vector_store %arg7[%c234, %c0_471], %1412 {strides = array<i32>} : memref<256x128xf32, #tpu.memory_space<vmem>>, vector<1x128xf32>,
    %c235_i32 = arith.constant 235 : i32
    %1414 = arith.addi %3, %c235_i32 : i32
    %1415 = arith.index_cast %1414 : i32 to index
    %1416 = memref.load %arg1[%1415] : memref<768xi32, #tpu.memory_space<smem>>
    %1417 = arith.index_cast %1416 : i32 to index
    %c0_472 = arith.constant 0 : index
    %1418 = vector.load %arg6[%1417, %c0_472] : memref<128x128xf32, #tpu.memory_space<vmem>>, vector<1x128xf32>
    %c235 = arith.constant 235 : index
    %c0_473 = arith.constant 0 : index
    %1419 = vector.load %arg7[%c235, %c0_473] : memref<256x128xf32, #tpu.memory_space<vmem>>, vector<1x128xf32>
    tpu.vector_store %arg7[%c235, %c0_473], %1418 {strides = array<i32>} : memref<256x128xf32, #tpu.memory_space<vmem>>, vector<1x128xf32>,
    %c236_i32 = arith.constant 236 : i32
    %1420 = arith.addi %3, %c236_i32 : i32
    %1421 = arith.index_cast %1420 : i32 to index
    %1422 = memref.load %arg1[%1421] : memref<768xi32, #tpu.memory_space<smem>>
    %1423 = arith.index_cast %1422 : i32 to index
    %c0_474 = arith.constant 0 : index
    %1424 = vector.load %arg6[%1423, %c0_474] : memref<128x128xf32, #tpu.memory_space<vmem>>, vector<1x128xf32>
    %c236 = arith.constant 236 : index
    %c0_475 = arith.constant 0 : index
    %1425 = vector.load %arg7[%c236, %c0_475] : memref<256x128xf32, #tpu.memory_space<vmem>>, vector<1x128xf32>
    tpu.vector_store %arg7[%c236, %c0_475], %1424 {strides = array<i32>} : memref<256x128xf32, #tpu.memory_space<vmem>>, vector<1x128xf32>,
    %c237_i32 = arith.constant 237 : i32
    %1426 = arith.addi %3, %c237_i32 : i32
    %1427 = arith.index_cast %1426 : i32 to index
    %1428 = memref.load %arg1[%1427] : memref<768xi32, #tpu.memory_space<smem>>
    %1429 = arith.index_cast %1428 : i32 to index
    %c0_476 = arith.constant 0 : index
    %1430 = vector.load %arg6[%1429, %c0_476] : memref<128x128xf32, #tpu.memory_space<vmem>>, vector<1x128xf32>
    %c237 = arith.constant 237 : index
    %c0_477 = arith.constant 0 : index
    %1431 = vector.load %arg7[%c237, %c0_477] : memref<256x128xf32, #tpu.memory_space<vmem>>, vector<1x128xf32>
    tpu.vector_store %arg7[%c237, %c0_477], %1430 {strides = array<i32>} : memref<256x128xf32, #tpu.memory_space<vmem>>, vector<1x128xf32>,
    %c238_i32 = arith.constant 238 : i32
    %1432 = arith.addi %3, %c238_i32 : i32
    %1433 = arith.index_cast %1432 : i32 to index
    %1434 = memref.load %arg1[%1433] : memref<768xi32, #tpu.memory_space<smem>>
    %1435 = arith.index_cast %1434 : i32 to index
    %c0_478 = arith.constant 0 : index
    %1436 = vector.load %arg6[%1435, %c0_478] : memref<128x128xf32, #tpu.memory_space<vmem>>, vector<1x128xf32>
    %c238 = arith.constant 238 : index
    %c0_479 = arith.constant 0 : index
    %1437 = vector.load %arg7[%c238, %c0_479] : memref<256x128xf32, #tpu.memory_space<vmem>>, vector<1x128xf32>
    tpu.vector_store %arg7[%c238, %c0_479], %1436 {strides = array<i32>} : memref<256x128xf32, #tpu.memory_space<vmem>>, vector<1x128xf32>,
    %c239_i32 = arith.constant 239 : i32
    %1438 = arith.addi %3, %c239_i32 : i32
    %1439 = arith.index_cast %1438 : i32 to index
    %1440 = memref.load %arg1[%1439] : memref<768xi32, #tpu.memory_space<smem>>
    %1441 = arith.index_cast %1440 : i32 to index
    %c0_480 = arith.constant 0 : index
    %1442 = vector.load %arg6[%1441, %c0_480] : memref<128x128xf32, #tpu.memory_space<vmem>>, vector<1x128xf32>
    %c239 = arith.constant 239 : index
    %c0_481 = arith.constant 0 : index
    %1443 = vector.load %arg7[%c239, %c0_481] : memref<256x128xf32, #tpu.memory_space<vmem>>, vector<1x128xf32>
    tpu.vector_store %arg7[%c239, %c0_481], %1442 {strides = array<i32>} : memref<256x128xf32, #tpu.memory_space<vmem>>, vector<1x128xf32>,
    %c240_i32 = arith.constant 240 : i32
    %1444 = arith.addi %3, %c240_i32 : i32
    %1445 = arith.index_cast %1444 : i32 to index
    %1446 = memref.load %arg1[%1445] : memref<768xi32, #tpu.memory_space<smem>>
    %1447 = arith.index_cast %1446 : i32 to index
    %c0_482 = arith.constant 0 : index
    %1448 = vector.load %arg6[%1447, %c0_482] : memref<128x128xf32, #tpu.memory_space<vmem>>, vector<1x128xf32>
    %c240 = arith.constant 240 : index
    %c0_483 = arith.constant 0 : index
    %1449 = vector.load %arg7[%c240, %c0_483] : memref<256x128xf32, #tpu.memory_space<vmem>>, vector<1x128xf32>
    tpu.vector_store %arg7[%c240, %c0_483], %1448 {strides = array<i32>} : memref<256x128xf32, #tpu.memory_space<vmem>>, vector<1x128xf32>,
    %c241_i32 = arith.constant 241 : i32
    %1450 = arith.addi %3, %c241_i32 : i32
    %1451 = arith.index_cast %1450 : i32 to index
    %1452 = memref.load %arg1[%1451] : memref<768xi32, #tpu.memory_space<smem>>
    %1453 = arith.index_cast %1452 : i32 to index
    %c0_484 = arith.constant 0 : index
    %1454 = vector.load %arg6[%1453, %c0_484] : memref<128x128xf32, #tpu.memory_space<vmem>>, vector<1x128xf32>
    %c241 = arith.constant 241 : index
    %c0_485 = arith.constant 0 : index
    %1455 = vector.load %arg7[%c241, %c0_485] : memref<256x128xf32, #tpu.memory_space<vmem>>, vector<1x128xf32>
    tpu.vector_store %arg7[%c241, %c0_485], %1454 {strides = array<i32>} : memref<256x128xf32, #tpu.memory_space<vmem>>, vector<1x128xf32>,
    %c242_i32 = arith.constant 242 : i32
    %1456 = arith.addi %3, %c242_i32 : i32
    %1457 = arith.index_cast %1456 : i32 to index
    %1458 = memref.load %arg1[%1457] : memref<768xi32, #tpu.memory_space<smem>>
    %1459 = arith.index_cast %1458 : i32 to index
    %c0_486 = arith.constant 0 : index
    %1460 = vector.load %arg6[%1459, %c0_486] : memref<128x128xf32, #tpu.memory_space<vmem>>, vector<1x128xf32>
    %c242 = arith.constant 242 : index
    %c0_487 = arith.constant 0 : index
    %1461 = vector.load %arg7[%c242, %c0_487] : memref<256x128xf32, #tpu.memory_space<vmem>>, vector<1x128xf32>
    tpu.vector_store %arg7[%c242, %c0_487], %1460 {strides = array<i32>} : memref<256x128xf32, #tpu.memory_space<vmem>>, vector<1x128xf32>,
    %c243_i32 = arith.constant 243 : i32
    %1462 = arith.addi %3, %c243_i32 : i32
    %1463 = arith.index_cast %1462 : i32 to index
    %1464 = memref.load %arg1[%1463] : memref<768xi32, #tpu.memory_space<smem>>
    %1465 = arith.index_cast %1464 : i32 to index
    %c0_488 = arith.constant 0 : index
    %1466 = vector.load %arg6[%1465, %c0_488] : memref<128x128xf32, #tpu.memory_space<vmem>>, vector<1x128xf32>
    %c243 = arith.constant 243 : index
    %c0_489 = arith.constant 0 : index
    %1467 = vector.load %arg7[%c243, %c0_489] : memref<256x128xf32, #tpu.memory_space<vmem>>, vector<1x128xf32>
    tpu.vector_store %arg7[%c243, %c0_489], %1466 {strides = array<i32>} : memref<256x128xf32, #tpu.memory_space<vmem>>, vector<1x128xf32>,
    %c244_i32 = arith.constant 244 : i32
    %1468 = arith.addi %3, %c244_i32 : i32
    %1469 = arith.index_cast %1468 : i32 to index
    %1470 = memref.load %arg1[%1469] : memref<768xi32, #tpu.memory_space<smem>>
    %1471 = arith.index_cast %1470 : i32 to index
    %c0_490 = arith.constant 0 : index
    %1472 = vector.load %arg6[%1471, %c0_490] : memref<128x128xf32, #tpu.memory_space<vmem>>, vector<1x128xf32>
    %c244 = arith.constant 244 : index
    %c0_491 = arith.constant 0 : index
    %1473 = vector.load %arg7[%c244, %c0_491] : memref<256x128xf32, #tpu.memory_space<vmem>>, vector<1x128xf32>
    tpu.vector_store %arg7[%c244, %c0_491], %1472 {strides = array<i32>} : memref<256x128xf32, #tpu.memory_space<vmem>>, vector<1x128xf32>,
    %c245_i32 = arith.constant 245 : i32
    %1474 = arith.addi %3, %c245_i32 : i32
    %1475 = arith.index_cast %1474 : i32 to index
    %1476 = memref.load %arg1[%1475] : memref<768xi32, #tpu.memory_space<smem>>
    %1477 = arith.index_cast %1476 : i32 to index
    %c0_492 = arith.constant 0 : index
    %1478 = vector.load %arg6[%1477, %c0_492] : memref<128x128xf32, #tpu.memory_space<vmem>>, vector<1x128xf32>
    %c245 = arith.constant 245 : index
    %c0_493 = arith.constant 0 : index
    %1479 = vector.load %arg7[%c245, %c0_493] : memref<256x128xf32, #tpu.memory_space<vmem>>, vector<1x128xf32>
    tpu.vector_store %arg7[%c245, %c0_493], %1478 {strides = array<i32>} : memref<256x128xf32, #tpu.memory_space<vmem>>, vector<1x128xf32>,
    %c246_i32 = arith.constant 246 : i32
    %1480 = arith.addi %3, %c246_i32 : i32
    %1481 = arith.index_cast %1480 : i32 to index
    %1482 = memref.load %arg1[%1481] : memref<768xi32, #tpu.memory_space<smem>>
    %1483 = arith.index_cast %1482 : i32 to index
    %c0_494 = arith.constant 0 : index
    %1484 = vector.load %arg6[%1483, %c0_494] : memref<128x128xf32, #tpu.memory_space<vmem>>, vector<1x128xf32>
    %c246 = arith.constant 246 : index
    %c0_495 = arith.constant 0 : index
    %1485 = vector.load %arg7[%c246, %c0_495] : memref<256x128xf32, #tpu.memory_space<vmem>>, vector<1x128xf32>
    tpu.vector_store %arg7[%c246, %c0_495], %1484 {strides = array<i32>} : memref<256x128xf32, #tpu.memory_space<vmem>>, vector<1x128xf32>,
    %c247_i32 = arith.constant 247 : i32
    %1486 = arith.addi %3, %c247_i32 : i32
    %1487 = arith.index_cast %1486 : i32 to index
    %1488 = memref.load %arg1[%1487] : memref<768xi32, #tpu.memory_space<smem>>
    %1489 = arith.index_cast %1488 : i32 to index
    %c0_496 = arith.constant 0 : index
    %1490 = vector.load %arg6[%1489, %c0_496] : memref<128x128xf32, #tpu.memory_space<vmem>>, vector<1x128xf32>
    %c247 = arith.constant 247 : index
    %c0_497 = arith.constant 0 : index
    %1491 = vector.load %arg7[%c247, %c0_497] : memref<256x128xf32, #tpu.memory_space<vmem>>, vector<1x128xf32>
    tpu.vector_store %arg7[%c247, %c0_497], %1490 {strides = array<i32>} : memref<256x128xf32, #tpu.memory_space<vmem>>, vector<1x128xf32>,
    %c248_i32 = arith.constant 248 : i32
    %1492 = arith.addi %3, %c248_i32 : i32
    %1493 = arith.index_cast %1492 : i32 to index
    %1494 = memref.load %arg1[%1493] : memref<768xi32, #tpu.memory_space<smem>>
    %1495 = arith.index_cast %1494 : i32 to index
    %c0_498 = arith.constant 0 : index
    %1496 = vector.load %arg6[%1495, %c0_498] : memref<128x128xf32, #tpu.memory_space<vmem>>, vector<1x128xf32>
    %c248 = arith.constant 248 : index
    %c0_499 = arith.constant 0 : index
    %1497 = vector.load %arg7[%c248, %c0_499] : memref<256x128xf32, #tpu.memory_space<vmem>>, vector<1x128xf32>
    tpu.vector_store %arg7[%c248, %c0_499], %1496 {strides = array<i32>} : memref<256x128xf32, #tpu.memory_space<vmem>>, vector<1x128xf32>,
    %c249_i32 = arith.constant 249 : i32
    %1498 = arith.addi %3, %c249_i32 : i32
    %1499 = arith.index_cast %1498 : i32 to index
    %1500 = memref.load %arg1[%1499] : memref<768xi32, #tpu.memory_space<smem>>
    %1501 = arith.index_cast %1500 : i32 to index
    %c0_500 = arith.constant 0 : index
    %1502 = vector.load %arg6[%1501, %c0_500] : memref<128x128xf32, #tpu.memory_space<vmem>>, vector<1x128xf32>
    %c249 = arith.constant 249 : index
    %c0_501 = arith.constant 0 : index
    %1503 = vector.load %arg7[%c249, %c0_501] : memref<256x128xf32, #tpu.memory_space<vmem>>, vector<1x128xf32>
    tpu.vector_store %arg7[%c249, %c0_501], %1502 {strides = array<i32>} : memref<256x128xf32, #tpu.memory_space<vmem>>, vector<1x128xf32>,
    %c250_i32 = arith.constant 250 : i32
    %1504 = arith.addi %3, %c250_i32 : i32
    %1505 = arith.index_cast %1504 : i32 to index
    %1506 = memref.load %arg1[%1505] : memref<768xi32, #tpu.memory_space<smem>>
    %1507 = arith.index_cast %1506 : i32 to index
    %c0_502 = arith.constant 0 : index
    %1508 = vector.load %arg6[%1507, %c0_502] : memref<128x128xf32, #tpu.memory_space<vmem>>, vector<1x128xf32>
    %c250 = arith.constant 250 : index
    %c0_503 = arith.constant 0 : index
    %1509 = vector.load %arg7[%c250, %c0_503] : memref<256x128xf32, #tpu.memory_space<vmem>>, vector<1x128xf32>
    tpu.vector_store %arg7[%c250, %c0_503], %1508 {strides = array<i32>} : memref<256x128xf32, #tpu.memory_space<vmem>>, vector<1x128xf32>,
    %c251_i32 = arith.constant 251 : i32
    %1510 = arith.addi %3, %c251_i32 : i32
    %1511 = arith.index_cast %1510 : i32 to index
    %1512 = memref.load %arg1[%1511] : memref<768xi32, #tpu.memory_space<smem>>
    %1513 = arith.index_cast %1512 : i32 to index
    %c0_504 = arith.constant 0 : index
    %1514 = vector.load %arg6[%1513, %c0_504] : memref<128x128xf32, #tpu.memory_space<vmem>>, vector<1x128xf32>
    %c251 = arith.constant 251 : index
    %c0_505 = arith.constant 0 : index
    %1515 = vector.load %arg7[%c251, %c0_505] : memref<256x128xf32, #tpu.memory_space<vmem>>, vector<1x128xf32>
    tpu.vector_store %arg7[%c251, %c0_505], %1514 {strides = array<i32>} : memref<256x128xf32, #tpu.memory_space<vmem>>, vector<1x128xf32>,
    %c252_i32 = arith.constant 252 : i32
    %1516 = arith.addi %3, %c252_i32 : i32
    %1517 = arith.index_cast %1516 : i32 to index
    %1518 = memref.load %arg1[%1517] : memref<768xi32, #tpu.memory_space<smem>>
    %1519 = arith.index_cast %1518 : i32 to index
    %c0_506 = arith.constant 0 : index
    %1520 = vector.load %arg6[%1519, %c0_506] : memref<128x128xf32, #tpu.memory_space<vmem>>, vector<1x128xf32>
    %c252 = arith.constant 252 : index
    %c0_507 = arith.constant 0 : index
    %1521 = vector.load %arg7[%c252, %c0_507] : memref<256x128xf32, #tpu.memory_space<vmem>>, vector<1x128xf32>
    tpu.vector_store %arg7[%c252, %c0_507], %1520 {strides = array<i32>} : memref<256x128xf32, #tpu.memory_space<vmem>>, vector<1x128xf32>,
    %c253_i32 = arith.constant 253 : i32
    %1522 = arith.addi %3, %c253_i32 : i32
    %1523 = arith.index_cast %1522 : i32 to index
    %1524 = memref.load %arg1[%1523] : memref<768xi32, #tpu.memory_space<smem>>
    %1525 = arith.index_cast %1524 : i32 to index
    %c0_508 = arith.constant 0 : index
    %1526 = vector.load %arg6[%1525, %c0_508] : memref<128x128xf32, #tpu.memory_space<vmem>>, vector<1x128xf32>
    %c253 = arith.constant 253 : index
    %c0_509 = arith.constant 0 : index
    %1527 = vector.load %arg7[%c253, %c0_509] : memref<256x128xf32, #tpu.memory_space<vmem>>, vector<1x128xf32>
    tpu.vector_store %arg7[%c253, %c0_509], %1526 {strides = array<i32>} : memref<256x128xf32, #tpu.memory_space<vmem>>, vector<1x128xf32>,
    %c254_i32 = arith.constant 254 : i32
    %1528 = arith.addi %3, %c254_i32 : i32
    %1529 = arith.index_cast %1528 : i32 to index
    %1530 = memref.load %arg1[%1529] : memref<768xi32, #tpu.memory_space<smem>>
    %1531 = arith.index_cast %1530 : i32 to index
    %c0_510 = arith.constant 0 : index
    %1532 = vector.load %arg6[%1531, %c0_510] : memref<128x128xf32, #tpu.memory_space<vmem>>, vector<1x128xf32>
    %c254 = arith.constant 254 : index
    %c0_511 = arith.constant 0 : index
    %1533 = vector.load %arg7[%c254, %c0_511] : memref<256x128xf32, #tpu.memory_space<vmem>>, vector<1x128xf32>
    tpu.vector_store %arg7[%c254, %c0_511], %1532 {strides = array<i32>} : memref<256x128xf32, #tpu.memory_space<vmem>>, vector<1x128xf32>,
    %c255_i32 = arith.constant 255 : i32
    %1534 = arith.addi %3, %c255_i32 : i32
    %1535 = arith.index_cast %1534 : i32 to index
    %1536 = memref.load %arg1[%1535] : memref<768xi32, #tpu.memory_space<smem>>
    %1537 = arith.index_cast %1536 : i32 to index
    %c0_512 = arith.constant 0 : index
    %1538 = vector.load %arg6[%1537, %c0_512] : memref<128x128xf32, #tpu.memory_space<vmem>>, vector<1x128xf32>
    %c255 = arith.constant 255 : index
    %c0_513 = arith.constant 0 : index
    %1539 = vector.load %arg7[%c255, %c0_513] : memref<256x128xf32, #tpu.memory_space<vmem>>, vector<1x128xf32>
    tpu.vector_store %arg7[%c255, %c0_513], %1538 {strides = array<i32>} : memref<256x128xf32, #tpu.memory_space<vmem>>, vector<1x128xf32>,
    %c0_514 = arith.constant 0 : index
    %c0_515 = arith.constant 0 : index
    %1540 = vector.load %arg7[%c0_514, %c0_515] : memref<256x128xf32, #tpu.memory_space<vmem>>, vector<256x128xf32>
    %1541 = vector.extract_strided_slice %1540 {offsets = [0, 0], sizes = [256, 64], strides = [1, 1]} : vector<256x128xf32> to vector<256x64xf32>
    %1542 = vector.extract_strided_slice %1540 {offsets = [0, 64], sizes = [256, 64], strides = [1, 1]} : vector<256x128xf32> to vector<256x64xf32>
    %1543 = vector.shape_cast %1542 : vector<256x64xf32> to vector<8x32x64xf32>
    %1544 = vector.shape_cast %1541 : vector<256x64xf32> to vector<8x32x64xf32>
    %cst = arith.constant dense<0.000000e+00> : vector<32x64xf32>
    %1545 = vector.multi_reduction <add>, %1544, %cst [0] : vector<8x32x64xf32> to vector<32x64xf32>
    %c0_516 = arith.constant 0 : index
    %c0_517 = arith.constant 0 : index
    %1546 = vector.load %arg2[%c0_516, %c0_517] : memref<32x256xf32, #tpu.memory_space<vmem>>, vector<32x256xf32>
    %1547 = vector.extract_strided_slice %1546 {offsets = [0, 0], sizes = [32, 192], strides = [1, 1]} : vector<32x256xf32> to vector<32x192xf32>
    %c0_518 = arith.constant 0 : index
    %c0_519 = arith.constant 0 : index
    %1548 = vector.load %arg3[%c0_518, %c0_519] : memref<64x192xf32, #tpu.memory_space<vmem>>, vector<64x192xf32>
    %cst_520 = arith.constant dense<0.000000e+00> : vector<32x192xf32>
    %1549 = tpu.matmul %1545, %1548, %cst_520 {dimension_numbers = #tpu.dot_dimension_numbers<[1], [0], [0], [1], [0, 0, 1, 1], [], []>} : vector<32x64xf32>, vector<64x192xf32>, vector<32x192xf32> -> vector<32x192xf32>
    %1550 = arith.addf %1547, %1549 : vector<32x192xf32>
    %1551 = vector.extract_strided_slice %1550 {offsets = [0, 0], sizes = [32, 128], strides = [1, 1]} : vector<32x192xf32> to vector<32x128xf32>
    %1552 = arith.negf %1551 : vector<32x128xf32>
    %1553 = math.exp %1552 : vector<32x128xf32>
    %cst_521 = arith.constant 1.000000e+00 : f32
    %1554 = vector.broadcast %cst_521 : f32 to vector<32x128xf32>
    %1555 = arith.addf %1554, %1553 : vector<32x128xf32>
    %1556 = arith.divf %1554, %1555 : vector<32x128xf32>
    %1557 = vector.extract_strided_slice %1556 {offsets = [0, 0], sizes = [32, 64], strides = [1, 1]} : vector<32x128xf32> to vector<32x64xf32>
    %1558 = vector.extract_strided_slice %1556 {offsets = [0, 64], sizes = [32, 64], strides = [1, 1]} : vector<32x128xf32> to vector<32x64xf32>
    %1559 = vector.extract_strided_slice %1550 {offsets = [0, 128], sizes = [32, 64], strides = [1, 1]} : vector<32x192xf32> to vector<32x64xf32>
    %1560 = math.tanh %1559 : vector<32x64xf32>
    %1561 = vector.extract_strided_slice %1546 {offsets = [0, 192], sizes = [32, 64], strides = [1, 1]} : vector<32x256xf32> to vector<32x64xf32>
    %c0_522 = arith.constant 0 : index
    %c0_523 = arith.constant 0 : index
    %1562 = vector.load %arg4[%c0_522, %c0_523] : memref<64x64xf32, #tpu.memory_space<vmem>>, vector<64x64xf32>
    %cst_524 = arith.constant dense<0.000000e+00> : vector<256x64xf32>
    %1563 = tpu.matmul %1541, %1562, %cst_524 {dimension_numbers = #tpu.dot_dimension_numbers<[1], [0], [0], [1], [0, 0, 1, 1], [], []>} : vector<256x64xf32>, vector<64x64xf32>, vector<256x64xf32> -> vector<256x64xf32>
    %1564 = vector.shape_cast %1563 : vector<256x64xf32> to vector<8x32x64xf32>
    %1565 = vector.shape_cast %1561 : vector<32x64xf32> to vector<1x32x64xf32>
    %1566 = vector.broadcast %1565 : vector<1x32x64xf32> to vector<8x32x64xf32>
    %1567 = arith.addf %1564, %1566 : vector<8x32x64xf32>
    %1568 = arith.negf %1567 : vector<8x32x64xf32>
    %1569 = math.exp %1568 : vector<8x32x64xf32>
    %cst_525 = arith.constant 1.000000e+00 : f32
    %1570 = vector.broadcast %cst_525 : f32 to vector<8x32x64xf32>
    %1571 = arith.addf %1570, %1569 : vector<8x32x64xf32>
    %1572 = arith.divf %1570, %1571 : vector<8x32x64xf32>
    %1573 = arith.mulf %1572, %1543 : vector<8x32x64xf32>
    %cst_526 = arith.constant dense<0.000000e+00> : vector<32x64xf32>
    %1574 = vector.multi_reduction <add>, %1573, %cst_526 [0] : vector<8x32x64xf32> to vector<32x64xf32>
    %1575 = arith.mulf %1557, %1560 : vector<32x64xf32>
    %1576 = arith.addf %1574, %1575 : vector<32x64xf32>
    %1577 = math.tanh %1576 : vector<32x64xf32>
    %1578 = arith.mulf %1558, %1577 : vector<32x64xf32>
    %1579 = tpu.concatenate %1578, %1576 in 1 : vector<32x64xf32>, vector<32x64xf32> -> vector<32x128xf32>
    %c32_i32_527 = arith.constant 32 : i32
    %1580 = arith.muli %arg0, %c32_i32_527 : i32
    %1581 = tpu.assume_multiple %1580, 32 : i32
    %1582 = arith.index_cast %1581 : i32 to index
    %c0_528 = arith.constant 0 : index
    %1583 = vector.load %arg6[%1582, %c0_528] : memref<128x128xf32, #tpu.memory_space<vmem>>, vector<32x128xf32>
    tpu.vector_store %arg6[%1582, %c0_528], %1579 {strides = array<i32>} : memref<128x128xf32, #tpu.memory_space<vmem>>, vector<32x128xf32>,
    %c0_529 = arith.constant 0 : index
    %c0_530 = arith.constant 0 : index
    %1584 = vector.load %arg5[%c0_529, %c0_530] : memref<32x128xf32, #tpu.memory_space<vmem>>, vector<32x128xf32>
    tpu.vector_store %arg5[%c0_529, %c0_530], %1579 {strides = array<i32>} : memref<32x128xf32, #tpu.memory_space<vmem>>, vector<32x128xf32>,
    return
  }
  func.func @transform_0(%arg0: i32, %arg1: memref<768xi32, #tpu.memory_space<smem>>) -> (i32, i32) {
    %c0_i32 = arith.constant 0 : i32
    %c0_i32_0 = arith.constant 0 : i32
    return %arg0, %c0_i32 : i32, i32
  }
  func.func @transform_1(%arg0: i32, %arg1: memref<768xi32, #tpu.memory_space<smem>>) -> (i32, i32) {
    %c0_i32 = arith.constant 0 : i32
    %c0_i32_0 = arith.constant 0 : i32
    %c0_i32_1 = arith.constant 0 : i32
    return %c0_i32, %c0_i32_0 : i32, i32
  }
  func.func @transform_2(%arg0: i32, %arg1: memref<768xi32, #tpu.memory_space<smem>>) -> (i32, i32) {
    %c0_i32 = arith.constant 0 : i32
    %c0_i32_0 = arith.constant 0 : i32
    %c0_i32_1 = arith.constant 0 : i32
    return %c0_i32, %c0_i32_0 : i32, i32
  }
  func.func @transform_3(%arg0: i32, %arg1: memref<768xi32, #tpu.memory_space<smem>>) -> (i32, i32) {
    %c0_i32 = arith.constant 0 : i32
    %c0_i32_0 = arith.constant 0 : i32
    return %arg0, %c0_i32 : i32, i32
  }
}

</mosaic_0001>

<bundles_post_ra>
// kernel: forward.5
= control target key start
LH: loop header
LB: loop body
LE: loop exit
PB: predicated region body
PF: predicated region fallthrough
CT: control target
= control target key end

     0   :  { %8 = vsyncpa [#allocation3], 0  ;;  %s659_s0 = inlined_call_operand.vmem [shape: f32[96,128], index: 0, kind: input, shape index: {}]   ;;  %s660_s1 = inlined_call_operand.hbm [shape: f32[64,128], index: 1, kind: input, shape index: {}]   ;;  %s661_s2 = inlined_call_operand.vmem [shape: f32[1,128], index: 2, kind: input, shape index: {}]   ;;  %s662_s3 = inlined_call_operand.hbm [shape: f32[96,128], index: 3, kind: output, shape index: {}]  }
   0x1   :  { %9 = vsyncpa [#allocation4], 0 }
   0x2   :  { %11 = vsyncpa [#allocation4 + $0x1], 0  ;;  %s562_s12 = smov 0   ;;  %s564_s13 = smov 0  }
   0x3   :  { %s566_s14 = smov 0   ;;  %s568_s15 = smov 0  }
   0x4 LB: > { %s583_s16 = sadd.s32 4294967295, %s535_s15   ;;  %s341_s17 = sadd.s32 4294967294, %s535_s15   ;;  %s535_s15 = sphi %s568_s15, %s668_s15   ;;  %s531_s14 = sphi %s566_s14, %s667_s14   ;;  %s527_s13 = sphi %s564_s13, %s666_s13   ;;  %s523_s12 = sphi %s562_s12, %s665_s12  }
   0x5   : > { %s587_s18 = sadd.s32 1, %s535_s15   ;;  %s92_s19 = sadd.s32 1, %s531_s14 }
   0x6   : > { %s89_s20 = ssub.s32 %s535_s15, %s587_s18  ;;  %p102_p0 = scmp.ne.s32.totalorder %s531_s14, %s527_s13 }
   0x7   : > { %p90_p1 = scmp.eq.s32.totalorder %s89_s20, 0  ;;  %p103_p2 = scmp.eq.s32.totalorder %s583_s16, 2 }
   0x8   : > { %p108_p3 = scmp.ne.s32.totalorder %s527_s13, %s523_s12  ;;  %p109_p4 = scmp.eq.s32.totalorder %s341_s17, 2 }
   0x9   : > { %s598_s21 = scalar_select %p90_p1, %s531_s14, %s92_s19  }
   0xa   : > { %p600_p5 = por %p103_p2, %p102_p0  ;;  %p604_p6 = por %p109_p4, %p108_p3 }
   0xb   : > { %p342_p7 = scmp.ge.s32.totalorder %s535_s15, 1  ;;  %p116_p8 = scmp.lt.s32.totalorder %s535_s15, 4 }
   0xc   : > { %p398_p9 = scmp.eq.s32.totalorder %s583_s16, 0  ;;  %s127_s26 = sshll.u32 %s660_s1, 4  ;;  %s128_s26 = int_to_ptr.hbm [resolvable:$true] %s127_s26 }
   0xd   : > { %p117_p10 = pnand %p342_p7, %p116_p8  ;;  %s537_s27 = smov [#allocation2]  }
   0xe   : > { %s129_s28 = sshll.u32 %s537_s27, 4  ;;  %s538_s29 = smov 128   ;;  %s130_s28 = int_to_ptr.vmem [resolvable:$true] %s129_s28 }
   0xf   : > { %p390_p11 = pneg %p117_p10  ;;  %s539_s30 = smov 8  }
  0x10   : > { %157 = sbr.rel (%p117_p10) target bundleno = 177 (0xb1), region = 32 }
  0x11   : > { %p391_p12 = pnand %p398_p9, %p390_p11 }
  0x13   : > { %393 = dma.hbm_to_vmem [thread:$0]  (!%p391_p12), %s128_s26, 1024, %s130_s28, [#allocation3], %s538_s29, %s538_s29, %s539_s30  }
  0x15   : > { %514 = dma.done.wait (%p398_p9), [#allocation3], 1024  }
  0x16   : > { %516 = vsyncadd (%p398_p9), [#allocation3], 4294966272  ;;  %s348_s4 = sshll.u32 %s583_s16, 2  ;;  %v200_v0 = vld [vmem:[#allocation2 + $0x38] sm:$0xff]  ;;  %v199_v1 = vld [vmem:[#allocation2 + $0x30] sm:$0xff]  ;;  %vm205_vm0 = vcmask 523264  }
  0x17   : > { %p183_p13 = scmp.lt.s32.totalorder %s348_s4, 11  ;;  %361 = vmatpush.msra.mxu2 %v200_v0  ;;  %362 = vmatpush.msra.mxu3 %v200_v0  ;;  %v198_v2 = vld [vmem:[#allocation2 + $0x28] sm:$0xff]  ;;  %v197_v3 = vld [vmem:[#allocation2 + $0x20] sm:$0xff]  ;;  %v196_v4 = vld [vmem:[#allocation2 + $0x18] sm:$0xff]  ;;  %s179_s9 = sand.u32 1, %s527_s13  }
  0x18   : > { %226 = vmatpush.msra.mxu0 %v200_v0  ;;  %360 = vmatpush.msra.mxu1 %v200_v0  ;;  %v195_v5 = vld [vmem:[#allocation2 + $0x10] sm:$0xff]  ;;  %v194_v6 = vld [vmem:[#allocation2 + $0x8] sm:$0xff]  ;;  %v193_v7 = vld [vmem:[#allocation2] sm:$0xff]  ;;  %s347_s10 = sshll.u32 %s179_s9, 5  ;;  %s359_s11 = sshll.u32 %s583_s16, 5 }
  0x19   : > { %364 = vmatpush.msra.mxu2 %v199_v1  ;;  %365 = vmatpush.msra.mxu3 %v199_v1  ;;  %s670_s4 = smov (!%p183_p13, %s348_s4), 11  ;;  %v438_v12 = vld [vmem:[%s661_s2] ss:$0 sm:$0xff]  ;;  %s263_s25 = scalar_lea.hbm %s662_s3, %s359_s11 }
  0x1a   : > { %227 = vmatpush.msra.mxu0 %v199_v1  ;;  %363 = vmatpush.msra.mxu1 %v199_v1  ;;  %s349_s5 = sshll.u32 %s670_s4, 3  ;;  %s181_s26 = scalar_lea.vmem [#allocation5], %s347_s10 }
  0x1b   : > { %367 = vmatpush.msra.mxu2 %v198_v2  ;;  %368 = vmatpush.msra.mxu3 %v198_v2  ;;  %s186_s8 = scalar_lea.vmem %s659_s0, %s349_s5  ;;  %s264_s27 = sshll.u32 %s181_s26, 4  ;;  %s265_s27 = int_to_ptr.vmem [resolvable:$true] %s264_s27 }
  0x1c   : > { %228 = vmatpush.msra.mxu0 %v198_v2  ;;  %366 = vmatpush.msra.mxu1 %v198_v2  ;;  %v191_v8 = vld [vmem:[%s186_s8 + $0x10] sm:$0xff]  ;;  %v192_v9 = vld [vmem:[%s186_s8 + $0x18] sm:$0xff]  ;;  %v189_v10 = vld [vmem:[%s186_s8] sm:$0xff]  ;;  %s266_s28 = sshll.u32 %s263_s25, 4  ;;  %s252_s16 = scalar_lea.sflag [#allocation4], %s179_s9  ;;  %s267_s28 = int_to_ptr.hbm [resolvable:$true] %s266_s28 }
  0x1d   : > { %370 = vmatpush.msra.mxu2 %v197_v3  ;;  %371 = vmatpush.msra.mxu3 %v197_v3  ;;  %v190_v11 = vld [vmem:[%s186_s8 + $0x8] sm:$0xff]  ;;  %s483_s29 = sshra.s32 %s267_s28, 4  ;;  %s489_s6 = scalar_lea.hbm %s662_s3, 96  ;;  %s484_s29 = int_to_ptr.hbm [resolvable:$true] %s483_s29 }
  0x1e   : > { %229 = vmatpush.msra.mxu0 %v197_v3  ;;  %369 = vmatpush.msra.mxu1 %v197_v3  ;;  %s485_s30 = scalar_lea.hbm %s484_s29, 32  ;;  %p490_p3 = scmp.lt.s32.totalorder %s484_s29, %s662_s3 }
  0x1f   : > { %373 = vmatpush.msra.mxu2 %v196_v4  ;;  %374 = vmatpush.msra.mxu3 %v196_v4  ;;  %p486_p0 = scmp.ne.s32.totalorder %s484_s29, %s485_s30  ;;  %p491_p4 = scmp.lt.s32.totalorder %s489_s6, %s485_s30 }
  0x20   : > { %230 = vmatpush.msra.mxu0 %v196_v4  ;;  %372 = vmatpush.msra.mxu1 %v196_v4 }
  0x21   : > { %376 = vmatpush.msra.mxu2 %v195_v5  ;;  %377 = vmatpush.msra.mxu3 %v195_v5  ;;  %p487_p1 = pnand %p486_p0, %p600_p5  ;;  %p492_p7 = por %p491_p4, %p490_p3 }
  0x22   : > { %231 = vmatpush.msra.mxu0 %v195_v5  ;;  %375 = vmatpush.msra.mxu1 %v195_v5 }
  0x23   : > { %379 = vmatpush.msra.mxu2 %v194_v6  ;;  %380 = vmatpush.msra.mxu3 %v194_v6  ;;  %p488_p2 = pneg %p487_p1 }
  0x24   : > { %232 = vmatpush.msra.mxu0 %v194_v6  ;;  %378 = vmatpush.msra.mxu1 %v194_v6 }
  0x25   : > { %382 = vmatpush.msra.mxu2 %v193_v7  ;;  %383 = vmatpush.msra.mxu3 %v193_v7  ;;  %p493_p8 = pnand %p492_p7, %p488_p2 }
  0x26   : > { %352 = vmatmul.msk.f32.vlgmr.msra.gmra.mxu2 %vm205_vm0, %v191_v8  ;;  %353 = vmatmul.msk.f32.vlgmr.msra.gmra.mxu3 %vm205_vm0, %v192_v9 }
  0x27   : > { %233 = vmatpush.msra.mxu0 %v193_v7  ;;  %381 = vmatpush.msra.mxu1 %v193_v7 }
  0x28   : > { %350 = vmatmul.msk.f32.vlgmr.msra.gmra.mxu0 %vm205_vm0, %v189_v10  ;;  %351 = vmatmul.msk.f32.vlgmr.msra.gmra.mxu1 %vm205_vm0, %v190_v11 }
  0xa5   : > { %v235_v13 = vpop.f32.mrf.mxu0  ;;  %v238_v14 = vpop.f32.mrf.mxu1 }
  0xa6   : > { %v236_v15 = vadd.f32 %v438_v12, %v235_v13  ;;  %v239_v16 = vadd.f32 %v438_v12, %v238_v14 }
  0xa8   : > { %247 = vst [vmem:[%s181_s26] sm:$0xff] %v236_v15 }
  0xa9   : > { %248 = vst [vmem:[%s181_s26 + $0x8] sm:$0xff] %v239_v16  ;;  %v241_v17 = vpop.f32.mrf.mxu2  ;;  %v244_v18 = vpop.f32.mrf.mxu3 }
  0xaa   : > { %v242_v19 = vadd.f32 %v438_v12, %v241_v17  ;;  %v245_v20 = vadd.f32 %v438_v12, %v244_v18 }
  0xac   : > { %249 = vst [vmem:[%s181_s26 + $0x10] sm:$0xff] %v242_v19 }
  0xad   : > { %250 = vst [vmem:[%s181_s26 + $0x18] sm:$0xff] %v245_v20 }
  0xae   : > { %496 = shalt.err (!%p493_p8)
}
  0xaf   : > { %s540_s9 = smov 128   ;;  %s541_s10 = smov 8  }
  0xb0   : > { %388 = dma.vmem_to_hbm [thread:$0]  (%p600_p5), %s265_s27, 512, %s267_s28, %s252_s16, %s540_s9, %s540_s9, %s541_s10  }
  0xb1 PF: > { %p400_p9 = scmp.ge.s32.totalorder %s535_s15, 2  ;;  %s281_s11 = sand.u32 1, %s523_s12  }
  0xb2   : > { %s282_s17 = scalar_lea.sflag [#allocation4], %s281_s11 }
  0xb3   : > { %p395_p10 = pnand %p400_p9, %p604_p6 }
  0xb5   : > { %p396_p11 = pneg %p395_p10 }
  0xb7   : > { %518 = dma.done.wait (%p396_p11), %s282_s17, 512  }
  0xb8   : > { %520 = vsyncadd (%p396_p11), %s282_s17, 4294966784  ;;  %p14_p12 = scmp.ge.s32.totalorder %s587_s18, 5   ;;  %s665_s12 = smov %s527_s13 }
  0xb9   : > { %s666_s13 = smov %s531_s14  ;;  %s667_s14 = smov %s598_s21 }
  0xba   : > { %s668_s15 = smov %s587_s18  ;;  %16 = sbr.rel (!%p14_p12) target bundleno = 4 (0x4), region = 72 }
  0xbf   :  { %288 = vsyncpa [#allocation3], 1 }
  0xc0   :  { %290 = vsyncpa [#allocation3 + $0x1], 1 }
  0xc1   :  { %291 = vsyncpa [#allocation4], 1 }
  0xc2   :  { %293 = vsyncpa [#allocation4 + $0x1], 1 }

// kernel: forward.3
= control target key start
LH: loop header
LB: loop body
LE: loop exit
PB: predicated region body
PF: predicated region fallthrough
CT: control target
= control target key end

     0   :  { %8 = vsyncpa [#allocation3], 0  ;;  %s1072_s0 = inlined_call_operand.hbm [shape: f32[96,512], index: 0, kind: input, shape index: {}]   ;;  %s1073_s1 = inlined_call_operand.hbm [shape: f32[512,256], index: 1, kind: input, shape index: {}]   ;;  %s1074_s2 = inlined_call_operand.vmem [shape: f32[1,256], index: 2, kind: input, shape index: {}]   ;;  %s1075_s3 = inlined_call_operand.vmem [shape: f32[96,256], index: 3, kind: output, shape index: {}]  }
   0x1   :  { %10 = vsyncpa [#allocation3 + $0x1], 0 }
   0x2   :  { %11 = vsyncpa [#allocation5], 0  ;;  %s883_s12 = smov 0   ;;  %s885_s13 = smov 0  }
   0x3   :  { %s887_s14 = smov 0   ;;  %s889_s15 = smov 0  }
   0x4 LB: > { %s684_s16 = sadd.s32 4294967295, %s856_s15   ;;  %p37_p0 = scmp.ne.s32.totalorder %s848_s13, %s844_s12  ;;  %s856_s15 = sphi %s889_s15, %s1083_s15   ;;  %s852_s14 = sphi %s887_s14, %s1082_s14   ;;  %s848_s13 = sphi %s885_s13, %s1081_s13   ;;  %s844_s12 = sphi %s883_s12, %s1080_s12  }
   0x5   : > { %p905_p1 = scmp.eq.s32.totalorder %s684_s16, 0  ;;  %p686_p2 = scmp.ge.s32.totalorder %s856_s15, 1 }
   0x6   : > { %p116_p3 = scmp.lt.s32.totalorder %s856_s15, 4  ;;  %s127_s21 = sshll.u32 %s1073_s1, 4  ;;  %s128_s21 = int_to_ptr.hbm [resolvable:$true] %s127_s21 }
   0x7   : > { %p913_p4 = por %p905_p1, %p37_p0  ;;  %s858_s23 = smov [#allocation4]  }
   0x8   : > { %p920_p5 = pnand %p686_p2, %p116_p3  ;;  %s129_s24 = sshll.u32 %s858_s23, 4  ;;  %s130_s24 = int_to_ptr.vmem [resolvable:$true] %s129_s24 }
   0x9   : > { %s929_s25 = sadd.s32 1, %s856_s15   ;;  %s859_s26 = smov 256  }
   0xa   : > { %p710_p6 = pneg %p920_p5  ;;  %s860_s27 = smov 16  }
   0xb   : > { %s21_s28 = ssub.s32 %s856_s15, %s929_s25  ;;  %s24_s29 = sadd.s32 1, %s852_s14 }
   0xc   : > { %p711_p7 = pnand %p710_p6, %p905_p1  ;;  %p22_p8 = scmp.eq.s32.totalorder %s21_s28, 0 }
   0xd   : > { %p31_p9 = scmp.ne.s32.totalorder %s852_s14, %s848_s13  ;;  %p32_p10 = scmp.eq.s32.totalorder %s856_s15, 0 }
   0xe   : > { %713 = dma.hbm_to_vmem [thread:$0]  (!%p711_p7), %s128_s21, 16384, %s130_s24, [#allocation5], %s859_s26, %s859_s26, %s860_s27  }
   0xf   : > { %p719_p11 = scmp.lt.s32.totalorder %s856_s15, 3  ;;  %p33_p12 = por %p32_p10, %p31_p9 }
  0x10   : > { %s939_s30 = scalar_select %p22_p8, %s852_s14, %s24_s29  }
  0x11   : > { %s146_s4 = sand.u32 1, %s852_s14   ;;  %s702_s6 = sshll.u32 %s856_s15, 7 }
  0x12   : > { %s689_s5 = sshll.u32 %s146_s4, 7  ;;  %s156_s9 = scalar_lea.hbm %s1072_s0, %s702_s6 }
  0x13   : > { %s150_s10 = scalar_lea.vmem [#allocation2], %s689_s5  ;;  %s157_s12 = sshll.u32 %s156_s9, 4  ;;  %s158_s12 = int_to_ptr.hbm [resolvable:$true] %s157_s12 }
  0x14   : > { %s159_s11 = sshll.u32 %s150_s10, 4  ;;  %p946_p13 = pnand %p719_p11, %p33_p12  ;;  %s160_s11 = int_to_ptr.vmem [resolvable:$true] %s159_s11 }
  0x15   : > { %s147_s20 = scalar_lea.sflag [#allocation3], %s146_s4  ;;  %s788_s21 = sshra.s32 %s158_s12, 4  ;;  %s789_s21 = int_to_ptr.hbm [resolvable:$true] %s788_s21 }
  0x16   : > { %s790_s23 = scalar_lea.hbm %s789_s21, 128  ;;  %p792_p2 = pneg %p946_p13 }
  0x17   : > { %p791_p0 = scmp.ne.s32.totalorder %s789_s21, %s790_s23  ;;  %s795_s27 = scalar_lea.hbm %s1072_s0, 384 }
  0x18   : > { %p796_p7 = scmp.lt.s32.totalorder %s789_s21, %s1072_s0  ;;  %p797_p8 = scmp.lt.s32.totalorder %s795_s27, %s790_s23 }
  0x19   : > { %p793_p3 = pnand %p792_p2, %p791_p0 }
  0x1a   : > { %p798_p9 = por %p797_p8, %p796_p7 }
  0x1b   : > { %p794_p6 = pneg %p793_p3 }
  0x1d   : > { %p799_p10 = pnand %p798_p9, %p794_p6 }
  0x1f   : > { %802 = shalt.err (!%p799_p10)
}
  0x20   : > { %s861_s4 = smov 512   ;;  %s862_s5 = smov 32  }
  0x21   : > { %717 = dma.hbm_to_vmem [thread:$0]  (!%p946_p13), %s158_s12, 2048, %s160_s11, %s147_s20, %s861_s4, %s861_s4, %s862_s5  }
  0x22   : > { %171 = sbr.rel (%p920_p5) target bundleno = 276 (0x114), region = 32  ;;  %s173_s6 = sand.u32 (!%p920_p5), 1, %s848_s13  }
  0x23   : > { %s694_s7 = sshll.u32 (!%p920_p5), %s173_s6, 7  ;;  %s174_s8 = scalar_lea.sflag (!%p920_p5), [#allocation3], %s173_s6 }
  0x24   : > { %s963_s9 = scalar_lea.vmem (!%p920_p5), [#allocation2], %s694_s7 }
  0x27   : > { %835 = dma.done.wait (%p913_p4), %s174_s8, 2048  }
  0x28   : > { %837 = vsyncadd (%p913_p4), %s174_s8, 4294965248 }
  0x29   : > { %839 = dma.done.wait (%p905_p1), [#allocation5], 16384  }
  0x2a   : > { %841 = vsyncadd (%p905_p1), [#allocation5], 4294950912  ;;  %v325_v0 = vld [vmem:[#allocation4 + $0x2f0] sm:$0xff]  ;;  %v323_v2 = vld [vmem:[#allocation4 + $0x2e0] sm:$0xff]  ;;  %s696_s22 = sshll.u32 %s684_s16, 2 }
  0x2b   : > { %v261_v1 = vld [vmem:[#allocation4 + $0xf0] sm:$0xff]  ;;  %423 = vmatpush.msra.mxu2 %v325_v0  ;;  %v259_v4 = vld [vmem:[#allocation4 + $0xe0] sm:$0xff]  ;;  %v326_v0 = vld [vmem:[#allocation4 + $0x2f8] sm:$0xff]  ;;  %p209_p1 = scmp.lt.s32.totalorder %s696_s22, 11 }
  0x2c   : > { %365 = vmatpush.msra.mxu0 %v261_v1  ;;  %v357_v3 = vld [vmem:[#allocation4 + $0x3f0] sm:$0xff]  ;;  %v355_v7 = vld [vmem:[#allocation4 + $0x3e0] sm:$0xff] }
  0x2d   : > { %v293_v5 = vld [vmem:[#allocation4 + $0x1f0] sm:$0xff]  ;;  %452 = vmatpush.msra.mxu3 %v357_v3  ;;  %424 = vmatpush.msra.mxu2 %v323_v2  ;;  %v291_v9 = vld [vmem:[#allocation4 + $0x1e0] sm:$0xff]  ;;  %v980_v2 = vld [vmem:[%s963_s9 + $0x18] sm:$0xff]  ;;  %s1085_s22 = smov (!%p209_p1, %s696_s22), 11 }
  0x2e   : > { %394 = vmatpush.msra.mxu1 %v293_v5  ;;  %v321_v6 = vld [vmem:[#allocation4 + $0x2d0] sm:$0xff]  ;;  %366 = vmatpush.msra.mxu0 %v259_v4  ;;  %v319_v11 = vld [vmem:[#allocation4 + $0x2c0] sm:$0xff]  ;;  %v262_v3 = vld [vmem:[#allocation4 + $0xf8] sm:$0xff]  ;;  %s703_s10 = sshll.u32 %s1085_s22, 4 }
  0x2f   : > { %v257_v8 = vld [vmem:[#allocation4 + $0xd0] sm:$0xff]  ;;  %453 = vmatpush.msra.mxu3 %v355_v7  ;;  %v255_v12 = vld [vmem:[#allocation4 + $0xc0] sm:$0xff]  ;;  %425 = vmatpush.msra.mxu2 %v321_v6  ;;  %v324_v4 = vld [vmem:[#allocation4 + $0x2e8] sm:$0xff]  ;;  %s1049_s19 = scalar_lea.vmem %s1075_s3, %s703_s10 }
  0x30   : > { %v353_v10 = vld [vmem:[#allocation4 + $0x3d0] sm:$0xff]  ;;  %395 = vmatpush.msra.mxu1 %v291_v9  ;;  %367 = vmatpush.msra.mxu0 %v257_v8  ;;  %v351_v14 = vld [vmem:[#allocation4 + $0x3c0] sm:$0xff]  ;;  %v358_v5 = vld [vmem:[#allocation4 + $0x3f8] sm:$0xff] }
  0x31   : > { %v289_v13 = vld [vmem:[#allocation4 + $0x1d0] sm:$0xff]  ;;  %v287_v15 = vld [vmem:[#allocation4 + $0x1c0] sm:$0xff]  ;;  %454 = vmatpush.msra.mxu3 %v353_v10  ;;  %426 = vmatpush.msra.mxu2 %v319_v11  ;;  %v260_v7 = vld [vmem:[#allocation4 + $0xe8] sm:$0xff] }
  0x32   : > { %396 = vmatpush.msra.mxu1 %v289_v13  ;;  %v317_v16 = vld [vmem:[#allocation4 + $0x2b0] sm:$0xff]  ;;  %368 = vmatpush.msra.mxu0 %v255_v12  ;;  %v315_v20 = vld [vmem:[#allocation4 + $0x2a0] sm:$0xff]  ;;  %v986_v8 = vld [vmem:[%s963_s9 + $0x8] sm:$0xff] }
  0x33   : > { %v253_v17 = vld [vmem:[#allocation4 + $0xb0] sm:$0xff]  ;;  %455 = vmatpush.msra.mxu3 %v351_v14  ;;  %v251_v21 = vld [vmem:[#allocation4 + $0xa0] sm:$0xff]  ;;  %427 = vmatpush.msra.mxu2 %v317_v16  ;;  %v322_v9 = vld [vmem:[#allocation4 + $0x2d8] sm:$0xff] }
  0x34   : > { %v349_v18 = vld [vmem:[#allocation4 + $0x3b0] sm:$0xff]  ;;  %397 = vmatpush.msra.mxu1 %v287_v15  ;;  %369 = vmatpush.msra.mxu0 %v253_v17  ;;  %v347_v22 = vld [vmem:[#allocation4 + $0x3a0] sm:$0xff]  ;;  %v294_v10 = vld [vmem:[#allocation4 + $0x1f8] sm:$0xff] }
  0x35   : > { %v285_v19 = vld [vmem:[#allocation4 + $0x1b0] sm:$0xff]  ;;  %v283_v23 = vld [vmem:[#allocation4 + $0x1a0] sm:$0xff]  ;;  %456 = vmatpush.msra.mxu3 %v349_v18  ;;  %428 = vmatpush.msra.mxu2 %v315_v20  ;;  %v356_v11 = vld [vmem:[#allocation4 + $0x3e8] sm:$0xff] }
  0x36   : > { %398 = vmatpush.msra.mxu1 %v285_v19  ;;  %v313_v24 = vld [vmem:[#allocation4 + $0x290] sm:$0xff]  ;;  %370 = vmatpush.msra.mxu0 %v251_v21  ;;  %v311_v28 = vld [vmem:[#allocation4 + $0x280] sm:$0xff]  ;;  %v258_v12 = vld [vmem:[#allocation4 + $0xd8] sm:$0xff] }
  0x37   : > { %v249_v25 = vld [vmem:[#allocation4 + $0x90] sm:$0xff]  ;;  %457 = vmatpush.msra.mxu3 %v347_v22  ;;  %v247_v29 = vld [vmem:[#allocation4 + $0x80] sm:$0xff]  ;;  %429 = vmatpush.msra.mxu2 %v313_v24  ;;  %v320_v13 = vld [vmem:[#allocation4 + $0x2c8] sm:$0xff] }
  0x38   : > { %v345_v26 = vld [vmem:[#allocation4 + $0x390] sm:$0xff]  ;;  %399 = vmatpush.msra.mxu1 %v283_v23  ;;  %371 = vmatpush.msra.mxu0 %v249_v25  ;;  %v343_v30 = vld [vmem:[#allocation4 + $0x380] sm:$0xff]  ;;  %v292_v14 = vld [vmem:[#allocation4 + $0x1e8] sm:$0xff] }
  0x39   : > { %v281_v27 = vld [vmem:[#allocation4 + $0x190] sm:$0xff]  ;;  %v279_v31 = vld [vmem:[#allocation4 + $0x180] sm:$0xff]  ;;  %458 = vmatpush.msra.mxu3 %v345_v26  ;;  %430 = vmatpush.msra.mxu2 %v311_v28  ;;  %v354_v15 = vld [vmem:[#allocation4 + $0x3d8] sm:$0xff] }
  0x3a   : > { %400 = vmatpush.msra.mxu1 %v281_v27  ;;  %v309_v32 = vld [vmem:[#allocation4 + $0x270] sm:$0xff]  ;;  %372 = vmatpush.msra.mxu0 %v247_v29  ;;  %v307_v36 = vld [vmem:[#allocation4 + $0x260] sm:$0xff]  ;;  %v256_v17 = vld [vmem:[#allocation4 + $0xc8] sm:$0xff] }
  0x3b   : > { %v245_v33 = vld [vmem:[#allocation4 + $0x70] sm:$0xff]  ;;  %459 = vmatpush.msra.mxu3 %v343_v30  ;;  %v243_v37 = vld [vmem:[#allocation4 + $0x60] sm:$0xff]  ;;  %431 = vmatpush.msra.mxu2 %v309_v32  ;;  %v290_v18 = vld [vmem:[#allocation4 + $0x1d8] sm:$0xff] }
  0x3c   : > { %v341_v34 = vld [vmem:[#allocation4 + $0x370] sm:$0xff]  ;;  %401 = vmatpush.msra.mxu1 %v279_v31  ;;  %373 = vmatpush.msra.mxu0 %v245_v33  ;;  %v339_v38 = vld [vmem:[#allocation4 + $0x360] sm:$0xff]  ;;  %v318_v19 = vld [vmem:[#allocation4 + $0x2b8] sm:$0xff] }
  0x3d   : > { %v277_v35 = vld [vmem:[#allocation4 + $0x170] sm:$0xff]  ;;  %v275_v39 = vld [vmem:[#allocation4 + $0x160] sm:$0xff]  ;;  %460 = vmatpush.msra.mxu3 %v341_v34  ;;  %432 = vmatpush.msra.mxu2 %v307_v36  ;;  %v352_v20 = vld [vmem:[#allocation4 + $0x3c8] sm:$0xff] }
  0x3e   : > { %402 = vmatpush.msra.mxu1 %v277_v35  ;;  %v305_v40 = vld [vmem:[#allocation4 + $0x250] sm:$0xff]  ;;  %374 = vmatpush.msra.mxu0 %v243_v37  ;;  %v303_v44 = vld [vmem:[#allocation4 + $0x240] sm:$0xff]  ;;  %v997_v22 = vld [vmem:[%s963_s9 + $0x38] sm:$0xff] }
  0x3f   : > { %v241_v41 = vld [vmem:[#allocation4 + $0x50] sm:$0xff]  ;;  %461 = vmatpush.msra.mxu3 %v339_v38  ;;  %v239_v45 = vld [vmem:[#allocation4 + $0x40] sm:$0xff]  ;;  %433 = vmatpush.msra.mxu2 %v305_v40  ;;  %v254_v23 = vld [vmem:[#allocation4 + $0xb8] sm:$0xff] }
  0x40   : > { %v337_v42 = vld [vmem:[#allocation4 + $0x350] sm:$0xff]  ;;  %403 = vmatpush.msra.mxu1 %v275_v39  ;;  %375 = vmatpush.msra.mxu0 %v241_v41  ;;  %v335_v46 = vld [vmem:[#allocation4 + $0x340] sm:$0xff]  ;;  %v288_v24 = vld [vmem:[#allocation4 + $0x1c8] sm:$0xff] }
  0x41   : > { %v273_v43 = vld [vmem:[#allocation4 + $0x150] sm:$0xff]  ;;  %v271_v47 = vld [vmem:[#allocation4 + $0x140] sm:$0xff]  ;;  %462 = vmatpush.msra.mxu3 %v337_v42  ;;  %434 = vmatpush.msra.mxu2 %v303_v44  ;;  %v316_v25 = vld [vmem:[#allocation4 + $0x2a8] sm:$0xff] }
  0x42   : > { %404 = vmatpush.msra.mxu1 %v273_v43  ;;  %v301_v48 = vld [vmem:[#allocation4 + $0x230] sm:$0xff]  ;;  %376 = vmatpush.msra.mxu0 %v239_v45  ;;  %v299_v52 = vld [vmem:[#allocation4 + $0x220] sm:$0xff]  ;;  %v350_v26 = vld [vmem:[#allocation4 + $0x3b8] sm:$0xff] }
  0x43   : > { %v237_v49 = vld [vmem:[#allocation4 + $0x30] sm:$0xff]  ;;  %463 = vmatpush.msra.mxu3 %v335_v46  ;;  %v235_v53 = vld [vmem:[#allocation4 + $0x20] sm:$0xff]  ;;  %435 = vmatpush.msra.mxu2 %v301_v48  ;;  %v1001_v27 = vld [vmem:[%s963_s9 + $0x28] sm:$0xff] }
  0x44   : > { %v333_v50 = vld [vmem:[#allocation4 + $0x330] sm:$0xff]  ;;  %405 = vmatpush.msra.mxu1 %v271_v47  ;;  %377 = vmatpush.msra.mxu0 %v237_v49  ;;  %v331_v54 = vld [vmem:[#allocation4 + $0x320] sm:$0xff]  ;;  %v252_v28 = vld [vmem:[#allocation4 + $0xa8] sm:$0xff] }
  0x45   : > { %v269_v51 = vld [vmem:[#allocation4 + $0x130] sm:$0xff]  ;;  %v267_v55 = vld [vmem:[#allocation4 + $0x120] sm:$0xff]  ;;  %464 = vmatpush.msra.mxu3 %v333_v50  ;;  %436 = vmatpush.msra.mxu2 %v299_v52  ;;  %v286_v29 = vld [vmem:[#allocation4 + $0x1b8] sm:$0xff] }
  0x46   : > { %406 = vmatpush.msra.mxu1 %v269_v51  ;;  %v297_v56 = vld [vmem:[#allocation4 + $0x210] sm:$0xff]  ;;  %378 = vmatpush.msra.mxu0 %v235_v53  ;;  %v295_v60 = vld [vmem:[#allocation4 + $0x200] sm:$0xff]  ;;  %v314_v30 = vld [vmem:[#allocation4 + $0x298] sm:$0xff] }
  0x47   : > { %v233_v57 = vld [vmem:[#allocation4 + $0x10] sm:$0xff]  ;;  %465 = vmatpush.msra.mxu3 %v331_v54  ;;  %v231_v61 = vld [vmem:[#allocation4] sm:$0xff]  ;;  %437 = vmatpush.msra.mxu2 %v297_v56  ;;  %v348_v31 = vld [vmem:[#allocation4 + $0x3a8] sm:$0xff] }
  0x48   : > { %v329_v58 = vld [vmem:[#allocation4 + $0x310] sm:$0xff]  ;;  %407 = vmatpush.msra.mxu1 %v267_v55  ;;  %379 = vmatpush.msra.mxu0 %v233_v57  ;;  %v327_v63 = vld [vmem:[#allocation4 + $0x300] sm:$0xff]  ;;  %v250_v32 = vld [vmem:[#allocation4 + $0x98] sm:$0xff] }
  0x49   : > { %v265_v59 = vld [vmem:[#allocation4 + $0x110] sm:$0xff]  ;;  %466 = vmatpush.msra.mxu3 %v329_v58  ;;  %v977_v1 = vld [vmem:[%s963_s9] sm:$0xff]  ;;  %438 = vmatpush.msra.mxu2 %v295_v60  ;;  %v284_v33 = vld [vmem:[#allocation4 + $0x1a8] sm:$0xff] }
  0x4a   : > { %v974_v62 = vld [vmem:[%s963_s9 + $0x10] sm:$0xff]  ;;  %408 = vmatpush.msra.mxu1 %v265_v59  ;;  %380 = vmatpush.msra.mxu0 %v231_v61  ;;  %v263_v6 = vld [vmem:[#allocation4 + $0x100] sm:$0xff]  ;;  %v312_v34 = vld [vmem:[#allocation4 + $0x288] sm:$0xff] }
  0x4b   : > { %439 = vmatmul.f32.vlgmr.msra.gmra.mxu2 %v974_v62  ;;  %467 = vmatpush.msra.mxu3 %v327_v63  ;;  %v990_v16 = vld [vmem:[%s963_s9 + $0x30] sm:$0xff]  ;;  %v993_v21 = vld [vmem:[%s963_s9 + $0x20] sm:$0xff]  ;;  %v346_v35 = vld [vmem:[#allocation4 + $0x398] sm:$0xff] }
  0x4c   : > { %539 = vmatpush.msrb.mxu2 %v326_v0  ;;  %381 = vmatmul.f32.vlgmr.msra.gmra.mxu0 %v977_v1  ;;  %v1006_v36 = vld [vmem:[%s963_s9 + $0x50] sm:$0xff]  ;;  %v248_v37 = vld [vmem:[#allocation4 + $0x88] sm:$0xff]  ;;  %v282_v38 = vld [vmem:[#allocation4 + $0x198] sm:$0xff] }
  0x4d   : > { %468 = vmatmul.f32.vlgmr.msra.gmra.mxu3 %v980_v2  ;;  %481 = vmatpush.msrb.mxu0 %v262_v3  ;;  %v310_v39 = vld [vmem:[#allocation4 + $0x278] sm:$0xff]  ;;  %v344_v40 = vld [vmem:[#allocation4 + $0x388] sm:$0xff]  ;;  %v1009_v41 = vld [vmem:[%s963_s9 + $0x40] sm:$0xff] }
  0x4e   : > { %540 = vmatpush.msrb.mxu2 %v324_v4  ;;  %568 = vmatpush.msrb.mxu3 %v358_v5  ;;  %v1013_v42 = vld [vmem:[%s963_s9 + $0x58] sm:$0xff]  ;;  %v280_v44 = vld [vmem:[#allocation4 + $0x188] sm:$0xff]  ;;  %v1022_v56 = vld [vmem:[%s963_s9 + $0x70] sm:$0xff] }
  0x4f   : > { %409 = vmatpush.msra.mxu1 %v263_v6  ;;  %482 = vmatpush.msrb.mxu0 %v260_v7  ;;  %v246_v43 = vld [vmem:[#allocation4 + $0x78] sm:$0xff]  ;;  %v308_v45 = vld [vmem:[#allocation4 + $0x268] sm:$0xff]  ;;  %v227_v61 = vld [vmem:[%s963_s9 + $0x60] sm:$0xff] }
  0x50   : > { %410 = vmatmul.f32.vlgmr.msra.gmra.mxu1 %v986_v8  ;;  %541 = vmatpush.msrb.mxu2 %v322_v9  ;;  %v342_v46 = vld [vmem:[#allocation4 + $0x378] sm:$0xff]  ;;  %v1017_v47 = vld [vmem:[%s963_s9 + $0x48] sm:$0xff] }
  0x51   : > { %510 = vmatpush.msrb.mxu1 %v294_v10  ;;  %569 = vmatpush.msrb.mxu3 %v356_v11  ;;  %v244_v48 = vld [vmem:[#allocation4 + $0x68] sm:$0xff]  ;;  %v278_v49 = vld [vmem:[#allocation4 + $0x178] sm:$0xff] }
  0x52   : > { %483 = vmatpush.msrb.mxu0 %v258_v12  ;;  %542 = vmatpush.msrb.mxu2 %v320_v13  ;;  %v306_v50 = vld [vmem:[#allocation4 + $0x258] sm:$0xff]  ;;  %v340_v51 = vld [vmem:[#allocation4 + $0x368] sm:$0xff] }
  0x53   : > { %511 = vmatpush.msrb.mxu1 %v292_v14  ;;  %570 = vmatpush.msrb.mxu3 %v354_v15  ;;  %v242_v52 = vld [vmem:[#allocation4 + $0x58] sm:$0xff]  ;;  %v276_v53 = vld [vmem:[#allocation4 + $0x168] sm:$0xff] }
  0x54   : > { %442 = vmatmul.f32.gmra.mxu2 %v990_v16  ;;  %484 = vmatpush.msrb.mxu0 %v256_v17  ;;  %v304_v54 = vld [vmem:[#allocation4 + $0x248] sm:$0xff]  ;;  %v338_v55 = vld [vmem:[#allocation4 + $0x358] sm:$0xff] }
  0x55   : > { %512 = vmatpush.msrb.mxu1 %v290_v18  ;;  %543 = vmatpush.msrb.mxu2 %v318_v19  ;;  %v240_v57 = vld [vmem:[#allocation4 + $0x48] sm:$0xff]  ;;  %v274_v58 = vld [vmem:[#allocation4 + $0x158] sm:$0xff] }
  0x56   : > { %571 = vmatpush.msrb.mxu3 %v352_v20  ;;  %384 = vmatmul.f32.gmra.mxu0 %v993_v21  ;;  %v302_v59 = vld [vmem:[#allocation4 + $0x238] sm:$0xff]  ;;  %v336_v60 = vld [vmem:[#allocation4 + $0x348] sm:$0xff] }
  0x57   : > { %471 = vmatmul.f32.gmra.mxu3 %v997_v22  ;;  %485 = vmatpush.msrb.mxu0 %v254_v23  ;;  %v230_v63 = vld [vmem:[%s963_s9 + $0x78] sm:$0xff]  ;;  %v272_v3 = vld [vmem:[#allocation4 + $0x148] sm:$0xff] }
  0x58   : > { %513 = vmatpush.msrb.mxu1 %v288_v24  ;;  %544 = vmatpush.msrb.mxu2 %v316_v25  ;;  %v238_v0 = vld [vmem:[#allocation4 + $0x38] sm:$0xff]  ;;  %v300_v4 = vld [vmem:[#allocation4 + $0x228] sm:$0xff] }
  0x59   : > { %572 = vmatpush.msrb.mxu3 %v350_v26  ;;  %413 = vmatmul.f32.gmra.mxu1 %v1001_v27  ;;  %v334_v5 = vld [vmem:[#allocation4 + $0x338] sm:$0xff]  ;;  %v228_v6 = vld [vmem:[%s963_s9 + $0x68] sm:$0xff] }
  0x5a   : > { %486 = vmatpush.msrb.mxu0 %v252_v28  ;;  %514 = vmatpush.msrb.mxu1 %v286_v29  ;;  %v236_v7 = vld [vmem:[#allocation4 + $0x28] sm:$0xff]  ;;  %v270_v9 = vld [vmem:[#allocation4 + $0x138] sm:$0xff] }
  0x5b   : > { %545 = vmatpush.msrb.mxu2 %v314_v30  ;;  %573 = vmatpush.msrb.mxu3 %v348_v31  ;;  %v298_v10 = vld [vmem:[#allocation4 + $0x218] sm:$0xff]  ;;  %v332_v11 = vld [vmem:[#allocation4 + $0x328] sm:$0xff] }
  0x5c   : > { %487 = vmatpush.msrb.mxu0 %v250_v32  ;;  %515 = vmatpush.msrb.mxu1 %v284_v33  ;;  %v234_v12 = vld [vmem:[#allocation4 + $0x18] sm:$0xff]  ;;  %v268_v13 = vld [vmem:[#allocation4 + $0x128] sm:$0xff] }
  0x5d   : > { %546 = vmatpush.msrb.mxu2 %v312_v34  ;;  %574 = vmatpush.msrb.mxu3 %v346_v35  ;;  %v296_v14 = vld [vmem:[#allocation4 + $0x208] sm:$0xff]  ;;  %v330_v15 = vld [vmem:[#allocation4 + $0x318] sm:$0xff] }
  0x5e   : > { %445 = vmatmul.f32.gmra.mxu2 %v1006_v36  ;;  %488 = vmatpush.msrb.mxu0 %v248_v37  ;;  %v232_v17 = vld [vmem:[#allocation4 + $0x8] sm:$0xff]  ;;  %v266_v18 = vld [vmem:[#allocation4 + $0x118] sm:$0xff] }
  0x5f   : > { %516 = vmatpush.msrb.mxu1 %v282_v38  ;;  %547 = vmatpush.msrb.mxu2 %v310_v39  ;;  %v328_v19 = vld [vmem:[#allocation4 + $0x308] sm:$0xff] }
  0x60   : > { %575 = vmatpush.msrb.mxu3 %v344_v40  ;;  %387 = vmatmul.f32.gmra.mxu0 %v1009_v41  ;;  %v264_v20 = vld [vmem:[#allocation4 + $0x108] sm:$0xff] }
  0x61   : > { %474 = vmatmul.f32.gmra.mxu3 %v1013_v42  ;;  %489 = vmatpush.msrb.mxu0 %v246_v43 }
  0x62   : > { %517 = vmatpush.msrb.mxu1 %v280_v44  ;;  %548 = vmatpush.msrb.mxu2 %v308_v45 }
  0x63   : > { %576 = vmatpush.msrb.mxu3 %v342_v46  ;;  %416 = vmatmul.f32.gmra.mxu1 %v1017_v47 }
  0x64   : > { %490 = vmatpush.msrb.mxu0 %v244_v48  ;;  %518 = vmatpush.msrb.mxu1 %v278_v49 }
  0x65   : > { %549 = vmatpush.msrb.mxu2 %v306_v50  ;;  %577 = vmatpush.msrb.mxu3 %v340_v51 }
  0x66   : > { %491 = vmatpush.msrb.mxu0 %v242_v52  ;;  %519 = vmatpush.msrb.mxu1 %v276_v53 }
  0x67   : > { %550 = vmatpush.msrb.mxu2 %v304_v54  ;;  %578 = vmatpush.msrb.mxu3 %v338_v55 }
  0x68   : > { %448 = vmatmul.f32.gmra.mxu2 %v1022_v56  ;;  %492 = vmatpush.msrb.mxu0 %v240_v57 }
  0x69   : > { %520 = vmatpush.msrb.mxu1 %v274_v58  ;;  %551 = vmatpush.msrb.mxu2 %v302_v59 }
  0x6a   : > { %579 = vmatpush.msrb.mxu3 %v336_v60  ;;  %390 = vmatmul.f32.gmra.mxu0 %v227_v61 }
  0x6b   : > { %477 = vmatmul.f32.gmra.mxu3 %v230_v63  ;;  %493 = vmatpush.msrb.mxu0 %v238_v0 }
  0x6c   : > { %521 = vmatpush.msrb.mxu1 %v272_v3  ;;  %552 = vmatpush.msrb.mxu2 %v300_v4 }
  0x6d   : > { %580 = vmatpush.msrb.mxu3 %v334_v5  ;;  %419 = vmatmul.f32.gmra.mxu1 %v228_v6 }
  0x6e   : > { %494 = vmatpush.msrb.mxu0 %v236_v7  ;;  %522 = vmatpush.msrb.mxu1 %v270_v9 }
  0x6f   : > { %553 = vmatpush.msrb.mxu2 %v298_v10  ;;  %581 = vmatpush.msrb.mxu3 %v332_v11 }
  0x70   : > { %495 = vmatpush.msrb.mxu0 %v234_v12  ;;  %523 = vmatpush.msrb.mxu1 %v268_v13 }
  0x71   : > { %554 = vmatpush.msrb.mxu2 %v296_v14  ;;  %582 = vmatpush.msrb.mxu3 %v330_v15 }
  0x72   : > { %496 = vmatpush.msrb.mxu0 %v232_v17  ;;  %524 = vmatpush.msrb.mxu1 %v266_v18 }
  0x73   : > { %555 = vmatmul.f32.vlgmr.msrb.gmra.mxu2 %v974_v62  ;;  %583 = vmatpush.msrb.mxu3 %v328_v19  ;;  %v359_v62 = vld [vmem:[%s1074_s2] sm:$0x3] }
  0x74   : > { %497 = vmatmul.f32.vlgmr.msrb.gmra.mxu0 %v977_v1  ;;  %525 = vmatpush.msrb.mxu1 %v264_v20  ;;  %v361_v1 = vperm.slane %v359_v62, 0  ;;  %v362_v49 = vperm.slane %v359_v62, 1 }
  0x75   : > { %584 = vmatmul.f32.vlgmr.msrb.gmra.mxu3 %v980_v2  ;;  %526 = vmatmul.f32.vlgmr.msrb.gmra.mxu1 %v986_v8 }
  0x7b   : > { %558 = vmatmul.f32.gmra.mxu2 %v990_v16 }
  0x7c   : > { %500 = vmatmul.f32.gmra.mxu0 %v993_v21 }
  0x7d   : > { %587 = vmatmul.f32.gmra.mxu3 %v997_v22  ;;  %529 = vmatmul.f32.gmra.mxu1 %v1001_v27 }
  0x83   : > { %561 = vmatmul.f32.gmra.mxu2 %v1006_v36 }
  0x84   : > { %503 = vmatmul.f32.gmra.mxu0 %v1009_v41 }
  0x85   : > { %590 = vmatmul.f32.gmra.mxu3 %v1013_v42  ;;  %532 = vmatmul.f32.gmra.mxu1 %v1017_v47 }
  0x8b   : > { %564 = vmatmul.f32.gmra.mxu2 %v1022_v56 }
  0x8c   : > { %506 = vmatmul.f32.gmra.mxu0 %v227_v61 }
  0x8d   : > { %593 = vmatmul.f32.gmra.mxu3 %v230_v63  ;;  %535 = vmatmul.f32.gmra.mxu1 %v228_v6 }
  0xc9   : > { %v382_v2 = vpop.f32.mrf.mxu0 }
  0xca   : > { %v383_v8 = vadd.f32 %v382_v2, %v361_v1 }
  0xcd   : > { %v411_v16 = vpop.f32.mrf.mxu1 }
  0xce   : > { %v412_v21 = vadd.f32 %v411_v16, %v383_v8  ;;  %v440_v22 = vpop.f32.mrf.mxu2 }
  0xd0   : > { %v441_v23 = vadd.f32 %v440_v22, %v412_v21  ;;  %v469_v24 = vpop.f32.mrf.mxu3 }
  0xd2   : > { %v470_v25 = vadd.f32 %v469_v24, %v441_v23 }
  0xd3   : > { %v385_v26 = vpop.f32.mrf.mxu0 }
  0xd4   : > { %597 = vst [vmem:[%s1049_s19] sm:$0xff] %v470_v25  ;;  %v386_v27 = vadd.f32 %v385_v26, %v361_v1 }
  0xd6   : > { %v414_v28 = vpop.f32.mrf.mxu1 }
  0xd7   : > { %v415_v29 = vadd.f32 %v414_v28, %v386_v27  ;;  %v443_v30 = vpop.f32.mrf.mxu2 }
  0xd9   : > { %v444_v31 = vadd.f32 %v443_v30, %v415_v29 }
  0xda   : > { %v472_v32 = vpop.f32.mrf.mxu3 }
  0xdb   : > { %v473_v33 = vadd.f32 %v472_v32, %v444_v31 }
  0xdd   : > { %599 = vst [vmem:[%s1049_s19 + $0x10] sm:$0xff] %v473_v33  ;;  %v388_v34 = vpop.f32.mrf.mxu0 }
  0xde   : > { %v389_v35 = vadd.f32 %v388_v34, %v361_v1 }
  0xe0   : > { %v417_v36 = vpop.f32.mrf.mxu1 }
  0xe1   : > { %v418_v37 = vadd.f32 %v417_v36, %v389_v35  ;;  %v446_v38 = vpop.f32.mrf.mxu2 }
  0xe3   : > { %v447_v39 = vadd.f32 %v446_v38, %v418_v37 }
  0xe4   : > { %v475_v40 = vpop.f32.mrf.mxu3 }
  0xe5   : > { %v476_v41 = vadd.f32 %v475_v40, %v447_v39 }
  0xe7   : > { %601 = vst [vmem:[%s1049_s19 + $0x20] sm:$0xff] %v476_v41  ;;  %v391_v42 = vpop.f32.mrf.mxu0 }
  0xe8   : > { %v392_v43 = vadd.f32 %v391_v42, %v361_v1 }
  0xea   : > { %v420_v44 = vpop.f32.mrf.mxu1 }
  0xeb   : > { %v421_v45 = vadd.f32 %v420_v44, %v392_v43  ;;  %v449_v46 = vpop.f32.mrf.mxu2 }
  0xed   : > { %v450_v47 = vadd.f32 %v449_v46, %v421_v45 }
  0xee   : > { %v478_v48 = vpop.f32.mrf.mxu3 }
  0xef   : > { %v479_v50 = vadd.f32 %v478_v48, %v450_v47 }
  0xf1   : > { %603 = vst [vmem:[%s1049_s19 + $0x30] sm:$0xff] %v479_v50  ;;  %v498_v51 = vpop.f32.mrf.mxu0 }
  0xf2   : > { %v499_v52 = vadd.f32 %v498_v51, %v362_v49  ;;  %v527_v53 = vpop.f32.mrf.mxu1 }
  0xf4   : > { %v528_v54 = vadd.f32 %v527_v53, %v499_v52 }
  0xf6   : > { %v556_v55 = vpop.f32.mrf.mxu2 }
  0xf7   : > { %v557_v56 = vadd.f32 %v556_v55, %v528_v54 }
  0xf8   : > { %v585_v57 = vpop.f32.mrf.mxu3 }
  0xf9   : > { %v586_v58 = vadd.f32 %v585_v57, %v557_v56  ;;  %v501_v59 = vpop.f32.mrf.mxu0 }
  0xfa   : > { %v502_v60 = vadd.f32 %v501_v59, %v362_v49  ;;  %v530_v61 = vpop.f32.mrf.mxu1 }
  0xfb   : > { %598 = vst [vmem:[%s1049_s19 + $0x8] sm:$0xff] %v586_v58 }
  0xfc   : > { %v531_v63 = vadd.f32 %v530_v61, %v502_v60 }
  0xfe   : > { %v559_v0 = vpop.f32.mrf.mxu2 }
  0xff   : > { %v560_v3 = vadd.f32 %v559_v0, %v531_v63 }
 0x100   : > { %v588_v4 = vpop.f32.mrf.mxu3 }
 0x101   : > { %v589_v5 = vadd.f32 %v588_v4, %v560_v3  ;;  %v504_v6 = vpop.f32.mrf.mxu0 }
 0x102   : > { %v505_v7 = vadd.f32 %v504_v6, %v362_v49  ;;  %v533_v9 = vpop.f32.mrf.mxu1 }
 0x103   : > { %600 = vst [vmem:[%s1049_s19 + $0x18] sm:$0xff] %v589_v5 }
 0x104   : > { %v534_v10 = vadd.f32 %v533_v9, %v505_v7 }
 0x106   : > { %v562_v11 = vpop.f32.mrf.mxu2 }
 0x107   : > { %v563_v12 = vadd.f32 %v562_v11, %v534_v10 }
 0x108   : > { %v591_v13 = vpop.f32.mrf.mxu3 }
 0x109   : > { %v592_v14 = vadd.f32 %v591_v13, %v563_v12  ;;  %v507_v15 = vpop.f32.mrf.mxu0 }
 0x10a   : > { %v508_v17 = vadd.f32 %v507_v15, %v362_v49  ;;  %v536_v18 = vpop.f32.mrf.mxu1 }
 0x10b   : > { %602 = vst [vmem:[%s1049_s19 + $0x28] sm:$0xff] %v592_v14 }
 0x10c   : > { %v537_v19 = vadd.f32 %v536_v18, %v508_v17 }
 0x10e   : > { %v565_v20 = vpop.f32.mrf.mxu2 }
 0x10f   : > { %v566_v62 = vadd.f32 %v565_v20, %v537_v19 }
 0x110   : > { %v594_v1 = vpop.f32.mrf.mxu3 }
 0x111   : > { %v595_v2 = vadd.f32 %v594_v1, %v566_v62 }
 0x113   : > { %604 = vst [vmem:[%s1049_s19 + $0x38] sm:$0xff] %v595_v2 }
 0x114 PF: > { %p14_p4 = scmp.ge.s32.totalorder %s929_s25, 5   ;;  %s1080_s12 = smov %s848_s13 }
 0x115   : > { %s1081_s13 = smov %s852_s14  ;;  %s1082_s14 = smov %s939_s30 }
 0x116   : > { %s1083_s15 = smov %s929_s25  ;;  %16 = sbr.rel (!%p14_p4) target bundleno = 4 (0x4), region = 76 }
 0x11b   :  { %629 = vsyncpa [#allocation3], 1 }
 0x11c   :  { %631 = vsyncpa [#allocation3 + $0x1], 1 }
 0x11d   :  { %632 = vsyncpa [#allocation5], 1 }

// kernel: forward.4
= control target key start
LH: loop header
LB: loop body
LE: loop exit
PB: predicated region body
PF: predicated region fallthrough
CT: control target
= control target key end

     0   :  { %s3697_s18 = smov [#allocation5]   ;;  %s5806_s0 = inlined_call_operand.hbm [shape: s32[768], index: 0, kind: input, shape index: {}]   ;;  %s5807_s1 = inlined_call_operand.vmem [shape: f32[96,256], index: 1, kind: input, shape index: {}]   ;;  %s5808_s2 = inlined_call_operand.hbm [shape: f32[64,192], index: 2, kind: input, shape index: {}]   ;;  %s5809_s3 = inlined_call_operand.hbm [shape: f32[64,64], index: 3, kind: input, shape index: {}]   ;;  %s5810_s4 = inlined_call_operand.vmem [shape: f32[96,128], index: 4, kind: output, shape index: {}]  }
   0x1   :  { %s10_s17 = sshll.u32 %s5806_s0, 4  ;;  %s11_s17 = int_to_ptr.hbm [resolvable:$true] %s10_s17 }
   0x2   :  { %13 = dma.hbm_to_smem %s11_s17, 96, %s3697_s18, [#allocation4] }
   0x3   :  { %3683 = dma.done.wait [#allocation4], 96 }
   0x4   :  { %3684 = vsyncadd [#allocation4], 4294967200 }
   0x5   :  { %16 = sfence }
   0x6   :  { %17 = vsyncpa [#allocation7], 0 }
   0x7   :  { %18 = vsyncpa [#allocation9], 0  ;;  %s3734_s19 = smov 0  }
   0x8 LB: > { %s134_s0 = sshll.u32 %s5808_s2, 4  ;;  %s3743_s22 = sadd.s32 4294967295, %s3695_s19   ;;  %s3695_s19 = sphi %s3734_s19, %s24_s19   ;;  %s135_s0 = int_to_ptr.hbm [resolvable:$true] %s134_s0 }
   0x9   : > { %p3272_p0 = scmp.ge.s32.totalorder %s3695_s19, 1  ;;  %p123_p1 = scmp.lt.s32.totalorder %s3695_s19, 4 }
   0xa   : > { %p3273_p2 = scmp.ne.s32.totalorder %s3743_s22, 0  ;;  %p3405_p3 = scmp.eq.s32.totalorder %s3743_s22, 0 }
   0xb   : > { %p3749_p4 = pnand %p3272_p0, %p123_p1  ;;  %s3698_s24 = smov [#allocation6]  }
   0xc   : > { %s136_s25 = sshll.u32 %s3698_s24, 4  ;;  %s148_s28 = sshll.u32 %s5809_s3, 4  ;;  %s137_s25 = int_to_ptr.vmem [resolvable:$true] %s136_s25  ;;  %s149_s28 = int_to_ptr.hbm [resolvable:$true] %s148_s28 }
   0xd   : > { %p3398_p5 = pneg %p3749_p4  ;;  %s3699_s29 = smov [#allocation8]  }
   0xe   : > { %s150_s30 = sshll.u32 %s3699_s29, 4  ;;  %s3700_s5 = smov 256   ;;  %s151_s30 = int_to_ptr.vmem [resolvable:$true] %s150_s30 }
   0xf   : > { %p3399_p6 = pnand %p3405_p3, %p3398_p5  ;;  %s3701_s6 = smov 16  }
  0x10   : > { %s3702_s7 = smov 128   ;;  %s3703_s8 = smov 8  }
  0x11   : > { %3401 = dma.hbm_to_vmem [thread:$0]  (!%p3399_p6), %s135_s0, 2048, %s137_s25, [#allocation7], %s3700_s5, %s3700_s5, %s3701_s6  }
  0x12   : > { %3404 = dma.hbm_to_vmem [thread:$0]  (!%p3399_p6), %s149_s28, 1024, %s151_s30, [#allocation9], %s3702_s7, %s3702_s7, %s3703_s8  }
  0x13   : > { %176 = sbr.rel (%p3749_p4) target bundleno = 960 (0x3c0), region = 32 }
  0x18   : > { %3686 = dma.done.wait (%p3405_p3), [#allocation7], 2048  }
  0x19   : > { %3688 = vsyncadd (%p3405_p3), [#allocation7], 4294965248 }
  0x1a   : > { %3690 = dma.done.wait (%p3405_p3), [#allocation9], 1024  }
  0x1b   : > { %3692 = vsyncadd (%p3405_p3), [#allocation9], 4294966272  ;;  %s3279_s9 = sshll.u32 %s3743_s22, 2 }
  0x1c   : > { %p208_p7 = scmp.lt.s32.totalorder %s3279_s9, 11  ;;  %223 = sbr.rel (%p3273_p2) target bundleno = 50 (0x32), region = 44 }
  0x1e   : > { %s6042_s9 = smov (!%p208_p7, %s3279_s9), 11 }
  0x1f   : > { %s3365_s10 = sshll.u32 %s6042_s9, 4  ;;  %s3283_s11 = sshll.u32 %s6042_s9, 3 }
  0x20   : > { %s3774_s14 = scalar_lea.vmem %s5807_s1, %s3365_s10  ;;  %s3779_s17 = scalar_lea.vmem %s5810_s4, %s3283_s11 }
  0x21   : > { %v3704_v0 = vmov 0.0  }
  0x22   : > { %224 = vst [vmem:[#allocation2] sm:$0xff] %v3704_v0 }
  0x23   : > { %225 = vst [vmem:[#allocation2 + $0x8] sm:$0xff] %v3704_v0 }
  0x24   : > { %226 = vst [vmem:[#allocation2 + $0x10] sm:$0xff] %v3704_v0 }
  0x25   : > { %227 = vst [vmem:[#allocation2 + $0x18] sm:$0xff] %v3704_v0 }
  0x26   : > { %228 = vst [vmem:[#allocation2 + $0x20] sm:$0xff] %v3704_v0 }
  0x27   : > { %229 = vst [vmem:[#allocation2 + $0x28] sm:$0xff] %v3704_v0 }
  0x28   : > { %230 = vst [vmem:[#allocation2 + $0x30] sm:$0xff] %v3704_v0 }
  0x29   : > { %231 = vst [vmem:[#allocation2 + $0x38] sm:$0xff] %v3704_v0 }
  0x2a   : > { %232 = vst [vmem:[#allocation2 + $0x40] sm:$0xff] %v3704_v0 }
  0x2b   : > { %233 = vst [vmem:[#allocation2 + $0x48] sm:$0xff] %v3704_v0 }
  0x2c   : > { %234 = vst [vmem:[#allocation2 + $0x50] sm:$0xff] %v3704_v0 }
  0x2d   : > { %235 = vst [vmem:[#allocation2 + $0x58] sm:$0xff] %v3704_v0 }
  0x2e   : > { %236 = vst [vmem:[#allocation2 + $0x60] sm:$0xff] %v3704_v0 }
  0x2f   : > { %237 = vst [vmem:[#allocation2 + $0x68] sm:$0xff] %v3704_v0 }
  0x30   : > { %238 = vst [vmem:[#allocation2 + $0x70] sm:$0xff] %v3704_v0 }
  0x31   : > { %239 = vst [vmem:[#allocation2 + $0x78] sm:$0xff] %v3704_v0 }
  0x32 PF: > { %v3783_v1 = vld [vmem:[#allocation8 + $0x38] sm:$0xff]  ;;  %v3785_v2 = vld [vmem:[#allocation8 + $0x30] sm:$0xff]  ;;  %s3788_s18 = sshll.u32 %s3743_s22, 8  ;;  %v3796_v3 = vld [vmem:[#allocation8 + $0x28] sm:$0xff]  ;;  %s3705_s26 = smov 64   ;;  %vm1552_vm0 = vcmask 523264  }
  0x33   : > { %3367 = vmatpush.msra.mxu2 %v3783_v1  ;;  %3368 = vmatpush.msra.mxu3 %v3783_v1  ;;  %s3793_s20 = sld [smem:[#allocation5 + %s3788_s18]]  ;;  %s245_s21 = sadd.s32 1, %s3788_s18  ;;  %v1618_v4 = vld [vmem:[%s3774_s14 + $0x28] sm:$0xff]  ;;  %v1635_v5 = vld [vmem:[#allocation6 + $0x70] sm:$0xff]  ;;  %v1636_v6 = vld [vmem:[#allocation6 + $0x78] sm:$0xff] }
  0x34   : > { %s3799_s0 = sld [smem:[#allocation5 + %s245_s21]]  ;;  %s250_s23 = sadd.s32 2, %s3788_s18  ;;  %v3807_v7 = vld [vmem:[#allocation8 + $0x20] sm:$0xff]  ;;  %2020 = vrot.lane.b32.xlu1 %v1618_v4, %s3705_s26  ;;  %1657 = vmatpush.msra.mxu0 %v1635_v5  ;;  %v3818_v8 = vld [vmem:[#allocation8 + $0x18] sm:$0xff]  ;;  %v3827_v9 = vld [vmem:[#allocation8 + $0x10] sm:$0xff] }
  0x35   : > { %3370 = vmatpush.msra.mxu2 %v3785_v2  ;;  %3371 = vmatpush.msra.mxu3 %v3785_v2  ;;  %s3804_s24 = sld [smem:[#allocation5 + %s250_s23]]  ;;  %s255_s25 = sadd.s32 3, %s3788_s18  ;;  %v3829_v10 = vld [vmem:[#allocation8 + $0x8] sm:$0xff]  ;;  %v3838_v13 = vld [vmem:[#allocation8] sm:$0xff]  ;;  %v1631_v51 = vld [vmem:[#allocation6 + $0x50] sm:$0xff] }
  0x36   : > { %s3810_s27 = sld [smem:[#allocation5 + %s255_s25]]  ;;  %s260_s28 = sadd.s32 4, %s3788_s18  ;;  %1686 = vmatpush.msra.mxu1 %v1636_v6  ;;  %v1633_v47 = vld [vmem:[#allocation6 + $0x60] sm:$0xff]  ;;  %v1634_v48 = vld [vmem:[#allocation6 + $0x68] sm:$0xff]  ;;  %v1632_v53 = vld [vmem:[#allocation6 + $0x58] sm:$0xff] }
  0x37   : > { %3373 = vmatpush.msra.mxu2 %v3796_v3  ;;  %3374 = vmatpush.msra.mxu3 %v3796_v3  ;;  %s3815_s29 = sld [smem:[#allocation5 + %s260_s28]]  ;;  %s265_s30 = sadd.s32 5, %s3788_s18  ;;  %v1614_v50 = vld [vmem:[%s3774_s14 + $0x8] sm:$0xff]  ;;  %v1620_v54 = vld [vmem:[%s3774_s14 + $0x38] sm:$0xff]  ;;  %v1629_v56 = vld [vmem:[#allocation6 + $0x40] sm:$0xff] }
  0x38   : > { %s3820_s5 = sld [smem:[#allocation5 + %s265_s30]]  ;;  %s270_s6 = sadd.s32 6, %s3788_s18  ;;  %1658 = vmatpush.msra.mxu0 %v1633_v47  ;;  %1687 = vmatpush.msra.mxu1 %v1634_v48  ;;  %v1630_v57 = vld [vmem:[#allocation6 + $0x48] sm:$0xff]  ;;  %v1627_v60 = vld [vmem:[#allocation6 + $0x30] sm:$0xff]  ;;  %v1628_v62 = vld [vmem:[#allocation6 + $0x38] sm:$0xff] }
  0x39   : > { %3376 = vmatpush.msra.mxu2 %v3807_v7  ;;  %3377 = vmatpush.msra.mxu3 %v3807_v7  ;;  %s3825_s7 = sld [smem:[#allocation5 + %s270_s6]]  ;;  %s242_s8 = scalar_lea.vmem [#allocation2], %s3793_s20 }
  0x3a   : > { %v243_v11 = vld [vmem:[%s242_s8] sm:$0x1]  ;;  %s275_s9 = sadd.s32 7, %s3788_s18  ;;  %s247_s10 = scalar_lea.vmem [#allocation2], %s3799_s0  ;;  %2016 = vrot.lane.b32.xlu0 %v1614_v50, %s3705_s26  ;;  %1659 = vmatpush.msra.mxu0 %v1631_v51 }
  0x3b   : > { %3379 = vmatpush.msra.mxu2 %v3818_v8  ;;  %3380 = vmatpush.msra.mxu3 %v3818_v8  ;;  %244 = vst [vmem:[#allocation3] sm:$0x1] %v243_v11  ;;  %v248_v12 = vld [vmem:[%s247_s10] sm:$0x1]  ;;  %s3836_s11 = sld [smem:[#allocation5 + %s275_s9]]  ;;  %s252_s12 = scalar_lea.vmem [#allocation2], %s3804_s24 }
  0x3c   : > { %249 = vst [vmem:[#allocation3 + $0x1] sm:$0x1] %v248_v12  ;;  %v253_v14 = vld [vmem:[%s252_s12] sm:$0x1]  ;;  %s400_s13 = sadd.s32 32, %s3788_s18  ;;  %s257_s15 = scalar_lea.vmem [#allocation2], %s3810_s27  ;;  %1688 = vmatpush.msra.mxu1 %v1632_v53  ;;  %2022 = vrot.lane.b32.xlu1 %v1620_v54, %s3705_s26 }
  0x3d   : > { %3382 = vmatpush.msra.mxu2 %v3827_v9  ;;  %3383 = vmatpush.msra.mxu3 %v3827_v9  ;;  %254 = vst [vmem:[#allocation3 + $0x2] sm:$0x1] %v253_v14  ;;  %v258_v15 = vld [vmem:[%s257_s15] sm:$0x1]  ;;  %s401_s16 = sld [smem:[#allocation5 + %s400_s13]]  ;;  %s262_s20 = scalar_lea.vmem [#allocation2], %s3815_s29 }
  0x3e   : > { %259 = vst [vmem:[#allocation3 + $0x3] sm:$0x1] %v258_v15  ;;  %v263_v16 = vld [vmem:[%s262_s20] sm:$0x1]  ;;  %s405_s21 = sadd.s32 33, %s3788_s18  ;;  %s267_s0 = scalar_lea.vmem [#allocation2], %s3820_s5  ;;  %1660 = vmatpush.msra.mxu0 %v1629_v56  ;;  %1689 = vmatpush.msra.mxu1 %v1630_v57 }
  0x3f   : > { %3385 = vmatpush.msra.mxu2 %v3829_v10  ;;  %3386 = vmatpush.msra.mxu3 %v3829_v10  ;;  %264 = vst [vmem:[#allocation3 + $0x4] sm:$0x1] %v263_v16  ;;  %v268_v17 = vld [vmem:[%s267_s0] sm:$0x1]  ;;  %s406_s23 = sld [smem:[#allocation5 + %s405_s21]]  ;;  %s272_s24 = scalar_lea.vmem [#allocation2], %s3825_s7 }
  0x40   : > { %269 = vst [vmem:[#allocation3 + $0x5] sm:$0x1] %v268_v17  ;;  %v273_v18 = vld [vmem:[%s272_s24] sm:$0x1]  ;;  %s410_s25 = sadd.s32 34, %s3788_s18  ;;  %s415_s27 = sadd.s32 35, %s3788_s18  ;;  %1661 = vmatpush.msra.mxu0 %v1627_v60  ;;  %1690 = vmatpush.msra.mxu1 %v1628_v62 }
  0x41   : > { %3388 = vmatpush.msra.mxu2 %v3838_v13  ;;  %3389 = vmatpush.msra.mxu3 %v3838_v13  ;;  %274 = vst [vmem:[#allocation3 + $0x6] sm:$0x1] %v273_v18  ;;  %s411_s28 = sld [smem:[#allocation5 + %s410_s25]]  ;;  %s277_s29 = scalar_lea.vmem [#allocation2], %s3836_s11  ;;  %v1625_v18 = vld [vmem:[#allocation6 + $0x20] sm:$0xff] }
  0x42   : > { %v278_v19 = vld [vmem:[%s277_s29] sm:$0x1]  ;;  %s416_s30 = sld [smem:[#allocation5 + %s415_s27]]  ;;  %s420_s5 = sadd.s32 36, %s3788_s18  ;;  %1662 = vmatpush.msra.mxu0 %v1625_v18 }
  0x43   : > { %279 = vst [vmem:[#allocation3 + $0x7] sm:$0x1] %v278_v19  ;;  %s421_s6 = sld [smem:[#allocation5 + %s420_s5]]  ;;  %s402_s7 = scalar_lea.vmem [#allocation2], %s401_s16  ;;  %v1626_v19 = vld [vmem:[#allocation6 + $0x28] sm:$0xff] }
  0x44   : > { %v403_v20 = vld [vmem:[%s402_s7] sm:$0x1]  ;;  %s425_s8 = sadd.s32 37, %s3788_s18  ;;  %s430_s9 = sadd.s32 38, %s3788_s18  ;;  %1691 = vmatpush.msra.mxu1 %v1626_v19 }
  0x45   : > { %404 = vst [vmem:[#allocation3 + $0x20] sm:$0x1] %v403_v20  ;;  %s426_s10 = sld [smem:[#allocation5 + %s425_s8]]  ;;  %s407_s12 = scalar_lea.vmem [#allocation2], %s406_s23 }
  0x46   : > { %v408_v21 = vld [vmem:[%s407_s12] sm:$0x1]  ;;  %s431_s13 = sld [smem:[#allocation5 + %s430_s9]]  ;;  %s435_s15 = sadd.s32 39, %s3788_s18 }
  0x47   : > { %409 = vst [vmem:[#allocation3 + $0x21] sm:$0x1] %v408_v21  ;;  %s436_s11 = sld [smem:[#allocation5 + %s435_s15]]  ;;  %s412_s20 = scalar_lea.vmem [#allocation2], %s411_s28  ;;  %v1616_v21 = vld [vmem:[%s3774_s14 + $0x18] sm:$0xff] }
  0x48   : > { %v413_v22 = vld [vmem:[%s412_s20] sm:$0x1]  ;;  %s560_s21 = sadd.s32 64, %s3788_s18  ;;  %s417_s0 = scalar_lea.vmem [#allocation2], %s416_s30  ;;  %2018 = vrot.lane.b32.xlu0 %v1616_v21, %s3705_s26 }
  0x49   : > { %414 = vst [vmem:[#allocation3 + $0x22] sm:$0x1] %v413_v22  ;;  %v418_v23 = vld [vmem:[%s417_s0] sm:$0x1]  ;;  %s561_s16 = sld [smem:[#allocation5 + %s560_s21]]  ;;  %s422_s24 = scalar_lea.vmem [#allocation2], %s421_s6 }
  0x4a   : > { %419 = vst [vmem:[#allocation3 + $0x23] sm:$0x1] %v418_v23  ;;  %v423_v24 = vld [vmem:[%s422_s24] sm:$0x1]  ;;  %s565_s23 = sadd.s32 65, %s3788_s18  ;;  %s570_s25 = sadd.s32 66, %s3788_s18 }
  0x4b   : > { %424 = vst [vmem:[#allocation3 + $0x24] sm:$0x1] %v423_v24  ;;  %s566_s27 = sld [smem:[#allocation5 + %s565_s23]]  ;;  %s427_s29 = scalar_lea.vmem [#allocation2], %s426_s10  ;;  %v3869_v31 = vld [vmem:[#allocation3] sm:$0xff]  ;;  %v1623_v22 = vld [vmem:[#allocation6 + $0x10] sm:$0xff] }
  0x4c   : > { %v428_v25 = vld [vmem:[%s427_s29] sm:$0x1]  ;;  %s571_s28 = sld [smem:[#allocation5 + %s570_s25]]  ;;  %s432_s5 = scalar_lea.vmem [#allocation2], %s431_s13  ;;  %2668 = vrot.lane.b32.xlu2 %v3869_v31, %s3705_s26  ;;  %1663 = vmatpush.msra.mxu0 %v1623_v22  ;;  %v1624_v24 = vld [vmem:[#allocation6 + $0x18] sm:$0xff]  ;;  %v1553_v57 = vsel %vm1552_vm0, %v3869_v31, 0.0 }
  0x4d   : > { %429 = vst [vmem:[#allocation3 + $0x25] sm:$0x1] %v428_v25  ;;  %v433_v26 = vld [vmem:[%s432_s5] sm:$0x1]  ;;  %s575_s30 = sadd.s32 67, %s3788_s18  ;;  %s437_s7 = scalar_lea.vmem [#allocation2], %s436_s11  ;;  %1692 = vmatpush.msra.mxu1 %v1624_v24 }
  0x4e   : > { %434 = vst [vmem:[#allocation3 + $0x26] sm:$0x1] %v433_v26  ;;  %v438_v27 = vld [vmem:[%s437_s7] sm:$0x1]  ;;  %s576_s8 = sld [smem:[#allocation5 + %s575_s30]]  ;;  %s580_s6 = sadd.s32 68, %s3788_s18 }
  0x4f   : > { %439 = vst [vmem:[#allocation3 + $0x27] sm:$0x1] %v438_v27  ;;  %s581_s9 = sld [smem:[#allocation5 + %s580_s6]]  ;;  %s562_s12 = scalar_lea.vmem [#allocation2], %s561_s16 }
  0x50   : > { %v563_v28 = vld [vmem:[%s562_s12] sm:$0x1]  ;;  %s585_s10 = sadd.s32 69, %s3788_s18  ;;  %s590_s15 = sadd.s32 70, %s3788_s18 }
  0x51   : > { %564 = vst [vmem:[#allocation3 + $0x40] sm:$0x1] %v563_v28  ;;  %s586_s20 = sld [smem:[#allocation5 + %s585_s10]]  ;;  %s567_s21 = scalar_lea.vmem [#allocation2], %s566_s27 }
  0x52   : > { %v568_v29 = vld [vmem:[%s567_s21] sm:$0x1]  ;;  %s591_s13 = sld [smem:[#allocation5 + %s590_s15]]  ;;  %s572_s11 = scalar_lea.vmem [#allocation2], %s571_s28 }
  0x53   : > { %569 = vst [vmem:[#allocation3 + $0x41] sm:$0x1] %v568_v29  ;;  %v573_v30 = vld [vmem:[%s572_s11] sm:$0x1]  ;;  %s595_s0 = sadd.s32 71, %s3788_s18  ;;  %s720_s24 = sadd.s32 96, %s3788_s18 }
  0x54   : > { %574 = vst [vmem:[#allocation3 + $0x42] sm:$0x1] %v573_v30  ;;  %s596_s23 = sld [smem:[#allocation5 + %s595_s0]]  ;;  %s577_s16 = scalar_lea.vmem [#allocation2], %s576_s8 }
  0x55   : > { %v578_v32 = vld [vmem:[%s577_s16] sm:$0x1]  ;;  %s721_s25 = sld [smem:[#allocation5 + %s720_s24]]  ;;  %s582_s27 = scalar_lea.vmem [#allocation2], %s581_s9 }
  0x56   : > { %579 = vst [vmem:[#allocation3 + $0x43] sm:$0x1] %v578_v32  ;;  %v583_v33 = vld [vmem:[%s582_s27] sm:$0x1]  ;;  %s725_s29 = sadd.s32 97, %s3788_s18  ;;  %s730_s28 = sadd.s32 98, %s3788_s18 }
  0x57   : > { %584 = vst [vmem:[#allocation3 + $0x44] sm:$0x1] %v583_v33  ;;  %s726_s5 = sld [smem:[#allocation5 + %s725_s29]]  ;;  %s587_s30 = scalar_lea.vmem [#allocation2], %s586_s20  ;;  %v3877_v37 = vld [vmem:[#allocation3 + $0x20] sm:$0xff] }
  0x58   : > { %v588_v34 = vld [vmem:[%s587_s30] sm:$0x1]  ;;  %s731_s7 = sld [smem:[#allocation5 + %s730_s28]]  ;;  %s592_s8 = scalar_lea.vmem [#allocation2], %s591_s13  ;;  %2676 = vrot.lane.b32.xlu2 %v3877_v37, %s3705_s26 }
  0x59   : > { %589 = vst [vmem:[#allocation3 + $0x45] sm:$0x1] %v588_v34  ;;  %v593_v35 = vld [vmem:[%s592_s8] sm:$0x1]  ;;  %s735_s6 = sadd.s32 99, %s3788_s18  ;;  %s740_s12 = sadd.s32 100, %s3788_s18 }
  0x5a   : > { %594 = vst [vmem:[#allocation3 + $0x46] sm:$0x1] %v593_v35  ;;  %s736_s10 = sld [smem:[#allocation5 + %s735_s6]]  ;;  %s597_s15 = scalar_lea.vmem [#allocation2], %s596_s23  ;;  %v1621_v33 = vld [vmem:[#allocation6] sm:$0xff]  ;;  %v1622_v34 = vld [vmem:[#allocation6 + $0x8] sm:$0xff] }
  0x5b   : > { %v598_v36 = vld [vmem:[%s597_s15] sm:$0x1]  ;;  %s741_s9 = sld [smem:[#allocation5 + %s740_s12]]  ;;  %s722_s20 = scalar_lea.vmem [#allocation2], %s721_s25  ;;  %1664 = vmatpush.msra.mxu0 %v1621_v33  ;;  %1693 = vmatpush.msra.mxu1 %v1622_v34 }
  0x5c   : > { %599 = vst [vmem:[#allocation3 + $0x47] sm:$0x1] %v598_v36  ;;  %v723_v38 = vld [vmem:[%s722_s20] sm:$0x1]  ;;  %s745_s21 = sadd.s32 101, %s3788_s18  ;;  %s750_s11 = sadd.s32 102, %s3788_s18 }
  0x5d   : > { %724 = vst [vmem:[#allocation3 + $0x60] sm:$0x1] %v723_v38  ;;  %s746_s0 = sld [smem:[#allocation5 + %s745_s21]]  ;;  %s727_s13 = scalar_lea.vmem [#allocation2], %s726_s5  ;;  %1907 = vmatpush.msrb.mxu0 %v3783_v1  ;;  %3366 = vmatpush.msrb.mxu1 %v3783_v1 }
  0x5e   : > { %v728_v39 = vld [vmem:[%s727_s13] sm:$0x1]  ;;  %s751_s24 = sld [smem:[#allocation5 + %s750_s11]]  ;;  %s732_s23 = scalar_lea.vmem [#allocation2], %s731_s7 }
  0x5f   : > { %729 = vst [vmem:[#allocation3 + $0x61] sm:$0x1] %v728_v39  ;;  %v733_v40 = vld [vmem:[%s732_s23] sm:$0x1]  ;;  %s755_s16 = sadd.s32 103, %s3788_s18  ;;  %s880_s27 = sadd.s32 128, %s3788_s18  ;;  %1908 = vmatpush.msrb.mxu0 %v3785_v2  ;;  %3369 = vmatpush.msrb.mxu1 %v3785_v2 }
  0x60   : > { %734 = vst [vmem:[#allocation3 + $0x62] sm:$0x1] %v733_v40  ;;  %s756_s25 = sld [smem:[#allocation5 + %s755_s16]]  ;;  %s737_s29 = scalar_lea.vmem [#allocation2], %s736_s10 }
  0x61   : > { %v738_v41 = vld [vmem:[%s737_s29] sm:$0x1]  ;;  %s881_s28 = sld [smem:[#allocation5 + %s880_s27]]  ;;  %s742_s30 = scalar_lea.vmem [#allocation2], %s741_s9  ;;  %1909 = vmatpush.msrb.mxu0 %v3796_v3  ;;  %3372 = vmatpush.msrb.mxu1 %v3796_v3 }
  0x62   : > { %739 = vst [vmem:[#allocation3 + $0x63] sm:$0x1] %v738_v41  ;;  %v743_v42 = vld [vmem:[%s742_s30] sm:$0x1]  ;;  %s885_s5 = sadd.s32 129, %s3788_s18  ;;  %s890_s8 = sadd.s32 130, %s3788_s18 }
  0x63   : > { %744 = vst [vmem:[#allocation3 + $0x64] sm:$0x1] %v743_v42  ;;  %s886_s6 = sld [smem:[#allocation5 + %s885_s5]]  ;;  %s747_s12 = scalar_lea.vmem [#allocation2], %s746_s0  ;;  %1910 = vmatpush.msrb.mxu0 %v3807_v7  ;;  %3375 = vmatpush.msrb.mxu1 %v3807_v7  ;;  %v4043_v62 = vld [vmem:[#allocation3 + $0x40] sm:$0xff] }
  0x64   : > { %v748_v43 = vld [vmem:[%s747_s12] sm:$0x1]  ;;  %s3887_s7 = sld [smem:[#allocation5 + %s890_s8]]  ;;  %s752_s15 = scalar_lea.vmem [#allocation2], %s751_s24 }
  0x65   : > { %749 = vst [vmem:[#allocation3 + $0x65] sm:$0x1] %v748_v43  ;;  %v753_v44 = vld [vmem:[%s752_s15] sm:$0x1]  ;;  %s895_s10 = sadd.s32 131, %s3788_s18  ;;  %s900_s20 = sadd.s32 132, %s3788_s18  ;;  %1911 = vmatpush.msrb.mxu0 %v3818_v8  ;;  %3378 = vmatpush.msrb.mxu1 %v3818_v8 }
  0x66   : > { %754 = vst [vmem:[#allocation3 + $0x66] sm:$0x1] %v753_v44  ;;  %s3891_s21 = sld [smem:[#allocation5 + %s895_s10]]  ;;  %s757_s9 = scalar_lea.vmem [#allocation2], %s756_s25 }
  0x67   : > { %v758_v45 = vld [vmem:[%s757_s9] sm:$0x1]  ;;  %s3893_s11 = sld [smem:[#allocation5 + %s900_s20]]  ;;  %s882_s0 = scalar_lea.vmem [#allocation2], %s881_s28  ;;  %1912 = vmatpush.msrb.mxu0 %v3827_v9  ;;  %3381 = vmatpush.msrb.mxu1 %v3827_v9 }
  0x68   : > { %759 = vst [vmem:[#allocation3 + $0x67] sm:$0x1] %v758_v45  ;;  %v883_v46 = vld [vmem:[%s882_s0] sm:$0x1]  ;;  %s905_s13 = sadd.s32 133, %s3788_s18  ;;  %s910_s23 = sadd.s32 134, %s3788_s18 }
  0x69   : > { %884 = vst [vmem:[#allocation3 + $0x80] sm:$0x1] %v883_v46  ;;  %s3897_s24 = sld [smem:[#allocation5 + %s905_s13]]  ;;  %s887_s16 = scalar_lea.vmem [#allocation2], %s886_s6  ;;  %1913 = vmatpush.msrb.mxu0 %v3829_v10  ;;  %3384 = vmatpush.msrb.mxu1 %v3829_v10 }
  0x6a   : > { %v888_v49 = vld [vmem:[%s887_s16] sm:$0x1]  ;;  %s3899_s27 = sld [smem:[#allocation5 + %s910_s23]]  ;;  %s892_s25 = scalar_lea.vmem [#allocation2], %s3887_s7 }
  0x6b   : > { %889 = vst [vmem:[#allocation3 + $0x81] sm:$0x1] %v888_v49  ;;  %v893_v52 = vld [vmem:[%s892_s25] sm:$0x1]  ;;  %s915_s29 = sadd.s32 135, %s3788_s18  ;;  %s1120_s28 = sadd.s32 176, %s3788_s18  ;;  %1914 = vmatpush.msrb.mxu0 %v3838_v13  ;;  %3387 = vmatpush.msrb.mxu1 %v3838_v13 }
  0x6c   : > { %894 = vst [vmem:[#allocation3 + $0x82] sm:$0x1] %v893_v52  ;;  %s3906_s30 = sld [smem:[#allocation5 + %s915_s29]]  ;;  %s897_s5 = scalar_lea.vmem [#allocation2], %s3891_s21 }
  0x6d   : > { %v898_v55 = vld [vmem:[%s897_s5] sm:$0x1]  ;;  %s3910_s8 = sld [smem:[#allocation5 + %s1120_s28]]  ;;  %s902_s6 = scalar_lea.vmem [#allocation2], %s3893_s11 }
  0x6e   : > { %899 = vst [vmem:[#allocation3 + $0x83] sm:$0x1] %v898_v55  ;;  %v903_v58 = vld [vmem:[%s902_s6] sm:$0x1]  ;;  %s1125_s12 = sadd.s32 177, %s3788_s18  ;;  %s1130_s7 = sadd.s32 178, %s3788_s18 }
  0x6f   : > { %904 = vst [vmem:[#allocation3 + $0x84] sm:$0x1] %v903_v58  ;;  %v3916_v59 = vld [vmem:[#allocation3 + $0x60] sm:$0xff]  ;;  %s1126_s15 = sld [smem:[#allocation5 + %s1125_s12]]  ;;  %s907_s10 = scalar_lea.vmem [#allocation2], %s3897_s24  ;;  %v1554_v58 = vsel %vm1552_vm0, %v3877_v37, 0.0 }
  0x70   : > { %v908_v61 = vld [vmem:[%s907_s10] sm:$0x1]  ;;  %3310 = vmatmul.msk.f32.vlgmr.msra.gmra.mxu2 %vm1552_vm0, %v3916_v59  ;;  %s1131_s20 = sld [smem:[#allocation5 + %s1130_s7]]  ;;  %s912_s21 = scalar_lea.vmem [#allocation2], %s3899_s27  ;;  %v1555_v31 = vadd.f32 %v1554_v58, %v1553_v57 }
  0x71   : > { %909 = vst [vmem:[#allocation3 + $0x85] sm:$0x1] %v908_v61  ;;  %v913_v63 = vld [vmem:[%s912_s21] sm:$0x1]  ;;  %s1135_s9 = sadd.s32 179, %s3788_s18  ;;  %s1140_s11 = sadd.s32 180, %s3788_s18 }
  0x72   : > { %914 = vst [vmem:[#allocation3 + $0x86] sm:$0x1] %v913_v63  ;;  %s1136_s0 = sld [smem:[#allocation5 + %s1135_s9]]  ;;  %s917_s13 = scalar_lea.vmem [#allocation2], %s3906_s30 }
  0x73   : > { %v918_v0 = vld [vmem:[%s917_s13] sm:$0x1]  ;;  %s1141_s23 = sld [smem:[#allocation5 + %s1140_s11]]  ;;  %s1122_s24 = scalar_lea.vmem [#allocation2], %s3910_s8 }
  0x74   : > { %919 = vst [vmem:[#allocation3 + $0x87] sm:$0x1] %v918_v0  ;;  %v1123_v4 = vld [vmem:[%s1122_s24] sm:$0x1]  ;;  %s1145_s16 = sadd.s32 181, %s3788_s18  ;;  %s1150_s25 = sadd.s32 182, %s3788_s18 }
  0x75   : > { %1124 = vst [vmem:[#allocation3 + $0xb0] sm:$0x1] %v1123_v4  ;;  %s1146_s29 = sld [smem:[#allocation5 + %s1145_s16]]  ;;  %s1127_s28 = scalar_lea.vmem [#allocation2], %s1126_s15  ;;  %v1556_v0 = vsel %vm1552_vm0, %v4043_v62, 0.0 }
  0x76   : > { %v1128_v5 = vld [vmem:[%s1127_s28] sm:$0x1]  ;;  %s1151_s27 = sld [smem:[#allocation5 + %s1150_s25]]  ;;  %s1132_s5 = scalar_lea.vmem [#allocation2], %s1131_s20 }
  0x77   : > { %1129 = vst [vmem:[#allocation3 + $0xb1] sm:$0x1] %v1128_v5  ;;  %v1133_v6 = vld [vmem:[%s1132_s5] sm:$0x1]  ;;  %s1155_s30 = sadd.s32 183, %s3788_s18  ;;  %s760_s6 = sadd.s32 104, %s3788_s18 }
  0x78   : > { %1134 = vst [vmem:[#allocation3 + $0xb2] sm:$0x1] %v1133_v6  ;;  %s1156_s12 = sld [smem:[#allocation5 + %s1155_s30]]  ;;  %s1137_s7 = scalar_lea.vmem [#allocation2], %s1136_s0  ;;  %v1557_v6 = vadd.f32 %v1556_v0, %v1555_v31 }
  0x79   : > { %v1138_v11 = vld [vmem:[%s1137_s7] sm:$0x1]  ;;  %s761_s8 = sld [smem:[#allocation5 + %s760_s6]]  ;;  %s1142_s10 = scalar_lea.vmem [#allocation2], %s1141_s23 }
  0x7a   : > { %1139 = vst [vmem:[#allocation3 + $0xb3] sm:$0x1] %v1138_v11  ;;  %v1143_v12 = vld [vmem:[%s1142_s10] sm:$0x1]  ;;  %s765_s15 = sadd.s32 105, %s3788_s18  ;;  %s770_s21 = sadd.s32 106, %s3788_s18 }
  0x7b   : > { %1144 = vst [vmem:[#allocation3 + $0xb4] sm:$0x1] %v1143_v12  ;;  %s766_s9 = sld [smem:[#allocation5 + %s765_s15]]  ;;  %s1147_s11 = scalar_lea.vmem [#allocation2], %s1146_s29  ;;  %v1536_v11 = vld [vmem:[#allocation3 + $0x80] sm:$0xff]  ;;  %v1558_v12 = vsel %vm1552_vm0, %v3916_v59, 0.0 }
  0x7c   : > { %v1148_v14 = vld [vmem:[%s1147_s11] sm:$0x1]  ;;  %s3932_s20 = sld [smem:[#allocation5 + %s770_s21]]  ;;  %s1152_s13 = scalar_lea.vmem [#allocation2], %s1151_s27 }
  0x7d   : > { %1149 = vst [vmem:[#allocation3 + $0xb5] sm:$0x1] %v1148_v14  ;;  %v1153_v15 = vld [vmem:[%s1152_s13] sm:$0x1]  ;;  %s775_s0 = sadd.s32 107, %s3788_s18  ;;  %s780_s24 = sadd.s32 108, %s3788_s18 }
  0x7e   : > { %1154 = vst [vmem:[#allocation3 + $0xb6] sm:$0x1] %v1153_v15  ;;  %s3936_s16 = sld [smem:[#allocation5 + %s775_s0]]  ;;  %s1157_s23 = scalar_lea.vmem [#allocation2], %s1156_s12 }
  0x7f   : > { %v1158_v16 = vld [vmem:[%s1157_s23] sm:$0x1]  ;;  %s3938_s25 = sld [smem:[#allocation5 + %s780_s24]]  ;;  %s762_s29 = scalar_lea.vmem [#allocation2], %s761_s8 }
  0x80   : > { %1159 = vst [vmem:[#allocation3 + $0xb7] sm:$0x1] %v1158_v16  ;;  %v763_v17 = vld [vmem:[%s762_s29] sm:$0x1]  ;;  %s785_s28 = sadd.s32 109, %s3788_s18  ;;  %s790_s5 = sadd.s32 110, %s3788_s18  ;;  %v1559_v16 = vadd.f32 %v1558_v12, %v1557_v6 }
  0x81   : > { %764 = vst [vmem:[#allocation3 + $0x68] sm:$0x1] %v763_v17  ;;  %s3942_s27 = sld [smem:[#allocation5 + %s785_s28]]  ;;  %s767_s30 = scalar_lea.vmem [#allocation2], %s766_s9  ;;  %v1560_v17 = vsel %vm1552_vm0, %v1536_v11, 0.0 }
  0x82   : > { %v768_v20 = vld [vmem:[%s767_s30] sm:$0x1]  ;;  %s3944_s6 = sld [smem:[#allocation5 + %s790_s5]]  ;;  %s772_s12 = scalar_lea.vmem [#allocation2], %s3932_s20  ;;  %v1561_v22 = vadd.f32 %v1560_v17, %v1559_v16 }
  0x83   : > { %769 = vst [vmem:[#allocation3 + $0x69] sm:$0x1] %v768_v20  ;;  %v773_v23 = vld [vmem:[%s772_s12] sm:$0x1]  ;;  %s795_s7 = sadd.s32 111, %s3788_s18  ;;  %s1160_s8 = sadd.s32 184, %s3788_s18 }
  0x84   : > { %774 = vst [vmem:[#allocation3 + $0x6a] sm:$0x1] %v773_v23  ;;  %s796_s10 = sld [smem:[#allocation5 + %s795_s7]]  ;;  %s777_s15 = scalar_lea.vmem [#allocation2], %s3936_s16 }
  0x85   : > { %v778_v25 = vld [vmem:[%s777_s15] sm:$0x1]  ;;  %s1161_s21 = sld [smem:[#allocation5 + %s1160_s8]]  ;;  %s782_s9 = scalar_lea.vmem [#allocation2], %s3938_s25 }
  0x86   : > { %779 = vst [vmem:[#allocation3 + $0x6b] sm:$0x1] %v778_v25  ;;  %v783_v26 = vld [vmem:[%s782_s9] sm:$0x1]  ;;  %s1165_s11 = sadd.s32 185, %s3788_s18  ;;  %s1170_s20 = sadd.s32 186, %s3788_s18 }
  0x87   : > { %v1542_v27 = vld [vmem:[#allocation3 + $0xb0] sm:$0xff]  ;;  %784 = vst [vmem:[#allocation3 + $0x6c] sm:$0x1] %v783_v26  ;;  %s1166_s13 = sld [smem:[#allocation5 + %s1165_s11]]  ;;  %s787_s0 = scalar_lea.vmem [#allocation2], %s3942_s27 }
  0x88   : > { %3320 = vmatmul.msk.f32.vlgmr.msra.gmra.mxu3 %vm1552_vm0, %v1542_v27  ;;  %v788_v28 = vld [vmem:[%s787_s0] sm:$0x1]  ;;  %s1171_s24 = sld [smem:[#allocation5 + %s1170_s20]]  ;;  %s792_s16 = scalar_lea.vmem [#allocation2], %s3944_s6 }
  0x89   : > { %789 = vst [vmem:[#allocation3 + $0x6d] sm:$0x1] %v788_v28  ;;  %v793_v29 = vld [vmem:[%s792_s16] sm:$0x1]  ;;  %s1175_s23 = sadd.s32 187, %s3788_s18  ;;  %s1180_s29 = sadd.s32 188, %s3788_s18 }
  0x8a   : > { %794 = vst [vmem:[#allocation3 + $0x6e] sm:$0x1] %v793_v29  ;;  %s1176_s25 = sld [smem:[#allocation5 + %s1175_s23]]  ;;  %s797_s28 = scalar_lea.vmem [#allocation2], %s796_s10 }
  0x8b   : > { %v798_v30 = vld [vmem:[%s797_s28] sm:$0x1]  ;;  %s3960_s5 = sld [smem:[#allocation5 + %s1180_s29]]  ;;  %s1162_s30 = scalar_lea.vmem [#allocation2], %s1161_s21 }
  0x8c   : > { %799 = vst [vmem:[#allocation3 + $0x6f] sm:$0x1] %v798_v30  ;;  %v1163_v32 = vld [vmem:[%s1162_s30] sm:$0x1]  ;;  %s1185_s27 = sadd.s32 189, %s3788_s18  ;;  %s1190_s12 = sadd.s32 190, %s3788_s18 }
  0x8d   : > { %1164 = vst [vmem:[#allocation3 + $0xb8] sm:$0x1] %v1163_v32  ;;  %s3964_s7 = sld [smem:[#allocation5 + %s1185_s27]]  ;;  %s1167_s6 = scalar_lea.vmem [#allocation2], %s1166_s13 }
  0x8e   : > { %v1168_v35 = vld [vmem:[%s1167_s6] sm:$0x1]  ;;  %s3966_s8 = sld [smem:[#allocation5 + %s1190_s12]]  ;;  %s1172_s10 = scalar_lea.vmem [#allocation2], %s1171_s24 }
  0x8f   : > { %1169 = vst [vmem:[#allocation3 + $0xb9] sm:$0x1] %v1168_v35  ;;  %v1173_v36 = vld [vmem:[%s1172_s10] sm:$0x1]  ;;  %s1195_s15 = sadd.s32 191, %s3788_s18  ;;  %s320_s21 = sadd.s32 16, %s3788_s18 }
  0x90   : > { %1174 = vst [vmem:[#allocation3 + $0xba] sm:$0x1] %v1173_v36  ;;  %s3972_s9 = sld [smem:[#allocation5 + %s1195_s15]]  ;;  %s1177_s11 = scalar_lea.vmem [#allocation2], %s1176_s25 }
  0x91   : > { %v1178_v38 = vld [vmem:[%s1177_s11] sm:$0x1]  ;;  %s3974_s20 = sld [smem:[#allocation5 + %s320_s21]]  ;;  %s1182_s13 = scalar_lea.vmem [#allocation2], %s3960_s5 }
  0x92   : > { %1179 = vst [vmem:[#allocation3 + $0xbb] sm:$0x1] %v1178_v38  ;;  %v1183_v39 = vld [vmem:[%s1182_s13] sm:$0x1]  ;;  %s325_s0 = sadd.s32 17, %s3788_s18  ;;  %s330_s24 = sadd.s32 18, %s3788_s18 }
  0x93   : > { %v1533_v1 = vld [vmem:[#allocation3 + $0x68] sm:$0xff]  ;;  %1184 = vst [vmem:[#allocation3 + $0xbc] sm:$0x1] %v1183_v39  ;;  %s3981_s16 = sld [smem:[#allocation5 + %s325_s0]]  ;;  %s1187_s23 = scalar_lea.vmem [#allocation2], %s3964_s7 }
  0x94   : > { %3311 = vmatmul.msk.f32.gmra.mxu2 %vm1552_vm0, %v1533_v1  ;;  %v1188_v2 = vld [vmem:[%s1187_s23] sm:$0x1]  ;;  %s3987_s29 = sld [smem:[#allocation5 + %s330_s24]]  ;;  %s1192_s25 = scalar_lea.vmem [#allocation2], %s3966_s8 }
  0x95   : > { %1189 = vst [vmem:[#allocation3 + $0xbd] sm:$0x1] %v1188_v2  ;;  %v1193_v40 = vld [vmem:[%s1192_s25] sm:$0x1]  ;;  %s335_s28 = sadd.s32 19, %s3788_s18  ;;  %s340_s5 = sadd.s32 20, %s3788_s18 }
  0x96   : > { %1194 = vst [vmem:[#allocation3 + $0xbe] sm:$0x1] %v1193_v40  ;;  %s336_s30 = sld [smem:[#allocation5 + %s335_s28]]  ;;  %s1197_s27 = scalar_lea.vmem [#allocation2], %s3972_s9 }
  0x97   : > { %v1198_v3 = vld [vmem:[%s1197_s27] sm:$0x1]  ;;  %s3995_s12 = sld [smem:[#allocation5 + %s340_s5]]  ;;  %s322_s7 = scalar_lea.vmem [#allocation2], %s3974_s20 }
  0x98   : > { %1199 = vst [vmem:[#allocation3 + $0xbf] sm:$0x1] %v1198_v3  ;;  %v323_v41 = vld [vmem:[%s322_s7] sm:$0x1]  ;;  %s345_s6 = sadd.s32 21, %s3788_s18  ;;  %s350_s8 = sadd.s32 22, %s3788_s18 }
  0x99   : > { %324 = vst [vmem:[#allocation3 + $0x10] sm:$0x1] %v323_v41  ;;  %s4002_s10 = sld [smem:[#allocation5 + %s345_s6]]  ;;  %s327_s15 = scalar_lea.vmem [#allocation2], %s3981_s16 }
  0x9a   : > { %v328_v7 = vld [vmem:[%s327_s15] sm:$0x1]  ;;  %s4007_s21 = sld [smem:[#allocation5 + %s350_s8]]  ;;  %s332_s9 = scalar_lea.vmem [#allocation2], %s3987_s29 }
  0x9b   : > { %329 = vst [vmem:[#allocation3 + $0x11] sm:$0x1] %v328_v7  ;;  %v333_v8 = vld [vmem:[%s332_s9] sm:$0x1]  ;;  %s355_s11 = sadd.s32 23, %s3788_s18  ;;  %s1040_s20 = sadd.s32 160, %s3788_s18 }
  0x9c   : > { %334 = vst [vmem:[#allocation3 + $0x12] sm:$0x1] %v333_v8  ;;  %s356_s13 = sld [smem:[#allocation5 + %s355_s11]]  ;;  %s337_s0 = scalar_lea.vmem [#allocation2], %s336_s30 }
  0x9d   : > { %v338_v9 = vld [vmem:[%s337_s0] sm:$0x1]  ;;  %s1041_s24 = sld [smem:[#allocation5 + %s1040_s20]]  ;;  %s342_s16 = scalar_lea.vmem [#allocation2], %s3995_s12 }
  0x9e   : > { %339 = vst [vmem:[#allocation3 + $0x13] sm:$0x1] %v338_v9  ;;  %v343_v42 = vld [vmem:[%s342_s16] sm:$0x1]  ;;  %s1045_s23 = sadd.s32 161, %s3788_s18  ;;  %s1050_s29 = sadd.s32 162, %s3788_s18 }
  0x9f   : > { %v1543_v43 = vld [vmem:[#allocation3 + $0xb8] sm:$0xff]  ;;  %344 = vst [vmem:[#allocation3 + $0x14] sm:$0x1] %v343_v42  ;;  %s1046_s25 = sld [smem:[#allocation5 + %s1045_s23]]  ;;  %s347_s28 = scalar_lea.vmem [#allocation2], %s4002_s10 }
  0xa0   : > { %3321 = vmatmul.msk.f32.gmra.mxu3 %vm1552_vm0, %v1543_v43  ;;  %v348_v10 = vld [vmem:[%s347_s28] sm:$0x1]  ;;  %s1051_s5 = sld [smem:[#allocation5 + %s1050_s29]]  ;;  %s352_s30 = scalar_lea.vmem [#allocation2], %s4007_s21 }
  0xa1   : > { %349 = vst [vmem:[#allocation3 + $0x15] sm:$0x1] %v348_v10  ;;  %v353_v13 = vld [vmem:[%s352_s30] sm:$0x1]  ;;  %s1055_s27 = sadd.s32 163, %s3788_s18  ;;  %s1060_s7 = sadd.s32 164, %s3788_s18 }
  0xa2   : > { %354 = vst [vmem:[#allocation3 + $0x16] sm:$0x1] %v353_v13  ;;  %s1056_s12 = sld [smem:[#allocation5 + %s1055_s27]]  ;;  %s357_s6 = scalar_lea.vmem [#allocation2], %s356_s13 }
  0xa3   : > { %v358_v44 = vld [vmem:[%s357_s6] sm:$0x1]  ;;  %s1061_s8 = sld [smem:[#allocation5 + %s1060_s7]]  ;;  %s1042_s15 = scalar_lea.vmem [#allocation2], %s1041_s24 }
  0xa4   : > { %359 = vst [vmem:[#allocation3 + $0x17] sm:$0x1] %v358_v44  ;;  %v1043_v45 = vld [vmem:[%s1042_s15] sm:$0x1]  ;;  %s1065_s10 = sadd.s32 165, %s3788_s18  ;;  %s1070_s9 = sadd.s32 166, %s3788_s18 }
  0xa5   : > { %1044 = vst [vmem:[#allocation3 + $0xa0] sm:$0x1] %v1043_v45  ;;  %s1066_s11 = sld [smem:[#allocation5 + %s1065_s10]]  ;;  %s1047_s20 = scalar_lea.vmem [#allocation2], %s1046_s25 }
  0xa6   : > { %v1048_v46 = vld [vmem:[%s1047_s20] sm:$0x1]  ;;  %s1071_s21 = sld [smem:[#allocation5 + %s1070_s9]]  ;;  %s1052_s0 = scalar_lea.vmem [#allocation2], %s1051_s5 }
  0xa7   : > { %1049 = vst [vmem:[#allocation3 + $0xa1] sm:$0x1] %v1048_v46  ;;  %v1053_v47 = vld [vmem:[%s1052_s0] sm:$0x1]  ;;  %s1075_s13 = sadd.s32 167, %s3788_s18  ;;  %s1200_s16 = sadd.s32 192, %s3788_s18 }
  0xa8   : > { %1054 = vst [vmem:[#allocation3 + $0xa2] sm:$0x1] %v1053_v47  ;;  %s1076_s23 = sld [smem:[#allocation5 + %s1075_s13]]  ;;  %s1057_s29 = scalar_lea.vmem [#allocation2], %s1056_s12 }
  0xa9   : > { %v1058_v48 = vld [vmem:[%s1057_s29] sm:$0x1]  ;;  %s1201_s24 = sld [smem:[#allocation5 + %s1200_s16]]  ;;  %s1062_s28 = scalar_lea.vmem [#allocation2], %s1061_s8 }
  0xaa   : > { %1059 = vst [vmem:[#allocation3 + $0xa3] sm:$0x1] %v1058_v48  ;;  %v1063_v49 = vld [vmem:[%s1062_s28] sm:$0x1]  ;;  %s1205_s25 = sadd.s32 193, %s3788_s18  ;;  %s1210_s30 = sadd.s32 194, %s3788_s18 }
  0xab   : > { %v1522_v50 = vld [vmem:[#allocation3 + $0x10] sm:$0xff]  ;;  %1064 = vst [vmem:[#allocation3 + $0xa4] sm:$0x1] %v1063_v49  ;;  %s1206_s27 = sld [smem:[#allocation5 + %s1205_s25]]  ;;  %s1067_s5 = scalar_lea.vmem [#allocation2], %s1066_s11 }
  0xac   : > { %2672 = vrot.lane.b32.xlu1 %v1522_v50, %s3705_s26  ;;  %v1068_v51 = vld [vmem:[%s1067_s5] sm:$0x1]  ;;  %s1211_s7 = sld [smem:[#allocation5 + %s1210_s30]]  ;;  %s1072_s12 = scalar_lea.vmem [#allocation2], %s1071_s21 }
  0xad   : > { %1069 = vst [vmem:[#allocation3 + $0xa5] sm:$0x1] %v1068_v51  ;;  %v1073_v52 = vld [vmem:[%s1072_s12] sm:$0x1]  ;;  %s1215_s6 = sadd.s32 195, %s3788_s18  ;;  %s1220_s15 = sadd.s32 196, %s3788_s18 }
  0xae   : > { %1074 = vst [vmem:[#allocation3 + $0xa6] sm:$0x1] %v1073_v52  ;;  %s1216_s8 = sld [smem:[#allocation5 + %s1215_s6]]  ;;  %s1077_s10 = scalar_lea.vmem [#allocation2], %s1076_s23 }
  0xaf   : > { %v1078_v53 = vld [vmem:[%s1077_s10] sm:$0x1]  ;;  %s1221_s9 = sld [smem:[#allocation5 + %s1220_s15]]  ;;  %s1202_s20 = scalar_lea.vmem [#allocation2], %s1201_s24 }
  0xb0   : > { %1079 = vst [vmem:[#allocation3 + $0xa7] sm:$0x1] %v1078_v53  ;;  %v1203_v54 = vld [vmem:[%s1202_s20] sm:$0x1]  ;;  %s1225_s11 = sadd.s32 197, %s3788_s18  ;;  %s1230_s0 = sadd.s32 198, %s3788_s18 }
  0xb1   : > { %1204 = vst [vmem:[#allocation3 + $0xc0] sm:$0x1] %v1203_v54  ;;  %s1226_s13 = sld [smem:[#allocation5 + %s1225_s11]]  ;;  %s1207_s16 = scalar_lea.vmem [#allocation2], %s1206_s27 }
  0xb2   : > { %v1208_v55 = vld [vmem:[%s1207_s16] sm:$0x1]  ;;  %s1231_s21 = sld [smem:[#allocation5 + %s1230_s0]]  ;;  %s1212_s29 = scalar_lea.vmem [#allocation2], %s1211_s7 }
  0xb3   : > { %1209 = vst [vmem:[#allocation3 + $0xc1] sm:$0x1] %v1208_v55  ;;  %v1213_v56 = vld [vmem:[%s1212_s29] sm:$0x1]  ;;  %s1235_s23 = sadd.s32 199, %s3788_s18  ;;  %s1360_s28 = sadd.s32 224, %s3788_s18 }
  0xb4   : > { %1214 = vst [vmem:[#allocation3 + $0xc2] sm:$0x1] %v1213_v56  ;;  %s1236_s25 = sld [smem:[#allocation5 + %s1235_s23]]  ;;  %s1217_s24 = scalar_lea.vmem [#allocation2], %s1216_s8 }
  0xb5   : > { %v1218_v60 = vld [vmem:[%s1217_s24] sm:$0x1]  ;;  %s1361_s30 = sld [smem:[#allocation5 + %s1360_s28]]  ;;  %s1222_s27 = scalar_lea.vmem [#allocation2], %s1221_s9 }
  0xb6   : > { %1219 = vst [vmem:[#allocation3 + $0xc3] sm:$0x1] %v1218_v60  ;;  %v1223_v61 = vld [vmem:[%s1222_s27] sm:$0x1]  ;;  %s1365_s5 = sadd.s32 225, %s3788_s18  ;;  %s1370_s7 = sadd.s32 226, %s3788_s18 }
  0xb7   : > { %1224 = vst [vmem:[#allocation3 + $0xc4] sm:$0x1] %v1223_v61  ;;  %s1366_s12 = sld [smem:[#allocation5 + %s1365_s5]]  ;;  %s1227_s6 = scalar_lea.vmem [#allocation2], %s1226_s13  ;;  %v1540_v19 = vld [vmem:[#allocation3 + $0xa0] sm:$0xff] }
  0xb8   : > { %v1228_v63 = vld [vmem:[%s1227_s6] sm:$0x1]  ;;  %s1371_s15 = sld [smem:[#allocation5 + %s1370_s7]]  ;;  %s1232_s8 = scalar_lea.vmem [#allocation2], %s1231_s21  ;;  %v1562_v24 = vsel %vm1552_vm0, %v1540_v19, 0.0 }
  0xb9   : > { %1229 = vst [vmem:[#allocation3 + $0xc5] sm:$0x1] %v1228_v63  ;;  %v1233_v37 = vld [vmem:[%s1232_s8] sm:$0x1]  ;;  %s1375_s10 = sadd.s32 227, %s3788_s18  ;;  %s1380_s20 = sadd.s32 228, %s3788_s18  ;;  %v1563_v27 = vadd.f32 %v1562_v24, %v1561_v22 }
  0xba   : > { %1234 = vst [vmem:[#allocation3 + $0xc6] sm:$0x1] %v1233_v37  ;;  %s1376_s9 = sld [smem:[#allocation5 + %s1375_s10]]  ;;  %s1237_s11 = scalar_lea.vmem [#allocation2], %s1236_s25 }
  0xbb   : > { %v1238_v4 = vld [vmem:[%s1237_s11] sm:$0x1]  ;;  %s1381_s0 = sld [smem:[#allocation5 + %s1380_s20]]  ;;  %s1362_s13 = scalar_lea.vmem [#allocation2], %s1361_s30 }
  0xbc   : > { %1239 = vst [vmem:[#allocation3 + $0xc7] sm:$0x1] %v1238_v4  ;;  %v1363_v5 = vld [vmem:[%s1362_s13] sm:$0x1]  ;;  %s1385_s16 = sadd.s32 229, %s3788_s18  ;;  %s1390_s29 = sadd.s32 230, %s3788_s18 }
  0xbd   : > { %1364 = vst [vmem:[#allocation3 + $0xe0] sm:$0x1] %v1363_v5  ;;  %s1386_s21 = sld [smem:[#allocation5 + %s1385_s16]]  ;;  %s1367_s23 = scalar_lea.vmem [#allocation2], %s1366_s12 }
  0xbe   : > { %v1368_v14 = vld [vmem:[%s1367_s23] sm:$0x1]  ;;  %s4053_s28 = sld [smem:[#allocation5 + %s1390_s29]]  ;;  %s1372_s25 = scalar_lea.vmem [#allocation2], %s1371_s15 }
  0xbf   : > { %1369 = vst [vmem:[#allocation3 + $0xe1] sm:$0x1] %v1368_v14  ;;  %v1373_v15 = vld [vmem:[%s1372_s25] sm:$0x1]  ;;  %s1395_s24 = sadd.s32 231, %s3788_s18  ;;  %s800_s30 = sadd.s32 112, %s3788_s18 }
  0xc0   : > { %1374 = vst [vmem:[#allocation3 + $0xe2] sm:$0x1] %v1373_v15  ;;  %s4057_s27 = sld [smem:[#allocation5 + %s1395_s24]]  ;;  %s1377_s5 = scalar_lea.vmem [#allocation2], %s1376_s9 }
  0xc1   : > { %v1378_v18 = vld [vmem:[%s1377_s5] sm:$0x1]  ;;  %s801_s7 = sld [smem:[#allocation5 + %s800_s30]]  ;;  %s1382_s12 = scalar_lea.vmem [#allocation2], %s1381_s0 }
  0xc2   : > { %1379 = vst [vmem:[#allocation3 + $0xe3] sm:$0x1] %v1378_v18  ;;  %v1383_v59 = vld [vmem:[%s1382_s12] sm:$0x1]  ;;  %s805_s6 = sadd.s32 113, %s3788_s18  ;;  %s810_s15 = sadd.s32 114, %s3788_s18 }
  0xc3   : > { %1384 = vst [vmem:[#allocation3 + $0xe4] sm:$0x1] %v1383_v59  ;;  %v1544_v20 = vld [vmem:[#allocation3 + $0xc0] sm:$0xff]  ;;  %s806_s8 = sld [smem:[#allocation5 + %s805_s6]]  ;;  %s1387_s10 = scalar_lea.vmem [#allocation2], %s1386_s21 }
  0xc4   : > { %v1388_v21 = vld [vmem:[%s1387_s10] sm:$0x1]  ;;  %s811_s20 = sld [smem:[#allocation5 + %s810_s15]]  ;;  %3322 = vmatmul.msk.f32.gmra.mxu3 %vm1552_vm0, %v1544_v20  ;;  %s1392_s9 = scalar_lea.vmem [#allocation2], %s4053_s28  ;;  %v1564_v28 = vsel %vm1552_vm0, %v1544_v20, 0.0 }
  0xc5   : > { %1389 = vst [vmem:[#allocation3 + $0xe5] sm:$0x1] %v1388_v21  ;;  %v1393_v23 = vld [vmem:[%s1392_s9] sm:$0x1]  ;;  %s815_s11 = sadd.s32 115, %s3788_s18  ;;  %s820_s0 = sadd.s32 116, %s3788_s18  ;;  %v1565_v32 = vadd.f32 %v1564_v28, %v1563_v27 }
  0xc6   : > { %1394 = vst [vmem:[#allocation3 + $0xe6] sm:$0x1] %v1393_v23  ;;  %s816_s13 = sld [smem:[#allocation5 + %s815_s11]]  ;;  %s1397_s16 = scalar_lea.vmem [#allocation2], %s4057_s27 }
  0xc7   : > { %v1398_v25 = vld [vmem:[%s1397_s16] sm:$0x1]  ;;  %s821_s29 = sld [smem:[#allocation5 + %s820_s0]]  ;;  %s802_s21 = scalar_lea.vmem [#allocation2], %s801_s7 }
  0xc8   : > { %1399 = vst [vmem:[#allocation3 + $0xe7] sm:$0x1] %v1398_v25  ;;  %v803_v26 = vld [vmem:[%s802_s21] sm:$0x1]  ;;  %s825_s23 = sadd.s32 117, %s3788_s18  ;;  %s830_s25 = sadd.s32 118, %s3788_s18 }
  0xc9   : > { %804 = vst [vmem:[#allocation3 + $0x70] sm:$0x1] %v803_v26  ;;  %s826_s28 = sld [smem:[#allocation5 + %s825_s23]]  ;;  %s807_s24 = scalar_lea.vmem [#allocation2], %s806_s8 }
  0xca   : > { %v808_v29 = vld [vmem:[%s807_s24] sm:$0x1]  ;;  %s831_s30 = sld [smem:[#allocation5 + %s830_s25]]  ;;  %s812_s27 = scalar_lea.vmem [#allocation2], %s811_s20 }
  0xcb   : > { %809 = vst [vmem:[#allocation3 + $0x71] sm:$0x1] %v808_v29  ;;  %v813_v30 = vld [vmem:[%s812_s27] sm:$0x1]  ;;  %s835_s5 = sadd.s32 119, %s3788_s18  ;;  %s280_s12 = sadd.s32 8, %s3788_s18 }
  0xcc   : > { %814 = vst [vmem:[#allocation3 + $0x72] sm:$0x1] %v813_v30  ;;  %s836_s7 = sld [smem:[#allocation5 + %s835_s5]]  ;;  %s817_s6 = scalar_lea.vmem [#allocation2], %s816_s13  ;;  %v3586_v30 = vld [vmem:[#allocation3 + $0x60] sm:$0xff] }
  0xcd   : > { %v818_v33 = vld [vmem:[%s817_s6] sm:$0x1]  ;;  %s281_s15 = sld [smem:[#allocation5 + %s280_s12]]  ;;  %s822_s10 = scalar_lea.vmem [#allocation2], %s821_s29 }
  0xce   : > { %819 = vst [vmem:[#allocation3 + $0x73] sm:$0x1] %v818_v33  ;;  %v823_v34 = vld [vmem:[%s822_s10] sm:$0x1]  ;;  %s285_s8 = sadd.s32 9, %s3788_s18  ;;  %s290_s9 = sadd.s32 10, %s3788_s18 }
  0xcf   : > { %v1548_v35 = vld [vmem:[#allocation3 + $0xe0] sm:$0xff]  ;;  %824 = vst [vmem:[#allocation3 + $0x74] sm:$0x1] %v823_v34  ;;  %s286_s11 = sld [smem:[#allocation5 + %s285_s8]]  ;;  %s827_s20 = scalar_lea.vmem [#allocation2], %s826_s28 }
  0xd0   : > { %v1566_v36 = vsel %vm1552_vm0, %v1548_v35, 0.0  ;;  %v828_v38 = vld [vmem:[%s827_s20] sm:$0x1]  ;;  %s291_s0 = sld [smem:[#allocation5 + %s290_s9]]  ;;  %s832_s13 = scalar_lea.vmem [#allocation2], %s831_s30 }
  0xd1   : > { %v1567_v39 = vadd.f32 %v1566_v36, %v1565_v32  ;;  %829 = vst [vmem:[#allocation3 + $0x75] sm:$0x1] %v828_v38  ;;  %v833_v1 = vld [vmem:[%s832_s13] sm:$0x1]  ;;  %s295_s16 = sadd.s32 11, %s3788_s18  ;;  %s300_s29 = sadd.s32 12, %s3788_s18 }
  0xd2   : > { %834 = vst [vmem:[#allocation3 + $0x76] sm:$0x1] %v833_v1  ;;  %s296_s21 = sld [smem:[#allocation5 + %s295_s16]]  ;;  %s837_s23 = scalar_lea.vmem [#allocation2], %s836_s7 }
  0xd3   : > { %3286 = vmatmul.msk.f32.vlgmr.msra.gmra.mxu0 %vm1552_vm0, %v1567_v39  ;;  %3290 = vmatmul.msk.f32.vlgmr.msra.gmra.mxu1 %vm1552_vm0, %v1567_v39  ;;  %v838_v2 = vld [vmem:[%s837_s23] sm:$0x1]  ;;  %s301_s25 = sld [smem:[#allocation5 + %s300_s29]]  ;;  %s282_s28 = scalar_lea.vmem [#allocation2], %s281_s15 }
  0xd4   : > { %839 = vst [vmem:[#allocation3 + $0x77] sm:$0x1] %v838_v2  ;;  %v283_v40 = vld [vmem:[%s282_s28] sm:$0x1]  ;;  %s305_s24 = sadd.s32 13, %s3788_s18  ;;  %s310_s27 = sadd.s32 14, %s3788_s18 }
  0xd5   : > { %284 = vst [vmem:[#allocation3 + $0x8] sm:$0x1] %v283_v40  ;;  %s306_s30 = sld [smem:[#allocation5 + %s305_s24]]  ;;  %s287_s5 = scalar_lea.vmem [#allocation2], %s286_s11 }
  0xd6   : > { %v288_v3 = vld [vmem:[%s287_s5] sm:$0x1]  ;;  %s311_s12 = sld [smem:[#allocation5 + %s310_s27]]  ;;  %s292_s6 = scalar_lea.vmem [#allocation2], %s291_s0 }
  0xd7   : > { %289 = vst [vmem:[#allocation3 + $0x9] sm:$0x1] %v288_v3  ;;  %v293_v41 = vld [vmem:[%s292_s6] sm:$0x1]  ;;  %s315_s7 = sadd.s32 15, %s3788_s18  ;;  %s440_s10 = sadd.s32 40, %s3788_s18 }
  0xd8   : > { %294 = vst [vmem:[#allocation3 + $0xa] sm:$0x1] %v293_v41  ;;  %s316_s8 = sld [smem:[#allocation5 + %s315_s7]]  ;;  %s297_s9 = scalar_lea.vmem [#allocation2], %s296_s21 }
  0xd9   : > { %v298_v7 = vld [vmem:[%s297_s9] sm:$0x1]  ;;  %s441_s15 = sld [smem:[#allocation5 + %s440_s10]]  ;;  %s302_s20 = scalar_lea.vmem [#allocation2], %s301_s25 }
  0xda   : > { %299 = vst [vmem:[#allocation3 + $0xb] sm:$0x1] %v298_v7  ;;  %v303_v8 = vld [vmem:[%s302_s20] sm:$0x1]  ;;  %s445_s11 = sadd.s32 41, %s3788_s18  ;;  %s450_s13 = sadd.s32 42, %s3788_s18 }
  0xdb   : > { %v1534_v9 = vld [vmem:[#allocation3 + $0x70] sm:$0xff]  ;;  %304 = vst [vmem:[#allocation3 + $0xc] sm:$0x1] %v303_v8  ;;  %s446_s16 = sld [smem:[#allocation5 + %s445_s11]]  ;;  %s307_s0 = scalar_lea.vmem [#allocation2], %s306_s30 }
  0xdc   : > { %3312 = vmatmul.msk.f32.gmra.mxu2 %vm1552_vm0, %v1534_v9  ;;  %v308_v42 = vld [vmem:[%s307_s0] sm:$0x1]  ;;  %s451_s29 = sld [smem:[#allocation5 + %s450_s13]]  ;;  %s312_s21 = scalar_lea.vmem [#allocation2], %s311_s12 }
  0xdd   : > { %309 = vst [vmem:[#allocation3 + $0xd] sm:$0x1] %v308_v42  ;;  %v313_v43 = vld [vmem:[%s312_s21] sm:$0x1]  ;;  %s455_s23 = sadd.s32 43, %s3788_s18  ;;  %s460_s28 = sadd.s32 44, %s3788_s18 }
  0xde   : > { %314 = vst [vmem:[#allocation3 + $0xe] sm:$0x1] %v313_v43  ;;  %s456_s25 = sld [smem:[#allocation5 + %s455_s23]]  ;;  %s317_s24 = scalar_lea.vmem [#allocation2], %s316_s8 }
  0xdf   : > { %v318_v10 = vld [vmem:[%s317_s24] sm:$0x1]  ;;  %s461_s27 = sld [smem:[#allocation5 + %s460_s28]]  ;;  %s442_s5 = scalar_lea.vmem [#allocation2], %s441_s15 }
  0xe0   : > { %319 = vst [vmem:[#allocation3 + $0xf] sm:$0x1] %v318_v10  ;;  %v443_v13 = vld [vmem:[%s442_s5] sm:$0x1]  ;;  %s465_s30 = sadd.s32 45, %s3788_s18  ;;  %s470_s6 = sadd.s32 46, %s3788_s18 }
  0xe1   : > { %444 = vst [vmem:[#allocation3 + $0x28] sm:$0x1] %v443_v13  ;;  %s466_s7 = sld [smem:[#allocation5 + %s465_s30]]  ;;  %s447_s10 = scalar_lea.vmem [#allocation2], %s446_s16 }
  0xe2   : > { %v448_v44 = vld [vmem:[%s447_s10] sm:$0x1]  ;;  %s471_s12 = sld [smem:[#allocation5 + %s470_s6]]  ;;  %s452_s9 = scalar_lea.vmem [#allocation2], %s451_s29 }
  0xe3   : > { %449 = vst [vmem:[#allocation3 + $0x29] sm:$0x1] %v448_v44  ;;  %v453_v45 = vld [vmem:[%s452_s9] sm:$0x1]  ;;  %s475_s8 = sadd.s32 47, %s3788_s18  ;;  %s600_s20 = sadd.s32 72, %s3788_s18 }
  0xe4   : > { %454 = vst [vmem:[#allocation3 + $0x2a] sm:$0x1] %v453_v45  ;;  %s476_s11 = sld [smem:[#allocation5 + %s475_s8]]  ;;  %s457_s13 = scalar_lea.vmem [#allocation2], %s456_s25 }
  0xe5   : > { %v458_v46 = vld [vmem:[%s457_s13] sm:$0x1]  ;;  %s601_s15 = sld [smem:[#allocation5 + %s600_s20]]  ;;  %s462_s0 = scalar_lea.vmem [#allocation2], %s461_s27 }
  0xe6   : > { %459 = vst [vmem:[#allocation3 + $0x2b] sm:$0x1] %v458_v46  ;;  %v463_v47 = vld [vmem:[%s462_s0] sm:$0x1]  ;;  %s605_s16 = sadd.s32 73, %s3788_s18  ;;  %s610_s21 = sadd.s32 74, %s3788_s18 }
  0xe7   : > { %464 = vst [vmem:[#allocation3 + $0x2c] sm:$0x1] %v463_v47  ;;  %s606_s23 = sld [smem:[#allocation5 + %s605_s16]]  ;;  %v4095_v48 = vld [vmem:[#allocation3 + $0x8] sm:$0xff]  ;;  %s467_s29 = scalar_lea.vmem [#allocation2], %s466_s7 }
  0xe8   : > { %v468_v49 = vld [vmem:[%s467_s29] sm:$0x1]  ;;  %s611_s28 = sld [smem:[#allocation5 + %s610_s21]]  ;;  %2670 = vrot.lane.b32.xlu0 %v4095_v48, %s3705_s26  ;;  %s472_s25 = scalar_lea.vmem [#allocation2], %s471_s12  ;;  %v1568_v41 = vsel %vm1552_vm0, %v4095_v48, 0.0  ;;  %v4178_v46 = vld [vmem:[#allocation3 + $0x68] sm:$0xff] }
  0xe9   : > { %469 = vst [vmem:[#allocation3 + $0x2d] sm:$0x1] %v468_v49  ;;  %v473_v50 = vld [vmem:[%s472_s25] sm:$0x1]  ;;  %s615_s24 = sadd.s32 75, %s3788_s18  ;;  %s620_s27 = sadd.s32 76, %s3788_s18 }
  0xea   : > { %474 = vst [vmem:[#allocation3 + $0x2e] sm:$0x1] %v473_v50  ;;  %s616_s5 = sld [smem:[#allocation5 + %s615_s24]]  ;;  %s477_s30 = scalar_lea.vmem [#allocation2], %s476_s11  ;;  %v1573_v47 = vsel %vm1552_vm0, %v4178_v46, 0.0 }
  0xeb   : > { %v478_v51 = vld [vmem:[%s477_s30] sm:$0x1]  ;;  %s621_s6 = sld [smem:[#allocation5 + %s620_s27]]  ;;  %s602_s7 = scalar_lea.vmem [#allocation2], %s601_s15 }
  0xec   : > { %479 = vst [vmem:[#allocation3 + $0x2f] sm:$0x1] %v478_v51  ;;  %v603_v52 = vld [vmem:[%s602_s7] sm:$0x1]  ;;  %s625_s10 = sadd.s32 77, %s3788_s18  ;;  %s630_s9 = sadd.s32 78, %s3788_s18 }
  0xed   : > { %604 = vst [vmem:[#allocation3 + $0x48] sm:$0x1] %v603_v52  ;;  %s626_s8 = sld [smem:[#allocation5 + %s625_s10]]  ;;  %s607_s20 = scalar_lea.vmem [#allocation2], %s606_s23 }
  0xee   : > { %v608_v53 = vld [vmem:[%s607_s20] sm:$0x1]  ;;  %s631_s12 = sld [smem:[#allocation5 + %s630_s9]]  ;;  %s612_s13 = scalar_lea.vmem [#allocation2], %s611_s28 }
  0xef   : > { %609 = vst [vmem:[#allocation3 + $0x49] sm:$0x1] %v608_v53  ;;  %v613_v54 = vld [vmem:[%s612_s13] sm:$0x1]  ;;  %s635_s11 = sadd.s32 79, %s3788_s18  ;;  %s480_s0 = sadd.s32 48, %s3788_s18 }
  0xf0   : > { %614 = vst [vmem:[#allocation3 + $0x4a] sm:$0x1] %v613_v54  ;;  %s636_s16 = sld [smem:[#allocation5 + %s635_s11]]  ;;  %s617_s21 = scalar_lea.vmem [#allocation2], %s616_s5 }
  0xf1   : > { %v618_v55 = vld [vmem:[%s617_s21] sm:$0x1]  ;;  %s481_s15 = sld [smem:[#allocation5 + %s480_s0]]  ;;  %s622_s29 = scalar_lea.vmem [#allocation2], %s621_s6 }
  0xf2   : > { %619 = vst [vmem:[#allocation3 + $0x4b] sm:$0x1] %v618_v55  ;;  %v623_v56 = vld [vmem:[%s622_s29] sm:$0x1]  ;;  %s485_s23 = sadd.s32 49, %s3788_s18  ;;  %s490_s25 = sadd.s32 50, %s3788_s18 }
  0xf3   : > { %624 = vst [vmem:[#allocation3 + $0x4c] sm:$0x1] %v623_v56  ;;  %v4107_v57 = vld [vmem:[#allocation3 + $0x28] sm:$0xff]  ;;  %s486_s24 = sld [smem:[#allocation5 + %s485_s23]]  ;;  %s627_s28 = scalar_lea.vmem [#allocation2], %s626_s8 }
  0xf4   : > { %v628_v58 = vld [vmem:[%s627_s28] sm:$0x1]  ;;  %s491_s27 = sld [smem:[#allocation5 + %s490_s25]]  ;;  %2678 = vrot.lane.b32.xlu0 %v4107_v57, %s3705_s26  ;;  %s632_s5 = scalar_lea.vmem [#allocation2], %s631_s12  ;;  %v1569_v3 = vsel %vm1552_vm0, %v4107_v57, 0.0 }
  0xf5   : > { %629 = vst [vmem:[#allocation3 + $0x4d] sm:$0x1] %v628_v58  ;;  %v633_v60 = vld [vmem:[%s632_s5] sm:$0x1]  ;;  %s495_s30 = sadd.s32 51, %s3788_s18  ;;  %s500_s6 = sadd.s32 52, %s3788_s18  ;;  %v1570_v42 = vadd.f32 %v1569_v3, %v1568_v41 }
  0xf6   : > { %634 = vst [vmem:[#allocation3 + $0x4e] sm:$0x1] %v633_v60  ;;  %s496_s7 = sld [smem:[#allocation5 + %s495_s30]]  ;;  %s637_s10 = scalar_lea.vmem [#allocation2], %s636_s16 }
  0xf7   : > { %v638_v61 = vld [vmem:[%s637_s10] sm:$0x1]  ;;  %s501_s9 = sld [smem:[#allocation5 + %s500_s6]]  ;;  %s482_s8 = scalar_lea.vmem [#allocation2], %s481_s15 }
  0xf8   : > { %639 = vst [vmem:[#allocation3 + $0x4f] sm:$0x1] %v638_v61  ;;  %v483_v63 = vld [vmem:[%s482_s8] sm:$0x1]  ;;  %s505_s20 = sadd.s32 53, %s3788_s18  ;;  %s510_s13 = sadd.s32 54, %s3788_s18 }
  0xf9   : > { %484 = vst [vmem:[#allocation3 + $0x30] sm:$0x1] %v483_v63  ;;  %s506_s11 = sld [smem:[#allocation5 + %s505_s20]]  ;;  %s487_s0 = scalar_lea.vmem [#allocation2], %s486_s24 }
  0xfa   : > { %v488_v31 = vld [vmem:[%s487_s0] sm:$0x1]  ;;  %s511_s12 = sld [smem:[#allocation5 + %s510_s13]]  ;;  %s492_s21 = scalar_lea.vmem [#allocation2], %s491_s27 }
  0xfb   : > { %489 = vst [vmem:[#allocation3 + $0x31] sm:$0x1] %v488_v31  ;;  %v493_v37 = vld [vmem:[%s492_s21] sm:$0x1]  ;;  %s515_s16 = sadd.s32 55, %s3788_s18  ;;  %s640_s29 = sadd.s32 80, %s3788_s18 }
  0xfc   : > { %494 = vst [vmem:[#allocation3 + $0x32] sm:$0x1] %v493_v37  ;;  %s516_s23 = sld [smem:[#allocation5 + %s515_s16]]  ;;  %2684 = vrot.lane.b32.xlu0 %v4043_v62, %s3705_s26  ;;  %s497_s15 = scalar_lea.vmem [#allocation2], %s496_s7 }
  0xfd   : > { %v498_v0 = vld [vmem:[%s497_s15] sm:$0x1]  ;;  %s641_s25 = sld [smem:[#allocation5 + %s640_s29]]  ;;  %s502_s24 = scalar_lea.vmem [#allocation2], %s501_s9 }
  0xfe   : > { %499 = vst [vmem:[#allocation3 + $0x33] sm:$0x1] %v498_v0  ;;  %v503_v4 = vld [vmem:[%s502_s24] sm:$0x1]  ;;  %s645_s28 = sadd.s32 81, %s3788_s18  ;;  %s650_s5 = sadd.s32 82, %s3788_s18 }
  0xff   : > { %504 = vst [vmem:[#allocation3 + $0x34] sm:$0x1] %v503_v4  ;;  %s646_s27 = sld [smem:[#allocation5 + %s645_s28]]  ;;  %s507_s30 = scalar_lea.vmem [#allocation2], %s506_s11  ;;  %v4137_v21 = vld [vmem:[#allocation3 + $0x48] sm:$0xff] }
 0x100   : > { %v508_v5 = vld [vmem:[%s507_s30] sm:$0x1]  ;;  %s651_s6 = sld [smem:[#allocation5 + %s650_s5]]  ;;  %s512_s10 = scalar_lea.vmem [#allocation2], %s511_s12  ;;  %v1571_v10 = vsel %vm1552_vm0, %v4137_v21, 0.0 }
 0x101   : > { %509 = vst [vmem:[#allocation3 + $0x35] sm:$0x1] %v508_v5  ;;  %v513_v62 = vld [vmem:[%s512_s10] sm:$0x1]  ;;  %s655_s7 = sadd.s32 83, %s3788_s18  ;;  %s660_s8 = sadd.s32 84, %s3788_s18  ;;  %v1572_v45 = vadd.f32 %v1571_v10, %v1570_v42 }
 0x102   : > { %514 = vst [vmem:[#allocation3 + $0x36] sm:$0x1] %v513_v62  ;;  %s656_s20 = sld [smem:[#allocation5 + %s655_s7]]  ;;  %s517_s13 = scalar_lea.vmem [#allocation2], %s516_s23 }
 0x103   : > { %v518_v6 = vld [vmem:[%s517_s13] sm:$0x1]  ;;  %s661_s9 = sld [smem:[#allocation5 + %s660_s8]]  ;;  %s642_s0 = scalar_lea.vmem [#allocation2], %s641_s25  ;;  %v1574_v51 = vadd.f32 %v1573_v47, %v1572_v45 }
 0x104   : > { %519 = vst [vmem:[#allocation3 + $0x37] sm:$0x1] %v518_v6  ;;  %v643_v11 = vld [vmem:[%s642_s0] sm:$0x1]  ;;  %s665_s11 = sadd.s32 85, %s3788_s18  ;;  %s670_s21 = sadd.s32 86, %s3788_s18 }
 0x105   : > { %644 = vst [vmem:[#allocation3 + $0x50] sm:$0x1] %v643_v11  ;;  %s666_s16 = sld [smem:[#allocation5 + %s665_s11]]  ;;  %s647_s29 = scalar_lea.vmem [#allocation2], %s646_s27 }
 0x106   : > { %v648_v12 = vld [vmem:[%s647_s29] sm:$0x1]  ;;  %s671_s12 = sld [smem:[#allocation5 + %s670_s21]]  ;;  %s652_s15 = scalar_lea.vmem [#allocation2], %s651_s6 }
 0x107   : > { %649 = vst [vmem:[#allocation3 + $0x51] sm:$0x1] %v648_v12  ;;  %v653_v14 = vld [vmem:[%s652_s15] sm:$0x1]  ;;  %s675_s23 = sadd.s32 87, %s3788_s18  ;;  %s920_s24 = sadd.s32 136, %s3788_s18 }
 0x108   : > { %654 = vst [vmem:[#allocation3 + $0x52] sm:$0x1] %v653_v14  ;;  %s676_s28 = sld [smem:[#allocation5 + %s675_s23]]  ;;  %s657_s5 = scalar_lea.vmem [#allocation2], %s656_s20 }
 0x109   : > { %v658_v15 = vld [vmem:[%s657_s5] sm:$0x1]  ;;  %s921_s25 = sld [smem:[#allocation5 + %s920_s24]]  ;;  %s662_s30 = scalar_lea.vmem [#allocation2], %s661_s9 }
 0x10a   : > { %659 = vst [vmem:[#allocation3 + $0x53] sm:$0x1] %v658_v15  ;;  %v663_v16 = vld [vmem:[%s662_s30] sm:$0x1]  ;;  %s925_s27 = sadd.s32 137, %s3788_s18  ;;  %s930_s10 = sadd.s32 138, %s3788_s18 }
 0x10b   : > { %664 = vst [vmem:[#allocation3 + $0x54] sm:$0x1] %v663_v16  ;;  %v4129_v17 = vld [vmem:[#allocation3 + $0x30] sm:$0xff]  ;;  %s926_s7 = sld [smem:[#allocation5 + %s925_s27]]  ;;  %s667_s6 = scalar_lea.vmem [#allocation2], %s666_s16 }
 0x10c   : > { %v668_v18 = vld [vmem:[%s667_s6] sm:$0x1]  ;;  %2680 = vrot.lane.b32.xlu1 %v4129_v17, %s3705_s26  ;;  %s931_s8 = sld [smem:[#allocation5 + %s930_s10]]  ;;  %s672_s20 = scalar_lea.vmem [#allocation2], %s671_s12 }
 0x10d   : > { %669 = vst [vmem:[#allocation3 + $0x55] sm:$0x1] %v668_v18  ;;  %v673_v59 = vld [vmem:[%s672_s20] sm:$0x1]  ;;  %s935_s13 = sadd.s32 139, %s3788_s18  ;;  %s940_s9 = sadd.s32 140, %s3788_s18 }
 0x10e   : > { %674 = vst [vmem:[#allocation3 + $0x56] sm:$0x1] %v673_v59  ;;  %s936_s0 = sld [smem:[#allocation5 + %s935_s13]]  ;;  %s677_s11 = scalar_lea.vmem [#allocation2], %s676_s28 }
 0x10f   : > { %v678_v19 = vld [vmem:[%s677_s11] sm:$0x1]  ;;  %s941_s21 = sld [smem:[#allocation5 + %s940_s9]]  ;;  %s922_s16 = scalar_lea.vmem [#allocation2], %s921_s25 }
 0x110   : > { %679 = vst [vmem:[#allocation3 + $0x57] sm:$0x1] %v678_v19  ;;  %v923_v20 = vld [vmem:[%s922_s16] sm:$0x1]  ;;  %s945_s29 = sadd.s32 141, %s3788_s18  ;;  %s950_s15 = sadd.s32 142, %s3788_s18 }
 0x111   : > { %924 = vst [vmem:[#allocation3 + $0x88] sm:$0x1] %v923_v20  ;;  %s946_s23 = sld [smem:[#allocation5 + %s945_s29]]  ;;  %s927_s12 = scalar_lea.vmem [#allocation2], %s926_s7 }
 0x112   : > { %v928_v22 = vld [vmem:[%s927_s12] sm:$0x1]  ;;  %s951_s24 = sld [smem:[#allocation5 + %s950_s15]]  ;;  %s932_s28 = scalar_lea.vmem [#allocation2], %s931_s8 }
 0x113   : > { %929 = vst [vmem:[#allocation3 + $0x89] sm:$0x1] %v928_v22  ;;  %v933_v23 = vld [vmem:[%s932_s28] sm:$0x1]  ;;  %s955_s5 = sadd.s32 143, %s3788_s18  ;;  %s1080_s30 = sadd.s32 168, %s3788_s18 }
 0x114   : > { %934 = vst [vmem:[#allocation3 + $0x8a] sm:$0x1] %v933_v23  ;;  %s956_s27 = sld [smem:[#allocation5 + %s955_s5]]  ;;  %2686 = vrot.lane.b32.xlu1 %v4137_v21, %s3705_s26  ;;  %s937_s25 = scalar_lea.vmem [#allocation2], %s936_s0 }
 0x115   : > { %v938_v24 = vld [vmem:[%s937_s25] sm:$0x1]  ;;  %s1081_s10 = sld [smem:[#allocation5 + %s1080_s30]]  ;;  %s942_s7 = scalar_lea.vmem [#allocation2], %s941_s21 }
 0x116   : > { %939 = vst [vmem:[#allocation3 + $0x8b] sm:$0x1] %v938_v24  ;;  %v943_v25 = vld [vmem:[%s942_s7] sm:$0x1]  ;;  %s1085_s6 = sadd.s32 169, %s3788_s18  ;;  %s1090_s20 = sadd.s32 170, %s3788_s18 }
 0x117   : > { %944 = vst [vmem:[#allocation3 + $0x8c] sm:$0x1] %v943_v25  ;;  %s1086_s8 = sld [smem:[#allocation5 + %s1085_s6]]  ;;  %s947_s13 = scalar_lea.vmem [#allocation2], %s946_s23 }
 0x118   : > { %v948_v26 = vld [vmem:[%s947_s13] sm:$0x1]  ;;  %s1091_s9 = sld [smem:[#allocation5 + %s1090_s20]]  ;;  %s952_s11 = scalar_lea.vmem [#allocation2], %s951_s24 }
 0x119   : > { %949 = vst [vmem:[#allocation3 + $0x8d] sm:$0x1] %v948_v26  ;;  %v953_v27 = vld [vmem:[%s952_s11] sm:$0x1]  ;;  %s1095_s0 = sadd.s32 171, %s3788_s18  ;;  %s1100_s16 = sadd.s32 172, %s3788_s18 }
 0x11a   : > { %954 = vst [vmem:[#allocation3 + $0x8e] sm:$0x1] %v953_v27  ;;  %s1096_s29 = sld [smem:[#allocation5 + %s1095_s0]]  ;;  %s957_s15 = scalar_lea.vmem [#allocation2], %s956_s27 }
 0x11b   : > { %v958_v28 = vld [vmem:[%s957_s15] sm:$0x1]  ;;  %s1101_s21 = sld [smem:[#allocation5 + %s1100_s16]]  ;;  %s1082_s12 = scalar_lea.vmem [#allocation2], %s1081_s10 }
 0x11c   : > { %959 = vst [vmem:[#allocation3 + $0x8f] sm:$0x1] %v958_v28  ;;  %v1083_v29 = vld [vmem:[%s1082_s12] sm:$0x1]  ;;  %s1105_s23 = sadd.s32 173, %s3788_s18  ;;  %s1110_s28 = sadd.s32 174, %s3788_s18  ;;  %2692 = vrot.lane.b32.xlu1 %v3586_v30, %s3705_s26 }
 0x11d   : > { %1084 = vst [vmem:[#allocation3 + $0xa8] sm:$0x1] %v1083_v29  ;;  %s1106_s24 = sld [smem:[#allocation5 + %s1105_s23]]  ;;  %s1087_s5 = scalar_lea.vmem [#allocation2], %s1086_s8 }
 0x11e   : > { %v1088_v32 = vld [vmem:[%s1087_s5] sm:$0x1]  ;;  %s1111_s30 = sld [smem:[#allocation5 + %s1110_s28]]  ;;  %s1092_s27 = scalar_lea.vmem [#allocation2], %s1091_s9 }
 0x11f   : > { %1089 = vst [vmem:[#allocation3 + $0xa9] sm:$0x1] %v1088_v32  ;;  %v1093_v33 = vld [vmem:[%s1092_s27] sm:$0x1]  ;;  %s1115_s25 = sadd.s32 175, %s3788_s18  ;;  %s1240_s7 = sadd.s32 200, %s3788_s18 }
 0x120   : > { %1094 = vst [vmem:[#allocation3 + $0xaa] sm:$0x1] %v1093_v33  ;;  %s1116_s10 = sld [smem:[#allocation5 + %s1115_s25]]  ;;  %s1097_s6 = scalar_lea.vmem [#allocation2], %s1096_s29 }
 0x121   : > { %v1098_v34 = vld [vmem:[%s1097_s6] sm:$0x1]  ;;  %s1241_s20 = sld [smem:[#allocation5 + %s1240_s7]]  ;;  %s1102_s13 = scalar_lea.vmem [#allocation2], %s1101_s21 }
 0x122   : > { %1099 = vst [vmem:[#allocation3 + $0xab] sm:$0x1] %v1098_v34  ;;  %v1103_v35 = vld [vmem:[%s1102_s13] sm:$0x1]  ;;  %s1245_s8 = sadd.s32 201, %s3788_s18  ;;  %s1250_s11 = sadd.s32 202, %s3788_s18 }
 0x123   : > { %1104 = vst [vmem:[#allocation3 + $0xac] sm:$0x1] %v1103_v35  ;;  %s1246_s0 = sld [smem:[#allocation5 + %s1245_s8]]  ;;  %s1107_s16 = scalar_lea.vmem [#allocation2], %s1106_s24  ;;  %v4184_v49 = vld [vmem:[#allocation3 + $0x88] sm:$0xff] }
 0x124   : > { %v1108_v36 = vld [vmem:[%s1107_s16] sm:$0x1]  ;;  %s1251_s9 = sld [smem:[#allocation5 + %s1250_s11]]  ;;  %s1112_s15 = scalar_lea.vmem [#allocation2], %s1111_s30  ;;  %v1575_v53 = vsel %vm1552_vm0, %v4184_v49, 0.0 }
 0x125   : > { %1109 = vst [vmem:[#allocation3 + $0xad] sm:$0x1] %v1108_v36  ;;  %v1113_v38 = vld [vmem:[%s1112_s15] sm:$0x1]  ;;  %s1255_s29 = sadd.s32 203, %s3788_s18  ;;  %s1260_s12 = sadd.s32 204, %s3788_s18  ;;  %v1576_v60 = vadd.f32 %v1575_v53, %v1574_v51 }
 0x126   : > { %1114 = vst [vmem:[#allocation3 + $0xae] sm:$0x1] %v1113_v38  ;;  %s1256_s23 = sld [smem:[#allocation5 + %s1255_s29]]  ;;  %s1117_s28 = scalar_lea.vmem [#allocation2], %s1116_s10  ;;  %v3589_v53 = vld [vmem:[#allocation3 + $0x80] sm:$0xff] }
 0x127   : > { %v1118_v39 = vld [vmem:[%s1117_s28] sm:$0x1]  ;;  %s1261_s21 = sld [smem:[#allocation5 + %s1260_s12]]  ;;  %s1242_s5 = scalar_lea.vmem [#allocation2], %s1241_s20 }
 0x128   : > { %1119 = vst [vmem:[#allocation3 + $0xaf] sm:$0x1] %v1118_v39  ;;  %v1243_v1 = vld [vmem:[%s1242_s5] sm:$0x1]  ;;  %s1265_s24 = sadd.s32 205, %s3788_s18  ;;  %s1270_s27 = sadd.s32 206, %s3788_s18 }
 0x129   : > { %1244 = vst [vmem:[#allocation3 + $0xc8] sm:$0x1] %v1243_v1  ;;  %s1266_s25 = sld [smem:[#allocation5 + %s1265_s24]]  ;;  %s1247_s7 = scalar_lea.vmem [#allocation2], %s1246_s0 }
 0x12a   : > { %v1248_v2 = vld [vmem:[%s1247_s7] sm:$0x1]  ;;  %s1271_s30 = sld [smem:[#allocation5 + %s1270_s27]]  ;;  %s1252_s6 = scalar_lea.vmem [#allocation2], %s1251_s9 }
 0x12b   : > { %1249 = vst [vmem:[#allocation3 + $0xc9] sm:$0x1] %v1248_v2  ;;  %v1253_v40 = vld [vmem:[%s1252_s6] sm:$0x1]  ;;  %s1275_s10 = sadd.s32 207, %s3788_s18  ;;  %s1400_s13 = sadd.s32 232, %s3788_s18 }
 0x12c   : > { %1254 = vst [vmem:[#allocation3 + $0xca] sm:$0x1] %v1253_v40  ;;  %s1276_s8 = sld [smem:[#allocation5 + %s1275_s10]]  ;;  %s1257_s20 = scalar_lea.vmem [#allocation2], %s1256_s23 }
 0x12d   : > { %v1258_v7 = vld [vmem:[%s1257_s20] sm:$0x1]  ;;  %s1401_s11 = sld [smem:[#allocation5 + %s1400_s13]]  ;;  %s1262_s0 = scalar_lea.vmem [#allocation2], %s1261_s21 }
 0x12e   : > { %1259 = vst [vmem:[#allocation3 + $0xcb] sm:$0x1] %v1258_v7  ;;  %v1263_v8 = vld [vmem:[%s1262_s0] sm:$0x1]  ;;  %s1405_s16 = sadd.s32 233, %s3788_s18  ;;  %s1410_s9 = sadd.s32 234, %s3788_s18 }
 0x12f   : > { %1264 = vst [vmem:[#allocation3 + $0xcc] sm:$0x1] %v1263_v8  ;;  %s1406_s15 = sld [smem:[#allocation5 + %s1405_s16]]  ;;  %s1267_s29 = scalar_lea.vmem [#allocation2], %s1266_s25  ;;  %v4196_v55 = vld [vmem:[#allocation3 + $0xa8] sm:$0xff]  ;;  %v4257_v7 = vld [vmem:[#allocation3 + $0x50] sm:$0xff] }
 0x130   : > { %v1268_v9 = vld [vmem:[%s1267_s29] sm:$0x1]  ;;  %s4166_s12 = sld [smem:[#allocation5 + %s1410_s9]]  ;;  %s1272_s23 = scalar_lea.vmem [#allocation2], %s1271_s30  ;;  %v1577_v61 = vsel %vm1552_vm0, %v4196_v55, 0.0 }
 0x131   : > { %1269 = vst [vmem:[#allocation3 + $0xcd] sm:$0x1] %v1268_v9  ;;  %v1273_v43 = vld [vmem:[%s1272_s23] sm:$0x1]  ;;  %s1415_s28 = sadd.s32 235, %s3788_s18  ;;  %s1420_s5 = sadd.s32 236, %s3788_s18  ;;  %v1578_v37 = vadd.f32 %v1577_v61, %v1576_v60 }
 0x132   : > { %1274 = vst [vmem:[#allocation3 + $0xce] sm:$0x1] %v1273_v43  ;;  %s1416_s21 = sld [smem:[#allocation5 + %s1415_s28]]  ;;  %s1277_s24 = scalar_lea.vmem [#allocation2], %s1276_s8 }
 0x133   : > { %v1278_v13 = vld [vmem:[%s1277_s24] sm:$0x1]  ;;  %s4172_s27 = sld [smem:[#allocation5 + %s1420_s5]]  ;;  %s1402_s25 = scalar_lea.vmem [#allocation2], %s1401_s11 }
 0x134   : > { %1279 = vst [vmem:[#allocation3 + $0xcf] sm:$0x1] %v1278_v13  ;;  %v1403_v44 = vld [vmem:[%s1402_s25] sm:$0x1]  ;;  %s1425_s7 = sadd.s32 237, %s3788_s18  ;;  %s1430_s30 = sadd.s32 238, %s3788_s18 }
 0x135   : > { %1404 = vst [vmem:[#allocation3 + $0xe8] sm:$0x1] %v1403_v44  ;;  %s4176_s6 = sld [smem:[#allocation5 + %s1425_s7]]  ;;  %s1407_s10 = scalar_lea.vmem [#allocation2], %s1406_s15  ;;  %v4271_v44 = vld [vmem:[#allocation3 + $0x70] sm:$0xff] }
 0x136   : > { %v1408_v48 = vld [vmem:[%s1407_s10] sm:$0x1]  ;;  %s4182_s13 = sld [smem:[#allocation5 + %s1430_s30]]  ;;  %s1412_s8 = scalar_lea.vmem [#allocation2], %s4166_s12 }
 0x137   : > { %1409 = vst [vmem:[#allocation3 + $0xe9] sm:$0x1] %v1408_v48  ;;  %v1413_v50 = vld [vmem:[%s1412_s8] sm:$0x1]  ;;  %s1435_s20 = sadd.s32 239, %s3788_s18  ;;  %s360_s11 = sadd.s32 24, %s3788_s18 }
 0x138   : > { %1414 = vst [vmem:[#allocation3 + $0xea] sm:$0x1] %v1413_v50  ;;  %s4189_s0 = sld [smem:[#allocation5 + %s1435_s20]]  ;;  %s1417_s16 = scalar_lea.vmem [#allocation2], %s1416_s21 }
 0x139   : > { %v1418_v52 = vld [vmem:[%s1417_s16] sm:$0x1]  ;;  %s361_s9 = sld [smem:[#allocation5 + %s360_s11]]  ;;  %s1422_s15 = scalar_lea.vmem [#allocation2], %s4172_s27 }
 0x13a   : > { %1419 = vst [vmem:[#allocation3 + $0xeb] sm:$0x1] %v1418_v52  ;;  %v1423_v54 = vld [vmem:[%s1422_s15] sm:$0x1]  ;;  %s365_s29 = sadd.s32 25, %s3788_s18  ;;  %s370_s12 = sadd.s32 26, %s3788_s18 }
 0x13b   : > { %1424 = vst [vmem:[#allocation3 + $0xec] sm:$0x1] %v1423_v54  ;;  %v4198_v56 = vld [vmem:[#allocation3 + $0xc8] sm:$0xff]  ;;  %s366_s23 = sld [smem:[#allocation5 + %s365_s29]]  ;;  %s1427_s28 = scalar_lea.vmem [#allocation2], %s4176_s6 }
 0x13c   : > { %v1428_v57 = vld [vmem:[%s1427_s28] sm:$0x1]  ;;  %s371_s5 = sld [smem:[#allocation5 + %s370_s12]]  ;;  %3323 = vmatmul.msk.f32.gmra.mxu3 %vm1552_vm0, %v4198_v56  ;;  %s1432_s21 = scalar_lea.vmem [#allocation2], %s4182_s13  ;;  %v1579_v0 = vsel %vm1552_vm0, %v4198_v56, 0.0 }
 0x13d   : > { %1429 = vst [vmem:[#allocation3 + $0xed] sm:$0x1] %v1428_v57  ;;  %v1433_v58 = vld [vmem:[%s1432_s21] sm:$0x1]  ;;  %s375_s24 = sadd.s32 27, %s3788_s18  ;;  %s380_s27 = sadd.s32 28, %s3788_s18  ;;  %v1580_v62 = vadd.f32 %v1579_v0, %v1578_v37 }
 0x13e   : > { %1434 = vst [vmem:[#allocation3 + $0xee] sm:$0x1] %v1433_v58  ;;  %s376_s25 = sld [smem:[#allocation5 + %s375_s24]]  ;;  %s1437_s7 = scalar_lea.vmem [#allocation2], %s4189_s0 }
 0x13f   : > { %v1438_v63 = vld [vmem:[%s1437_s7] sm:$0x1]  ;;  %s381_s30 = sld [smem:[#allocation5 + %s380_s27]]  ;;  %s362_s6 = scalar_lea.vmem [#allocation2], %s361_s9 }
 0x140   : > { %1439 = vst [vmem:[#allocation3 + $0xef] sm:$0x1] %v1438_v63  ;;  %v363_v31 = vld [vmem:[%s362_s6] sm:$0x1]  ;;  %s385_s10 = sadd.s32 29, %s3788_s18  ;;  %s390_s8 = sadd.s32 30, %s3788_s18 }
 0x141   : > { %364 = vst [vmem:[#allocation3 + $0x18] sm:$0x1] %v363_v31  ;;  %s386_s13 = sld [smem:[#allocation5 + %s385_s10]]  ;;  %s367_s20 = scalar_lea.vmem [#allocation2], %s366_s23  ;;  %v4300_v31 = vld [vmem:[#allocation3 + $0xa0] sm:$0xff] }
 0x142   : > { %v368_v4 = vld [vmem:[%s367_s20] sm:$0x1]  ;;  %s391_s11 = sld [smem:[#allocation5 + %s390_s8]]  ;;  %s372_s0 = scalar_lea.vmem [#allocation2], %s371_s5 }
 0x143   : > { %369 = vst [vmem:[#allocation3 + $0x19] sm:$0x1] %v368_v4  ;;  %v373_v5 = vld [vmem:[%s372_s0] sm:$0x1]  ;;  %s395_s16 = sadd.s32 31, %s3788_s18  ;;  %s520_s15 = sadd.s32 56, %s3788_s18 }
 0x144   : > { %374 = vst [vmem:[#allocation3 + $0x1a] sm:$0x1] %v373_v5  ;;  %s396_s9 = sld [smem:[#allocation5 + %s395_s16]]  ;;  %s377_s29 = scalar_lea.vmem [#allocation2], %s376_s25 }
 0x145   : > { %v378_v6 = vld [vmem:[%s377_s29] sm:$0x1]  ;;  %s521_s12 = sld [smem:[#allocation5 + %s520_s15]]  ;;  %s382_s28 = scalar_lea.vmem [#allocation2], %s381_s30 }
 0x146   : > { %379 = vst [vmem:[#allocation3 + $0x1b] sm:$0x1] %v378_v6  ;;  %v383_v11 = vld [vmem:[%s382_s28] sm:$0x1]  ;;  %s525_s23 = sadd.s32 57, %s3788_s18  ;;  %s530_s21 = sadd.s32 58, %s3788_s18 }
 0x147   : > { %v4217_v12 = vld [vmem:[#allocation3 + $0xe8] sm:$0xff]  ;;  %384 = vst [vmem:[#allocation3 + $0x1c] sm:$0x1] %v383_v11  ;;  %s526_s5 = sld [smem:[#allocation5 + %s525_s23]]  ;;  %s387_s24 = scalar_lea.vmem [#allocation2], %s386_s13  ;;  %v4322_v6 = vld [vmem:[#allocation3 + $0xb8] sm:$0xff] }
 0x148   : > { %v1581_v14 = vsel %vm1552_vm0, %v4217_v12, 0.0  ;;  %v388_v15 = vld [vmem:[%s387_s24] sm:$0x1]  ;;  %s531_s27 = sld [smem:[#allocation5 + %s530_s21]]  ;;  %s392_s25 = scalar_lea.vmem [#allocation2], %s391_s11 }
 0x149   : > { %v1582_v16 = vadd.f32 %v1581_v14, %v1580_v62  ;;  %389 = vst [vmem:[#allocation3 + $0x1d] sm:$0x1] %v388_v15  ;;  %v393_v18 = vld [vmem:[%s392_s25] sm:$0x1]  ;;  %s535_s7 = sadd.s32 59, %s3788_s18  ;;  %s540_s30 = sadd.s32 60, %s3788_s18 }
 0x14a   : > { %394 = vst [vmem:[#allocation3 + $0x1e] sm:$0x1] %v393_v18  ;;  %s536_s6 = sld [smem:[#allocation5 + %s535_s7]]  ;;  %s397_s10 = scalar_lea.vmem [#allocation2], %s396_s9  ;;  %v1584_v14 = vsel %vm1552_vm0, %v4129_v17, 0.0 }
 0x14b   : > { %3287 = vmatmul.msk.f32.gmra.mxu0 %vm1552_vm0, %v1582_v16  ;;  %3291 = vmatmul.msk.f32.gmra.mxu1 %vm1552_vm0, %v1582_v16  ;;  %v398_v59 = vld [vmem:[%s397_s10] sm:$0x1]  ;;  %s541_s8 = sld [smem:[#allocation5 + %s540_s30]]  ;;  %s522_s13 = scalar_lea.vmem [#allocation2], %s521_s12  ;;  %v4334_v16 = vld [vmem:[#allocation3 + $0xb0] sm:$0xff] }
 0x14c   : > { %399 = vst [vmem:[#allocation3 + $0x1f] sm:$0x1] %v398_v59  ;;  %v523_v19 = vld [vmem:[%s522_s13] sm:$0x1]  ;;  %s545_s20 = sadd.s32 61, %s3788_s18  ;;  %s550_s0 = sadd.s32 62, %s3788_s18 }
 0x14d   : > { %524 = vst [vmem:[#allocation3 + $0x38] sm:$0x1] %v523_v19  ;;  %s546_s11 = sld [smem:[#allocation5 + %s545_s20]]  ;;  %s527_s16 = scalar_lea.vmem [#allocation2], %s526_s5 }
 0x14e   : > { %v528_v20 = vld [vmem:[%s527_s16] sm:$0x1]  ;;  %s551_s15 = sld [smem:[#allocation5 + %s550_s0]]  ;;  %s532_s29 = scalar_lea.vmem [#allocation2], %s531_s27 }
 0x14f   : > { %529 = vst [vmem:[#allocation3 + $0x39] sm:$0x1] %v528_v20  ;;  %v533_v21 = vld [vmem:[%s532_s29] sm:$0x1]  ;;  %s555_s9 = sadd.s32 63, %s3788_s18  ;;  %s680_s28 = sadd.s32 88, %s3788_s18 }
 0x150   : > { %534 = vst [vmem:[#allocation3 + $0x3a] sm:$0x1] %v533_v21  ;;  %s556_s23 = sld [smem:[#allocation5 + %s555_s9]]  ;;  %s537_s21 = scalar_lea.vmem [#allocation2], %s536_s6  ;;  %v1586_v21 = vsel %vm1552_vm0, %v4257_v7, 0.0 }
 0x151   : > { %v538_v22 = vld [vmem:[%s537_s21] sm:$0x1]  ;;  %s681_s12 = sld [smem:[#allocation5 + %s680_s28]]  ;;  %s542_s24 = scalar_lea.vmem [#allocation2], %s541_s8 }
 0x152   : > { %539 = vst [vmem:[#allocation3 + $0x3b] sm:$0x1] %v538_v22  ;;  %v543_v23 = vld [vmem:[%s542_s24] sm:$0x1]  ;;  %s685_s5 = sadd.s32 89, %s3788_s18  ;;  %s690_s25 = sadd.s32 90, %s3788_s18 }
 0x153   : > { %544 = vst [vmem:[#allocation3 + $0x3c] sm:$0x1] %v543_v23  ;;  %s686_s7 = sld [smem:[#allocation5 + %s685_s5]]  ;;  %s547_s30 = scalar_lea.vmem [#allocation2], %s546_s11  ;;  %v4237_v30 = vld [vmem:[#allocation3 + $0x18] sm:$0xff] }
 0x154   : > { %v548_v24 = vld [vmem:[%s547_s30] sm:$0x1]  ;;  %s691_s27 = sld [smem:[#allocation5 + %s690_s25]]  ;;  %s552_s10 = scalar_lea.vmem [#allocation2], %s551_s15  ;;  %2674 = vrot.lane.b32.xlu2 %v4237_v30, %s3705_s26 }
 0x155   : > { %549 = vst [vmem:[#allocation3 + $0x3d] sm:$0x1] %v548_v24  ;;  %v553_v25 = vld [vmem:[%s552_s10] sm:$0x1]  ;;  %s695_s6 = sadd.s32 91, %s3788_s18  ;;  %s700_s13 = sadd.s32 92, %s3788_s18 }
 0x156   : > { %554 = vst [vmem:[#allocation3 + $0x3e] sm:$0x1] %v553_v25  ;;  %s696_s20 = sld [smem:[#allocation5 + %s695_s6]]  ;;  %s557_s0 = scalar_lea.vmem [#allocation2], %s556_s23  ;;  %v1588_v25 = vsel %vm1552_vm0, %v4271_v44, 0.0 }
 0x157   : > { %v558_v26 = vld [vmem:[%s557_s0] sm:$0x1]  ;;  %s701_s8 = sld [smem:[#allocation5 + %s700_s13]]  ;;  %s682_s16 = scalar_lea.vmem [#allocation2], %s681_s12 }
 0x158   : > { %559 = vst [vmem:[#allocation3 + $0x3f] sm:$0x1] %v558_v26  ;;  %v683_v27 = vld [vmem:[%s682_s16] sm:$0x1]  ;;  %s705_s11 = sadd.s32 93, %s3788_s18  ;;  %s710_s29 = sadd.s32 94, %s3788_s18 }
 0x159   : > { %684 = vst [vmem:[#allocation3 + $0x58] sm:$0x1] %v683_v27  ;;  %s706_s9 = sld [smem:[#allocation5 + %s705_s11]]  ;;  %s687_s28 = scalar_lea.vmem [#allocation2], %s686_s7 }
 0x15a   : > { %v688_v28 = vld [vmem:[%s687_s28] sm:$0x1]  ;;  %s711_s15 = sld [smem:[#allocation5 + %s710_s29]]  ;;  %s692_s21 = scalar_lea.vmem [#allocation2], %s691_s27 }
 0x15b   : > { %689 = vst [vmem:[#allocation3 + $0x59] sm:$0x1] %v688_v28  ;;  %v693_v29 = vld [vmem:[%s692_s21] sm:$0x1]  ;;  %s715_s23 = sadd.s32 95, %s3788_s18  ;;  %s840_s24 = sadd.s32 120, %s3788_s18 }
 0x15c   : > { %694 = vst [vmem:[#allocation3 + $0x5a] sm:$0x1] %v693_v29  ;;  %s716_s5 = sld [smem:[#allocation5 + %s715_s23]]  ;;  %s697_s12 = scalar_lea.vmem [#allocation2], %s696_s20 }
 0x15d   : > { %v698_v32 = vld [vmem:[%s697_s12] sm:$0x1]  ;;  %s841_s25 = sld [smem:[#allocation5 + %s840_s24]]  ;;  %s702_s7 = scalar_lea.vmem [#allocation2], %s701_s8 }
 0x15e   : > { %699 = vst [vmem:[#allocation3 + $0x5b] sm:$0x1] %v698_v32  ;;  %v703_v33 = vld [vmem:[%s702_s7] sm:$0x1]  ;;  %s845_s30 = sadd.s32 121, %s3788_s18  ;;  %s850_s27 = sadd.s32 122, %s3788_s18 }
 0x15f   : > { %704 = vst [vmem:[#allocation3 + $0x5c] sm:$0x1] %v703_v33  ;;  %s846_s10 = sld [smem:[#allocation5 + %s845_s30]]  ;;  %s707_s6 = scalar_lea.vmem [#allocation2], %s706_s9  ;;  %v4245_v38 = vld [vmem:[#allocation3 + $0x38] sm:$0xff] }
 0x160   : > { %v708_v34 = vld [vmem:[%s707_s6] sm:$0x1]  ;;  %s851_s13 = sld [smem:[#allocation5 + %s850_s27]]  ;;  %s712_s20 = scalar_lea.vmem [#allocation2], %s711_s15  ;;  %2682 = vrot.lane.b32.xlu2 %v4245_v38, %s3705_s26 }
 0x161   : > { %709 = vst [vmem:[#allocation3 + $0x5d] sm:$0x1] %v708_v34  ;;  %v713_v35 = vld [vmem:[%s712_s20] sm:$0x1]  ;;  %s855_s0 = sadd.s32 123, %s3788_s18  ;;  %s860_s16 = sadd.s32 124, %s3788_s18 }
 0x162   : > { %714 = vst [vmem:[#allocation3 + $0x5e] sm:$0x1] %v713_v35  ;;  %s856_s11 = sld [smem:[#allocation5 + %s855_s0]]  ;;  %s717_s29 = scalar_lea.vmem [#allocation2], %s716_s5 }
 0x163   : > { %v718_v36 = vld [vmem:[%s717_s29] sm:$0x1]  ;;  %s861_s8 = sld [smem:[#allocation5 + %s860_s16]]  ;;  %s842_s9 = scalar_lea.vmem [#allocation2], %s841_s25 }
 0x164   : > { %719 = vst [vmem:[#allocation3 + $0x5f] sm:$0x1] %v718_v36  ;;  %v843_v39 = vld [vmem:[%s842_s9] sm:$0x1]  ;;  %s865_s28 = sadd.s32 125, %s3788_s18  ;;  %s870_s21 = sadd.s32 126, %s3788_s18 }
 0x165   : > { %844 = vst [vmem:[#allocation3 + $0x78] sm:$0x1] %v843_v39  ;;  %s866_s23 = sld [smem:[#allocation5 + %s865_s28]]  ;;  %s847_s15 = scalar_lea.vmem [#allocation2], %s846_s10  ;;  %v4393_v39 = vld [vmem:[#allocation3 + $0xe0] sm:$0xff] }
 0x166   : > { %v848_v1 = vld [vmem:[%s847_s15] sm:$0x1]  ;;  %s871_s24 = sld [smem:[#allocation5 + %s870_s21]]  ;;  %s852_s5 = scalar_lea.vmem [#allocation2], %s851_s13 }
 0x167   : > { %849 = vst [vmem:[#allocation3 + $0x79] sm:$0x1] %v848_v1  ;;  %v853_v2 = vld [vmem:[%s852_s5] sm:$0x1]  ;;  %s875_s12 = sadd.s32 127, %s3788_s18  ;;  %s1000_s7 = sadd.s32 152, %s3788_s18 }
 0x168   : > { %854 = vst [vmem:[#allocation3 + $0x7a] sm:$0x1] %v853_v2  ;;  %s876_s25 = sld [smem:[#allocation5 + %s875_s12]]  ;;  %s857_s30 = scalar_lea.vmem [#allocation2], %s856_s11  ;;  %2688 = vrot.lane.b32.xlu2 %v4257_v7, %s3705_s26  ;;  %v1592_v1 = vsel %vm1552_vm0, %v4334_v16, 0.0 }
 0x169   : > { %v858_v40 = vld [vmem:[%s857_s30] sm:$0x1]  ;;  %s1001_s27 = sld [smem:[#allocation5 + %s1000_s7]]  ;;  %s862_s6 = scalar_lea.vmem [#allocation2], %s861_s8 }
 0x16a   : > { %859 = vst [vmem:[#allocation3 + $0x7b] sm:$0x1] %v858_v40  ;;  %v863_v3 = vld [vmem:[%s862_s6] sm:$0x1]  ;;  %s1005_s10 = sadd.s32 153, %s3788_s18  ;;  %s1010_s20 = sadd.s32 154, %s3788_s18 }
 0x16b   : > { %864 = vst [vmem:[#allocation3 + $0x7c] sm:$0x1] %v863_v3  ;;  %s1006_s0 = sld [smem:[#allocation5 + %s1005_s10]]  ;;  %v4255_v41 = vld [vmem:[#allocation3 + $0x58] sm:$0xff]  ;;  %s867_s13 = scalar_lea.vmem [#allocation2], %s866_s23  ;;  %v3595_v3 = vld [vmem:[#allocation3 + $0xc0] sm:$0xff] }
 0x16c   : > { %v868_v8 = vld [vmem:[%s867_s13] sm:$0x1]  ;;  %s1011_s16 = sld [smem:[#allocation5 + %s1010_s20]]  ;;  %2690 = vrot.lane.b32.xlu0 %v4255_v41, %s3705_s26  ;;  %s872_s11 = scalar_lea.vmem [#allocation2], %s871_s24 }
 0x16d   : > { %869 = vst [vmem:[#allocation3 + $0x7d] sm:$0x1] %v868_v8  ;;  %v873_v9 = vld [vmem:[%s872_s11] sm:$0x1]  ;;  %s1015_s29 = sadd.s32 155, %s3788_s18  ;;  %s1020_s8 = sadd.s32 156, %s3788_s18 }
 0x16e   : > { %874 = vst [vmem:[#allocation3 + $0x7e] sm:$0x1] %v873_v9  ;;  %s1016_s9 = sld [smem:[#allocation5 + %s1015_s29]]  ;;  %s877_s28 = scalar_lea.vmem [#allocation2], %s876_s25 }
 0x16f   : > { %v878_v42 = vld [vmem:[%s877_s28] sm:$0x1]  ;;  %s1021_s21 = sld [smem:[#allocation5 + %s1020_s8]]  ;;  %s1002_s23 = scalar_lea.vmem [#allocation2], %s1001_s27 }
 0x170   : > { %879 = vst [vmem:[#allocation3 + $0x7f] sm:$0x1] %v878_v42  ;;  %v1003_v43 = vld [vmem:[%s1002_s23] sm:$0x1]  ;;  %s1025_s15 = sadd.s32 157, %s3788_s18  ;;  %s1030_s5 = sadd.s32 158, %s3788_s18  ;;  %2694 = vrot.lane.b32.xlu2 %v4178_v46, %s3705_s26 }
 0x171   : > { %1004 = vst [vmem:[#allocation3 + $0x98] sm:$0x1] %v1003_v43  ;;  %s1026_s24 = sld [smem:[#allocation5 + %s1025_s15]]  ;;  %s1007_s12 = scalar_lea.vmem [#allocation2], %s1006_s0 }
 0x172   : > { %v1008_v10 = vld [vmem:[%s1007_s12] sm:$0x1]  ;;  %s4267_s7 = sld [smem:[#allocation5 + %s1030_s5]]  ;;  %s1012_s30 = scalar_lea.vmem [#allocation2], %s1011_s16 }
 0x173   : > { %1009 = vst [vmem:[#allocation3 + $0x99] sm:$0x1] %v1008_v10  ;;  %v1013_v13 = vld [vmem:[%s1012_s30] sm:$0x1]  ;;  %s1035_s25 = sadd.s32 159, %s3788_s18  ;;  %s960_s6 = sadd.s32 144, %s3788_s18 }
 0x174   : > { %1014 = vst [vmem:[#allocation3 + $0x9a] sm:$0x1] %v1013_v13  ;;  %s1036_s10 = sld [smem:[#allocation5 + %s1035_s25]]  ;;  %2696 = vrot.lane.b32.xlu0 %v4271_v44, %s3705_s26  ;;  %s1017_s27 = scalar_lea.vmem [#allocation2], %s1016_s9  ;;  %v1598_v10 = vsel %vm1552_vm0, %v4237_v30, 0.0  ;;  %v1599_v13 = vsel %vm1552_vm0, %v4245_v38, 0.0 }
 0x175   : > { %v1018_v45 = vld [vmem:[%s1017_s27] sm:$0x1]  ;;  %s961_s20 = sld [smem:[#allocation5 + %s960_s6]]  ;;  %s1022_s0 = scalar_lea.vmem [#allocation2], %s1021_s21 }
 0x176   : > { %1019 = vst [vmem:[#allocation3 + $0x9b] sm:$0x1] %v1018_v45  ;;  %v1023_v47 = vld [vmem:[%s1022_s0] sm:$0x1]  ;;  %s965_s13 = sadd.s32 145, %s3788_s18  ;;  %s970_s16 = sadd.s32 146, %s3788_s18 }
 0x177   : > { %1024 = vst [vmem:[#allocation3 + $0x9c] sm:$0x1] %v1023_v47  ;;  %v4279_v48 = vld [vmem:[#allocation3 + $0x78] sm:$0xff]  ;;  %s966_s11 = sld [smem:[#allocation5 + %s965_s13]]  ;;  %s1027_s29 = scalar_lea.vmem [#allocation2], %s1026_s24 }
 0x178   : > { %v1028_v50 = vld [vmem:[%s1027_s29] sm:$0x1]  ;;  %3313 = vmatmul.msk.f32.gmra.mxu2 %vm1552_vm0, %v4279_v48  ;;  %s971_s8 = sld [smem:[#allocation5 + %s970_s16]]  ;;  %2698 = vrot.lane.b32.xlu1 %v4279_v48, %s3705_s26  ;;  %s1032_s9 = scalar_lea.vmem [#allocation2], %s4267_s7 }
 0x179   : > { %1029 = vst [vmem:[#allocation3 + $0x9d] sm:$0x1] %v1028_v50  ;;  %v1033_v46 = vld [vmem:[%s1032_s9] sm:$0x1]  ;;  %s975_s28 = sadd.s32 147, %s3788_s18  ;;  %s980_s21 = sadd.s32 148, %s3788_s18  ;;  %2700 = vrot.lane.b32.xlu2 %v3589_v53, %s3705_s26 }
 0x17a   : > { %1034 = vst [vmem:[#allocation3 + $0x9e] sm:$0x1] %v1033_v46  ;;  %s976_s23 = sld [smem:[#allocation5 + %s975_s28]]  ;;  %s1037_s15 = scalar_lea.vmem [#allocation2], %s1036_s10 }
 0x17b   : > { %v1038_v51 = vld [vmem:[%s1037_s15] sm:$0x1]  ;;  %s981_s5 = sld [smem:[#allocation5 + %s980_s21]]  ;;  %s962_s24 = scalar_lea.vmem [#allocation2], %s961_s20 }
 0x17c   : > { %1039 = vst [vmem:[#allocation3 + $0x9f] sm:$0x1] %v1038_v51  ;;  %v963_v52 = vld [vmem:[%s962_s24] sm:$0x1]  ;;  %s985_s12 = sadd.s32 149, %s3788_s18  ;;  %s990_s30 = sadd.s32 150, %s3788_s18  ;;  %2702 = vrot.lane.b32.xlu0 %v4184_v49, %s3705_s26 }
 0x17d   : > { %964 = vst [vmem:[#allocation3 + $0x90] sm:$0x1] %v963_v52  ;;  %s986_s7 = sld [smem:[#allocation5 + %s985_s12]]  ;;  %s967_s25 = scalar_lea.vmem [#allocation2], %s966_s11  ;;  %v1600_v52 = vadd.f32 %v1599_v13, %v1598_v10  ;;  %v1613_v13 = vld [vmem:[%s3774_s14] sm:$0xff] }
 0x17e   : > { %v968_v54 = vld [vmem:[%s967_s25] sm:$0x1]  ;;  %s991_s6 = sld [smem:[#allocation5 + %s990_s30]]  ;;  %s972_s10 = scalar_lea.vmem [#allocation2], %s971_s8 }
 0x17f   : > { %969 = vst [vmem:[#allocation3 + $0x91] sm:$0x1] %v968_v54  ;;  %v973_v57 = vld [vmem:[%s972_s10] sm:$0x1]  ;;  %s995_s27 = sadd.s32 151, %s3788_s18  ;;  %s1280_s20 = sadd.s32 208, %s3788_s18 }
 0x180   : > { %974 = vst [vmem:[#allocation3 + $0x92] sm:$0x1] %v973_v57  ;;  %s996_s0 = sld [smem:[#allocation5 + %s995_s27]]  ;;  %3314 = vmatmul.msk.f32.gmra.mxu2 %vm1552_vm0, %v3589_v53  ;;  %s977_s13 = scalar_lea.vmem [#allocation2], %s976_s23  ;;  %v1601_v57 = vsel %vm1552_vm0, %v4255_v41, 0.0 }
 0x181   : > { %v978_v58 = vld [vmem:[%s977_s13] sm:$0x1]  ;;  %s1281_s16 = sld [smem:[#allocation5 + %s1280_s20]]  ;;  %s982_s29 = scalar_lea.vmem [#allocation2], %s981_s5 }
 0x182   : > { %979 = vst [vmem:[#allocation3 + $0x93] sm:$0x1] %v978_v58  ;;  %v983_v60 = vld [vmem:[%s982_s29] sm:$0x1]  ;;  %s1285_s11 = sadd.s32 209, %s3788_s18  ;;  %s1290_s9 = sadd.s32 210, %s3788_s18 }
 0x183   : > { %984 = vst [vmem:[#allocation3 + $0x94] sm:$0x1] %v983_v60  ;;  %s1286_s28 = sld [smem:[#allocation5 + %s1285_s11]]  ;;  %v4298_v61 = vld [vmem:[#allocation3 + $0x98] sm:$0xff]  ;;  %s987_s8 = scalar_lea.vmem [#allocation2], %s986_s7  ;;  %v1602_v60 = vadd.f32 %v1601_v57, %v1600_v52  ;;  %v1615_v52 = vld [vmem:[%s3774_s14 + $0x10] sm:$0xff] }
 0x184   : > { %v988_v63 = vld [vmem:[%s987_s8] sm:$0x1]  ;;  %s1291_s21 = sld [smem:[#allocation5 + %s1290_s9]]  ;;  %2708 = vrot.lane.b32.xlu0 %v4300_v31, %s3705_s26  ;;  %s992_s23 = scalar_lea.vmem [#allocation2], %s991_s6  ;;  %2706 = vrot.lane.b32.xlu2 %v4298_v61, %s3705_s26 }
 0x185   : > { %989 = vst [vmem:[#allocation3 + $0x95] sm:$0x1] %v988_v63  ;;  %v993_v37 = vld [vmem:[%s992_s23] sm:$0x1]  ;;  %s1295_s15 = sadd.s32 211, %s3788_s18  ;;  %s1300_s5 = sadd.s32 212, %s3788_s18 }
 0x186   : > { %994 = vst [vmem:[#allocation3 + $0x96] sm:$0x1] %v993_v37  ;;  %s1296_s24 = sld [smem:[#allocation5 + %s1295_s15]]  ;;  %s997_s12 = scalar_lea.vmem [#allocation2], %s996_s0  ;;  %v1603_v63 = vsel %vm1552_vm0, %v4279_v48, 0.0 }
 0x187   : > { %v998_v0 = vld [vmem:[%s997_s12] sm:$0x1]  ;;  %s4308_s30 = sld [smem:[#allocation5 + %s1300_s5]]  ;;  %s1282_s7 = scalar_lea.vmem [#allocation2], %s1281_s16 }
 0x188   : > { %999 = vst [vmem:[#allocation3 + $0x97] sm:$0x1] %v998_v0  ;;  %v1283_v4 = vld [vmem:[%s1282_s7] sm:$0x1]  ;;  %s1305_s25 = sadd.s32 213, %s3788_s18  ;;  %s1310_s10 = sadd.s32 214, %s3788_s18  ;;  %3315 = vmatmul.msk.f32.gmra.mxu2 %vm1552_vm0, %v4184_v49  ;;  %v1604_v0 = vadd.f32 %v1603_v63, %v1602_v60 }
 0x189   : > { %1284 = vst [vmem:[#allocation3 + $0xd0] sm:$0x1] %v1283_v4  ;;  %s4314_s6 = sld [smem:[#allocation5 + %s1305_s25]]  ;;  %s1287_s27 = scalar_lea.vmem [#allocation2], %s1286_s28  ;;  %v4326_v49 = vld [vmem:[#allocation3 + $0x10] sm:$0xff] }
 0x18a   : > { %v1288_v5 = vld [vmem:[%s1287_s27] sm:$0x1]  ;;  %s4316_s20 = sld [smem:[#allocation5 + %s1310_s10]]  ;;  %s1292_s0 = scalar_lea.vmem [#allocation2], %s1291_s21  ;;  %v1583_v11 = vsel %vm1552_vm0, %v4326_v49, 0.0 }
 0x18b   : > { %1289 = vst [vmem:[#allocation3 + $0xd1] sm:$0x1] %v1288_v5  ;;  %v1293_v62 = vld [vmem:[%s1292_s0] sm:$0x1]  ;;  %s1315_s13 = sadd.s32 215, %s3788_s18  ;;  %s1440_s29 = sadd.s32 240, %s3788_s18  ;;  %v1585_v19 = vadd.f32 %v1584_v14, %v1583_v11 }
 0x18c   : > { %1294 = vst [vmem:[#allocation3 + $0xd2] sm:$0x1] %v1293_v62  ;;  %s4320_s16 = sld [smem:[#allocation5 + %s1315_s13]]  ;;  %2714 = vrot.lane.b32.xlu0 %v4322_v6, %s3705_s26  ;;  %s1297_s11 = scalar_lea.vmem [#allocation2], %s1296_s24  ;;  %2712 = vrot.lane.b32.xlu2 %v4334_v16, %s3705_s26  ;;  %v1605_v5 = vsel %vm1552_vm0, %v4298_v61, 0.0  ;;  %v1607_v16 = vsel %vm1552_vm0, %v4322_v6, 0.0 }
 0x18d   : > { %v1298_v15 = vld [vmem:[%s1297_s11] sm:$0x1]  ;;  %s4332_s9 = sld [smem:[#allocation5 + %s1440_s29]]  ;;  %s1302_s28 = scalar_lea.vmem [#allocation2], %s4308_s30  ;;  %v1587_v24 = vadd.f32 %v1586_v21, %v1585_v19  ;;  %v1606_v14 = vadd.f32 %v1605_v5, %v1604_v0 }
 0x18e   : > { %1299 = vst [vmem:[#allocation3 + $0xd3] sm:$0x1] %v1298_v15  ;;  %v1303_v18 = vld [vmem:[%s1302_s28] sm:$0x1]  ;;  %s1445_s8 = sadd.s32 241, %s3788_s18  ;;  %s1450_s21 = sadd.s32 242, %s3788_s18 }
 0x18f   : > { %1304 = vst [vmem:[#allocation3 + $0xd4] sm:$0x1] %v1303_v18  ;;  %s4341_s23 = sld [smem:[#allocation5 + %s1445_s8]]  ;;  %v1538_v17 = vld [vmem:[#allocation3 + $0x90] sm:$0xff]  ;;  %s1307_s15 = scalar_lea.vmem [#allocation2], %s4314_s6  ;;  %v1608_v18 = vadd.f32 %v1607_v16, %v1606_v14  ;;  %v3596_v21 = vld [vmem:[#allocation3] sm:$0xff]  ;;  %v1695_v14 = vpop.f32.mrf.mxu1 }
 0x190   : > { %v1308_v59 = vld [vmem:[%s1307_s15] sm:$0x1]  ;;  %s4344_s5 = sld [smem:[#allocation5 + %s1450_s21]]  ;;  %3316 = vmatmul.msk.f32.gmra.mxu2 %vm1552_vm0, %v1538_v17  ;;  %2704 = vrot.lane.b32.xlu1 %v1538_v17, %s3705_s26  ;;  %s1312_s24 = scalar_lea.vmem [#allocation2], %s4316_s20  ;;  %v1590_v29 = vsel %vm1552_vm0, %v1538_v17, 0.0 }
 0x191   : > { %1309 = vst [vmem:[#allocation3 + $0xd5] sm:$0x1] %v1308_v59  ;;  %v1313_v20 = vld [vmem:[%s1312_s24] sm:$0x1]  ;;  %s1455_s12 = sadd.s32 243, %s3788_s18  ;;  %s1460_s30 = sadd.s32 244, %s3788_s18 }
 0x192   : > { %1314 = vst [vmem:[#allocation3 + $0xd6] sm:$0x1] %v1313_v20  ;;  %s1456_s7 = sld [smem:[#allocation5 + %s1455_s12]]  ;;  %s1317_s25 = scalar_lea.vmem [#allocation2], %s4320_s16 }
 0x193   : > { %v1318_v22 = vld [vmem:[%s1317_s25] sm:$0x1]  ;;  %s4354_s10 = sld [smem:[#allocation5 + %s1460_s30]]  ;;  %s1442_s6 = scalar_lea.vmem [#allocation2], %s4332_s9 }
 0x194   : > { %1319 = vst [vmem:[#allocation3 + $0xd7] sm:$0x1] %v1318_v22  ;;  %v1443_v23 = vld [vmem:[%s1442_s6] sm:$0x1]  ;;  %s1465_s27 = sadd.s32 245, %s3788_s18  ;;  %s1470_s20 = sadd.s32 246, %s3788_s18  ;;  %2718 = vrot.lane.b32.xlu2 %v4198_v56, %s3705_s26  ;;  %v1589_v56 = vadd.f32 %v1588_v25, %v1587_v24  ;;  %v4485_v24 = vpop.permute.xlu1 %2020 }
 0x195   : > { %1444 = vst [vmem:[#allocation3 + $0xf0] sm:$0x1] %v1443_v23  ;;  %s4359_s0 = sld [smem:[#allocation5 + %s1465_s27]]  ;;  %s1447_s13 = scalar_lea.vmem [#allocation2], %s4341_s23  ;;  %v3597_v22 = vld [vmem:[#allocation3 + $0x30] sm:$0xff]  ;;  %v3598_v23 = vld [vmem:[#allocation3 + $0x8] sm:$0xff] }
 0x196   : > { %v1448_v26 = vld [vmem:[%s1447_s13] sm:$0x1]  ;;  %s4366_s29 = sld [smem:[#allocation5 + %s1470_s20]]  ;;  %s1452_s16 = scalar_lea.vmem [#allocation2], %s4344_s5  ;;  %v1591_v36 = vadd.f32 %v1590_v29, %v1589_v56 }
 0x197   : > { %1449 = vst [vmem:[#allocation3 + $0xf1] sm:$0x1] %v1448_v26  ;;  %v1453_v27 = vld [vmem:[%s1452_s16] sm:$0x1]  ;;  %s1475_s11 = sadd.s32 247, %s3788_s18  ;;  %s1320_s9 = sadd.s32 216, %s3788_s18 }
 0x198   : > { %1454 = vst [vmem:[#allocation3 + $0xf2] sm:$0x1] %v1453_v27  ;;  %s4371_s28 = sld [smem:[#allocation5 + %s1475_s11]]  ;;  %3317 = vmatmul.msk.f32.gmra.mxu2 %vm1552_vm0, %v4298_v61  ;;  %2710 = vrot.lane.b32.xlu1 %v4196_v55, %s3705_s26  ;;  %s1457_s8 = scalar_lea.vmem [#allocation2], %s1456_s7  ;;  %v1593_v8 = vadd.f32 %v1592_v1, %v1591_v36  ;;  %v3599_v26 = vld [vmem:[#allocation3 + $0x40] sm:$0xff]  ;;  %v3600_v27 = vld [vmem:[#allocation3 + $0x48] sm:$0xff] }
 0x199   : > { %v1458_v28 = vld [vmem:[%s1457_s8] sm:$0x1]  ;;  %s4378_s21 = sld [smem:[#allocation5 + %s1320_s9]]  ;;  %s1462_s23 = scalar_lea.vmem [#allocation2], %s4354_s10 }
 0x19a   : > { %1459 = vst [vmem:[#allocation3 + $0xf3] sm:$0x1] %v1458_v28  ;;  %v1463_v32 = vld [vmem:[%s1462_s23] sm:$0x1]  ;;  %s1325_s15 = sadd.s32 217, %s3788_s18  ;;  %s1330_s5 = sadd.s32 218, %s3788_s18 }
 0x19b   : > { %1464 = vst [vmem:[#allocation3 + $0xf4] sm:$0x1] %v1463_v32  ;;  %v1546_v33 = vld [vmem:[#allocation3 + $0xd0] sm:$0xff]  ;;  %s4383_s24 = sld [smem:[#allocation5 + %s1325_s15]]  ;;  %s1467_s12 = scalar_lea.vmem [#allocation2], %s4359_s0  ;;  %v3601_v56 = vld [vmem:[#allocation3 + $0x20] sm:$0xff] }
 0x19c   : > { %v1468_v34 = vld [vmem:[%s1467_s12] sm:$0x1]  ;;  %3324 = vmatmul.msk.f32.gmra.mxu3 %vm1552_vm0, %v1546_v33  ;;  %s4387_s30 = sld [smem:[#allocation5 + %s1330_s5]]  ;;  %2720 = vrot.lane.b32.xlu0 %v1546_v33, %s3705_s26  ;;  %s1472_s7 = scalar_lea.vmem [#allocation2], %s4366_s29  ;;  %v1594_v9 = vsel %vm1552_vm0, %v1546_v33, 0.0  ;;  %v4497_v28 = vpop.permute.xlu1 %2022 }
 0x19d   : > { %1469 = vst [vmem:[#allocation3 + $0xf5] sm:$0x1] %v1468_v34  ;;  %v1473_v35 = vld [vmem:[%s1472_s7] sm:$0x1]  ;;  %s1335_s25 = sadd.s32 219, %s3788_s18  ;;  %s1340_s10 = sadd.s32 220, %s3788_s18  ;;  %2724 = vrot.lane.b32.xlu2 %v4393_v39, %s3705_s26  ;;  %v1595_v44 = vadd.f32 %v1594_v9, %v1593_v8 }
 0x19e   : > { %1474 = vst [vmem:[#allocation3 + $0xf6] sm:$0x1] %v1473_v35  ;;  %s4399_s6 = sld [smem:[#allocation5 + %s1335_s25]]  ;;  %s1477_s27 = scalar_lea.vmem [#allocation2], %s4371_s28  ;;  %v4507_v35 = vpop.permute.xlu2 %2668 }
 0x19f   : > { %v1478_v2 = vld [vmem:[%s1477_s27] sm:$0x1]  ;;  %s4402_s20 = sld [smem:[#allocation5 + %s1340_s10]]  ;;  %s1322_s0 = scalar_lea.vmem [#allocation2], %s4378_s21 }
 0x1a0   : > { %1479 = vst [vmem:[#allocation3 + $0xf7] sm:$0x1] %v1478_v2  ;;  %v1323_v40 = vld [vmem:[%s1322_s0] sm:$0x1]  ;;  %s1345_s13 = sadd.s32 221, %s3788_s18  ;;  %s1350_s29 = sadd.s32 222, %s3788_s18  ;;  %3318 = vmatmul.msk.f32.gmra.mxu2 %vm1552_vm0, %v4300_v31  ;;  %2716 = vrot.lane.b32.xlu1 %v3595_v3, %s3705_s26  ;;  %v1666_v3 = vpop.f32.mrf.mxu0 }
 0x1a1   : > { %1324 = vst [vmem:[#allocation3 + $0xd8] sm:$0x1] %v1323_v40  ;;  %s4410_s16 = sld [smem:[#allocation5 + %s1345_s13]]  ;;  %s1327_s11 = scalar_lea.vmem [#allocation2], %s4383_s24 }
 0x1a2   : > { %v1328_v42 = vld [vmem:[%s1327_s11] sm:$0x1]  ;;  %s4414_s9 = sld [smem:[#allocation5 + %s1350_s29]]  ;;  %s1332_s28 = scalar_lea.vmem [#allocation2], %s4387_s30 }
 0x1a3   : > { %1329 = vst [vmem:[#allocation3 + $0xd9] sm:$0x1] %v1328_v42  ;;  %v1333_v43 = vld [vmem:[%s1332_s28] sm:$0x1]  ;;  %s1355_s8 = sadd.s32 223, %s3788_s18  ;;  %s1480_s21 = sadd.s32 248, %s3788_s18 }
 0x1a4   : > { %1334 = vst [vmem:[#allocation3 + $0xda] sm:$0x1] %v1333_v43  ;;  %s4419_s23 = sld [smem:[#allocation5 + %s1355_s8]]  ;;  %2726 = vrot.lane.b32.xlu0 %v4217_v12, %s3705_s26  ;;  %s1337_s15 = scalar_lea.vmem [#allocation2], %s4399_s6  ;;  %v4504_v32 = vpop.permute.xlu1 %2672 }
 0x1a5   : > { %v1338_v45 = vld [vmem:[%s1337_s15] sm:$0x1]  ;;  %s4428_s5 = sld [smem:[#allocation5 + %s1480_s21]]  ;;  %s1342_s24 = scalar_lea.vmem [#allocation2], %s4402_s20  ;;  %5830 = vst [vmem:[#allocation13_spill] sm:$0xff] %v4504_v32 }
 0x1a6   : > { %1339 = vst [vmem:[#allocation3 + $0xdb] sm:$0x1] %v1338_v45  ;;  %v1343_v47 = vld [vmem:[%s1342_s24] sm:$0x1]  ;;  %s1485_s12 = sadd.s32 249, %s3788_s18  ;;  %s1490_s30 = sadd.s32 250, %s3788_s18  ;;  %v4516_v10 = vpop.permute.xlu2 %2676 }
 0x1a7   : > { %v4433_v50 = vld [vmem:[#allocation3 + $0xf0] sm:$0xff]  ;;  %1344 = vst [vmem:[#allocation3 + $0xdc] sm:$0x1] %v1343_v47  ;;  %s4435_s7 = sld [smem:[#allocation5 + %s1485_s12]]  ;;  %s1347_s25 = scalar_lea.vmem [#allocation2], %s4410_s16 }
 0x1a8   : > { %v1596_v46 = vsel %vm1552_vm0, %v4433_v50, 0.0  ;;  %v1348_v51 = vld [vmem:[%s1347_s25] sm:$0x1]  ;;  %s4440_s10 = sld [smem:[#allocation5 + %s1490_s30]]  ;;  %3319 = vmatmul.msk.f32.gmra.mxu2 %vm1552_vm0, %v4196_v55  ;;  %s1352_s6 = scalar_lea.vmem [#allocation2], %s4414_s9 }
 0x1a9   : > { %v1597_v53 = vadd.f32 %v1596_v46, %v1595_v44  ;;  %1349 = vst [vmem:[#allocation3 + $0xdd] sm:$0x1] %v1348_v51  ;;  %v1353_v54 = vld [vmem:[%s1352_s6] sm:$0x1]  ;;  %s1495_s27 = sadd.s32 251, %s3788_s18  ;;  %s1500_s20 = sadd.s32 252, %s3788_s18  ;;  %v1707_v51 = vadd.f32 %v1666_v3, %v1613_v13 }
 0x1aa   : > { %1354 = vst [vmem:[#allocation3 + $0xde] sm:$0x1] %v1353_v54  ;;  %s1496_s0 = sld [smem:[#allocation5 + %s1495_s27]]  ;;  %s1357_s13 = scalar_lea.vmem [#allocation2], %s4419_s23 }
 0x1ab   : > { %3288 = vmatmul.msk.f32.gmra.mxu0 %vm1552_vm0, %v1597_v53  ;;  %3292 = vmatmul.msk.f32.gmra.mxu1 %vm1552_vm0, %v1597_v53  ;;  %v1358_v55 = vld [vmem:[%s1357_s13] sm:$0x1]  ;;  %s1501_s29 = sld [smem:[#allocation5 + %s1500_s20]]  ;;  %s1482_s16 = scalar_lea.vmem [#allocation2], %s4428_s5  ;;  %v3294_v63 = vmul.f32 -1.442695, %v1707_v51 }
 0x1ac   : > { %1359 = vst [vmem:[#allocation3 + $0xdf] sm:$0x1] %v1358_v55  ;;  %v1483_v58 = vld [vmem:[%s1482_s16] sm:$0x1]  ;;  %s1505_s11 = sadd.s32 253, %s3788_s18  ;;  %s1510_s9 = sadd.s32 254, %s3788_s18  ;;  %v4511_v1 = vpop.permute.xlu1 %2680 }
 0x1ad   : > { %1484 = vst [vmem:[#allocation3 + $0xf8] sm:$0x1] %v1483_v58  ;;  %s1506_s28 = sld [smem:[#allocation5 + %s1505_s11]]  ;;  %s1487_s8 = scalar_lea.vmem [#allocation2], %s4435_s7 }
 0x1ae   : > { %v1488_v31 = vld [vmem:[%s1487_s8] sm:$0x1]  ;;  %s1511_s21 = sld [smem:[#allocation5 + %s1510_s9]]  ;;  %s1492_s23 = scalar_lea.vmem [#allocation2], %s4440_s10  ;;  %5831 = vst [vmem:[#allocation14_spill] sm:$0xff] %v4511_v1 }
 0x1af   : > { %1489 = vst [vmem:[#allocation3 + $0xf9] sm:$0x1] %v1488_v31  ;;  %v1493_v37 = vld [vmem:[%s1492_s23] sm:$0x1]  ;;  %s1515_s15 = sadd.s32 255, %s3788_s18 }
 0x1b0   : > { %1494 = vst [vmem:[#allocation3 + $0xfa] sm:$0x1] %v1493_v37  ;;  %s1516_s24 = sld [smem:[#allocation5 + %s1515_s15]]  ;;  %s1497_s5 = scalar_lea.vmem [#allocation2], %s1496_s0 }
 0x1b1   : > { %v1498_v4 = vld [vmem:[%s1497_s5] sm:$0x1]  ;;  %s1502_s12 = scalar_lea.vmem [#allocation2], %s1501_s29 }
 0x1b2   : > { %1499 = vst [vmem:[#allocation3 + $0xfb] sm:$0x1] %v1498_v4  ;;  %v1503_v62 = vld [vmem:[%s1502_s12] sm:$0x1]  ;;  %v4532_v4 = vpop.permute.xlu2 %2674 }
 0x1b3   : > { %1504 = vst [vmem:[#allocation3 + $0xfc] sm:$0x1] %v1503_v62  ;;  %v1547_v48 = vld [vmem:[#allocation3 + $0xd8] sm:$0xff]  ;;  %s1507_s30 = scalar_lea.vmem [#allocation2], %s1506_s28 }
 0x1b4   : > { %v1508_v11 = vld [vmem:[%s1507_s30] sm:$0x1]  ;;  %3325 = vmatmul.msk.f32.gmra.mxu3 %vm1552_vm0, %v1547_v48  ;;  %2722 = vrot.lane.b32.xlu1 %v1547_v48, %s3705_s26  ;;  %s1512_s18 = scalar_lea.vmem [#allocation2], %s1511_s21  ;;  %v1609_v17 = vsel %vm1552_vm0, %v1547_v48, 0.0  ;;  %v4519_v45 = vpop.permute.xlu1 %2686  ;;  %5834 = vst [vmem:[#allocation17_spill] sm:$0xff] %v4532_v4 }
 0x1b5   : > { %1509 = vst [vmem:[#allocation3 + $0xfd] sm:$0x1] %v1508_v11  ;;  %v1513_v15 = vld [vmem:[%s1512_s18] sm:$0x1]  ;;  %v1610_v59 = vadd.f32 %v1609_v17, %v1608_v18 }
 0x1b6   : > { %1514 = vst [vmem:[#allocation3 + $0xfe] sm:$0x1] %v1513_v15  ;;  %s1517_s7 = scalar_lea.vmem [#allocation2], %s1516_s24 }
 0x1b7   : > { %v1518_v61 = vld [vmem:[%s1517_s7] sm:$0x1]  ;;  %5832 = vst [vmem:[#allocation15_spill] sm:$0xff] %v4519_v45 }
 0x1b8   : > { %1519 = vst [vmem:[#allocation3 + $0xff] sm:$0x1] %v1518_v61 }
 0x1bc   : > { %3326 = vmatmul.msk.f32.gmra.mxu3 %vm1552_vm0, %v4393_v39  ;;  %2728 = vrot.lane.b32.xlu1 %v4433_v50, %s3705_s26  ;;  %v4534_v48 = vpop.permute.xlu1 %2692 }
 0x1bf   : > { %v1551_v19 = vld [vmem:[#allocation3 + $0xf8] sm:$0xff] }
 0x1c0   : > { %v1611_v20 = vsel %vm1552_vm0, %v1551_v19, 0.0  ;;  %2730 = vrot.lane.b32.xlu2 %v1551_v19, %s3705_s26 }
 0x1c1   : > { %v1612_v6 = vadd.f32 %v1611_v20, %v1610_v59  ;;  %v3603_v20 = vld [vmem:[%s3774_s14 + $0x8] sm:$0xff] }
 0x1c3   : > { %3289 = vmatmul.msk.f32.gmra.mxu0 %vm1552_vm0, %v1612_v6  ;;  %3293 = vmatmul.msk.f32.gmra.mxu1 %vm1552_vm0, %v1612_v6  ;;  %v1708_v6 = vadd.f32 %v3603_v20, %v1695_v14 }
 0x1c4   : > { %3327 = vmatmul.msk.f32.gmra.mxu3 %vm1552_vm0, %v4217_v12  ;;  %v1982_v12 = vpop.f32.mrf.mxu3 }
 0x1c5   : > { %v2050_v25 = vadd.f32 %v4485_v24, %v1982_v12 }
 0x1c7   : > { %v3352_v58 = vmul.f32 -1.442695, %v2050_v25 }
 0x1c8   : > { %v1669_v53 = vpop.f32.mrf.mxu0  ;;  %v1698_v3 = vpop.f32.mrf.mxu1 }
 0x1c9   : > { %v1709_v60 = vadd.f32 %v1669_v53, %v1615_v52 }
 0x1cb   : > { %3298 = vmatmul.msk.f32.vlgmr.msrb.gmra.mxu0 %vm1552_vm0, %v3596_v21  ;;  %3304 = vmatmul.msk.f32.vlgmr.msrb.gmra.mxu1 %vm1552_vm0, %v3597_v22  ;;  %v3295_v5 = vmul.f32 -1.442695, %v1709_v60 }
 0x1cc   : > { %3328 = vmatmul.msk.f32.gmra.mxu3 %vm1552_vm0, %v4433_v50  ;;  %v1985_v39 = vpop.f32.mrf.mxu3 }
 0x1cd   : > { %v2051_v18 = vadd.f32 %v4497_v28, %v1985_v39 }
 0x1d3   : > { %3299 = vmatmul.msk.f32.gmra.mxu0 %vm1552_vm0, %v3598_v23  ;;  %3305 = vmatmul.msk.f32.gmra.mxu1 %vm1552_vm0, %v4245_v38  ;;  %v1952_v38 = vpop.f32.mrf.mxu2 }
 0x1d4   : > { %3329 = vmatmul.msk.f32.gmra.mxu3 %vm1552_vm0, %v1551_v19  ;;  %v1988_v44 = vpop.f32.mrf.mxu3 }
 0x1db   : > { %3300 = vmatmul.msk.f32.gmra.mxu0 %vm1552_vm0, %v4326_v49  ;;  %3306 = vmatmul.msk.f32.gmra.mxu1 %vm1552_vm0, %v3599_v26  ;;  %v1955_v29 = vpop.f32.mrf.mxu2  ;;  %v3602_v49 = vld [vmem:[#allocation3 + $0x28] sm:$0xff] }
 0x1dc   : > { %v1991_v12 = vpop.f32.mrf.mxu3 }
 0x1e3   : > { %3301 = vmatmul.msk.f32.gmra.mxu0 %vm1552_vm0, %v4237_v30  ;;  %3307 = vmatmul.msk.f32.gmra.mxu1 %vm1552_vm0, %v3600_v27  ;;  %v4502_v30 = vpop.permute.xlu0 %2016  ;;  %v1958_v33 = vpop.f32.mrf.mxu2 }
 0x1e4   : > { %v2040_v34 = vadd.f32 %v4502_v30, %v1952_v38  ;;  %v2042_v42 = vadd.f32 %v4485_v24, %v1958_v33  ;;  %v2052_v50 = vadd.f32 %v4502_v30, %v1988_v44  ;;  %v3353_v38 = vmul.f32 -1.442695, %v2051_v18 }
 0x1e6   : > { %v3342_v36 = vmul.f32 -1.442695, %v2040_v34  ;;  %v3344_v47 = vmul.f32 -1.442695, %v2042_v42  ;;  %v3354_v57 = vmul.f32 -1.442695, %v2052_v50 }
 0x1e7   : > { %v1617_v50 = vld [vmem:[%s3774_s14 + $0x20] sm:$0xff] }
 0x1e8   : > { %3426 = vpow2.f32 %v3342_v36 }
 0x1ea   : > { %v4561_v34 = vpop.permute.xlu1 %2698 }
 0x1eb   : > { %3302 = vmatmul.msk.f32.gmra.mxu0 %vm1552_vm0, %v3601_v56  ;;  %3308 = vmatmul.msk.f32.gmra.mxu1 %vm1552_vm0, %v4257_v7  ;;  %v4509_v7 = vpop.permute.xlu0 %2018  ;;  %v4556_v56 = vpop.permute.xlu2 %2682 }
 0x1ec   : > { %v2041_v2 = vadd.f32 %v4509_v7, %v1955_v29  ;;  %5836 = vst [vmem:[#allocation19_spill] sm:$0xff] %v4556_v56 }
 0x1ee   : > { %v3343_v8 = vmul.f32 -1.442695, %v2041_v2  ;;  %v3427_v43 = vpop.eup %3426 }
 0x1ef   : > { %v4522_v46 = vadd.f32 1.0, %v3427_v43 }
 0x1f0   : > { %3428 = vpow2.f32 %v3343_v8 }
 0x1f1   : > { %vm2373_vm1 = vweird.f32 %v4522_v46  ;;  %v2379_v53 = vand.u32 2147483648, %v4522_v46 }
 0x1f3   : > { %3303 = vmatmul.msk.f32.gmra.mxu0 %vm1552_vm0, %v3602_v49  ;;  %3309 = vmatmul.msk.f32.gmra.mxu1 %vm1552_vm0, %v4255_v41  ;;  %v4526_v31 = vpop.permute.xlu0 %2670  ;;  %v2053_v49 = vadd.f32 %v4509_v7, %v1991_v12 }
 0x1f4   : > { %5833 = vst [vmem:[#allocation16_spill] sm:$0xff] %v4526_v31 }
 0x1f5   : > { %v3355_v13 = vmul.f32 -1.442695, %v2053_v49 }
 0x1f6   : > { %v3429_v54 = vpop.eup %3428 }
 0x1f7   : > { %v4528_v37 = vadd.f32 1.0, %v3429_v54 }
 0x1f9   : > { %vm2388_vm5 = vweird.f32 %v4528_v37 }
 0x1fb   : > { %v1961_v40 = vpop.f32.mrf.mxu2  ;;  %v4548_v22 = vpop.permute.xlu0 %2678 }
 0x1fc   : > { %v2043_v41 = vadd.f32 %v4497_v28, %v1961_v40  ;;  %5835 = vst [vmem:[#allocation18_spill] sm:$0xff] %v4548_v22 }
 0x1fe   : > { %v3345_v9 = vmul.f32 -1.442695, %v2043_v41 }
 0x200   : > { %3430 = vpow2.f32 %v3345_v9  ;;  %v3604_v9 = vld [vmem:[%s3774_s14 + $0x18] sm:$0xff] }
 0x201   : > { %3432 = vpow2.f32 %v3344_v47  ;;  %v1710_v42 = vadd.f32 %v3604_v9, %v1698_v3  ;;  %v2377_v47 = vand.u32 2147483647, %v4522_v46  ;;  %v2394_v3 = vand.u32 2147483648, %v4528_v37 }
 0x202   : > { %3434 = vrcp.f32 %v4522_v46  ;;  %v4612_v49 = vpop.permute.xlu1 %2704 }
 0x203   : > { %3436 = vpow2.f32 %v3354_v57  ;;  %v1964_v59 = vpop.f32.mrf.mxu2  ;;  %5840 = vst [vmem:[#allocation23_spill] sm:$0xff] %v4612_v49  ;;  %vm4630_vm8 = vcmp.eq.f32.partialorder %v2377_v47, 8.507059e+37 }
 0x204   : > { %3438 = vpow2.f32 %v3352_v58  ;;  %v2044_v26 = vadd.f32 %v4502_v30, %v1964_v59 }
 0x205   : > { %3440 = vpow2.f32 %v3294_v63 }
 0x206   : > { %v3431_v55 = vpop.eup %3430  ;;  %3442 = vrcp.f32 %v4528_v37  ;;  %v3346_v36 = vmul.f32 -1.442695, %v2044_v26 }
 0x207   : > { %v4530_v0 = vadd.f32 1.0, %v3431_v55  ;;  %v3433_v62 = vpop.eup %3432 }
 0x208   : > { %v4537_v11 = vpop.eup %3434  ;;  %v4540_v15 = vadd.f32 1.0, %v3433_v62 }
 0x209   : > { %3444 = vrcp.f32 %v4530_v0  ;;  %v3437_v16 = vpop.eup %3436  ;;  %v2369_v17 = vmul.f32 %v4537_v11, %v4522_v46  ;;  %vm2374_vm2 = vweird.f32 %v4537_v11  ;;  %vm2418_vm3 = vweird.f32 %v4530_v0 }
 0x20a   : > { %3446 = vpow2.f32 %v3295_v5  ;;  %v3439_v61 = vpop.eup %3438  ;;  %v4551_v23 = vadd.f32 1.0, %v3437_v16  ;;  %v4591_v5 = vpop.permute.xlu0 %2684  ;;  %v2422_v18 = vand.u32 2147483647, %v4530_v0  ;;  %vm4620_vm7 = vmor %vm2373_vm1, %vm2374_vm2  ;;  %v2380_v46 = vor.u32 1.1754944e-38, %v2379_v53 }
 0x20b   : > { %v3441_v19 = vpop.eup %3440  ;;  %3448 = vrcp.f32 %v4540_v15  ;;  %v2370_v29 = vsub.f32 1.0, %v2369_v17  ;;  %v4563_v39 = vadd.f32 1.0, %v3439_v61  ;;  %v1967_v44 = vpop.f32.mrf.mxu2  ;;  %vm2403_vm13 = vweird.f32 %v4540_v15 }
 0x20c   : > { %v4546_v21 = vpop.eup %3442  ;;  %v4559_v33 = vadd.f32 1.0, %v3441_v19  ;;  %3450 = vtanh.f32 %v1708_v6  ;;  %v2045_v52 = vadd.f32 %v4509_v7, %v1967_v44  ;;  %v4600_v19 = vpop.permute.xlu2 %2688  ;;  %v2424_v6 = vand.u32 2147483648, %v4530_v0 }
 0x20d   : > { %3452 = vrcp.f32 %v4551_v23  ;;  %v2384_v40 = vmul.f32 %v4546_v21, %v4528_v37  ;;  %v2371_v43 = vmul.f32 %v4537_v11, %v2370_v29  ;;  %5839 = vst [vmem:[#allocation22_spill] sm:$0xff] %v4600_v19  ;;  %vm2389_vm6 = vweird.f32 %v4546_v21 }
 0x20e   : > { %3454 = vpow2.f32 %v3346_v36  ;;  %v3347_v60 = vmul.f32 -1.442695, %v2045_v52  ;;  %vm4654_vm10 = vcmp.eq.f32.partialorder %v2422_v18, 8.507059e+37  ;;  %vm4662_vm11 = vmor %vm2388_vm5, %vm2389_vm6  ;;  %vm2553_vm1 = vweird.f32 %v4551_v23 }
 0x20f   : > { %v4553_v25 = vpop.eup %3444  ;;  %3456 = vpow2.f32 %v3353_v38  ;;  %v2385_v57 = vsub.f32 1.0, %v2384_v40  ;;  %v4594_v62 = vadd.f32 %v4537_v11, %v2371_v43  ;;  %v2392_v38 = vand.u32 2147483647, %v4528_v37 }
 0x210   : > { %v3447_v27 = vpop.eup %3446  ;;  %v2414_v2 = vmul.f32 %v4553_v25, %v4530_v0  ;;  %3458 = vrcp.f32 %v4559_v33  ;;  %vm2419_vm4 = vweird.f32 %v4553_v25  ;;  %v2409_v37 = vand.u32 2147483648, %v4540_v15 }
 0x211   : > { %v4570_v41 = vadd.f32 1.0, %v3447_v27  ;;  %v4572_v8 = vpop.eup %3448  ;;  %3460 = vrcp.f32 %v4563_v39  ;;  %v2386_v12 = vmul.f32 %v4546_v21, %v2385_v57  ;;  %vm4645_vm9 = vmor %vm2418_vm3, %vm2419_vm4  ;;  %v2376_v57 = vsel %vm4620_vm7, %v4537_v11, %v4594_v62 }
 0x212   : > { %v2415_v54 = vsub.f32 1.0, %v2414_v2  ;;  %v4583_v55 = vpop.eup %3450  ;;  %v2399_v58 = vmul.f32 %v4572_v8, %v4540_v15  ;;  %vm4667_vm12 = vcmp.eq.f32.partialorder %v2392_v38, 8.507059e+37  ;;  %v2395_v11 = vor.u32 1.1754944e-38, %v2394_v3 }
 0x213   : > { %5837 = vst [vmem:[#allocation20_spill] sm:$0xff] %v4570_v41  ;;  %3462 = vrcp.f32 %v4570_v41  ;;  %v4589_v63 = vpop.eup %3452  ;;  %v2387_v47 = vadd.f32 %v4546_v21, %v2386_v12  ;;  %vm2404_vm14 = vweird.f32 %v4572_v8  ;;  %v2381_v3 = vsel %vm4630_vm8, %v2380_v46, %v2376_v57  ;;  %v4716_v57 = vpop.permute.xlu1 %2710 }
 0x214   : > { %5838 = vst [vmem:[#allocation21_spill] sm:$0xff] %v4583_v55  ;;  %3464 = vpow2.f32 %v3355_v13  ;;  %v3455_v61 = vpop.eup %3454  ;;  %v2416_v20 = vmul.f32 %v4553_v25, %v2415_v54  ;;  %v2400_v29 = vsub.f32 1.0, %v2399_v58  ;;  %v2549_v9 = vmul.f32 %v4589_v63, %v4551_v23  ;;  %vm4706_vm15 = vmor %vm2403_vm13, %vm2404_vm14 }
 0x215   : > { %3466 = vpow2.f32 %v3347_v60  ;;  %v3457_v59 = vpop.eup %3456  ;;  %v4605_v26 = vadd.f32 1.0, %v3455_v61  ;;  %v2425_v60 = vor.u32 1.1754944e-38, %v2424_v6  ;;  %vm2554_vm2 = vweird.f32 %v4589_v63 }
 0x216   : > { %v4607_v27 = vpop.eup %3458  ;;  %v2417_v54 = vadd.f32 %v4553_v25, %v2416_v20  ;;  %v2550_v62 = vsub.f32 1.0, %v2549_v9  ;;  %v2391_v20 = vsel %vm4662_vm11, %v4546_v21, %v2387_v47  ;;  %v2559_v61 = vand.u32 2147483648, %v4551_v23  ;;  %vm4737_vm4 = vmor %vm2553_vm1, %vm2554_vm2 }
 0x217   : > { %v4614_v36 = vpop.eup %3460  ;;  %3468 = vrcp.f32 %v4605_v26  ;;  %v4638_v52 = vmul.f32 %v4607_v27, %v4559_v33  ;;  %v2396_v46 = vsel %vm4667_vm12, %v2395_v11, %v2391_v20  ;;  %vm2433_vm7 = vweird.f32 %v4605_v26 }
 0x218   : > { %3470 = vtanh.f32 %v1710_v42  ;;  %v2551_v47 = vmul.f32 %v4589_v63, %v2550_v62  ;;  %v2776_v62 = vmul.f32 %v4534_v48, %v2381_v3  ;;  %v2519_v48 = vmul.f32 %v4614_v36, %v4563_v39 }
 0x219   : > { %v4628_v43 = vpop.eup %3462  ;;  %vm2524_vm11 = vweird.f32 %v4614_v36 }
 0x21a   : > { %v4696_v21 = vmul.f32 %v4628_v43, %v4570_v41 }
 0x21f   : > { %v1994_v16 = vpop.f32.mrf.mxu3 }
 0x220   : > { %v2054_v17 = vadd.f32 %v4485_v24, %v1994_v16  ;;  %v1970_v16 = vpop.f32.mrf.mxu2 }
 0x221   : > { %v2046_v12 = vadd.f32 %v4485_v24, %v1970_v16 }
 0x222   : > { %v3356_v44 = vmul.f32 -1.442695, %v2054_v17  ;;  %v4676_v17 = vpop.permute.xlu0 %2690 }
 0x223   : > { %5853 = vst [vmem:[#allocation24_spill] sm:$0xff] %v4676_v17 }
 0x228   : > { %v1672_v51 = vpop.f32.mrf.mxu0  ;;  %v1973_v11 = vpop.f32.mrf.mxu2 }
 0x229   : > { %v1711_v14 = vadd.f32 %v1672_v51, %v1617_v50  ;;  %v3465_v50 = vpop.eup %3464  ;;  %v4634_v51 = vadd.f32 1.0, %v3457_v59  ;;  %v2421_v59 = vsel %vm4645_vm9, %v4553_v25, %v2417_v54  ;;  %v2560_v54 = vor.u32 1.1754944e-38, %v2559_v61 }
 0x22a   : > { %v3467_v53 = vpop.eup %3466  ;;  %v4700_v9 = vadd.f32 1.0, %v3465_v50  ;;  %v2426_v13 = vsel %vm4654_vm10, %v2425_v60, %v2421_v59  ;;  %v2410_v50 = vor.u32 1.1754944e-38, %v2409_v37  ;;  %v2552_v37 = vadd.f32 %v4589_v63, %v2551_v47  ;;  %v2697_v47 = vpop.permute.xlu0 %2696 }
 0x22b   : > { %v3296_v40 = vmul.f32 -1.442695, %v1711_v14  ;;  %v2401_v14 = vmul.f32 %v4572_v8, %v2400_v29  ;;  %v4674_v18 = vpop.eup %3468  ;;  %v4684_v6 = vadd.f32 1.0, %v3467_v53  ;;  %v1701_v29 = vpop.f32.mrf.mxu1  ;;  %v3605_v53 = vld [vmem:[%s3774_s14 + $0x28] sm:$0xff]  ;;  %v2557_v59 = vand.u32 2147483647, %v4551_v23 }
 0x22c   : > { %v4687_v38 = vpop.eup %3470  ;;  %v2429_v25 = vmul.f32 %v4674_v18, %v4605_v26  ;;  %v1712_v0 = vadd.f32 %v3605_v53, %v1701_v29  ;;  %v2437_v53 = vand.u32 2147483647, %v4605_v26  ;;  %v4764_v61 = vsel %vm1552_vm0, %v2776_v62, 0.0 }
 0x22d   : > { %3472 = vpow2.f32 %v3296_v40  ;;  %5854 = vst [vmem:[#allocation25_spill] sm:$0xff] %v4687_v38  ;;  %v2402_v2 = vadd.f32 %v4572_v8, %v2401_v14  ;;  %v2407_v40 = vand.u32 2147483647, %v4540_v15  ;;  %v3348_v15 = vmul.f32 -1.442695, %v2046_v12 }
 0x22e   : > { %3474 = vpow2.f32 %v3356_v44  ;;  %v2695_v44 = vpop.permute.xlu2 %2694  ;;  %v2430_v60 = vsub.f32 1.0, %v2429_v25  ;;  %vm4754_vm5 = vcmp.eq.f32.partialorder %v2557_v59, 8.507059e+37  ;;  %vm2434_vm6 = vweird.f32 %v4674_v18 }
 0x22f   : > { %3476 = vrcp.f32 %v4634_v51  ;;  %v2406_v58 = vsel %vm4706_vm15, %v4572_v8, %v2402_v2  ;;  %vm2408_vm3 = vcmp.eq.f32.partialorder %v2407_v40, 8.507059e+37  ;;  %v2779_v8 = vmul.f32 %v4561_v34, %v2426_v13  ;;  %vm4795_vm9 = vmor %vm2433_vm7, %vm2434_vm6 }
 0x230   : > { %3478 = vrcp.f32 %v4684_v6  ;;  %v2777_v2 = vmul.f32 %v2695_v44, %v2396_v46  ;;  %v2411_v25 = vsel %vm2408_vm3, %v2410_v50, %v2406_v58  ;;  %v2431_v34 = vmul.f32 %v4674_v18, %v2430_v60 }
 0x231   : > { %3480 = vrcp.f32 %v4700_v9  ;;  %v2439_v13 = vand.u32 2147483648, %v4605_v26  ;;  %v2556_v44 = vsel %vm4737_vm4, %v4589_v63, %v2552_v37  ;;  %v2520_v60 = vsub.f32 1.0, %v2519_v48 }
 0x232   : > { %3482 = vpow2.f32 %v3348_v15  ;;  %v4767_v29 = vsel %vm1552_vm0, %v2779_v8, 0.0  ;;  %v4770_v63 = vsel %vm1552_vm0, %v2777_v2, 0.0  ;;  %v2432_v3 = vadd.f32 %v4674_v18, %v2431_v34  ;;  %v2717_v8 = vpop.permute.xlu1 %2716  ;;  %v4842_v38 = vpop.permute.xlu0 %2702 }
 0x233   : > { %v3473_v14 = vpop.eup %3472  ;;  %3484 = vtanh.f32 %v1712_v0  ;;  %v1619_v0 = vld [vmem:[%s3774_s14 + $0x30] sm:$0xff]  ;;  %5862 = vst [vmem:[#allocation27_spill] sm:$0xff] %v4767_v29  ;;  %v2561_v62 = vsel %vm4754_vm5, %v2560_v54, %v2556_v44  ;;  %vm4782_vm8 = vcmp.eq.f32.partialorder %v2437_v53, 8.507059e+37  ;;  %v2521_v46 = vmul.f32 %v4614_v36, %v2520_v60 }
 0x234   : > { %v3475_v16 = vpop.eup %3474  ;;  %v4732_v12 = vadd.f32 1.0, %v3473_v14  ;;  %5863 = vst [vmem:[#allocation28_spill] sm:$0xff] %v4770_v63  ;;  %v2527_v54 = vand.u32 2147483647, %v4563_v39  ;;  %v2788_v53 = vmul.f32 %v2717_v8, %v2561_v62  ;;  %vm2523_vm10 = vweird.f32 %v4563_v39 }
 0x235   : > { %v4729_v20 = vpop.eup %3476  ;;  %v4743_v40 = vadd.f32 1.0, %v3475_v16  ;;  %v2778_v16 = vmul.f32 %v2697_v47, %v2411_v25  ;;  %v2440_v47 = vor.u32 1.1754944e-38, %v2439_v13  ;;  %v2529_v13 = vand.u32 2147483648, %v4563_v39  ;;  %vm4837_vm14 = vmor %vm2523_vm10, %vm2524_vm11 }
 0x236   : > { %5857 = vst [vmem:[#allocation26_spill] sm:$0xff] %v4732_v12  ;;  %v4747_v23 = vpop.eup %3478  ;;  %3486 = vrcp.f32 %v4732_v12  ;;  %v2701_v37 = vpop.permute.xlu2 %2700  ;;  %v2452_v8 = vand.u32 2147483647, %v4684_v6  ;;  %vm2448_vm12 = vweird.f32 %v4684_v6  ;;  %vm4821_vm13 = vcmp.eq.f32.partialorder %v2527_v54, 8.507059e+37 }
 0x237   : > { %v1997_v42 = vpop.f32.mrf.mxu3  ;;  %3488 = vrcp.f32 %v4743_v40  ;;  %v4773_v59 = vpop.eup %3480  ;;  %v4789_v29 = vsel %vm1552_vm0, %v2778_v16, 0.0  ;;  %v2530_v39 = vor.u32 1.1754944e-38, %v2529_v13  ;;  %vm2449_vm1 = vweird.f32 %v4747_v23 }
 0x238   : > { %v2055_v58 = vadd.f32 %v4497_v28, %v1997_v42  ;;  %v2444_v42 = vmul.f32 %v4747_v23, %v4684_v6  ;;  %v3483_v48 = vpop.eup %3482  ;;  %5867 = vst [vmem:[#allocation30_spill] sm:$0xff] %v4789_v29  ;;  %v4816_v56 = vmul.f32 %v4773_v59, %v4700_v9  ;;  %vm4853_vm15 = vcmp.eq.f32.partialorder %v2452_v8, 8.507059e+37  ;;  %vm4881_vm2 = vmor %vm2448_vm12, %vm2449_vm1 }
 0x239   : > { %v4786_v34 = vpop.eup %3484  ;;  %v4807_v16 = vadd.f32 1.0, %v3483_v48  ;;  %vm2538_vm3 = vweird.f32 %v4634_v51  ;;  %vm2539_vm4 = vweird.f32 %v4729_v20  ;;  %vm2568_vm7 = vweird.f32 %v4700_v9 }
 0x23a   : > { %5866 = vst [vmem:[#allocation29_spill] sm:$0xff] %v4786_v34  ;;  %v3357_v17 = vmul.f32 -1.442695, %v2055_v58  ;;  %v2047_v58 = vadd.f32 %v4497_v28, %v1973_v11  ;;  %v2454_v34 = vand.u32 2147483648, %v4684_v6  ;;  %v2522_v11 = vadd.f32 %v4614_v36, %v2521_v46  ;;  %vm4923_vm6 = vmor %vm2538_vm3, %vm2539_vm4 }
 0x23b   : > { %v2542_v6 = vand.u32 2147483647, %v4634_v51 }
 0x23c   : > { %v4802_v44 = vpop.eup %3486  ;;  %3490 = vpow2.f32 %v3357_v17  ;;  %v3349_v2 = vmul.f32 -1.442695, %v2047_v58 }
 0x23d   : > { %5870 = vst [vmem:[#allocation31_spill] sm:$0xff] %v4802_v44  ;;  %v4810_v60 = vpop.eup %3488  ;;  %3492 = vrcp.f32 %v4807_v16  ;;  %vm4911_vm5 = vcmp.eq.f32.partialorder %v2542_v6, 8.507059e+37 }
 0x23f   : > { %v2000_v14 = vpop.f32.mrf.mxu3 }
 0x240   : > { %v1675_v50 = vpop.f32.mrf.mxu0  ;;  %v4760_v15 = vpop.f32.mrf.mxu1 }
 0x241   : > { %v1713_v25 = vadd.f32 %v1675_v50, %v1619_v0  ;;  %v2436_v0 = vsel %vm4795_vm9, %v4674_v18, %v2432_v3  ;;  %v2445_v50 = vsub.f32 1.0, %v2444_v42  ;;  %v2056_v18 = vadd.f32 %v4502_v30, %v2000_v14 }
 0x242   : > { %v4827_v42 = vmul.f32 %v4802_v44, %v4732_v12  ;;  %v2441_v48 = vsel %vm4782_vm8, %v2440_v47, %v2436_v0  ;;  %vm2569_vm8 = vweird.f32 %v4773_v59 }
 0x243   : > { %v3297_v62 = vmul.f32 -1.442695, %v1713_v25  ;;  %v2446_v54 = vmul.f32 %v4747_v23, %v2445_v50  ;;  %v2780_v29 = vmul.f32 %v2701_v37, %v2441_v48  ;;  %v3358_v63 = vmul.f32 -1.442695, %v2056_v18  ;;  %v3606_v18 = vld [vmem:[%s3774_s14 + $0x38] sm:$0xff]  ;;  %vm4962_vm9 = vmor %vm2568_vm7, %vm2569_vm8  ;;  %s3362_s14 = sshll.u32 %s3743_s22, 5 }
 0x244   : > { %5873 = vst [vmem:[#allocation32_spill] sm:$0xff] %v4827_v42  ;;  %v2526_v50 = vsel %vm4837_vm14, %v4614_v36, %v2522_v11  ;;  %v4865_v11 = vadd.f32 %v3606_v18, %v4760_v15  ;;  %s2925_s25 = scalar_lea.vmem [#allocation2], %s3362_s14 }
 0x245   : > { %3494 = vpow2.f32 %v3297_v62  ;;  %v2455_v62 = vor.u32 1.1754944e-38, %v2454_v34  ;;  %v2447_v13 = vadd.f32 %v4747_v23, %v2446_v54  ;;  %v2531_v34 = vsel %vm4821_vm13, %v2530_v39, %v2526_v50 }
 0x246   : > { %5880 = vst [vmem:[#allocation35_spill] sm:$0xff] %v4865_v11 }
 0x247   : > { %v2003_v46 = vpop.f32.mrf.mxu3 }
 0x248   : > { %v1916_v4 = vpop.f32.mrf.mxu0  ;;  %v1934_v26 = vpop.f32.mrf.mxu1  ;;  %v2057_v12 = vadd.f32 %v4509_v7, %v2003_v46 }
 0x249   : > { %v2028_v17 = vadd.f32 %v4502_v30, %v1916_v4  ;;  %v2034_v25 = vadd.f32 %v4485_v24, %v1934_v26  ;;  %v2534_v4 = vmul.f32 %v4729_v20, %v4634_v51  ;;  %v4847_v26 = vpop.permute.xlu2 %2706 }
 0x24a   : > { %5876 = vst [vmem:[#allocation33_spill] sm:$0xff] %v4847_v26  ;;  %v3359_v54 = vmul.f32 -1.442695, %v2057_v12  ;;  %v2451_v12 = vsel %vm4881_vm2, %v4747_v23, %v2447_v13  ;;  %v4902_v13 = vpop.permute.xlu0 %2708 }
 0x24b   : > { %v3330_v47 = vmul.f32 -1.442695, %v2028_v17  ;;  %v3336_v0 = vmul.f32 -1.442695, %v2034_v25  ;;  %v4858_v17 = vsel %vm1552_vm0, %v2788_v53, 0.0  ;;  %v3491_v25 = vpop.eup %3490  ;;  %v2535_v37 = vsub.f32 1.0, %v2534_v4 }
 0x24c   : > { %5879 = vst [vmem:[#allocation34_spill] sm:$0xff] %v4858_v17  ;;  %v4869_v8 = vpop.eup %3492  ;;  %v4872_v53 = vsel %vm1552_vm0, %v2780_v29, 0.0  ;;  %v4875_v4 = vadd.f32 1.0, %v3491_v25  ;;  %v2469_v29 = vand.u32 2147483648, %v4807_v16  ;;  %v2565_v25 = vsub.f32 1.0, %v4816_v56 }
 0x24d   : > { %3496 = vpow2.f32 %v3330_v47  ;;  %v2536_v47 = vmul.f32 %v4729_v20, %v2535_v37  ;;  %v2459_v23 = vmul.f32 %v4869_v8, %v4807_v16  ;;  %v2456_v15 = vsel %vm4853_vm15, %v2455_v62, %v2451_v12 }
 0x24e   : > { %3498 = vpow2.f32 %v3349_v2  ;;  %v3495_v2 = vpop.eup %3494  ;;  %v2544_v56 = vand.u32 2147483648, %v4634_v51 }
 0x24f   : > { %3500 = vpow2.f32 %v3336_v0  ;;  %v2537_v48 = vadd.f32 %v4729_v20, %v2536_v47  ;;  %v2460_v12 = vsub.f32 1.0, %v2459_v23 }
 0x250   : > { %3502 = vpow2.f32 %v3358_v63  ;;  %v1919_v14 = vpop.f32.mrf.mxu0  ;;  %v1937_v46 = vpop.f32.mrf.mxu1  ;;  %v2545_v51 = vor.u32 1.1754944e-38, %v2544_v56 }
 0x251   : > { %v2029_v3 = vadd.f32 %v4509_v7, %v1919_v14  ;;  %v2035_v63 = vadd.f32 %v4497_v28, %v1937_v46  ;;  %v4896_v14 = vadd.f32 1.0, %v3495_v2  ;;  %3504 = vpow2.f32 %v3359_v54  ;;  %v1976_v2 = vpop.f32.mrf.mxu2 }
 0x253   : > { %v3497_v0 = vpop.eup %3496  ;;  %v3331_v39 = vmul.f32 -1.442695, %v2029_v3  ;;  %v3337_v50 = vmul.f32 -1.442695, %v2035_v63  ;;  %5883 = vst [vmem:[#allocation36_spill] sm:$0xff] %v4896_v14  ;;  %v4906_v3 = vor.u32 1.1754944e-38, %v2469_v29  ;;  %v2713_v63 = vpop.permute.xlu2 %2712  ;;  %v2781_v29 = vmul.f32 %v4842_v38, %v2456_v15 }
 0x254   : > { %v3499_v18 = vpop.eup %3498  ;;  %v4898_v46 = vadd.f32 1.0, %v3497_v0  ;;  %v2786_v0 = vmul.f32 %v2713_v63, %v2531_v34  ;;  %v2566_v34 = vmul.f32 %v4773_v59, %v2565_v25  ;;  %v2541_v38 = vsel %vm4923_vm6, %v4729_v20, %v2537_v48 }
 0x255   : > { %v3501_v37 = vpop.eup %3500  ;;  %5884 = vst [vmem:[#allocation37_spill] sm:$0xff] %v4906_v3  ;;  %3506 = vpow2.f32 %v3331_v39  ;;  %v4917_v58 = vadd.f32 1.0, %v3499_v18  ;;  %v2048_v39 = vadd.f32 %v4502_v30, %v1976_v2  ;;  %vm2583_vm6 = vweird.f32 %v4743_v40 }
 0x256   : > { %v3503_v36 = vpop.eup %3502  ;;  %3508 = vrcp.f32 %v4898_v46  ;;  %v4915_v54 = vadd.f32 1.0, %v3501_v37  ;;  %v2567_v63 = vadd.f32 %v4773_v59, %v2566_v34  ;;  %vm2193_vm11 = vweird.f32 %v4898_v46 }
 0x257   : > { %3510 = vpow2.f32 %v3337_v50  ;;  %5887 = vst [vmem:[#allocation38_spill] sm:$0xff] %v4917_v58  ;;  %v4932_v50 = vadd.f32 1.0, %v3503_v36  ;;  %v3505_v18 = vpop.eup %3504  ;;  %v4943_v36 = vsel %vm1552_vm0, %v2786_v0, 0.0  ;;  %v2484_v15 = vand.u32 2147483648, %v4917_v58 }
 0x258   : > { %3512 = vrcp.f32 %v4896_v14  ;;  %v1922_v47 = vpop.f32.mrf.mxu0  ;;  %v1940_v6 = vpop.f32.mrf.mxu1  ;;  %5890 = vst [vmem:[#allocation39_spill] sm:$0xff] %v4943_v36  ;;  %v3350_v20 = vmul.f32 -1.442695, %v2048_v39  ;;  %v2546_v0 = vsel %vm4911_vm5, %v2545_v51, %v2541_v38  ;;  %v5004_v34 = vadd.f32 1.0, %v3505_v18 }
 0x259   : > { %3514 = vrcp.f32 %v4915_v54  ;;  %v2030_v37 = vadd.f32 %v4485_v24, %v1922_v47  ;;  %v2036_v25 = vadd.f32 %v4502_v30, %v1940_v6  ;;  %v4953_v47 = vsel %vm1552_vm0, %v2781_v29, 0.0  ;;  %v2006_v51 = vpop.f32.mrf.mxu3  ;;  %v2715_v36 = vpop.permute.xlu0 %2714 }
 0x25a   : > { %3516 = vrcp.f32 %v4875_v4  ;;  %5891 = vst [vmem:[#allocation40_spill] sm:$0xff] %v4953_v47  ;;  %v2574_v6 = vand.u32 2147483648, %v4700_v9  ;;  %v2572_v47 = vand.u32 2147483647, %v4700_v9  ;;  %v4981_v19 = vor.u32 1.1754944e-38, %v2484_v15 }
 0x25b   : > { %v3507_v23 = vpop.eup %3506  ;;  %3518 = vrcp.f32 %v4917_v58  ;;  %v3332_v62 = vmul.f32 -1.442695, %v2030_v37  ;;  %v4972_v37 = vmul.f32 %v4869_v8, %v2460_v12  ;;  %v3338_v11 = vmul.f32 -1.442695, %v2036_v25  ;;  %v2719_v42 = vpop.permute.xlu2 %2718 }
 0x25c   : > { %v4947_v56 = vpop.eup %3508  ;;  %v4949_v2 = vadd.f32 1.0, %v3507_v23  ;;  %3520 = vrcp.f32 %v4932_v50  ;;  %5896 = vst [vmem:[#allocation43_spill] sm:$0xff] %v4981_v19  ;;  %v4983_v1 = vmul.f32 %v2715_v36, %v2546_v0  ;;  %v2571_v12 = vsel %vm4962_vm9, %v4773_v59, %v2567_v63 }
 0x25d   : > { %v3511_v48 = vpop.eup %3510  ;;  %v2189_v29 = vmul.f32 %v4947_v56, %v4898_v46  ;;  %5895 = vst [vmem:[#allocation42_spill] sm:$0xff] %v4972_v37  ;;  %v2575_v9 = vor.u32 1.1754944e-38, %v2574_v6  ;;  %v2058_v15 = vadd.f32 %v4485_v24, %v2006_v51  ;;  %v2199_v0 = vand.u32 2147483648, %v4898_v46 }
 0x25e   : > { %v4967_v39 = vpop.eup %3512  ;;  %3522 = vrcp.f32 %v4949_v2  ;;  %v4977_v23 = vadd.f32 1.0, %v3511_v48  ;;  %5897 = vst [vmem:[#allocation44_spill] sm:$0xff] %v4983_v1  ;;  %vm5006_vm10 = vcmp.eq.f32.partialorder %v2572_v47, 8.507059e+37  ;;  %vm2283_vm12 = vweird.f32 %v4915_v54 }
 0x25f   : > { %5894 = vst [vmem:[#allocation41_spill] sm:$0xff] %v4967_v39  ;;  %v4975_v38 = vpop.eup %3514  ;;  %3524 = vpow2.f32 %v3332_v62  ;;  %v4992_v48 = vmul.f32 %v4967_v39, %v4896_v14  ;;  %v2190_v62 = vsub.f32 1.0, %v2189_v29  ;;  %v2197_v29 = vand.u32 2147483647, %v4898_v46 }
 0x260   : > { %3526 = vpow2.f32 %v3350_v20  ;;  %v1925_v25 = vpop.f32.mrf.mxu0  ;;  %v1943_v32 = vpop.f32.mrf.mxu1  ;;  %v2279_v59 = vmul.f32 %v4975_v38, %v4915_v54  ;;  %v3360_v14 = vmul.f32 -1.442695, %v2058_v15  ;;  %v2200_v18 = vor.u32 1.1754944e-38, %v2199_v0 }
 0x261   : > { %v4988_v49 = vpop.eup %3516  ;;  %5898 = vst [vmem:[#allocation45_spill] sm:$0xff] %v4992_v48  ;;  %3528 = vrcp.f32 %v4977_v23  ;;  %v2031_v63 = vadd.f32 %v4497_v28, %v1925_v25  ;;  %v2037_v6 = vadd.f32 %v4509_v7, %v1943_v32  ;;  %v5017_v25 = vmul.f32 %v4810_v60, %v4743_v40 }
 0x262   : > { %v4996_v36 = vpop.eup %3518  ;;  %3530 = vpow2.f32 %v3338_v11  ;;  %v2191_v19 = vmul.f32 %v4947_v56, %v2190_v62  ;;  %v2280_v22 = vsub.f32 1.0, %v2279_v59  ;;  %v2287_v15 = vand.u32 2147483647, %v4915_v54 }
 0x263   : > { %5899 = vst [vmem:[#allocation46_spill] sm:$0xff] %v4996_v36  ;;  %v5001_v20 = vpop.eup %3520  ;;  %v3333_v11 = vmul.f32 -1.442695, %v2031_v63  ;;  %v2474_v32 = vmul.f32 %v4996_v36, %v4917_v58  ;;  %v2576_v63 = vsel %vm5006_vm10, %v2575_v9, %v2571_v12  ;;  %v3339_v45 = vmul.f32 -1.442695, %v2037_v6 }
 0x264   : > { %v5011_v51 = vpop.eup %3522  ;;  %v2289_v62 = vand.u32 2147483648, %v4915_v54  ;;  %vm5035_vm13 = vcmp.eq.f32.partialorder %v2197_v29, 8.507059e+37  ;;  %v2789_v12 = vmul.f32 %v2719_v42, %v2576_v63  ;;  %v2192_v59 = vadd.f32 %v4947_v56, %v2191_v19 }
 0x265   : > { %v3525_v1 = vpop.eup %3524  ;;  %v2204_v47 = vmul.f32 %v5011_v51, %v4949_v2  ;;  %3532 = vpow2.f32 %v3333_v11  ;;  %v2475_v26 = vsub.f32 1.0, %v2474_v32  ;;  %vm2194_vm14 = vweird.f32 %v4947_v56 }
 0x266   : > { %v3527_v39 = vpop.eup %3526  ;;  %v5025_v44 = vadd.f32 1.0, %v3525_v1  ;;  %3534 = vrcp.f32 %v5004_v34  ;;  %v2281_v0 = vmul.f32 %v4975_v38, %v2280_v22  ;;  %vm5050_vm15 = vcmp.eq.f32.partialorder %v2287_v15, 8.507059e+37  ;;  %vm5058_vm1 = vmor %vm2193_vm11, %vm2194_vm14 }
 0x267   : > { %v5029_v3 = vpop.eup %3528  ;;  %v2205_v48 = vsub.f32 1.0, %v2204_v47  ;;  %v5039_v9 = vadd.f32 1.0, %v3527_v39  ;;  %3536 = vpow2.f32 %v3360_v14  ;;  %v2290_v14 = vor.u32 1.1754944e-38, %v2289_v62 }
 0x268   : > { %v3531_v31 = vpop.eup %3530  ;;  %3538 = vrcp.f32 %v5025_v44  ;;  %v2294_v29 = vmul.f32 %v5029_v3, %v4977_v23  ;;  %v2212_v19 = vand.u32 2147483647, %v4949_v2  ;;  %v2214_v39 = vand.u32 2147483648, %v4949_v2 }
 0x269   : > { %v2206_v6 = vmul.f32 %v5011_v51, %v2205_v48  ;;  %v5048_v11 = vadd.f32 1.0, %v3531_v31  ;;  %3540 = vpow2.f32 %v3339_v45  ;;  %vm2284_vm2 = vweird.f32 %v4975_v38 }
 0x26a   : > { %v5064_v45 = vmul.f32 %v4996_v36, %v2475_v26  ;;  %v5067_v31 = vsel %vm1552_vm0, %v2789_v12, 0.0  ;;  %3542 = vrcp.f32 %v5039_v9  ;;  %v2196_v46 = vsel %vm5058_vm1, %v4947_v56, %v2192_v59  ;;  %vm5095_vm7 = vmor %vm2283_vm12, %vm2284_vm2 }
 0x26b   : > { %v3533_v22 = vpop.eup %3532  ;;  %5909 = vst [vmem:[#allocation48_spill] sm:$0xff] %v5067_v31  ;;  %v2282_v32 = vadd.f32 %v4975_v38, %v2281_v0  ;;  %v2304_v63 = vand.u32 2147483648, %v4977_v23  ;;  %v2207_v26 = vadd.f32 %v5011_v51, %v2206_v6  ;;  %vm2209_vm3 = vweird.f32 %v5011_v51 }
 0x26c   : > { %5908 = vst [vmem:[#allocation47_spill] sm:$0xff] %v5064_v45  ;;  %v5070_v47 = vpop.eup %3534  ;;  %v5077_v15 = vadd.f32 1.0, %v3533_v22  ;;  %v2295_v12 = vsub.f32 1.0, %v2294_v29  ;;  %3544 = vrcp.f32 %v5048_v11  ;;  %vm2208_vm4 = vweird.f32 %v4949_v2 }
 0x26d   : > { %v3537_v62 = vpop.eup %3536  ;;  %vm5085_vm5 = vcmp.eq.f32.partialorder %v2212_v19, 8.507059e+37  ;;  %v2215_v59 = vor.u32 1.1754944e-38, %v2214_v39  ;;  %vm2298_vm8 = vweird.f32 %v4977_v23  ;;  %v2302_v2 = vand.u32 2147483647, %v4977_v23  ;;  %vm5112_vm9 = vmor %vm2208_vm4, %vm2209_vm3 }
 0x26e   : > { %v5082_v31 = vpop.eup %3538  ;;  %3546 = vrcp.f32 %v5077_v15  ;;  %v2229_v29 = vand.u32 2147483648, %v5025_v44  ;;  %v2580_v19 = vsub.f32 1.0, %v5017_v25  ;;  %v5105_v39 = vsel %vm5035_vm13, %v2200_v18, %v2196_v46  ;;  %v1979_v46 = vpop.f32.mrf.mxu2 }
 0x26f   : > { %v3541_v0 = vpop.eup %3540  ;;  %v2286_v54 = vsel %vm5095_vm7, %v4975_v38, %v2282_v32  ;;  %v5116_v48 = vor.u32 1.1754944e-38, %v2304_v63  ;;  %v2211_v25 = vsel %vm5112_vm9, %v5011_v51, %v2207_v26  ;;  %v2296_v18 = vmul.f32 %v5029_v3, %v2295_v12 }
 0x270   : > { %v5118_v45 = vadd.f32 1.0, %v3541_v0  ;;  %v5120_v58 = vpop.eup %3542  ;;  %v2219_v38 = vmul.f32 %v5082_v31, %v5025_v44  ;;  %v5128_v1 = vadd.f32 1.0, %v3537_v62  ;;  %vm2299_vm10 = vweird.f32 %v5029_v3 }
 0x271   : > { %v2319_v32 = vand.u32 2147483648, %v5048_v11  ;;  %v5138_v51 = vsel %vm5050_vm15, %v2290_v14, %v2286_v54  ;;  %v2227_v26 = vand.u32 2147483647, %v5025_v44  ;;  %v5141_v12 = vor.u32 1.1754944e-38, %v2229_v29  ;;  %v2009_v54 = vpop.f32.mrf.mxu3  ;;  %vm5177_vm14 = vmor %vm2298_vm8, %vm2299_vm10 }
 0x272   : > { %5916 = vst [vmem:[#allocation49_spill] sm:$0xff] %v5128_v1  ;;  %3548 = vrcp.f32 %v5118_v45  ;;  %v5134_v0 = vpop.eup %3544  ;;  %v2581_v62 = vmul.f32 %v4810_v60, %v2580_v19  ;;  %v5148_v22 = vsel %vm5085_vm5, %v2215_v59, %v2211_v25  ;;  %vm5150_vm11 = vcmp.eq.f32.partialorder %v2302_v2, 8.507059e+37  ;;  %v1928_v59 = vpop.f32.mrf.mxu0 }
 0x273   : > { %5917 = vst [vmem:[#allocation50_spill] sm:$0xff] %v5138_v51  ;;  %v2489_v14 = vmul.f32 %v5120_v58, %v5039_v9  ;;  %v2049_v29 = vadd.f32 %v4509_v7, %v1979_v46  ;;  %v2297_v19 = vadd.f32 %v5029_v3, %v2296_v18  ;;  %v2220_v51 = vsub.f32 1.0, %v2219_v38  ;;  %v1946_v2 = vpop.f32.mrf.mxu1 }
 0x274   : > { %v5144_v6 = vpop.eup %3546  ;;  %5918 = vst [vmem:[#allocation51_spill] sm:$0xff] %v5148_v22  ;;  %3550 = vrcp.f32 %v5128_v1  ;;  %vm2224_vm12 = vweird.f32 %v5082_v31  ;;  %v2309_v25 = vmul.f32 %v5134_v0, %v5048_v11  ;;  %v5165_v42 = vor.u32 1.1754944e-38, %v2319_v32 }
 0x275   : > { %v2234_v56 = vmul.f32 %v5144_v6, %v5077_v15  ;;  %vm2584_vm13 = vweird.f32 %v4810_v60  ;;  %v2582_v46 = vadd.f32 %v4810_v60, %v2581_v62  ;;  %v2587_v18 = vand.u32 2147483647, %v4743_v40 }
 0x276   : > { %v2589_v38 = vand.u32 2147483648, %v4743_v40  ;;  %v3351_v36 = vmul.f32 -1.442695, %v2049_v29  ;;  %vm2223_vm15 = vweird.f32 %v5025_v44  ;;  %v2059_v62 = vadd.f32 %v4497_v28, %v2009_v54  ;;  %vm5193_vm1 = vmor %vm2583_vm6, %vm2584_vm13 }
 0x277   : > { %v2235_v32 = vsub.f32 1.0, %v2234_v56  ;;  %v2032_v1 = vadd.f32 %v4502_v30, %v1928_v59  ;;  %v2038_v17 = vadd.f32 %v4485_v24, %v1946_v2  ;;  %v2301_v29 = vsel %vm5177_vm14, %v5029_v3, %v2297_v19 }
 0x278   : > { %v5171_v22 = vpop.eup %3548  ;;  %v2221_v41 = vmul.f32 %v5082_v31, %v2220_v51  ;;  %v2490_v23 = vsub.f32 1.0, %v2489_v14  ;;  %v2594_v30 = vmul.f32 %v4988_v49, %v4875_v4  ;;  %v2310_v54 = vsub.f32 1.0, %v2309_v25 }
 0x279   : > { %vm2238_vm2 = vweird.f32 %v5077_v15  ;;  %v2324_v24 = vmul.f32 %v5171_v22, %v5118_v45  ;;  %3552 = vpow2.f32 %v3351_v36  ;;  %v3334_v3 = vmul.f32 -1.442695, %v2032_v1 }
 0x27a   : > { %v5202_v37 = vpop.eup %3550  ;;  %v2242_v51 = vand.u32 2147483647, %v5077_v15  ;;  %v2244_v40 = vand.u32 2147483648, %v5077_v15  ;;  %v2590_v14 = vor.u32 1.1754944e-38, %v2589_v38  ;;  %v3340_v19 = vmul.f32 -1.442695, %v2038_v17 }
 0x27b   : > { %v2236_v56 = vmul.f32 %v5144_v6, %v2235_v32  ;;  %v2586_v59 = vsel %vm5193_vm1, %v4810_v60, %v2582_v46  ;;  %vm5210_vm3 = vcmp.eq.f32.partialorder %v2587_v18, 8.507059e+37  ;;  %v3361_v36 = vmul.f32 -1.442695, %v2059_v62 }
 0x27c   : > { %v5217_v1 = vsel %vm5150_vm11, %v5116_v48, %v2301_v29  ;;  %v2491_v25 = vmul.f32 %v5120_v58, %v2490_v23  ;;  %3554 = vpow2.f32 %v3334_v3  ;;  %v2595_v17 = vsub.f32 1.0, %v2594_v30  ;;  %vm5242_vm11 = vmor %vm2223_vm15, %vm2224_vm12 }
 0x27d   : > { %v2222_v38 = vadd.f32 %v5082_v31, %v2221_v41  ;;  %vm5221_vm4 = vcmp.eq.f32.partialorder %v2227_v26, 8.507059e+37  ;;  %v2311_v55 = vmul.f32 %v5134_v0, %v2310_v54  ;;  %vm2313_vm5 = vweird.f32 %v5048_v11  ;;  %v2721_v26 = vpop.permute.xlu0 %2720 }
 0x27e   : > { %v2325_v60 = vsub.f32 1.0, %v2324_v24  ;;  %3556 = vpow2.f32 %v3340_v19  ;;  %vm2314_vm6 = vweird.f32 %v5134_v0  ;;  %vm2493_vm7 = vweird.f32 %v5039_v9 }
 0x27f   : > { %vm5229_vm8 = vcmp.eq.f32.partialorder %v2242_v51, 8.507059e+37  ;;  %v2245_v63 = vor.u32 1.1754944e-38, %v2244_v40  ;;  %v2591_v41 = vsel %vm5210_vm3, %v2590_v14, %v2586_v59  ;;  %v3553_v46 = vpop.eup %3552  ;;  %v2237_v18 = vadd.f32 %v5144_v6, %v2236_v56  ;;  %vm5304_vm3 = vmor %vm2313_vm5, %vm2314_vm6 }
 0x280   : > { %vm2239_vm9 = vweird.f32 %v5144_v6  ;;  %vm2328_vm10 = vweird.f32 %v5118_v45  ;;  %3558 = vpow2.f32 %v3361_v36  ;;  %v2334_v23 = vand.u32 2147483648, %v5118_v45 }
 0x281   : > { %v5248_v30 = vadd.f32 1.0, %v3553_v46  ;;  %v2596_v54 = vmul.f32 %v4988_v49, %v2595_v17  ;;  %v2226_v24 = vsel %vm5242_vm11, %v5082_v31, %v2222_v38  ;;  %v5255_v3 = vadd.f32 %v5134_v0, %v2311_v55  ;;  %vm5260_vm12 = vmor %vm2238_vm2, %vm2239_vm9 }
 0x282   : > { %v2326_v44 = vmul.f32 %v5171_v22, %v2325_v60  ;;  %v2790_v51 = vmul.f32 %v2721_v26, %v2591_v41  ;;  %v3555_v40 = vpop.eup %3554  ;;  %vm2598_vm13 = vweird.f32 %v4875_v4  ;;  %vm2599_vm14 = vweird.f32 %v4988_v49 }
 0x283   : > { %3560 = vrcp.f32 %v5248_v30  ;;  %v2609_v31 = vmul.f32 %v5001_v20, %v4932_v50  ;;  %v2241_v56 = vsel %vm5260_vm12, %v5144_v6, %v2237_v18  ;;  %v5272_v59 = vadd.f32 1.0, %v3555_v40  ;;  %vm5290_vm2 = vmor %vm2598_vm13, %vm2599_vm14 }
 0x284   : > { %v3557_v19 = vpop.eup %3556  ;;  %v2602_v15 = vand.u32 2147483647, %v4875_v4  ;;  %v2604_v2 = vand.u32 2147483648, %v4875_v4  ;;  %v2597_v17 = vadd.f32 %v4988_v49, %v2596_v54  ;;  %v2492_v38 = vadd.f32 %v5120_v58, %v2491_v25 }
 0x285   : > { %v5276_v36 = vadd.f32 1.0, %v3557_v19  ;;  %vm2494_vm15 = vweird.f32 %v5120_v58  ;;  %v5282_v60 = vadd.f32 %v5171_v22, %v2326_v44  ;;  %vm2329_vm1 = vweird.f32 %v5171_v22 }
 0x286   : > { %v3559_v55 = vpop.eup %3558  ;;  %3562 = vrcp.f32 %v5272_v59  ;;  %v2497_v25 = vand.u32 2147483647, %v5039_v9  ;;  %v5298_v41 = vsel %vm5221_vm4, %v5141_v12, %v2226_v24  ;;  %v5308_v4 = vor.u32 1.1754944e-38, %v2334_v23  ;;  %vm5326_vm4 = vmor %vm2493_vm7, %vm2494_vm15 }
 0x287   : > { %3564 = vrcp.f32 %v5276_v36  ;;  %v2610_v46 = vsub.f32 1.0, %v2609_v31  ;;  %v5317_v12 = vsel %vm5229_vm8, %v2245_v63, %v2241_v56  ;;  %v5320_v18 = vsel %vm1552_vm0, %v2790_v51, 0.0  ;;  %vm5336_vm5 = vmor %vm2328_vm10, %vm2329_vm1 }
 0x288   : > { %v2605_v62 = vor.u32 1.1754944e-38, %v2604_v2  ;;  %v5340_v63 = vadd.f32 1.0, %v3559_v55  ;;  %v2601_v24 = vsel %vm5290_vm2, %v4988_v49, %v2597_v17  ;;  %vm2603_vm6 = vcmp.eq.f32.partialorder %v2602_v15, 8.507059e+37 }
 0x289   : > { %v5330_v54 = vpop.eup %3560  ;;  %v2496_v44 = vsel %vm5326_vm4, %v5120_v58, %v2492_v38  ;;  %vm2498_vm7 = vcmp.eq.f32.partialorder %v2497_v25, 8.507059e+37  ;;  %v5943_v14 = vand.u32 2147483648, %v5039_v9  ;;  %v5944_v19 = vand.u32 2147483647, %v5048_v11 }
 0x28a   : > { %v2504_v40 = vmul.f32 %v5330_v54, %v5248_v30  ;;  %v2257_v58 = vand.u32 2147483647, %v5272_v59  ;;  %v2259_v56 = vand.u32 2147483648, %v5272_v59  ;;  %v2611_v15 = vmul.f32 %v5001_v20, %v2610_v46 }
 0x28b   : > { %v2500_v31 = vor.u32 1.1754944e-38, %v5943_v14  ;;  %vm5358_vm8 = vcmp.eq.f32.partialorder %v5944_v19, 8.507059e+37  ;;  %vm2613_vm9 = vweird.f32 %v4932_v50  ;;  %v2349_v9 = vand.u32 2147483648, %v5276_v36 }
 0x28c   : > { %v3563_v2 = vpop.eup %3562  ;;  %v5368_v38 = vsel %vm2603_vm6, %v2605_v62, %v2601_v24  ;;  %v2505_v6 = vsub.f32 1.0, %v2504_v40  ;;  %3566 = vrcp.f32 %v5340_v63  ;;  %vm2614_vm10 = vweird.f32 %v5001_v20  ;;  %v1931_v62 = vpop.f32.mrf.mxu0 }
 0x28d   : > { %5947 = vst [vmem:[#allocation52_spill] sm:$0xff] %v5368_v38  ;;  %v2501_v11 = vsel %vm2498_vm7, %v2500_v31, %v2496_v44  ;;  %v5370_v55 = vpop.eup %3564  ;;  %v2249_v25 = vmul.f32 %v3563_v2, %v5272_v59  ;;  %vm2253_vm11 = vweird.f32 %v5272_v59  ;;  %v2617_v23 = vand.u32 2147483647, %v4932_v50  ;;  %v1949_v24 = vpop.f32.mrf.mxu1  ;;  %vm5399_vm15 = vmor %vm2613_vm9, %vm2614_vm10 }
 0x28e   : > { %v2619_v14 = vand.u32 2147483648, %v4932_v50  ;;  %vm2508_vm12 = vweird.f32 %v5248_v30  ;;  %vm5380_vm13 = vcmp.eq.f32.partialorder %v2257_v58, 8.507059e+37  ;;  %v2260_v31 = vor.u32 1.1754944e-38, %v2259_v56 }
 0x28f   : > { %v2250_v44 = vsub.f32 1.0, %v2249_v25  ;;  %v2612_v19 = vadd.f32 %v5001_v20, %v2611_v15  ;;  %vm2254_vm14 = vweird.f32 %v3563_v2  ;;  %v2339_v46 = vmul.f32 %v5370_v55, %v5276_v36 }
 0x290   : > { %v5387_v51 = vor.u32 1.1754944e-38, %v2349_v9  ;;  %v5950_v29 = vsub.f32 1.0, %v4638_v52  ;;  %v2506_v32 = vmul.f32 %v5330_v54, %v2505_v6  ;;  %v2033_v58 = vadd.f32 %v4509_v7, %v1931_v62  ;;  %vm2255_vm4 = vmor %vm2253_vm11, %vm2254_vm14 }
 0x291   : > { %v2251_v25 = vmul.f32 %v3563_v2, %v2250_v44  ;;  %v2039_v38 = vadd.f32 %v4497_v28, %v1949_v24  ;;  %vm5403_vm1 = vcmp.eq.f32.partialorder %v2617_v23, 8.507059e+37  ;;  %v2620_v52 = vor.u32 1.1754944e-38, %v2619_v14 }
 0x292   : > { %v1734_v17 = vmul.f32 %v4607_v27, %v5950_v29  ;;  %v2784_v29 = vmul.f32 %v4902_v13, %v2501_v11  ;;  %vm1737_vm2 = vweird.f32 %v4607_v27  ;;  %v5409_v7 = vpop.eup %3566  ;;  %v2616_v50 = vsel %vm5399_vm15, %v5001_v20, %v2612_v19 }
 0x293   : > { %v2252_v28 = vadd.f32 %v3563_v2, %v2251_v25  ;;  %v3335_v9 = vmul.f32 -1.442695, %v2033_v58  ;;  %v3341_v6 = vmul.f32 -1.442695, %v2039_v38  ;;  %v2340_v23 = vsub.f32 1.0, %v2339_v46 }
 0x294   : > { %v1735_v14 = vadd.f32 %v4607_v27, %v1734_v17  ;;  %v5955_v13 = vsel %vm5304_vm3, %v5134_v0, %v5255_v3  ;;  %v2764_v20 = vmul.f32 %v4507_v35, %v5105_v39  ;;  %v2507_v59 = vadd.f32 %v5330_v54, %v2506_v32 }
 0x295   : > { %v2321_v11 = vsel %vm5358_vm8, %v5165_v42, %v5955_v13  ;;  %v2256_v38 = vsel %vm2255_vm4, %v3563_v2, %v2252_v28  ;;  %3568 = vpow2.f32 %v3335_v9  ;;  %vm2509_vm6 = vweird.f32 %v5330_v54  ;;  %v2725_v2 = vpop.permute.xlu2 %2724 }
 0x296   : > { %v2261_v17 = vsel %vm5380_vm13, %v2260_v31, %v2256_v38  ;;  %v1740_v26 = vand.u32 2147483647, %v4559_v33  ;;  %v1742_v0 = vand.u32 2147483648, %v4559_v33  ;;  %3570 = vpow2.f32 %v3341_v6  ;;  %vm5449_vm9 = vmor %vm2508_vm12, %vm2509_vm6 }
 0x297   : > { %vm2343_vm3 = vweird.f32 %v5276_v36  ;;  %v2768_v42 = vmul.f32 %v4516_v10, %v2261_v17  ;;  %v2772_v35 = vmul.f32 %v4591_v5, %v2321_v11  ;;  %v2512_v39 = vand.u32 2147483647, %v5248_v30 }
 0x298   : > { %v2624_v3 = vmul.f32 %v5070_v47, %v5004_v34  ;;  %v2341_v32 = vmul.f32 %v5370_v55, %v2340_v23  ;;  %vm2344_vm7 = vweird.f32 %v5370_v55  ;;  %v2621_v49 = vsel %vm5403_vm1, %v2620_v52, %v2616_v50 }
 0x299   : > { %vm1736_vm8 = vweird.f32 %v4559_v33  ;;  %v2796_v46 = vsel %vm1552_vm0, %v2764_v20, 0.0  ;;  %v2797_v62 = vsel %vm1552_vm0, %v2768_v42, 0.0  ;;  %v2511_v33 = vsel %vm5449_vm9, %v5330_v54, %v2507_v59  ;;  %vm5509_vm1 = vmor %vm2343_vm3, %vm2344_vm7  ;;  %v5969_v42 = vld [vmem:[#allocation21_spill] sm:$0xff] }
 0x29a   : > { %vm5455_vm10 = vmor %vm1736_vm8, %vm1737_vm2  ;;  %v2625_v24 = vsub.f32 1.0, %v2624_v3  ;;  %vm5467_vm11 = vcmp.eq.f32.partialorder %v1740_v26, 8.507059e+37  ;;  %v2798_v31 = vadd.f32 %v2797_v62, %v2796_v46  ;;  %v5962_v19 = vand.u32 2147483648, %v5248_v30 }
 0x29b   : > { %v1739_v44 = vsel %vm5455_vm10, %v4607_v27, %v1735_v14  ;;  %v3569_v58 = vpop.eup %3568  ;;  %v5963_v56 = vand.u32 2147483647, %v5118_v45  ;;  %v1743_v54 = vor.u32 1.1754944e-38, %v1742_v0  ;;  %v2792_v52 = vmul.f32 %v2725_v2, %v2621_v49  ;;  %v5972_v49 = vld [vmem:[#allocation20_spill] sm:$0xff] }
 0x29c   : > { %v2515_v25 = vor.u32 1.1754944e-38, %v5962_v19  ;;  %v2799_v28 = vsel %vm1552_vm0, %v2772_v35, 0.0  ;;  %vm2513_vm13 = vcmp.eq.f32.partialorder %v2512_v39, 8.507059e+37  ;;  %v3571_v27 = vpop.eup %3570  ;;  %v5480_v9 = vadd.f32 1.0, %v3569_v58 }
 0x29d   : > { %vm5475_vm12 = vcmp.eq.f32.partialorder %v5963_v56, 8.507059e+37  ;;  %v2800_v50 = vadd.f32 %v2799_v28, %v2798_v31  ;;  %v5966_v30 = vsub.f32 1.0, %v4696_v21  ;;  %vm2464_vm14 = vweird.f32 %v4869_v8 }
 0x29e   : > { %v2516_v6 = vsel %vm2513_vm13, %v2515_v25, %v2511_v33  ;;  %v5487_v45 = vadd.f32 %v5370_v55, %v2341_v32  ;;  %v5491_v14 = vsel %vm5467_vm11, %v1743_v54, %v1739_v44  ;;  %v5493_v13 = vadd.f32 1.0, %v3571_v27  ;;  %v5975_v33 = vld [vmem:[#allocation34_spill] sm:$0xff]  ;;  %v5979_v25 = vld [vmem:[#allocation49_spill] sm:$0xff] }
 0x29f   : > { %v1749_v23 = vmul.f32 %v4628_v43, %v5966_v30  ;;  %v2626_v11 = vmul.f32 %v5070_v47, %v2625_v24  ;;  %v2802_v20 = vadd.f32 %v4764_v61, %v2800_v50  ;;  %3572 = vrcp.f32 %v5480_v9 }
 0x2a0   : > { %v2632_v21 = vand.u32 2147483647, %v5004_v34  ;;  %v2634_v38 = vand.u32 2147483648, %v5004_v34  ;;  %vm2463_vm15 = vweird.f32 %v4807_v16  ;;  %v2805_v59 = vsel %vm1552_vm0, %v2784_v29, 0.0 }
 0x2a1   : > { %v2809_v17 = vsel %vm1552_vm0, %v2792_v52, 0.0  ;;  %3574 = vrcp.f32 %v5493_v13  ;;  %v2785_v26 = vmul.f32 %v4716_v57, %v2516_v6  ;;  %v2804_v0 = vadd.f32 %v4872_v53, %v2802_v20  ;;  %v5980_v52 = vld [vmem:[#allocation42_spill] sm:$0xff] }
 0x2a2   : > { %v2856_v35 = vmul.f32 %v5969_v42, %v5491_v14  ;;  %v5517_v29 = vadd.f32 %v4628_v43, %v1749_v23  ;;  %vm1752_vm2 = vweird.f32 %v4628_v43  ;;  %v2346_v57 = vsel %vm5509_vm1, %v5370_v55, %v5487_v45  ;;  %v6003_v23 = vld [vmem:[#allocation23_spill] sm:$0xff]  ;;  %v6028_v55 = vld [vmem:[#allocation45_spill] sm:$0xff] }
 0x2a3   : > { %v2627_v39 = vadd.f32 %v5070_v47, %v2626_v11  ;;  %vm2628_vm4 = vweird.f32 %v5004_v34  ;;  %vm2629_vm6 = vweird.f32 %v5070_v47  ;;  %v2806_v53 = vadd.f32 %v2805_v59, %v2804_v0  ;;  %v5989_v59 = vld [vmem:[#allocation16_spill] sm:$0xff] }
 0x2a4   : > { %vm5527_vm3 = vcmp.eq.f32.partialorder %v2632_v21, 8.507059e+37  ;;  %v2635_v32 = vor.u32 1.1754944e-38, %v2634_v38  ;;  %vm1751_vm7 = vweird.f32 %v5972_v49  ;;  %v2272_v2 = vand.u32 2147483647, %v5480_v9  ;;  %vm5543_vm9 = vmor %vm2628_vm4, %vm2629_vm6  ;;  %v2727_v21 = vpop.permute.xlu0 %2726  ;;  %v5988_v38 = vld [vmem:[#allocation51_spill] sm:$0xff] }
 0x2a5   : > { %v5534_v10 = vsel %vm1552_vm0, %v2785_v26, 0.0  ;;  %vm5536_vm8 = vmor %vm1751_vm7, %vm1752_vm2  ;;  %v1755_v34 = vand.u32 2147483647, %v5972_v49  ;;  %v1757_v46 = vand.u32 2147483648, %v5972_v49  ;;  %v3573_v62 = vpop.eup %3572  ;;  %v2808_v24 = vadd.f32 %v5975_v33, %v2806_v53  ;;  %v5990_v49 = vld [vmem:[#allocation15_spill] sm:$0xff] }
 0x2a6   : > { %v1754_v40 = vsel %vm5536_vm8, %v4628_v43, %v5517_v29  ;;  %v5978_v31 = vsel %vm5336_vm5, %v5171_v22, %v5282_v60  ;;  %v2639_v58 = vmul.f32 %v5202_v37, %v5979_v25  ;;  %v2264_v54 = vmul.f32 %v3573_v62, %v5480_v9  ;;  %v2731_v43 = vpop.permute.xlu2 %2730 }
 0x2a7   : > { %v2336_v19 = vsel %vm5475_vm12, %v5308_v4, %v5978_v31  ;;  %v5561_v56 = vpop.eup %3574  ;;  %vm2268_vm10 = vweird.f32 %v5480_v9  ;;  %v2631_v48 = vsel %vm5543_vm9, %v5070_v47, %v2627_v39  ;;  %v2462_v22 = vadd.f32 %v4869_v8, %v5980_v52  ;;  %vm5589_vm12 = vmor %vm2463_vm15, %vm2464_vm14  ;;  %v5992_v31 = vld [vmem:[#allocation46_spill] sm:$0xff] }
 0x2a8   : > { %v5981_v60 = vand.u32 2147483647, %v5276_v36  ;;  %v2810_v15 = vadd.f32 %v2809_v17, %v2808_v24  ;;  %v2274_v28 = vand.u32 2147483648, %v5480_v9  ;;  %v2354_v27 = vmul.f32 %v5561_v56, %v5493_v13 }
 0x2a9   : > { %v2364_v50 = vand.u32 2147483648, %v5493_v13  ;;  %v2265_v6 = vsub.f32 1.0, %v2264_v54  ;;  %vm5580_vm11 = vcmp.eq.f32.partialorder %v2272_v2, 8.507059e+37  ;;  %v2362_v30 = vand.u32 2147483647, %v5493_v13 }
 0x2aa   : > { %vm5572_vm5 = vcmp.eq.f32.partialorder %v5981_v60, 8.507059e+37  ;;  %v2640_v36 = vsub.f32 1.0, %v2639_v58  ;;  %v5593_v11 = vadd.f32 %v2856_v35, %v2810_v15  ;;  %vm2269_vm13 = vweird.f32 %v3573_v62  ;;  %v5995_v58 = vld [vmem:[#allocation37_spill] sm:$0xff]  ;;  %v5997_v15 = vld [vmem:[#allocation32_spill] sm:$0xff] }
 0x2ab   : > { %v2636_v20 = vsel %vm5527_vm3, %v2635_v32, %v2631_v48  ;;  %v2765_v17 = vmul.f32 %v5989_v59, %v5988_v38  ;;  %v2266_v26 = vmul.f32 %v3573_v62, %v2265_v6  ;;  %v2355_v0 = vsub.f32 1.0, %v2354_v27  ;;  %v5607_v32 = vpop.permute.xlu1 %2722  ;;  %vm2270_vm2 = vmor %vm2268_vm10, %vm2269_vm13  ;;  %v5999_v27 = vld [vmem:[#allocation31_spill] sm:$0xff]  ;;  %v6004_v38 = vld [vmem:[#allocation13_spill] sm:$0xff] }
 0x2ac   : > { %v2466_v42 = vsel %vm5589_vm12, %v4869_v8, %v2462_v22  ;;  %v2641_v39 = vmul.f32 %v5202_v37, %v2640_v36  ;;  %3576 = vtanh.f32 %v5593_v11  ;;  %v2275_v35 = vor.u32 1.1754944e-38, %v2274_v28  ;;  %v5996_v22 = vld [vmem:[#allocation38_spill] sm:$0xff] }
 0x2ad   : > { %v5604_v53 = vor.u32 1.1754944e-38, %v2364_v50  ;;  %v2773_v3 = vmul.f32 %v5990_v49, %v2336_v19  ;;  %v2267_v2 = vadd.f32 %v3573_v62, %v2266_v26  ;;  %v1758_v33 = vor.u32 1.1754944e-38, %v1757_v46  ;;  %v6006_v26 = vld [vmem:[#allocation14_spill] sm:$0xff] }
 0x2ae   : > { %v2793_v24 = vmul.f32 %v2727_v21, %v2636_v20  ;;  %v5991_v44 = vand.u32 2147483647, %v4807_v16  ;;  %vm2479_vm15 = vweird.f32 %v5992_v31  ;;  %vm2358_vm4 = vweird.f32 %v5493_v13 }
 0x2af   : > { %vm5616_vm6 = vcmp.eq.f32.partialorder %v1755_v34, 8.507059e+37  ;;  %v2811_v19 = vsel %vm1552_vm0, %v2765_v17, 0.0  ;;  %v2642_v54 = vadd.f32 %v5202_v37, %v2641_v39  ;;  %vm2644_vm3 = vweird.f32 %v5202_v37  ;;  %v6005_v17 = vld [vmem:[#allocation50_spill] sm:$0xff] }
 0x2b0   : > { %vm2468_vm14 = vcmp.eq.f32.partialorder %v5991_v44, 8.507059e+37  ;;  %v2271_v16 = vsel %vm2270_vm2, %v3573_v62, %v2267_v2  ;;  %v2356_v48 = vmul.f32 %v5561_v56, %v2355_v0  ;;  %v2647_v9 = vand.u32 2147483647, %v5979_v25  ;;  %v6000_v62 = vld [vmem:[#allocation18_spill] sm:$0xff] }
 0x2b1   : > { %v2471_v46 = vsel %vm2468_vm14, %v5995_v58, %v2466_v42  ;;  %v2649_v52 = vand.u32 2147483648, %v5979_v25  ;;  %vm2478_vm7 = vweird.f32 %v5996_v22  ;;  %v2276_v34 = vsel %vm5580_vm11, %v2275_v35, %v2271_v16  ;;  %v6007_v42 = vld [vmem:[#allocation22_spill] sm:$0xff] }
 0x2b2   : > { %v2814_v60 = vsel %vm1552_vm0, %v2773_v3, 0.0  ;;  %vm2643_vm9 = vweird.f32 %v5979_v25  ;;  %v5998_v28 = vsub.f32 1.0, %v5997_v15  ;;  %vm2359_vm10 = vweird.f32 %v5561_v56  ;;  %v3577_v47 = vpop.eup %3576  ;;  %v6010_v44 = vld [vmem:[#allocation26_spill] sm:$0xff]  ;;  %vm5704_vm8 = vmor %vm2478_vm7, %vm2479_vm15  ;;  %v6036_v15 = vld [vmem:[#allocation36_spill] sm:$0xff] }
 0x2b3   : > { %v2769_v6 = vmul.f32 %v6000_v62, %v2276_v34  ;;  %vm5637_vm12 = vmor %vm2643_vm9, %vm2644_vm3  ;;  %v2782_v20 = vmul.f32 %v6003_v23, %v2471_v46  ;;  %v2351_v25 = vsel %vm5572_vm5, %v5387_v51, %v2346_v57  ;;  %v2766_v59 = vmul.f32 %v6004_v38, %v5298_v41  ;;  %2872 = vrot.lane.b32.xlu0 %v3577_v47, %s3705_s26  ;;  %v2729_v49 = vpop.permute.xlu1 %2728  ;;  %v6011_v46 = vld [vmem:[#allocation47_spill] sm:$0xff]  ;;  %v6014_v34 = vld [vmem:[#allocation28_spill] sm:$0xff] }
 0x2b4   : > { %v1764_v50 = vmul.f32 %v5999_v27, %v5998_v28  ;;  %v2646_v21 = vsel %vm5637_vm12, %v5202_v37, %v2642_v54  ;;  %v2770_v0 = vmul.f32 %v6006_v26, %v6005_v17  ;;  %v2774_v61 = vmul.f32 %v6007_v42, %v2351_v25  ;;  %vm5679_vm13 = vmor %vm2358_vm4, %vm2359_vm10  ;;  %v6021_v25 = vld [vmem:[#allocation25_spill] sm:$0xff]  ;;  %v6024_v26 = vld [vmem:[#allocation43_spill] sm:$0xff] }
 0x2b5   : > { %v2357_v39 = vadd.f32 %v5561_v56, %v2356_v48  ;;  %vm5659_vm1 = vcmp.eq.f32.partialorder %v2362_v30, 8.507059e+37  ;;  %v2812_v51 = vsel %vm1552_vm0, %v2769_v6, 0.0  ;;  %vm2648_vm5 = vcmp.eq.f32.partialorder %v2647_v9, 8.507059e+37  ;;  %v6025_v42 = vld [vmem:[#allocation17_spill] sm:$0xff] }
 0x2b6   : > { %v2650_v45 = vor.u32 1.1754944e-38, %v2649_v52  ;;  %v2813_v37 = vadd.f32 %v2812_v51, %v2811_v19  ;;  %v1765_v41 = vadd.f32 %v5999_v27, %v1764_v50  ;;  %v2826_v57 = vsel %vm1552_vm0, %v2766_v59, 0.0  ;;  %v6020_v50 = vld [vmem:[#allocation40_spill] sm:$0xff]  ;;  %v6023_v59 = vld [vmem:[#allocation39_spill] sm:$0xff] }
 0x2b7   : > { %v2827_v4 = vsel %vm1552_vm0, %v2770_v0, 0.0  ;;  %vm1767_vm11 = vweird.f32 %v5999_v27  ;;  %v2829_v3 = vsel %vm1552_vm0, %v2774_v61, 0.0  ;;  %v1772_v58 = vand.u32 2147483648, %v6010_v44  ;;  %v6026_v61 = vld [vmem:[#allocation48_spill] sm:$0xff] }
 0x2b8   : > { %v2651_v35 = vsel %vm2648_vm5, %v2650_v45, %v2646_v21  ;;  %v2828_v30 = vadd.f32 %v2827_v4, %v2826_v57  ;;  %v2815_v2 = vadd.f32 %v2814_v60, %v2813_v37  ;;  %v2477_v54 = vadd.f32 %v5992_v31, %v6011_v46  ;;  %v6027_v45 = vld [vmem:[#allocation19_spill] sm:$0xff]  ;;  %v6030_v57 = vld [vmem:[#allocation41_spill] sm:$0xff] }
 0x2b9   : > { %v2654_v19 = vmul.f32 %v5409_v7, %v5340_v63  ;;  %v5690_v48 = vsel %vm5616_vm6, %v1758_v33, %v1754_v40  ;;  %vm1766_vm14 = vweird.f32 %v6010_v44  ;;  %v1770_v9 = vand.u32 2147483647, %v6010_v44 }
 0x2ba   : > { %v2830_v52 = vadd.f32 %v2829_v3, %v2828_v30  ;;  %v2817_v13 = vadd.f32 %v6014_v34, %v2815_v2  ;;  %v2824_v60 = vsel %vm1552_vm0, %v2793_v24, 0.0  ;;  %vm5696_vm2 = vmor %vm1766_vm14, %vm1767_vm11  ;;  %v2794_v5 = vmul.f32 %v2729_v49, %v2651_v35  ;;  %v6019_v24 = vld [vmem:[#allocation30_spill] sm:$0xff]  ;;  %v6031_v35 = vld [vmem:[#allocation24_spill] sm:$0xff] }
 0x2bb   : > { %v2655_v28 = vsub.f32 1.0, %v2654_v19  ;;  %v2361_v29 = vsel %vm5679_vm13, %v5561_v56, %v2357_v39  ;;  %v2833_v40 = vsel %vm1552_vm0, %v2782_v20, 0.0  ;;  %v1769_v33 = vsel %vm5696_vm2, %v5999_v27, %v1765_v41 }
 0x2bc   : > { %v2832_v8 = vadd.f32 %v6019_v24, %v2830_v52  ;;  %v2819_v62 = vadd.f32 %v6020_v50, %v2817_v13  ;;  %v1773_v6 = vor.u32 1.1754944e-38, %v1772_v58  ;;  %v2481_v36 = vsel %vm5704_vm8, %v5992_v31, %v2477_v54  ;;  %v6039_v24 = vld [vmem:[#allocation52_spill] sm:$0xff] }
 0x2bd   : > { %v2656_v23 = vmul.f32 %v5409_v7, %v2655_v28  ;;  %v2857_v56 = vmul.f32 %v6021_v25, %v5690_v48  ;;  %vm1771_vm15 = vcmp.eq.f32.partialorder %v1770_v9, 8.507059e+37  ;;  %v6022_v47 = vand.u32 2147483647, %v5996_v22  ;;  %v6035_v9 = vld [vmem:[#allocation33_spill] sm:$0xff] }
 0x2be   : > { %v2834_v20 = vadd.f32 %v2833_v40, %v2832_v8  ;;  %v2821_v27 = vadd.f32 %v5534_v10, %v2819_v62  ;;  %v5726_v21 = vsel %vm1771_vm15, %v1773_v6, %v1769_v33  ;;  %v2839_v38 = vsel %vm1552_vm0, %v2794_v5, 0.0  ;;  %v6038_v33 = vld [vmem:[#allocation35_spill] sm:$0xff] }
 0x2bf   : > { %vm2483_vm4 = vcmp.eq.f32.partialorder %v6022_v47, 8.507059e+37  ;;  %v2366_v31 = vsel %vm5659_vm1, %v5604_v53, %v2361_v29  ;;  %vm2659_vm6 = vweird.f32 %v5409_v7  ;;  %v2767_v22 = vmul.f32 %v6025_v42, %v5317_v12  ;;  %v6037_v29 = vld [vmem:[#allocation27_spill] sm:$0xff] }
 0x2c0   : > { %v2836_v17 = vadd.f32 %v6023_v59, %v2834_v20  ;;  %v2486_v0 = vsel %vm2483_vm4, %v6024_v26, %v2481_v36  ;;  %v2823_v39 = vadd.f32 %v6026_v61, %v2821_v27  ;;  %v2657_v10 = vadd.f32 %v5409_v7, %v2656_v23  ;;  %v6040_v36 = vld [vmem:[#allocation44_spill] sm:$0xff] }
 0x2c1   : > { %v2664_v51 = vand.u32 2147483648, %v5340_v63  ;;  %v2771_v37 = vmul.f32 %v6027_v45, %v5217_v1  ;;  %v6029_v41 = vsub.f32 1.0, %v6028_v55  ;;  %v2775_v49 = vmul.f32 %v6031_v35, %v2366_v31  ;;  %v6032_v1 = vld [vmem:[#allocation29_spill] sm:$0xff] }
 0x2c2   : > { %v2838_v53 = vadd.f32 %v5320_v18, %v2836_v17  ;;  %v2841_v30 = vsel %vm1552_vm0, %v2767_v22, 0.0  ;;  %v2825_v12 = vadd.f32 %v2824_v60, %v2823_v39  ;;  %vm2658_vm3 = vweird.f32 %v5340_v63 }
 0x2c3   : > { %v1779_v4 = vmul.f32 %v6030_v57, %v6029_v41  ;;  %v2662_v3 = vand.u32 2147483647, %v5340_v63  ;;  %v2842_v2 = vsel %vm1552_vm0, %v2771_v37, 0.0  ;;  %v2858_v58 = vmul.f32 %v6032_v1, %v5726_v21  ;;  %vm5755_vm7 = vmor %vm2658_vm3, %vm2659_vm6 }
 0x2c4   : > { %v2840_v44 = vadd.f32 %v2839_v38, %v2838_v53  ;;  %v2843_v46 = vadd.f32 %v2842_v2, %v2841_v30  ;;  %v2844_v54 = vsel %vm1552_vm0, %v2775_v49, 0.0  ;;  %v2861_v19 = vadd.f32 %v2857_v56, %v2825_v12 }
 0x2c5   : > { %v2661_v63 = vsel %vm5755_vm7, %v5409_v7, %v2657_v10  ;;  %v2665_v16 = vor.u32 1.1754944e-38, %v2664_v51  ;;  %v2783_v52 = vmul.f32 %v6035_v9, %v2486_v0  ;;  %v1780_v13 = vadd.f32 %v6030_v57, %v1779_v4 }
 0x2c6   : > { %v2862_v34 = vadd.f32 %v2858_v58, %v2840_v44  ;;  %vm1782_vm9 = vweird.f32 %v6030_v57  ;;  %v2845_v60 = vadd.f32 %v2844_v54, %v2843_v46  ;;  %3578 = vtanh.f32 %v2861_v19 }
 0x2c7   : > { %vm2663_vm10 = vcmp.eq.f32.partialorder %v2662_v3, 8.507059e+37  ;;  %vm1781_vm12 = vweird.f32 %v6036_v15  ;;  %v1787_v5 = vand.u32 2147483648, %v6036_v15  ;;  %v1785_v7 = vand.u32 2147483647, %v6036_v15 }
 0x2c8   : > { %3580 = vtanh.f32 %v2862_v34  ;;  %v2666_v28 = vsel %vm2663_vm10, %v2665_v16, %v2661_v63  ;;  %v2847_v40 = vadd.f32 %v6037_v29, %v2845_v60  ;;  %v2791_v8 = vmul.f32 %v5607_v32, %v6039_v24  ;;  %vm1783_vm1 = vmor %vm1781_vm12, %vm1782_vm9 }
 0x2c9   : > { %3582 = vtanh.f32 %v6038_v33  ;;  %v2848_v50 = vsel %vm1552_vm0, %v2783_v52, 0.0  ;;  %v1784_v62 = vsel %vm1783_vm1, %v6030_v57, %v1780_v13  ;;  %v2850_v23 = vsel %vm1552_vm0, %v6040_v36, 0.0 }
 0x2ca   : > { %v2849_v6 = vadd.f32 %v2848_v50, %v2847_v40  ;;  %v1788_v25 = vor.u32 1.1754944e-38, %v1787_v5  ;;  %v2795_v56 = vmul.f32 %v2731_v43, %v2666_v28  ;;  %vm1786_vm5 = vcmp.eq.f32.partialorder %v1785_v7, 8.507059e+37 }
 0x2cb   : > { %v2852_v27 = vsel %vm1552_vm0, %v2791_v8, 0.0 }
 0x2cc   : > { %v2851_v20 = vadd.f32 %v2850_v23, %v2849_v6  ;;  %v3579_v47 = vpop.eup %3578  ;;  %v1789_v38 = vsel %vm1786_vm5, %v1788_v25, %v1784_v62  ;;  %v2854_v17 = vsel %vm1552_vm0, %v2795_v56, 0.0 }
 0x2cd   : > { %2874 = vrot.lane.b32.xlu1 %v3579_v47, %s3705_s26 }
 0x2ce   : > { %v3581_v31 = vpop.eup %3580  ;;  %v2853_v59 = vadd.f32 %v2852_v27, %v2851_v20 }
 0x2cf   : > { %v3583_v32 = vpop.eup %3582  ;;  %2876 = vrot.lane.b32.xlu2 %v3581_v31, %s3705_s26 }
 0x2d0   : > { %v2855_v26 = vadd.f32 %v2854_v17, %v2853_v59  ;;  %v2859_v0 = vmul.f32 %v3583_v32, %v1789_v38 }
 0x2d2   : > { %v2863_v42 = vadd.f32 %v2859_v0, %v2855_v26 }
 0x2d4   : > { %3584 = vtanh.f32 %v2863_v42 }
 0x2d7   : > { %2908 = vrot.lane.b32.xlu2 %v5593_v11, %s3705_s26 }
 0x2da   : > { %v3585_v22 = vpop.eup %3584 }
 0x2db   : > { %2878 = vrot.lane.b32.xlu0 %v3585_v22, %s3705_s26 }
 0x325   : > { %v2873_v10 = vpop.permute.xlu0 %2872 }
 0x326   : > { %v2884_v51 = vmul.f32 %v2873_v10, %v5491_v14 }
 0x329   : > { %v2877_v61 = vpop.permute.xlu2 %2876 }
 0x32a   : > { %v2886_v39 = vmul.f32 %v2877_v61, %v5726_v21 }
 0x32c   : > { %2896 = vrot.lane.b32.xlu1 %v2886_v39, %s3705_s26 }
 0x331   : > { %v2909_v53 = vpop.permute.xlu2 %2908 }
 0x334   : > { %2892 = vrot.lane.b32.xlu1 %v2884_v51, %s3705_s26 }
 0x33c   : > { %2912 = vrot.lane.b32.xlu1 %v2862_v34, %s3705_s26 }
 0x33f   : > { %v2875_v45 = vpop.permute.xlu1 %2874 }
 0x340   : > { %v2885_v11 = vmul.f32 %v2875_v45, %v5690_v48 }
 0x342   : > { %2894 = vrot.lane.b32.xlu0 %v2885_v11, %s3705_s26 }
 0x34a   : > { %2910 = vrot.lane.b32.xlu0 %v2861_v19, %s3705_s26 }
 0x34d   : > { %v2879_v37 = vpop.permute.xlu0 %2878 }
 0x34e   : > { %v2887_v21 = vmul.f32 %v2879_v37, %v1789_v38 }
 0x350   : > { %2898 = vrot.lane.b32.xlu2 %v2887_v21, %s3705_s26 }
 0x358   : > { %2914 = vrot.lane.b32.xlu2 %v2863_v42, %s3705_s26 }
 0x39e   : > { %v2897_v14 = vpop.permute.xlu1 %2896 }
 0x3a6   : > { %v2893_v55 = vpop.permute.xlu1 %2892 }
 0x3a7   : > { %v2920_v41 = vsel %vm1552_vm0, %v2893_v55, %v2909_v53 }
 0x3a8   : > { %2930 = vst [vmem:[%s3779_s17] sm:$0xff] %v2920_v41 }
 0x3a9   : > { %2926 = vst [vmem:[%s2925_s25] sm:$0xff] %v2920_v41 }
 0x3aa   : > { %v2899_v48 = vpop.permute.xlu2 %2898 }
 0x3ae   : > { %v2913_v57 = vpop.permute.xlu1 %2912 }
 0x3af   : > { %v2922_v4 = vsel %vm1552_vm0, %v2897_v14, %v2913_v57 }
 0x3b0   : > { %2928 = vst [vmem:[%s2925_s25 + $0x10] sm:$0xff] %v2922_v4 }
 0x3b1   : > { %2932 = vst [vmem:[%s3779_s17 + $0x10] sm:$0xff] %v2922_v4 }
 0x3b2   : > { %v2915_v35 = vpop.permute.xlu2 %2914 }
 0x3b3   : > { %v2923_v49 = vsel %vm1552_vm0, %v2899_v48, %v2915_v35 }
 0x3b4   : > { %2933 = vst [vmem:[%s3779_s17 + $0x18] sm:$0xff] %v2923_v49  ;;  %v2895_v30 = vpop.permute.xlu0 %2894 }
 0x3b5   : > { %2929 = vst [vmem:[%s2925_s25 + $0x18] sm:$0xff] %v2923_v49 }
 0x3bc   : > { %v2911_v12 = vpop.permute.xlu0 %2910 }
 0x3bd   : > { %v2921_v3 = vsel %vm1552_vm0, %v2895_v30, %v2911_v12 }
 0x3be   : > { %2927 = vst [vmem:[%s2925_s25 + $0x8] sm:$0xff] %v2921_v3 }
 0x3bf   : > { %2931 = vst [vmem:[%s3779_s17 + $0x8] sm:$0xff] %v2921_v3 }
 0x3c0 PF: > { %s24_s19 = sadd.s32 1, %s3695_s19  }
 0x3c1   : > { %p21_p8 = scmp.ge.s32.totalorder %s24_s19, 5  }
 0x3c3   :  { %23 = sbr.rel (!%p21_p8) target bundleno = 8 (0x8), region = 332 }
 0x3c8   :  { %2956 = vsyncpa [#allocation7], 1 }
 0x3c9   :  { %2958 = vsyncpa [#allocation7 + $0x1], 1 }
 0x3ca   :  { %2959 = vsyncpa [#allocation9], 1 }

</bundles_post_ra>
